<compile_context>
chip_gen: v5e
topology: v5e:2x2
jax: 0.10.0
libtpu: 0.0.40
codegen_flags: <defaults>
</compile_context>

<pallas_src>
import functools

import jax
import jax.numpy as jnp
from jax.experimental import pallas as pl
from jax.experimental.pallas import tpu as pltpu


def _ppo_sr_kernel(feat_ref, gumbel_ref, w1_ref, bias_ref, w2_ref, out_ref,
                   *, two_s, n_head):
    x = feat_ref[...]                                             # (TB, S) bf16

    b1 = bias_ref[:, :two_s]                                      # (1, 2S) f32
    b2 = bias_ref[:, two_s:two_s + n_head]                        # (1, C)  f32

    # ---- fused first layer [critic.0 | actor.0] -> ReLU on (TB, 2S) ----
    h = jnp.maximum(
        jnp.dot(x, w1_ref[...], preferred_element_type=jnp.float32) + b1,
        0.0)

    # ---- fused heads (block-diagonal weight): head = [value(2) | logits(A)] ----
    head = jnp.dot(h, w2_ref[...], preferred_element_type=jnp.float32) + b2

    col = jax.lax.broadcasted_iota(jnp.int32, head.shape, 1)
    is_logit = col >= 2
    neg = jnp.float32(-1e30)
    masked = jnp.where(is_logit, head, neg)                       # logits | -inf

    # ---- softmax over logit columns only (mask applied before exp) ----
    lmax = jnp.max(masked, axis=-1, keepdims=True)
    e = jnp.exp(masked - lmax)                                    # exactly 0 in value cols
    probs = e / jnp.sum(e, axis=-1, keepdims=True)                # exact division

    # ---- Categorical sample via Gumbel-max (value columns stay ~ -1e30) ----
    z = masked + gumbel_ref[...]
    zmax = jnp.max(z, axis=-1, keepdims=True)
    idx = jnp.min(jnp.where(z == zmax, col, n_head), axis=-1, keepdims=True)

    # ---- single lane-contiguous output slab: [value | probs | action_idx] ----
    out_ref[:, :n_head] = jnp.where(is_logit, probs, head)
    out_ref[:, n_head:] = (idx - 2).astype(jnp.float32)


def fuse_params(params):
    """Host-side, once: fuse per-branch weights for the two in-kernel matmuls."""
    S = params["wc1"].shape[0]
    A = params["wa2"].shape[1]
    C = 2 + A
    # Fused first layer: bf16 (dominant HBM stream, MXU-native format).
    w1 = jnp.concatenate([params["wc1"], params["wa1"]],
                         axis=1).astype(jnp.bfloat16)             # (S, 2S)
    # Fused heads: block-diagonal (2S, 2+A); tiny, kept f32 for head precision.
    w2 = jnp.zeros((2 * S, C), jnp.float32)
    w2 = w2.at[:S, :2].set(params["wv"])
    w2 = w2.at[S:, 2:].set(params["wa2"])
    # Both biases packed into one lane-padded f32 row -> single resident DMA.
    width = 2 * S + C
    pad = (-width) % 128
    bias = jnp.concatenate(
        [params["bc1"], params["ba1"], params["bv"], params["ba2"],
         jnp.zeros((1, pad), jnp.float32)], axis=1)               # (1, ⌈·/128⌉·128)
    return w1, bias, w2


def ppo_atari_sr_forward(features, gumbel, fused_params, *, block_b=512):
    """features: (B, S) f32.  gumbel: (B, 2+A) f32 Gumbel noise generated at
    head width (the two value-column entries are ignored by the kernel)."""
    w1, bias, w2 = fused_params
    B, S = features.shape
    two_s, C = w2.shape
    A = C - 2
    assert gumbel.shape == (B, C)

    tb = B if B <= block_b else block_b
    assert B % tb == 0, "demo keeps B a multiple of the batch tile"
    # TODO(synk): for ragged B rely on Pallas' clipped final block (rows are
    # independent, so padded garbage rows cannot contaminate valid rows).

    x_bf16 = features.astype(jnp.bfloat16)     # halve the dominant HBM stream

    kernel = functools.partial(_ppo_sr_kernel, two_s=two_s, n_head=C)

    packed = pl.pallas_call(
        kernel,
        out_shape=jax.ShapeDtypeStruct((B, C + 1), jnp.float32),
        grid_spec=pltpu.PrefetchScalarGridSpec(
            num_scalar_prefetch=0,
            grid=(pl.cdiv(B, tb),),
            in_specs=[
                pl.BlockSpec((tb, S), lambda i: (i, 0)),            # features (tiled)
                pl.BlockSpec((tb, C), lambda i: (i, 0)),            # gumbel   (tiled)
                pl.BlockSpec((S, two_s), lambda i: (0, 0)),         # w1   (resident)
                pl.BlockSpec((1, bias.shape[1]), lambda i: (0, 0)), # bias (resident)
                pl.BlockSpec((two_s, C), lambda i: (0, 0)),         # w2   (resident)
            ],
            out_specs=pl.BlockSpec((tb, C + 1), lambda i: (i, 0)),
        ),
        compiler_params=pltpu.CompilerParams(
            dimension_semantics=("parallel",)),   # v7x: shard batch over 2 TCs
    )(x_bf16, gumbel, w1, bias, w2)

    value = packed[:, :2]                          # (B, 2)
    probs = packed[:, 2:C]                         # (B, A)
    idx = packed[:, C].astype(jnp.int32)           # (B,)
    action = jax.nn.one_hot(idx, A, dtype=jnp.float32)   # encode_action
    return value, action, probs


def init_params(key, state_dim, action_dim):
    """Deterministic orthogonal init mirroring init_orthogonal(..., gain)."""
    ks = jax.random.split(key, 5)
    ortho = jax.nn.initializers.orthogonal
    wc1 = ortho(0.1)(ks[0], (state_dim, state_dim), jnp.float32)
    # Critic2Heads: two Linear(state_dim, 1) heads (ext, int), gain 0.01
    wv = jnp.concatenate(
        [ortho(0.01)(ks[1], (state_dim, 1), jnp.float32),
         ortho(0.01)(ks[2], (state_dim, 1), jnp.float32)], axis=1)
    wa1 = ortho(0.01)(ks[3], (state_dim, state_dim), jnp.float32)
    wa2 = ortho(0.01)(ks[4], (state_dim, action_dim), jnp.float32)
    return {
        "wc1": wc1, "bc1": jnp.zeros((1, state_dim), jnp.float32),
        "wv": wv,   "bv": jnp.zeros((1, 2), jnp.float32),
        "wa1": wa1, "ba1": jnp.zeros((1, state_dim), jnp.float32),
        "wa2": wa2, "ba2": jnp.zeros((1, action_dim), jnp.float32),
    }


def _reference_forward(features, gumbel, params):
    """Pure-JAX reference of the PyTorch forward.  Inputs/first-layer weights
    are rounded to bf16 (matching the kernel's streaming dtype); all math and
    accumulation are done in f32 at highest precision."""
    hp = jax.lax.Precision.HIGHEST
    x = features.astype(jnp.bfloat16).astype(jnp.float32)
    wc1 = params["wc1"].astype(jnp.bfloat16).astype(jnp.float32)
    wa1 = params["wa1"].astype(jnp.bfloat16).astype(jnp.float32)
    hc = jnp.maximum(jnp.dot(x, wc1, precision=hp) + params["bc1"], 0.0)
    value = jnp.dot(hc, params["wv"], precision=hp) + params["bv"]
    ha = jnp.maximum(jnp.dot(x, wa1, precision=hp) + params["ba1"], 0.0)
    logits = jnp.dot(ha, params["wa2"], precision=hp) + params["ba2"]
    probs = jax.nn.softmax(logits, axis=-1)
    idx = jnp.argmax(logits + gumbel[:, 2:], axis=-1)
    action = jax.nn.one_hot(idx, logits.shape[-1], dtype=jnp.float32)
    return value, action, probs


if __name__ == "__main__":
    batch, state_dim, action_dim = 1024, 32, 8     # grid=(2,) with TB=512
    head_w = 2 + action_dim

    key = jax.random.PRNGKey(0)
    k_feat, k_gumbel, k_param = jax.random.split(key, 3)

    features = jax.random.normal(k_feat, (batch, state_dim), jnp.float32)
    # Gumbel noise for Categorical(probs).sample(), generated directly at head
    # width C (no pad op, no extra DMA); value-column entries are ignored.
    gumbel = jax.random.gumbel(k_gumbel, (batch, head_w), jnp.float32)
    params = init_params(k_param, state_dim, action_dim)
    fused = fuse_params(params)

    value, action, probs = ppo_atari_sr_forward(features, gumbel, fused,
                                                block_b=512)
    jax.block_until_ready((value, action, probs))

    assert value.shape == (batch, 2)
    assert action.shape == (batch, action_dim)
    assert probs.shape == (batch, action_dim)

    # sanity: probs rows sum to 1 (exact division), action rows are one-hot
    assert bool(jnp.allclose(jnp.sum(probs, axis=-1), 1.0, atol=1e-6))
    assert bool(jnp.all(jnp.sum(action, axis=-1) == 1.0))

    # check fused kernel against the unfused pure-JAX reference
    v_ref, a_ref, p_ref = _reference_forward(features, gumbel, params)
    assert bool(jnp.allclose(value, v_ref, atol=1e-4))
    assert bool(jnp.allclose(probs, p_ref, atol=1e-4))
    assert bool(jnp.array_equal(action, a_ref))

    print("KERNEL_OK")
</pallas_src>

<mosaic_0001>
module attributes {stable_mosaic.version = 11 : i64} {
  func.func @_ppo_sr_kernel(%arg0: i32, %arg1: memref<512x32xbf16, #tpu.memory_space<vmem>>, %arg2: memref<512x10xf32, #tpu.memory_space<vmem>>, %arg3: memref<32x64xbf16, #tpu.memory_space<vmem>>, %arg4: memref<1x128xf32, #tpu.memory_space<vmem>>, %arg5: memref<64x10xf32, #tpu.memory_space<vmem>>, %arg6: memref<512x11xf32, #tpu.memory_space<vmem>>) attributes {dimension_semantics = [#tpu.dimension_semantics<parallel>], iteration_bounds = array<i64: 2>, scalar_prefetch = 0 : i64, scratch_operands = 0 : i64, tpu.core_type = #tpu.core_type<tc>, window_params = [{transform_indices = @transform_0, window_bounds = array<i64: 512, 32>}, {transform_indices = @transform_1, window_bounds = array<i64: 512, 10>}, {pipeline_mode = #tpu.pipeline_mode<synchronous>, transform_indices = @transform_2, window_bounds = array<i64: 32, 64>}, {pipeline_mode = #tpu.pipeline_mode<synchronous>, transform_indices = @transform_3, window_bounds = array<i64: 1, 128>}, {pipeline_mode = #tpu.pipeline_mode<synchronous>, transform_indices = @transform_4, window_bounds = array<i64: 64, 10>}, {transform_indices = @transform_5, window_bounds = array<i64: 512, 11>}]} {
    %c0 = arith.constant 0 : index
    %c0_0 = arith.constant 0 : index
    %0 = vector.load %arg1[%c0, %c0_0] : memref<512x32xbf16, #tpu.memory_space<vmem>>, vector<512x32xbf16>
    %c0_1 = arith.constant 0 : index
    %c0_2 = arith.constant 0 : index
    %1 = vector.load %arg4[%c0_1, %c0_2] : memref<1x128xf32, #tpu.memory_space<vmem>>, vector<1x64xf32>
    %c0_3 = arith.constant 0 : index
    %c64 = arith.constant 64 : index
    %2 = vector.load %arg4[%c0_3, %c64] : memref<1x128xf32, #tpu.memory_space<vmem>>, vector<1x10xf32>
    %c0_4 = arith.constant 0 : index
    %c0_5 = arith.constant 0 : index
    %3 = vector.load %arg3[%c0_4, %c0_5] : memref<32x64xbf16, #tpu.memory_space<vmem>>, vector<32x64xbf16>
    %cst = arith.constant dense<0.000000e+00> : vector<512x64xf32>
    %4 = tpu.matmul %0, %3, %cst {dimension_numbers = #tpu.dot_dimension_numbers<[1], [0], [0], [1], [0, 0, 1, 1], [], []>} : vector<512x32xbf16>, vector<32x64xbf16>, vector<512x64xf32> -> vector<512x64xf32>
    %5 = vector.broadcast %1 : vector<1x64xf32> to vector<512x64xf32>
    %6 = arith.addf %4, %5 : vector<512x64xf32>
    %cst_6 = arith.constant 0.000000e+00 : f32
    %7 = vector.broadcast %cst_6 : f32 to vector<512x64xf32>
    %8 = arith.maximumf %6, %7 : vector<512x64xf32>
    %c0_7 = arith.constant 0 : index
    %c0_8 = arith.constant 0 : index
    %9 = vector.load %arg5[%c0_7, %c0_8] : memref<64x10xf32, #tpu.memory_space<vmem>>, vector<64x10xf32>
    %cst_9 = arith.constant dense<0.000000e+00> : vector<512x10xf32>
    %10 = tpu.matmul %8, %9, %cst_9 {dimension_numbers = #tpu.dot_dimension_numbers<[1], [0], [0], [1], [0, 0, 1, 1], [], []>} : vector<512x64xf32>, vector<64x10xf32>, vector<512x10xf32> -> vector<512x10xf32>
    %11 = vector.broadcast %2 : vector<1x10xf32> to vector<512x10xf32>
    %12 = arith.addf %10, %11 : vector<512x10xf32>
    %13 = tpu.iota {dimensions = array<i32: 1>} : vector<512x10xi32>
    %c2_i32 = arith.constant 2 : i32
    %14 = vector.broadcast %c2_i32 : i32 to vector<512x10xi32>
    %15 = arith.cmpi sge, %13, %14 : vector<512x10xi32>
    %cst_10 = arith.constant -1.000000e+30 : f32
    %16 = vector.broadcast %cst_10 : f32 to vector<512x10xf32>
    %17 = arith.select %15, %12, %16 : vector<512x10xi1>, vector<512x10xf32>
    %cst_11 = arith.constant dense<0xFF800000> : vector<512xf32>
    %18 = vector.multi_reduction <maximumf>, %17, %cst_11 [1] : vector<512x10xf32> to vector<512xf32>
    %19 = vector.shape_cast %18 : vector<512xf32> to vector<512x1xf32>
    %20 = vector.broadcast %19 : vector<512x1xf32> to vector<512x10xf32>
    %21 = arith.subf %17, %20 : vector<512x10xf32>
    %22 = math.exp %21 : vector<512x10xf32>
    %cst_12 = arith.constant dense<0.000000e+00> : vector<512xf32>
    %23 = vector.multi_reduction <add>, %22, %cst_12 [1] : vector<512x10xf32> to vector<512xf32>
    %24 = vector.shape_cast %23 : vector<512xf32> to vector<512x1xf32>
    %25 = vector.broadcast %24 : vector<512x1xf32> to vector<512x10xf32>
    %26 = arith.divf %22, %25 : vector<512x10xf32>
    %c0_13 = arith.constant 0 : index
    %c0_14 = arith.constant 0 : index
    %27 = vector.load %arg2[%c0_13, %c0_14] : memref<512x10xf32, #tpu.memory_space<vmem>>, vector<512x10xf32>
    %28 = arith.addf %17, %27 : vector<512x10xf32>
    %cst_15 = arith.constant dense<0xFF800000> : vector<512xf32>
    %29 = vector.multi_reduction <maximumf>, %28, %cst_15 [1] : vector<512x10xf32> to vector<512xf32>
    %30 = vector.shape_cast %29 : vector<512xf32> to vector<512x1xf32>
    %31 = vector.broadcast %30 : vector<512x1xf32> to vector<512x10xf32>
    %32 = arith.cmpf oeq, %28, %31 : vector<512x10xf32>
    %c10_i32 = arith.constant 10 : i32
    %33 = vector.broadcast %c10_i32 : i32 to vector<512x10xi32>
    %34 = arith.select %32, %13, %33 : vector<512x10xi1>, vector<512x10xi32>
    %cst_16 = arith.constant dense<2147483647> : vector<512xi32>
    %35 = vector.multi_reduction <minsi>, %34, %cst_16 [1] : vector<512x10xi32> to vector<512xi32>
    %36 = vector.shape_cast %35 : vector<512xi32> to vector<512x1xi32>
    %37 = arith.select %15, %26, %12 : vector<512x10xi1>, vector<512x10xf32>
    %c0_17 = arith.constant 0 : index
    %c0_18 = arith.constant 0 : index
    %38 = vector.load %arg6[%c0_17, %c0_18] : memref<512x11xf32, #tpu.memory_space<vmem>>, vector<512x10xf32>
    tpu.vector_store %arg6[%c0_17, %c0_18], %37 {strides = array<i32>} : memref<512x11xf32, #tpu.memory_space<vmem>>, vector<512x10xf32>,
    %c2_i32_19 = arith.constant 2 : i32
    %39 = vector.broadcast %c2_i32_19 : i32 to vector<512x1xi32>
    %40 = arith.subi %36, %39 : vector<512x1xi32>
    %41 = arith.sitofp %40 : vector<512x1xi32> to vector<512x1xf32>
    %c0_20 = arith.constant 0 : index
    %c10 = arith.constant 10 : index
    %42 = vector.load %arg6[%c0_20, %c10] : memref<512x11xf32, #tpu.memory_space<vmem>>, vector<512x1xf32>
    tpu.vector_store %arg6[%c0_20, %c10], %41 {strides = array<i32>} : memref<512x11xf32, #tpu.memory_space<vmem>>, vector<512x1xf32>,
    return
  }
  func.func @transform_0(%arg0: i32) -> (i32, i32) {
    %c0_i32 = arith.constant 0 : i32
    %c0_i32_0 = arith.constant 0 : i32
    return %arg0, %c0_i32 : i32, i32
  }
  func.func @transform_1(%arg0: i32) -> (i32, i32) {
    %c0_i32 = arith.constant 0 : i32
    %c0_i32_0 = arith.constant 0 : i32
    return %arg0, %c0_i32 : i32, i32
  }
  func.func @transform_2(%arg0: i32) -> (i32, i32) {
    %c0_i32 = arith.constant 0 : i32
    %c0_i32_0 = arith.constant 0 : i32
    %c0_i32_1 = arith.constant 0 : i32
    return %c0_i32, %c0_i32_0 : i32, i32
  }
  func.func @transform_3(%arg0: i32) -> (i32, i32) {
    %c0_i32 = arith.constant 0 : i32
    %c0_i32_0 = arith.constant 0 : i32
    %c0_i32_1 = arith.constant 0 : i32
    return %c0_i32, %c0_i32_0 : i32, i32
  }
  func.func @transform_4(%arg0: i32) -> (i32, i32) {
    %c0_i32 = arith.constant 0 : i32
    %c0_i32_0 = arith.constant 0 : i32
    %c0_i32_1 = arith.constant 0 : i32
    return %c0_i32, %c0_i32_0 : i32, i32
  }
  func.func @transform_5(%arg0: i32) -> (i32, i32) {
    %c0_i32 = arith.constant 0 : i32
    %c0_i32_0 = arith.constant 0 : i32
    return %arg0, %c0_i32 : i32, i32
  }
}

</mosaic_0001>

<bundles_post_ra>
// kernel: tpu_custom_call.1
= control target key start
LH: loop header
LB: loop body
LE: loop exit
PB: predicated region body
PF: predicated region fallthrough
CT: control target
= control target key end

     0   :  { %s5299_s18 = smov 0   ;;  %s9188_s0 = inlined_call_operand.vmem [shape: bf16[1024,32], index: 0, kind: input, shape index: {}]   ;;  %s9189_s1 = inlined_call_operand.vmem [shape: f32[1024,10], index: 1, kind: input, shape index: {}]   ;;  %s9190_s2 = inlined_call_operand.vmem [shape: bf16[32,64], index: 2, kind: input, shape index: {}]   ;;  %s9191_s3 = inlined_call_operand.vmem [shape: f32[1,128], index: 3, kind: input, shape index: {}]   ;;  %s9192_s4 = inlined_call_operand.vmem [shape: f32[64,10], index: 4, kind: input, shape index: {}]   ;;  %s9193_s5 = inlined_call_operand.vmem [shape: f32[1024,11], index: 5, kind: output, shape index: {}]  }
   0x1 LB: > { %s4639_s19 = sadd.s32 4294967295, %s5266_s18   ;;  %p4643_p0 = scmp.ge.s32.totalorder %s5266_s18, 1  ;;  %s5266_s18 = sphi %s5299_s18, %s15_s18  }
   0x2   : > { %p199_p1 = scmp.lt.s32.totalorder %s5266_s18, 3 }
   0x4   : > { %p200_p2 = pnand %p4643_p0, %p199_p1 }
   0x6   : > { %203 = sbr.rel (%p200_p2) target bundleno = 1377 (0x561), region = 40 }
   0xb   : > { %v4981_v0 = vld [vmem:[%s9190_s2 + $0x8] sm:$0xff]  ;;  %s4644_s22 = sshll.u32 %s4639_s19, 6  ;;  %v4980_v1 = vld [vmem:[%s9190_s2] sm:$0xff]  ;;  %vm495_vm0 = vcmask 261120   ;;  %v832_v8 = vld [vmem:[%s9192_s4 + $0x38] sm:$0xff]  ;;  %s5268_s12 = smov 64  }
   0xc   : > { %p233_p3 = scmp.lt.s32.totalorder %s4644_s22, 127  ;;  %598 = vmatpush.bf16.msra.mxu0 %v4981_v0  ;;  %4982 = vmatpush.bf16.msra.mxu3 %v4981_v0  ;;  %v831_v9 = vld [vmem:[%s9192_s4 + $0x30] sm:$0xff]  ;;  %v5342_v10 = vld [vmem:[%s9191_s3] ss:$0 sm:$0xff]  ;;  %v830_v11 = vld [vmem:[%s9192_s4 + $0x28] sm:$0xff]  ;;  %vm836_vm1 = vcmask 523264  }
   0xd   : > { %1037 = vmatpush.msra.mxu1 %v832_v8  ;;  %4984 = vmatpush.msra.mxu2 %v832_v8  ;;  %v829_v12 = vld [vmem:[%s9192_s4 + $0x20] sm:$0xff]  ;;  %v828_v13 = vld [vmem:[%s9192_s4 + $0x18] sm:$0xff]  ;;  %v827_v15 = vld [vmem:[%s9192_s4 + $0x10] sm:$0xff]  ;;  %vm1305_vm3 = vcmask 80896  }
   0xe   : > { %s9997_s22 = smov (!%p233_p3, %s4644_s22), 127  ;;  %833 = vrot.lane.b32.xlu0 %v5342_v10, %s5268_s12  ;;  %v826_v16 = vld [vmem:[%s9192_s4 + $0x8] sm:$0xff]  ;;  %v825_v17 = vld [vmem:[%s9192_s4] sm:$0xff] }
   0xf   : > { %s4645_s25 = sshll.u32 %s9997_s22, 2  ;;  %1038 = vmatpush.msra.mxu1 %v831_v9  ;;  %4985 = vmatpush.msra.mxu2 %v831_v9 }
  0x10   : > { %599 = vmatpush.bf16.msra.mxu0 %v4980_v1  ;;  %s5319_s28 = scalar_lea.vmem %s9188_s0, %s4645_s25  ;;  %4983 = vmatpush.bf16.msra.mxu3 %v4980_v1  ;;  %s4647_s25 = sshll.u32 %s9997_s22, 3 }
  0x11   : > { %v4948_v2 = vld [vmem:[%s5319_s28] sm:$0xff]  ;;  %v4949_v3 = vld [vmem:[%s5319_s28 + $0x8] sm:$0xff]  ;;  %v4950_v4 = vld [vmem:[%s5319_s28 + $0x10] sm:$0xff]  ;;  %1039 = vmatpush.msra.mxu1 %v830_v11  ;;  %4986 = vmatpush.msra.mxu2 %v830_v11  ;;  %s5430_s29 = scalar_lea.vmem %s9189_s1, %s4647_s25  ;;  %s6338_s8 = scalar_lea.vmem %s9193_s5, %s4647_s25 }
  0x12   : > { %v4951_v5 = vld [vmem:[%s5319_s28 + $0x18] sm:$0xff]  ;;  %v4952_v6 = vld [vmem:[%s5319_s28 + $0x20] sm:$0xff]  ;;  %v4953_v7 = vld [vmem:[%s5319_s28 + $0x28] sm:$0xff] }
  0x13   : > { %4786 = vmatmul.msk.bf16.vlgmr.msra.gmra.mxu0 %vm495_vm0, %v4948_v2  ;;  %1040 = vmatpush.msra.mxu1 %v829_v12  ;;  %v4954_v14 = vld [vmem:[%s5319_s28 + $0x30] sm:$0xff]  ;;  %v4955_v18 = vld [vmem:[%s5319_s28 + $0x38] sm:$0xff]  ;;  %v4956_v19 = vld [vmem:[%s5319_s28 + $0x40] sm:$0xff] }
  0x14   : > { %4987 = vmatpush.msra.mxu2 %v829_v12  ;;  %v4957_v26 = vld [vmem:[%s5319_s28 + $0x48] sm:$0xff]  ;;  %v4958_v33 = vld [vmem:[%s5319_s28 + $0x50] sm:$0xff]  ;;  %v4959_v40 = vld [vmem:[%s5319_s28 + $0x58] sm:$0xff]  ;;  %v1238_v12 = vlaneseq }
  0x15   : > { %1041 = vmatpush.msra.mxu1 %v828_v13  ;;  %v4960_v47 = vld [vmem:[%s5319_s28 + $0x60] sm:$0xff]  ;;  %v4961_v54 = vld [vmem:[%s5319_s28 + $0x68] sm:$0xff]  ;;  %v4962_v61 = vld [vmem:[%s5319_s28 + $0x70] sm:$0xff] }
  0x16   : > { %4988 = vmatpush.msra.mxu2 %v828_v13 }
  0x17   : > { %1042 = vmatpush.msra.mxu1 %v827_v15 }
  0x18   : > { %4989 = vmatpush.msra.mxu2 %v827_v15  ;;  %v5420_v15 = vand.u32 127, %v1238_v12 }
  0x19   : > { %1043 = vmatpush.msra.mxu1 %v826_v16 }
  0x1a   : > { %4990 = vmatpush.msra.mxu2 %v826_v16  ;;  %v4964_v16 = vld [vmem:[%s5319_s28 + $0x80] sm:$0xff]  ;;  %vm1240_vm2 = vcmp.ge.s32.totalorder %v5420_v15, 2 }
  0x1b   : > { %1044 = vmatpush.msra.mxu1 %v825_v17 }
  0x1c   : > { %4991 = vmatpush.msra.mxu2 %v825_v17 }
  0x23   : > { %4787 = vmatmul.msk.bf16.gmra.mxu0 %vm495_vm0, %v4949_v3 }
  0x33   : > { %4788 = vmatmul.msk.bf16.gmra.mxu0 %vm495_vm0, %v4950_v4  ;;  %v4965_v4 = vld [vmem:[%s5319_s28 + $0x88] sm:$0xff] }
  0x34   : > { %4803 = vmatmul.msk.bf16.vlgmr.msra.gmra.mxu3 %vm495_vm0, %v4965_v4 }
  0x43   : > { %4789 = vmatmul.msk.bf16.gmra.mxu0 %vm495_vm0, %v4951_v5  ;;  %v4963_v5 = vld [vmem:[%s5319_s28 + $0x78] sm:$0xff] }
  0x53   : > { %4790 = vmatmul.msk.bf16.gmra.mxu0 %vm495_vm0, %v4952_v6 }
  0x63   : > { %4791 = vmatmul.msk.bf16.gmra.mxu0 %vm495_vm0, %v4953_v7 }
  0x73   : > { %4792 = vmatmul.msk.bf16.gmra.mxu0 %vm495_vm0, %v4954_v14  ;;  %v4966_v14 = vld [vmem:[%s5319_s28 + $0x90] sm:$0xff] }
  0x74   : > { %4804 = vmatmul.msk.bf16.gmra.mxu3 %vm495_vm0, %v4966_v14 }
  0x83   : > { %4793 = vmatmul.msk.bf16.gmra.mxu0 %vm495_vm0, %v4955_v18  ;;  %v5423_v18 = vpop.permute.xlu0 %833 }
  0x90   : > { %v601_v20 = vpop.f32.mrf.mxu0 }
  0x91   : > { %v602_v21 = vadd.f32 %v5342_v10, %v601_v20 }
  0x93   : > { %v761_v22 = vmax.f32 %v602_v21, 0.0  ;;  %4794 = vmatmul.msk.bf16.gmra.mxu0 %vm495_vm0, %v4956_v19 }
  0x95   : > { %4818 = vmatmul.msk.f32.vlgmr.msra.gmra.mxu1 %vm836_vm1, %v761_v22 }
  0x98   : > { %v603_v23 = vpop.f32.mrf.mxu0 }
  0x99   : > { %v604_v24 = vadd.f32 %v5342_v10, %v603_v23  ;;  %v2842_v23 = vld [vmem:[%s5430_s29] sm:$0xff] }
  0x9b   : > { %v762_v25 = vmax.f32 %v604_v24, 0.0 }
  0x9d   : > { %4819 = vmatmul.msk.f32.gmra.mxu1 %vm836_vm1, %v762_v25 }
  0xa0   : > { %v606_v27 = vpop.f32.mrf.mxu0 }
  0xa1   : > { %v607_v28 = vadd.f32 %v5342_v10, %v606_v27 }
  0xa3   : > { %v763_v29 = vmax.f32 %v607_v28, 0.0  ;;  %4795 = vmatmul.msk.bf16.gmra.mxu0 %vm495_vm0, %v4957_v26 }
  0xa5   : > { %4820 = vmatmul.msk.f32.gmra.mxu1 %vm836_vm1, %v763_v29 }
  0xa8   : > { %v608_v30 = vpop.f32.mrf.mxu0 }
  0xa9   : > { %v609_v31 = vadd.f32 %v5342_v10, %v608_v30 }
  0xab   : > { %v764_v32 = vmax.f32 %v609_v31, 0.0 }
  0xad   : > { %4821 = vmatmul.msk.f32.gmra.mxu1 %vm836_vm1, %v764_v32 }
  0xb0   : > { %v611_v34 = vpop.f32.mrf.mxu0 }
  0xb1   : > { %v612_v35 = vadd.f32 %v5342_v10, %v611_v34  ;;  %v4967_v34 = vld [vmem:[%s5319_s28 + $0x98] sm:$0xff] }
  0xb2   : > { %4805 = vmatmul.msk.bf16.gmra.mxu3 %vm495_vm0, %v4967_v34 }
  0xb3   : > { %v765_v36 = vmax.f32 %v612_v35, 0.0  ;;  %4796 = vmatmul.msk.bf16.gmra.mxu0 %vm495_vm0, %v4958_v33  ;;  %v2843_v33 = vld [vmem:[%s5430_s29 + $0x8] sm:$0xff] }
  0xb5   : > { %4822 = vmatmul.msk.f32.gmra.mxu1 %vm836_vm1, %v765_v36 }
  0xb8   : > { %v613_v37 = vpop.f32.mrf.mxu0 }
  0xb9   : > { %v614_v38 = vadd.f32 %v5342_v10, %v613_v37 }
  0xbb   : > { %v766_v39 = vmax.f32 %v614_v38, 0.0 }
  0xbd   : > { %4823 = vmatmul.msk.f32.gmra.mxu1 %vm836_vm1, %v766_v39 }
  0xc0   : > { %v616_v41 = vpop.f32.mrf.mxu0 }
  0xc1   : > { %v617_v42 = vadd.f32 %v5342_v10, %v616_v41 }
  0xc3   : > { %v767_v43 = vmax.f32 %v617_v42, 0.0  ;;  %4797 = vmatmul.msk.bf16.gmra.mxu0 %vm495_vm0, %v4959_v40 }
  0xc5   : > { %4824 = vmatmul.msk.f32.gmra.mxu1 %vm836_vm1, %v767_v43 }
  0xc8   : > { %v618_v44 = vpop.f32.mrf.mxu0 }
  0xc9   : > { %v619_v45 = vadd.f32 %v5342_v10, %v618_v44 }
  0xcb   : > { %v768_v46 = vmax.f32 %v619_v45, 0.0 }
  0xcd   : > { %4825 = vmatmul.msk.f32.gmra.mxu1 %vm836_vm1, %v768_v46  ;;  %v2844_v46 = vld [vmem:[%s5430_s29 + $0x10] sm:$0xff] }
  0xd0   : > { %v621_v48 = vpop.f32.mrf.mxu0 }
  0xd1   : > { %v622_v49 = vadd.f32 %v5342_v10, %v621_v48 }
  0xd3   : > { %v769_v50 = vmax.f32 %v622_v49, 0.0  ;;  %4798 = vmatmul.msk.bf16.gmra.mxu0 %vm495_vm0, %v4960_v47 }
  0xd5   : > { %4826 = vmatmul.msk.f32.gmra.mxu1 %vm836_vm1, %v769_v50 }
  0xd8   : > { %v623_v51 = vpop.f32.mrf.mxu0 }
  0xd9   : > { %v624_v52 = vadd.f32 %v5342_v10, %v623_v51 }
  0xdb   : > { %v770_v53 = vmax.f32 %v624_v52, 0.0 }
  0xdd   : > { %4827 = vmatmul.msk.f32.gmra.mxu1 %vm836_vm1, %v770_v53  ;;  %v4968_v53 = vld [vmem:[%s5319_s28 + $0xa0] sm:$0xff] }
  0xde   : > { %4806 = vmatmul.msk.bf16.gmra.mxu3 %vm495_vm0, %v4968_v53 }
  0xe0   : > { %v626_v55 = vpop.f32.mrf.mxu0 }
  0xe1   : > { %v627_v56 = vadd.f32 %v5342_v10, %v626_v55 }
  0xe3   : > { %v771_v57 = vmax.f32 %v627_v56, 0.0  ;;  %4799 = vmatmul.msk.bf16.gmra.mxu0 %vm495_vm0, %v4961_v54 }
  0xe5   : > { %4828 = vmatmul.msk.f32.gmra.mxu1 %vm836_vm1, %v771_v57  ;;  %v2845_v57 = vld [vmem:[%s5430_s29 + $0x18] sm:$0xff] }
  0xe8   : > { %v628_v58 = vpop.f32.mrf.mxu0 }
  0xe9   : > { %v629_v59 = vadd.f32 %v5342_v10, %v628_v58 }
  0xeb   : > { %v772_v60 = vmax.f32 %v629_v59, 0.0 }
  0xed   : > { %4829 = vmatmul.msk.f32.gmra.mxu1 %vm836_vm1, %v772_v60 }
  0xf0   : > { %v631_v62 = vpop.f32.mrf.mxu0 }
  0xf1   : > { %v632_v63 = vadd.f32 %v5342_v10, %v631_v62 }
  0xf3   : > { %v773_v0 = vmax.f32 %v632_v63, 0.0  ;;  %4800 = vmatmul.msk.bf16.gmra.mxu0 %vm495_vm0, %v4962_v61 }
  0xf5   : > { %4830 = vmatmul.msk.f32.gmra.mxu1 %vm836_vm1, %v773_v0  ;;  %v2846_v0 = vld [vmem:[%s5430_s29 + $0x20] sm:$0xff] }
  0xf8   : > { %v633_v1 = vpop.f32.mrf.mxu0 }
  0xf9   : > { %v634_v2 = vadd.f32 %v5342_v10, %v633_v1 }
  0xfb   : > { %v774_v3 = vmax.f32 %v634_v2, 0.0 }
  0xfd   : > { %4831 = vmatmul.msk.f32.gmra.mxu1 %vm836_vm1, %v774_v3 }
 0x100   : > { %v636_v6 = vpop.f32.mrf.mxu0 }
 0x101   : > { %v637_v7 = vadd.f32 %v5342_v10, %v636_v6 }
 0x103   : > { %v775_v8 = vmax.f32 %v637_v7, 0.0  ;;  %4801 = vmatmul.msk.bf16.gmra.mxu0 %vm495_vm0, %v4963_v5 }
 0x105   : > { %4832 = vmatmul.msk.f32.gmra.mxu1 %vm836_vm1, %v775_v8 }
 0x108   : > { %v638_v9 = vpop.f32.mrf.mxu0 }
 0x109   : > { %v639_v11 = vadd.f32 %v5342_v10, %v638_v9 }
 0x10b   : > { %v776_v13 = vmax.f32 %v639_v11, 0.0  ;;  %v4969_v11 = vld [vmem:[%s5319_s28 + $0xa8] sm:$0xff] }
 0x10c   : > { %4807 = vmatmul.msk.bf16.gmra.mxu3 %vm495_vm0, %v4969_v11 }
 0x10d   : > { %4833 = vmatmul.msk.f32.gmra.mxu1 %vm836_vm1, %v776_v13 }
 0x110   : > { %v641_v17 = vpop.f32.mrf.mxu0 }
 0x111   : > { %v642_v19 = vadd.f32 %v5342_v10, %v641_v17 }
 0x112   : > { %v1046_v20 = vpop.f32.mrf.mxu1 }
 0x113   : > { %v777_v21 = vmax.f32 %v642_v19, 0.0  ;;  %v5435_v22 = vadd.f32 %v1046_v20, %v5423_v18  ;;  %4802 = vmatmul.msk.bf16.gmra.mxu0 %vm495_vm0, %v4964_v16  ;;  %v2847_v16 = vld [vmem:[%s5430_s29 + $0x28] sm:$0xff] }
 0x115   : > { %4834 = vmatmul.msk.f32.gmra.mxu1 %vm836_vm1, %v777_v21  ;;  %v5443_v24 = vsel %vm1240_vm2, %v5435_v22, -1e+30 }
 0x116   : > { %v1306_v25 = vsel %vm1305_vm3, %v5443_v24, -inf  ;;  %v5448_v26 = vadd.f32 %v2842_v23, %v5443_v24 }
 0x117   : > { %1307 = vmax.xlane.f32.xlu0 %v1306_v25 }
 0x118   : > { %v643_v27 = vpop.f32.mrf.mxu0  ;;  %v2970_v28 = vsel %vm1305_vm3, %v5448_v26, -inf }
 0x119   : > { %v644_v29 = vadd.f32 %v5342_v10, %v643_v27  ;;  %2971 = vmax.xlane.f32.xlu2 %v2970_v28 }
 0x11a   : > { %v1049_v30 = vpop.f32.mrf.mxu1 }
 0x11b   : > { %v778_v31 = vmax.f32 %v644_v29, 0.0  ;;  %v5454_v32 = vadd.f32 %v1049_v30, %v5423_v18  ;;  %v2848_v30 = vld [vmem:[%s5430_s29 + $0x30] sm:$0xff] }
 0x11d   : > { %4835 = vmatmul.msk.f32.gmra.mxu1 %vm836_vm1, %v778_v31  ;;  %v5462_v35 = vsel %vm1240_vm2, %v5454_v32, -1e+30 }
 0x11e   : > { %v1309_v36 = vsel %vm1305_vm3, %v5462_v35, -inf  ;;  %v5468_v37 = vadd.f32 %v2843_v33, %v5462_v35 }
 0x11f   : > { %1310 = vmax.xlane.f32.xlu1 %v1309_v36 }
 0x120   : > { %v646_v38 = vpop.f32.mrf.mxu0  ;;  %v2973_v39 = vsel %vm1305_vm3, %v5468_v37, -inf }
 0x121   : > { %v647_v40 = vadd.f32 %v5342_v10, %v646_v38  ;;  %2974 = vmax.xlane.f32.xlu0 %v2973_v39 }
 0x122   : > { %v1052_v41 = vpop.f32.mrf.mxu1 }
 0x123   : > { %v779_v42 = vmax.f32 %v647_v40, 0.0  ;;  %v5474_v43 = vadd.f32 %v1052_v41, %v5423_v18  ;;  %v2849_v40 = vld [vmem:[%s5430_s29 + $0x38] sm:$0xff]  ;;  %v4970_v41 = vld [vmem:[%s5319_s28 + $0xb0] sm:$0xff] }
 0x124   : > { %4808 = vmatmul.msk.bf16.gmra.mxu3 %vm495_vm0, %v4970_v41 }
 0x125   : > { %4836 = vmatmul.msk.f32.gmra.mxu1 %vm836_vm1, %v779_v42  ;;  %v5480_v44 = vsel %vm1240_vm2, %v5474_v43, -1e+30 }
 0x126   : > { %v1312_v45 = vsel %vm1305_vm3, %v5480_v44, -inf  ;;  %v5487_v50 = vadd.f32 %v2844_v46, %v5480_v44 }
 0x127   : > { %1313 = vmax.xlane.f32.xlu1 %v1312_v45 }
 0x128   : > { %v648_v47 = vpop.f32.mrf.mxu0  ;;  %v2976_v55 = vsel %vm1305_vm3, %v5487_v50, -inf }
 0x129   : > { %v649_v48 = vadd.f32 %v5342_v10, %v648_v47 }
 0x12a   : > { %v1055_v49 = vpop.f32.mrf.mxu1 }
 0x12b   : > { %v780_v51 = vmax.f32 %v649_v48, 0.0  ;;  %v5490_v52 = vadd.f32 %v1055_v49, %v5423_v18 }
 0x12d   : > { %4837 = vmatmul.msk.f32.gmra.mxu1 %vm836_vm1, %v780_v51  ;;  %v5497_v54 = vsel %vm1240_vm2, %v5490_v52, -1e+30 }
 0x12e   : > { %v1315_v56 = vsel %vm1305_vm3, %v5497_v54, -inf  ;;  %v5507_v61 = vadd.f32 %v2845_v57, %v5497_v54  ;;  %v2850_v57 = vld [vmem:[%s5430_s29 + $0x40] sm:$0xff] }
 0x12f   : > { %2977 = vmax.xlane.f32.xlu1 %v2976_v55  ;;  %1316 = vmax.xlane.f32.xlu2 %v1315_v56 }
 0x130   : > { %v651_v58 = vpop.f32.mrf.mxu0  ;;  %v2979_v2 = vsel %vm1305_vm3, %v5507_v61, -inf }
 0x131   : > { %v652_v59 = vadd.f32 %v5342_v10, %v651_v58 }
 0x132   : > { %v1058_v60 = vpop.f32.mrf.mxu1 }
 0x133   : > { %v781_v62 = vmax.f32 %v652_v59, 0.0  ;;  %v5510_v63 = vadd.f32 %v1058_v60, %v5423_v18 }
 0x135   : > { %9472 = vst [vmem:[#allocation2_spill] sm:$0xff] %v5510_v63  ;;  %v5516_v1 = vsel %vm1240_vm2, %v5510_v63, -1e+30  ;;  %4838 = vmatmul.msk.f32.gmra.mxu1 %vm836_vm1, %v781_v62 }
 0x136   : > { %v5522_v3 = vadd.f32 %v2846_v0, %v5516_v1  ;;  %v1318_v14 = vsel %vm1305_vm3, %v5516_v1, -inf }
 0x137   : > { %2980 = vmax.xlane.f32.xlu2 %v2979_v2 }
 0x138   : > { %v653_v4 = vpop.f32.mrf.mxu0  ;;  %v2982_v5 = vsel %vm1305_vm3, %v5522_v3, -inf }
 0x139   : > { %v654_v6 = vadd.f32 %v5342_v10, %v653_v4  ;;  %2983 = vmax.xlane.f32.xlu0 %v2982_v5 }
 0x13a   : > { %v1061_v7 = vpop.f32.mrf.mxu1 }
 0x13b   : > { %v782_v8 = vmax.f32 %v654_v6, 0.0  ;;  %v5528_v9 = vadd.f32 %v1061_v7, %v5423_v18  ;;  %v2851_v7 = vld [vmem:[%s5430_s29 + $0x48] sm:$0xff] }
 0x13d   : > { %9473 = vst [vmem:[#allocation3_spill] sm:$0xff] %v5528_v9  ;;  %4839 = vmatmul.msk.f32.gmra.mxu1 %vm836_vm1, %v782_v8  ;;  %v5535_v12 = vsel %vm1240_vm2, %v5528_v9, -1e+30  ;;  %v4971_v8 = vld [vmem:[%s5319_s28 + $0xb8] sm:$0xff] }
 0x13e   : > { %v1321_v13 = vsel %vm1305_vm3, %v5535_v12, -inf  ;;  %v5545_v21 = vadd.f32 %v2847_v16, %v5535_v12  ;;  %4809 = vmatmul.msk.bf16.gmra.mxu3 %vm495_vm0, %v4971_v8  ;;  %v2854_v8 = vld [vmem:[%s5430_s29 + $0x60] sm:$0xff] }
 0x13f   : > { %1322 = vmax.xlane.f32.xlu1 %v1321_v13  ;;  %1319 = vmax.xlane.f32.xlu2 %v1318_v14 }
 0x140   : > { %v656_v17 = vpop.f32.mrf.mxu0  ;;  %v2985_v28 = vsel %vm1305_vm3, %v5545_v21, -inf }
 0x141   : > { %v657_v19 = vadd.f32 %v5342_v10, %v656_v17 }
 0x142   : > { %v1064_v20 = vpop.f32.mrf.mxu1 }
 0x143   : > { %v783_v23 = vmax.f32 %v657_v19, 0.0  ;;  %v5548_v25 = vadd.f32 %v1064_v20, %v5423_v18 }
 0x145   : > { %9474 = vst [vmem:[#allocation4_spill] sm:$0xff] %v5548_v25  ;;  %4840 = vmatmul.msk.f32.gmra.mxu1 %vm836_vm1, %v783_v23  ;;  %v5554_v27 = vsel %vm1240_vm2, %v5548_v25, -1e+30 }
 0x146   : > { %v1324_v29 = vsel %vm1305_vm3, %v5554_v27, -inf  ;;  %v5563_v36 = vadd.f32 %v2848_v30, %v5554_v27 }
 0x147   : > { %2986 = vmax.xlane.f32.xlu1 %v2985_v28  ;;  %1325 = vmax.xlane.f32.xlu2 %v1324_v29  ;;  %v2852_v29 = vld [vmem:[%s5430_s29 + $0x50] sm:$0xff] }
 0x148   : > { %v658_v31 = vpop.f32.mrf.mxu0  ;;  %v2988_v46 = vsel %vm1305_vm3, %v5563_v36, -inf }
 0x149   : > { %v659_v33 = vadd.f32 %v5342_v10, %v658_v31 }
 0x14a   : > { %v1067_v34 = vpop.f32.mrf.mxu1 }
 0x14b   : > { %v784_v38 = vmax.f32 %v659_v33, 0.0  ;;  %v5566_v39 = vadd.f32 %v1067_v34, %v5423_v18 }
 0x14d   : > { %9475 = vst [vmem:[#allocation5_spill] sm:$0xff] %v5566_v39  ;;  %4841 = vmatmul.msk.f32.gmra.mxu1 %vm836_vm1, %v784_v38  ;;  %v5574_v42 = vsel %vm1240_vm2, %v5566_v39, -1e+30  ;;  %v4976_v39 = vld [vmem:[%s5319_s28 + $0xe0] sm:$0xff] }
 0x14e   : > { %v1327_v45 = vsel %vm1305_vm3, %v5574_v42, -inf  ;;  %v5582_v47 = vadd.f32 %v2849_v40, %v5574_v42 }
 0x14f   : > { %1328 = vmax.xlane.f32.xlu1 %v1327_v45  ;;  %2989 = vmax.xlane.f32.xlu2 %v2988_v46 }
 0x150   : > { %v661_v48 = vpop.f32.mrf.mxu0  ;;  %v2991_v49 = vsel %vm1305_vm3, %v5582_v47, -inf }
 0x151   : > { %v662_v51 = vadd.f32 %v5342_v10, %v661_v48  ;;  %2992 = vmax.xlane.f32.xlu0 %v2991_v49  ;;  %v4972_v48 = vld [vmem:[%s5319_s28 + $0xc0] sm:$0xff] }
 0x152   : > { %v1070_v53 = vpop.f32.mrf.mxu1  ;;  %4810 = vmatmul.msk.bf16.gmra.mxu3 %vm495_vm0, %v4972_v48 }
 0x153   : > { %v785_v55 = vmax.f32 %v662_v51, 0.0  ;;  %v5588_v56 = vadd.f32 %v1070_v53, %v5423_v18  ;;  %v2853_v53 = vld [vmem:[%s5430_s29 + $0x58] sm:$0xff] }
 0x155   : > { %9476 = vst [vmem:[#allocation6_spill] sm:$0xff] %v5588_v56  ;;  %v5594_v58 = vsel %vm1240_vm2, %v5588_v56, -1e+30  ;;  %4842 = vmatmul.msk.f32.gmra.mxu1 %vm836_vm1, %v785_v55 }
 0x156   : > { %v1330_v59 = vsel %vm1305_vm3, %v5594_v58, -inf  ;;  %v5600_v60 = vadd.f32 %v2850_v57, %v5594_v58 }
 0x157   : > { %1331 = vmax.xlane.f32.xlu2 %v1330_v59 }
 0x158   : > { %v663_v62 = vpop.f32.mrf.mxu0  ;;  %v2994_v0 = vsel %vm1305_vm3, %v5600_v60, -inf }
 0x159   : > { %v664_v2 = vadd.f32 %v5342_v10, %v663_v62  ;;  %2995 = vmax.xlane.f32.xlu1 %v2994_v0 }
 0x15a   : > { %v1073_v4 = vpop.f32.mrf.mxu1 }
 0x15b   : > { %v786_v5 = vmax.f32 %v664_v2, 0.0  ;;  %v5606_v6 = vadd.f32 %v1073_v4, %v5423_v18 }
 0x15d   : > { %9477 = vst [vmem:[#allocation7_spill] sm:$0xff] %v5606_v6  ;;  %v5613_v11 = vsel %vm1240_vm2, %v5606_v6, -1e+30  ;;  %4843 = vmatmul.msk.f32.gmra.mxu1 %vm836_vm1, %v786_v5 }
 0x15e   : > { %v5618_v13 = vadd.f32 %v2851_v7, %v5613_v11  ;;  %v1333_v16 = vsel %vm1305_vm3, %v5613_v11, -inf }
 0x160   : > { %v666_v14 = vpop.f32.mrf.mxu0  ;;  %v2997_v17 = vsel %vm1305_vm3, %v5618_v13, -inf }
 0x161   : > { %v667_v19 = vadd.f32 %v5342_v10, %v666_v14  ;;  %1334 = vmax.xlane.f32.xlu1 %v1333_v16  ;;  %2998 = vmax.xlane.f32.xlu2 %v2997_v17 }
 0x162   : > { %v1076_v20 = vpop.f32.mrf.mxu1 }
 0x163   : > { %v787_v23 = vmax.f32 %v667_v19, 0.0  ;;  %v5626_v28 = vadd.f32 %v1076_v20, %v5423_v18 }
 0x165   : > { %9478 = vst [vmem:[#allocation8_spill] sm:$0xff] %v5626_v28  ;;  %v5632_v30 = vsel %vm1240_vm2, %v5626_v28, -1e+30  ;;  %4844 = vmatmul.msk.f32.gmra.mxu1 %vm836_vm1, %v787_v23  ;;  %v4975_v28 = vld [vmem:[%s5319_s28 + $0xd8] sm:$0xff] }
 0x166   : > { %v5636_v31 = vadd.f32 %v2852_v29, %v5632_v30  ;;  %v1336_v34 = vsel %vm1305_vm3, %v5632_v30, -inf  ;;  %v2855_v29 = vld [vmem:[%s5430_s29 + $0x68] sm:$0xff] }
 0x168   : > { %v668_v33 = vpop.f32.mrf.mxu0  ;;  %v3000_v38 = vsel %vm1305_vm3, %v5636_v31, -inf }
 0x169   : > { %v669_v40 = vadd.f32 %v5342_v10, %v668_v33  ;;  %1337 = vmax.xlane.f32.xlu2 %v1336_v34  ;;  %3001 = vmax.xlane.f32.xlu0 %v3000_v38  ;;  %v4973_v33 = vld [vmem:[%s5319_s28 + $0xc8] sm:$0xff] }
 0x16a   : > { %v1079_v41 = vpop.f32.mrf.mxu1  ;;  %4811 = vmatmul.msk.bf16.gmra.mxu3 %vm495_vm0, %v4973_v33 }
 0x16b   : > { %v788_v45 = vmax.f32 %v669_v40, 0.0  ;;  %v5644_v46 = vadd.f32 %v1079_v41, %v5423_v18 }
 0x16d   : > { %9479 = vst [vmem:[#allocation9_spill] sm:$0xff] %v5644_v46  ;;  %v5650_v49 = vsel %vm1240_vm2, %v5644_v46, -1e+30  ;;  %4845 = vmatmul.msk.f32.gmra.mxu1 %vm836_vm1, %v788_v45 }
 0x16e   : > { %v1339_v51 = vsel %vm1305_vm3, %v5650_v49, -inf  ;;  %v5659_v62 = vadd.f32 %v2853_v53, %v5650_v49 }
 0x16f   : > { %1340 = vmax.xlane.f32.xlu1 %v1339_v51  ;;  %v5700_v51 = vpop.f32.mrf.mxu3 }
 0x170   : > { %v671_v55 = vpop.f32.mrf.mxu0  ;;  %v3003_v5 = vsel %vm1305_vm3, %v5659_v62, -inf }
 0x171   : > { %v672_v57 = vadd.f32 %v5342_v10, %v671_v55 }
 0x172   : > { %v1082_v59 = vpop.f32.mrf.mxu1 }
 0x173   : > { %v789_v0 = vmax.f32 %v672_v57, 0.0  ;;  %v5662_v2 = vadd.f32 %v1082_v59, %v5423_v18 }
 0x175   : > { %9480 = vst [vmem:[#allocation10_spill] sm:$0xff] %v5662_v2  ;;  %v5667_v4 = vsel %vm1240_vm2, %v5662_v2, -1e+30  ;;  %4846 = vmatmul.msk.f32.gmra.mxu1 %vm836_vm1, %v789_v0  ;;  %v2856_v0 = vld [vmem:[%s5430_s29 + $0x70] sm:$0xff] }
 0x176   : > { %v1342_v7 = vsel %vm1305_vm3, %v5667_v4, -inf  ;;  %v5677_v19 = vadd.f32 %v2854_v8, %v5667_v4 }
 0x177   : > { %3004 = vmax.xlane.f32.xlu1 %v3003_v5  ;;  %1343 = vmax.xlane.f32.xlu2 %v1342_v7 }
 0x178   : > { %v673_v14 = vpop.f32.mrf.mxu0  ;;  %v3006_v40 = vsel %vm1305_vm3, %v5677_v19, -inf }
 0x179   : > { %v674_v16 = vadd.f32 %v5342_v10, %v673_v14 }
 0x17a   : > { %v1085_v17 = vpop.f32.mrf.mxu1 }
 0x17b   : > { %v790_v20 = vmax.f32 %v674_v16, 0.0  ;;  %v5680_v23 = vadd.f32 %v1085_v17, %v5423_v18  ;;  %v5720_v17 = vpop.f32.mrf.mxu3 }
 0x17d   : > { %9481 = vst [vmem:[#allocation11_spill] sm:$0xff] %v5680_v23  ;;  %v5687_v34 = vsel %vm1240_vm2, %v5680_v23, -1e+30  ;;  %4847 = vmatmul.msk.f32.gmra.mxu1 %vm836_vm1, %v790_v20 }
 0x17e   : > { %v1345_v38 = vsel %vm1305_vm3, %v5687_v34, -inf  ;;  %v5696_v41 = vadd.f32 %v2855_v29, %v5687_v34 }
 0x17f   : > { %1346 = vmax.xlane.f32.xlu1 %v1345_v38  ;;  %3007 = vmax.xlane.f32.xlu2 %v3006_v40 }
 0x180   : > { %v676_v45 = vpop.f32.mrf.mxu0  ;;  %v3009_v48 = vsel %vm1305_vm3, %v5696_v41, -inf }
 0x181   : > { %v677_v53 = vadd.f32 %v5342_v10, %v676_v45  ;;  %3010 = vmax.xlane.f32.xlu0 %v3009_v48  ;;  %v2857_v45 = vld [vmem:[%s5430_s29 + $0x78] sm:$0xff] }
 0x182   : > { %v1088_v55 = vpop.f32.mrf.mxu1 }
 0x183   : > { %v791_v57 = vmax.f32 %v677_v53, 0.0  ;;  %v5704_v59 = vadd.f32 %v1088_v55, %v5423_v18  ;;  %v4974_v53 = vld [vmem:[%s5319_s28 + $0xd0] sm:$0xff] }
 0x184   : > { %4812 = vmatmul.msk.bf16.gmra.mxu3 %vm495_vm0, %v4974_v53 }
 0x185   : > { %9482 = vst [vmem:[#allocation12_spill] sm:$0xff] %v5704_v59  ;;  %v5710_v5 = vsel %vm1240_vm2, %v5704_v59, -1e+30  ;;  %4848 = vmatmul.msk.f32.gmra.mxu1 %vm836_vm1, %v791_v57 }
 0x186   : > { %v1348_v7 = vsel %vm1305_vm3, %v5710_v5, -inf  ;;  %v5716_v8 = vadd.f32 %v2856_v0, %v5710_v5 }
 0x187   : > { %1349 = vmax.xlane.f32.xlu2 %v1348_v7 }
 0x188   : > { %v678_v14 = vpop.f32.mrf.mxu0  ;;  %v3012_v16 = vsel %vm1305_vm3, %v5716_v8, -inf }
 0x189   : > { %v679_v20 = vadd.f32 %v5342_v10, %v678_v14  ;;  %3013 = vmax.xlane.f32.xlu1 %v3012_v16 }
 0x18a   : > { %v1091_v29 = vpop.f32.mrf.mxu1  ;;  %v1308_v33 = vpop.xlane.xlu0 %1307 }
 0x18b   : > { %v792_v38 = vmax.f32 %v679_v20, 0.0  ;;  %v5724_v40 = vadd.f32 %v1091_v29, %v5423_v18  ;;  %v1498_v57 = vsub.f32 %v5443_v24, %v1308_v33 }
 0x18c   : > { %v2972_v48 = vpop.xlane.xlu2 %2971 }
 0x18d   : > { %9483 = vst [vmem:[#allocation13_spill] sm:$0xff] %v5724_v40  ;;  %v5731_v55 = vsel %vm1240_vm2, %v5724_v40, -1e+30  ;;  %vm3162_vm4 = vcmp.eq.f32.partialorder %v5448_v26, %v2972_v48  ;;  %4849 = vmatmul.msk.f32.gmra.mxu1 %vm836_vm1, %v792_v38  ;;  %v5748_v26 = vpop.f32.mrf.mxu3  ;;  %v1562_v29 = vmul.f32 1.442695, %v1498_v57 }
 0x18e   : > { %v3226_v0 = vsel %vm3162_vm4, %v5420_v15, 10  ;;  %v1351_v7 = vsel %vm1305_vm3, %v5731_v55, -inf  ;;  %v5740_v14 = vadd.f32 %v2857_v45, %v5731_v55 }
 0x18f   : > { %1352 = vmax.xlane.f32.xlu0 %v1351_v7  ;;  %v5744_v16 = vsel %vm1305_vm3, %v3226_v0, 2147483647  ;;  %5002 = vpow2.f32 %v1562_v29 }
 0x190   : > { %v681_v20 = vpop.f32.mrf.mxu0  ;;  %v3015_v24 = vsel %vm1305_vm3, %v5740_v14, -inf  ;;  %v3292_v38 = vshra.s32 %v5744_v16, 16 }
 0x191   : > { %v682_v33 = vadd.f32 %v5342_v10, %v681_v20  ;;  %3016 = vmax.xlane.f32.xlu2 %v3015_v24 }
 0x192   : > { %v1094_v45 = vpop.f32.mrf.mxu1  ;;  %v1311_v48 = vpop.xlane.xlu1 %1310  ;;  %v5762_v57 = vcvt.s32.f32 %v3292_v38 }
 0x193   : > { %v793_v53 = vmax.f32 %v682_v33, 0.0  ;;  %v5753_v7 = vadd.f32 %v1094_v45, %v5423_v18  ;;  %v2858_v33 = vld [vmem:[%s5430_s29 + $0x80] sm:$0xff] }
 0x194   : > { %v2975_v0 = vpop.xlane.xlu0 %2974  ;;  %4813 = vmatmul.msk.bf16.gmra.mxu3 %vm495_vm0, %v4975_v28 }
 0x195   : > { %9484 = vst [vmem:[#allocation14_spill] sm:$0xff] %v5753_v7  ;;  %v5758_v40 = vsel %vm1240_vm2, %v5753_v7, -1e+30  ;;  %vm3163_vm5 = vcmp.eq.f32.partialorder %v5468_v37, %v2975_v0  ;;  %4850 = vmatmul.msk.f32.vlgmr.msra.gmra.mxu2 %vm836_vm1, %v793_v53  ;;  %v5773_v0 = vpop.f32.mrf.mxu3  ;;  %v1499_v53 = vsub.f32 %v5462_v35, %v1311_v48  ;;  %v687_v35 = vadd.f32 %v5342_v10, %v5700_v51 }
 0x196   : > { %v3227_v20 = vsel %vm3163_vm5, %v5420_v15, 10  ;;  %v1354_v24 = vsel %vm1305_vm3, %v5758_v40, -inf }
 0x197   : > { %1355 = vmax.xlane.f32.xlu1 %v1354_v24  ;;  %3295 = vmin.xlane.f32.xlu0 %v5762_v57  ;;  %v5769_v29 = vsel %vm1305_vm3, %v3227_v20, 2147483647  ;;  %v5780_v24 = vadd.f32 %v2858_v33, %v5758_v40  ;;  %v5782_v20 = vpop.eup %5002  ;;  %v1564_v48 = vmul.f32 1.442695, %v1499_v53 }
 0x198   : > { %v683_v45 = vpop.f32.mrf.mxu0  ;;  %v3307_v37 = vshra.s32 %v5769_v29, 16 }
 0x199   : > { %v684_v38 = vadd.f32 %v5342_v10, %v683_v45  ;;  %v3018_v33 = vsel %vm1305_vm3, %v5780_v24, -inf  ;;  %5004 = vpow2.f32 %v1564_v48 }
 0x19a   : > { %v1097_v7 = vpop.f32.mrf.mxu1  ;;  %v1314_v59 = vpop.xlane.xlu1 %1313  ;;  %v5777_v23 = vcvt.s32.f32 %v3307_v37  ;;  %v1690_v37 = vsel %vm1305_vm3, %v5782_v20, 0.0 }
 0x19b   : > { %v794_v2 = vmax.f32 %v684_v38, 0.0  ;;  %v5785_v46 = vadd.f32 %v1097_v7, %v5423_v18  ;;  %v1500_v45 = vsub.f32 %v5480_v44, %v1314_v59  ;;  %v2859_v44 = vld [vmem:[%s5430_s29 + $0x88] sm:$0xff]  ;;  %v795_v59 = vmax.f32 %v687_v35, 0.0 }
 0x19c   : > { %3310 = vmin.xlane.f32.xlu2 %v5777_v23  ;;  %v689_v35 = vadd.f32 %v5342_v10, %v5720_v17 }
 0x19d   : > { %9485 = vst [vmem:[#allocation15_spill] sm:$0xff] %v5785_v46  ;;  %4851 = vmatmul.msk.f32.gmra.mxu2 %vm836_vm1, %v794_v2  ;;  %v5801_v7 = vsel %vm1240_vm2, %v5785_v46, -1e+30  ;;  %v5804_v2 = vpop.f32.mrf.mxu3  ;;  %v1566_v51 = vmul.f32 1.442695, %v1500_v45 }
 0x19e   : > { %v5807_v6 = vadd.f32 %v2859_v44, %v5801_v7 }
 0x19f   : > { %3019 = vmax.xlane.f32.xlu0 %v3018_v33  ;;  %1691 = vadd.xlane.f32.xlu1 %v1690_v37  ;;  %v1357_v33 = vsel %vm1305_vm3, %v5801_v7, -inf  ;;  %5006 = vpow2.f32 %v1566_v51  ;;  %v5831_v51 = vpop.eup %5004 }
 0x1a0   : > { %v3021_v48 = vsel %vm1305_vm3, %v5807_v6, -inf  ;;  %v1693_v56 = vsel %vm1305_vm3, %v5831_v51, 0.0 }
 0x1a2   : > { %v1100_v38 = vpop.f32.mrf.mxu1  ;;  %v2978_v53 = vpop.xlane.xlu1 %2977 }
 0x1a3   : > { %v5810_v28 = vadd.f32 %v1100_v38, %v5423_v18  ;;  %vm3164_vm6 = vcmp.eq.f32.partialorder %v5487_v50, %v2978_v53  ;;  %v1317_v46 = vpop.xlane.xlu2 %1316 }
 0x1a4   : > { %v3228_v37 = vsel %vm3164_vm6, %v5420_v15, 10  ;;  %1358 = vmax.xlane.f32.xlu2 %v1357_v33  ;;  %4814 = vmatmul.msk.bf16.gmra.mxu3 %vm495_vm0, %v4976_v39 }
 0x1a5   : > { %9486 = vst [vmem:[#allocation16_spill] sm:$0xff] %v5810_v28  ;;  %v5819_v45 = vsel %vm1240_vm2, %v5810_v28, -1e+30  ;;  %4852 = vmatmul.msk.f32.gmra.mxu2 %vm836_vm1, %v795_v59  ;;  %v5829_v44 = vsel %vm1305_vm3, %v3228_v37, 2147483647  ;;  %v5833_v38 = vpop.f32.mrf.mxu3  ;;  %v796_v59 = vmax.f32 %v689_v35, 0.0  ;;  %v5836_v33 = vpop.eup %5006  ;;  %v1501_v35 = vsub.f32 %v5497_v54, %v1317_v46 }
 0x1a6   : > { %9487 = vst [vmem:[#allocation17_spill] sm:$0xff] %v5819_v45  ;;  %v1360_v50 = vsel %vm1305_vm3, %v5819_v45, -inf  ;;  %v3322_v17 = vshra.s32 %v5829_v44, 16 }
 0x1a7   : > { %1361 = vmax.xlane.f32.xlu0 %v1360_v50  ;;  %3022 = vmax.xlane.f32.xlu1 %v3021_v48  ;;  %v692_v50 = vadd.f32 %v5342_v10, %v5748_v26  ;;  %v2860_v48 = vld [vmem:[%s5430_s29 + $0x90] sm:$0xff] }
 0x1a8   : > { %v5849_v9 = vcvt.s32.f32 %v3322_v17  ;;  %v5862_v54 = vadd.f32 %v2860_v48, %v5819_v45 }
 0x1aa   : > { %v1103_v53 = vpop.f32.mrf.mxu1  ;;  %v3024_v48 = vsel %vm1305_vm3, %v5862_v54, -inf }
 0x1ab   : > { %v2981_v28 = vpop.xlane.xlu2 %2980  ;;  %v5858_v26 = vadd.f32 %v1103_v53, %v5423_v18 }
 0x1ac   : > { %vm3165_vm7 = vcmp.eq.f32.partialorder %v5507_v61, %v2981_v28  ;;  %1694 = vadd.xlane.f32.xlu2 %v1693_v56  ;;  %v2984_v37 = vpop.xlane.xlu0 %2983  ;;  %v1696_v61 = vsel %vm1305_vm3, %v5836_v33, 0.0  ;;  %v1568_v28 = vmul.f32 1.442695, %v1501_v35  ;;  %v694_v35 = vadd.f32 %v5342_v10, %v5773_v0 }
 0x1ad   : > { %v3229_v25 = vsel %vm3165_vm7, %v5420_v15, 10  ;;  %vm3166_vm8 = vcmp.eq.f32.partialorder %v5522_v3, %v2984_v37  ;;  %4853 = vmatmul.msk.f32.gmra.mxu2 %vm836_vm1, %v796_v59  ;;  %9489 = vst [vmem:[#allocation19_spill] sm:$0xff] %v5858_v26  ;;  %v5865_v46 = vpop.f32.mrf.mxu3  ;;  %v797_v59 = vmax.f32 %v692_v50, 0.0  ;;  %v5871_v39 = vsel %vm1240_vm2, %v5858_v26, -1e+30 }
 0x1ae   : > { %v5854_v56 = vsel %vm1305_vm3, %v3229_v25, 2147483647  ;;  %v3230_v3 = vsel %vm3166_vm8, %v5420_v15, 10  ;;  %9490 = vst [vmem:[#allocation20_spill] sm:$0xff] %v5871_v39  ;;  %5008 = vpow2.f32 %v1568_v28  ;;  %v1363_v26 = vsel %vm1305_vm3, %v5871_v39, -inf }
 0x1af   : > { %9488 = vst [vmem:[#allocation18_spill] sm:$0xff] %v5854_v56  ;;  %1697 = vadd.xlane.f32.xlu0 %v1696_v61  ;;  %3325 = vmin.xlane.f32.xlu1 %v5849_v9  ;;  %v3337_v25 = vshra.s32 %v5854_v56, 16  ;;  %v5876_v61 = vsel %vm1305_vm3, %v3230_v3, 2147483647  ;;  %v2861_v3 = vld [vmem:[%s5430_s29 + $0x98] sm:$0xff]  ;;  %v798_v56 = vmax.f32 %v694_v35, 0.0 }
 0x1b0   : > { %9491 = vst [vmem:[#allocation21_spill] sm:$0xff] %v5876_v61  ;;  %v3352_v63 = vshra.s32 %v5876_v61, 16  ;;  %v4977_v35 = vld [vmem:[%s5319_s28 + $0xe8] sm:$0xff] }
 0x1b1   : > { %v5879_v50 = vcvt.s32.f32 %v3337_v25  ;;  %v5894_v25 = vadd.f32 %v2861_v3, %v5871_v39 }
 0x1b2   : > { %v1106_v17 = vpop.f32.mrf.mxu1  ;;  %v1323_v53 = vpop.xlane.xlu1 %1322 }
 0x1b3   : > { %v1320_v37 = vpop.xlane.xlu2 %1319  ;;  %9492 = vst [vmem:[#allocation22_spill] sm:$0xff] %v5879_v50  ;;  %v5899_v45 = vadd.f32 %v1106_v17, %v5423_v18  ;;  %v3027_v17 = vsel %vm1305_vm3, %v5894_v25, -inf }
 0x1b4   : > { %3025 = vmax.xlane.f32.xlu2 %v3024_v48  ;;  %v1502_v28 = vsub.f32 %v5516_v1, %v1320_v37  ;;  %v5896_v0 = vpop.eup %5008  ;;  %4815 = vmatmul.msk.bf16.gmra.mxu3 %vm495_vm0, %v4977_v35 }
 0x1b5   : > { %4854 = vmatmul.msk.f32.gmra.mxu2 %vm836_vm1, %v797_v59  ;;  %v5888_v48 = vpop.f32.mrf.mxu3  ;;  %v5891_v59 = vcvt.s32.f32 %v3352_v63  ;;  %9494 = vst [vmem:[#allocation24_spill] sm:$0xff] %v5899_v45  ;;  %v697_v63 = vadd.f32 %v5342_v10, %v5804_v2  ;;  %v1699_v3 = vsel %vm1305_vm3, %v5896_v0, 0.0  ;;  %v2862_v2 = vld [vmem:[%s5430_s29 + $0xa0] sm:$0xff] }
 0x1b6   : > { %v1570_v37 = vmul.f32 1.442695, %v1502_v28 }
 0x1b7   : > { %3340 = vmin.xlane.f32.xlu0 %v5879_v50  ;;  %1364 = vmax.xlane.f32.xlu1 %v1363_v26  ;;  %9493 = vst [vmem:[#allocation23_spill] sm:$0xff] %v5891_v59  ;;  %v1503_v50 = vsub.f32 %v5535_v12, %v1323_v53  ;;  %v799_v53 = vmax.f32 %v697_v63, 0.0 }
 0x1b8   : > { %5010 = vpow2.f32 %v1570_v37 }
 0x1ba   : > { %v1109_v26 = vpop.f32.mrf.mxu1  ;;  %v2987_v1 = vpop.xlane.xlu1 %2986 }
 0x1bb   : > { %v5901_v61 = vpop.xlane.xlu2 %1325  ;;  %v5920_v12 = vadd.f32 %v1109_v26, %v5423_v18  ;;  %vm3167_vm9 = vcmp.eq.f32.partialorder %v5545_v21, %v2987_v1 }
 0x1bc   : > { %3355 = vmin.xlane.f32.xlu2 %v5891_v59  ;;  %v5917_v59 = vsel %vm1240_vm2, %v5899_v45, -1e+30  ;;  %v3231_v26 = vsel %vm3167_vm9, %v5420_v15, 10 }
 0x1bd   : > { %4855 = vmatmul.msk.f32.gmra.mxu2 %vm836_vm1, %v798_v56  ;;  %9495 = vst [vmem:[#allocation25_spill] sm:$0xff] %v5917_v59  ;;  %v1572_v56 = vmul.f32 1.442695, %v1503_v50  ;;  %v5924_v28 = vpop.f32.mrf.mxu3  ;;  %v5927_v35 = vadd.f32 %v2862_v2, %v5917_v59  ;;  %v5932_v45 = vsel %vm1240_vm2, %v5920_v12, -1e+30  ;;  %v699_v50 = vadd.f32 %v5342_v10, %v5833_v38 }
 0x1be   : > { %9496 = vst [vmem:[#allocation26_spill] sm:$0xff] %v5920_v12  ;;  %v1369_v1 = vsel %vm1305_vm3, %v5932_v45, -inf  ;;  %v5945_v37 = vsel %vm1305_vm3, %v3231_v26, 2147483647 }
 0x1bf   : > { %3028 = vmax.xlane.f32.xlu0 %v3027_v17  ;;  %1700 = vadd.xlane.f32.xlu1 %v1699_v3  ;;  %9497 = vst [vmem:[#allocation27_spill] sm:$0xff] %v5927_v35  ;;  %v1366_v17 = vsel %vm1305_vm3, %v5917_v59, -inf  ;;  %5012 = vpow2.f32 %v1572_v56  ;;  %v3030_v63 = vsel %vm1305_vm3, %v5927_v35, -inf  ;;  %v5947_v3 = vpop.eup %5010  ;;  %v800_v56 = vmax.f32 %v699_v50, 0.0  ;;  %v4978_v35 = vld [vmem:[%s5319_s28 + $0xf0] sm:$0xff] }
 0x1c0   : > { %9498 = vst [vmem:[#allocation28_spill] sm:$0xff] %v5932_v45  ;;  %v3367_v10 = vshra.s32 %v5945_v37, 16  ;;  %v1702_v26 = vsel %vm1305_vm3, %v5947_v3, 0.0  ;;  %v5969_v50 = vld [vmem:[%s9191_s3] ss:$0 sm:$0xff] }
 0x1c1   : > { %9499 = vst [vmem:[#allocation29_spill] sm:$0xff] %v5945_v37  ;;  %v702_v37 = vadd.f32 %v5969_v50, %v5865_v46 }
 0x1c2   : > { %v1112_v2 = vpop.f32.mrf.mxu1 }
 0x1c3   : > { %v2990_v21 = vpop.xlane.xlu2 %2989 }
 0x1c4   : > { %1367 = vmax.xlane.f32.xlu2 %v1366_v17  ;;  %vm3168_vm10 = vcmp.eq.f32.partialorder %v5563_v36, %v2990_v21  ;;  %v1504_v36 = vsub.f32 %v5554_v27, %v5901_v61  ;;  %v5964_v21 = vcvt.s32.f32 %v3367_v10  ;;  %4816 = vmatmul.msk.bf16.gmra.mxu3 %vm495_vm0, %v4978_v35  ;;  %v5980_v27 = vadd.f32 %v1112_v2, %v5423_v18 }
 0x1c5   : > { %4856 = vmatmul.msk.f32.gmra.mxu2 %vm836_vm1, %v799_v53  ;;  %v5951_v38 = vpop.f32.mrf.mxu3  ;;  %v2993_v53 = vpop.xlane.xlu0 %2992  ;;  %v3232_v12 = vsel %vm3168_vm10, %v5420_v15, 10  ;;  %v801_v10 = vmax.f32 %v702_v37, 0.0 }
 0x1c6   : > { %v5953_v17 = vpop.eup %5012  ;;  %vm3169_vm11 = vcmp.eq.f32.partialorder %v5582_v47, %v2993_v53  ;;  %9500 = vst [vmem:[#allocation30_spill] sm:$0xff] %v5964_v21  ;;  %v5976_v59 = vsel %vm1305_vm3, %v3232_v12, 2147483647  ;;  %v1574_v46 = vmul.f32 1.442695, %v1504_v36 }
 0x1c7   : > { %1370 = vmax.xlane.f32.xlu0 %v1369_v1  ;;  %3031 = vmax.xlane.f32.xlu1 %v3030_v63  ;;  %v1329_v1 = vpop.xlane.xlu1 %1328  ;;  %v2863_v63 = vld [vmem:[%s5430_s29 + $0xa8] sm:$0xff]  ;;  %9501 = vst [vmem:[#allocation31_spill] sm:$0xff] %v5976_v59  ;;  %v3233_v61 = vsel %vm3169_vm11, %v5420_v15, 10  ;;  %v3382_v53 = vshra.s32 %v5976_v59, 16  ;;  %v5993_v2 = vsel %vm1240_vm2, %v5980_v27, -1e+30  ;;  %v704_v59 = vadd.f32 %v5969_v50, %v5888_v48 }
 0x1c8   : > { %9502 = vst [vmem:[#allocation32_spill] sm:$0xff] %v5980_v27  ;;  %v5984_v47 = vadd.f32 %v2863_v63, %v5932_v45  ;;  %5014 = vpow2.f32 %v1574_v46  ;;  %v1372_v27 = vsel %vm1305_vm3, %v5993_v2, -inf }
 0x1c9   : > { %9504 = vst [vmem:[#allocation34_spill] sm:$0xff] %v5993_v2  ;;  %v6001_v37 = vcvt.s32.f32 %v3382_v53 }
 0x1ca   : > { %9503 = vst [vmem:[#allocation33_spill] sm:$0xff] %v5984_v47  ;;  %v1115_v35 = vpop.f32.mrf.mxu1  ;;  %v3033_v63 = vsel %vm1305_vm3, %v5984_v47, -inf }
 0x1cb   : > { %9506 = vst [vmem:[#allocation36_spill] sm:$0xff] %v6001_v37  ;;  %v6021_v39 = vadd.f32 %v1115_v35, %v5423_v18 }
 0x1cc   : > { %1703 = vadd.xlane.f32.xlu2 %v1702_v26  ;;  %v1705_v26 = vsel %vm1305_vm3, %v5953_v17, 0.0 }
 0x1cd   : > { %4857 = vmatmul.msk.f32.gmra.mxu2 %vm836_vm1, %v800_v56  ;;  %v1332_v56 = vpop.xlane.xlu2 %1331  ;;  %v5988_v12 = vpop.f32.mrf.mxu3  ;;  %9509 = vst [vmem:[#allocation39_spill] sm:$0xff] %v6021_v39 }
 0x1cf   : > { %1706 = vadd.xlane.f32.xlu0 %v1705_v26  ;;  %3370 = vmin.xlane.f32.xlu1 %v5964_v21  ;;  %v5998_v26 = vsel %vm1305_vm3, %v3233_v61, 2147483647  ;;  %v2996_v36 = vpop.xlane.xlu1 %2995  ;;  %v2864_v61 = vld [vmem:[%s5430_s29 + $0xb0] sm:$0xff]  ;;  %v6018_v21 = vpop.eup %5014 }
 0x1d0   : > { %9505 = vst [vmem:[#allocation35_spill] sm:$0xff] %v5998_v26  ;;  %v3397_v45 = vshra.s32 %v5998_v26, 16  ;;  %v6016_v48 = vadd.f32 %v2864_v61, %v5993_v2  ;;  %v1708_v35 = vsel %vm1305_vm3, %v6018_v21, 0.0  ;;  %vm3170_vm12 = vcmp.eq.f32.partialorder %v5600_v60, %v2996_v36 }
 0x1d1   : > { %v709_v36 = vadd.f32 %v5969_v50, %v5951_v38 }
 0x1d2   : > { %v6013_v53 = vcvt.s32.f32 %v3397_v45  ;;  %9508 = vst [vmem:[#allocation38_spill] sm:$0xff] %v6016_v48  ;;  %v1118_v26 = vpop.f32.mrf.mxu1  ;;  %v3036_v61 = vsel %vm1305_vm3, %v6016_v48, -inf }
 0x1d3   : > { %v804_v38 = vmax.f32 %v709_v36, 0.0  ;;  %v712_v36 = vadd.f32 %v5969_v50, %v5988_v12 }
 0x1d4   : > { %3034 = vmax.xlane.f32.xlu2 %v3033_v63  ;;  %v802_v63 = vmax.f32 %v704_v59, 0.0  ;;  %9507 = vst [vmem:[#allocation37_spill] sm:$0xff] %v6013_v53  ;;  %v1506_v59 = vsub.f32 %v5594_v58, %v1332_v56  ;;  %v6040_v58 = vadd.f32 %v1118_v26, %v5423_v18 }
 0x1d5   : > { %4858 = vmatmul.msk.f32.gmra.mxu2 %vm836_vm1, %v801_v10  ;;  %v2999_v47 = vpop.xlane.xlu2 %2998  ;;  %v6010_v46 = vpop.f32.mrf.mxu3  ;;  %v1505_v10 = vsub.f32 %v5574_v42, %v1329_v1  ;;  %v707_v42 = vadd.f32 %v5969_v50, %v5924_v28  ;;  %v2865_v28 = vld [vmem:[%s5430_s29 + $0xb8] sm:$0xff]  ;;  %v805_v12 = vmax.f32 %v712_v36, 0.0 }
 0x1d6   : > { %9511 = vst [vmem:[#allocation41_spill] sm:$0xff] %v6040_v58  ;;  %v1578_v56 = vmul.f32 1.442695, %v1506_v59  ;;  %v6053_v26 = vsel %vm1240_vm2, %v6040_v58, -1e+30  ;;  %vm3171_vm13 = vcmp.eq.f32.partialorder %v5618_v13, %v2999_v47 }
 0x1d7   : > { %3385 = vmin.xlane.f32.xlu0 %v6001_v37  ;;  %1373 = vmax.xlane.f32.xlu1 %v1372_v27  ;;  %v4979_v27 = vld [vmem:[%s5319_s28 + $0xf8] sm:$0xff]  ;;  %v1576_v45 = vmul.f32 1.442695, %v1505_v10  ;;  %v1335_v1 = vpop.xlane.xlu1 %1334  ;;  %v3234_v37 = vsel %vm3170_vm12, %v5420_v15, 10  ;;  %9513 = vst [vmem:[#allocation43_spill] sm:$0xff] %v6053_v26 }
 0x1d8   : > { %4817 = vmatmul.msk.bf16.gmra.mxu3 %vm495_vm0, %v4979_v27  ;;  %v1507_v13 = vsub.f32 %v5613_v11, %v1335_v1 }
 0x1d9   : > { %5016 = vpow2.f32 %v1576_v45 }
 0x1da   : > { %5018 = vpow2.f32 %v1578_v56  ;;  %v1121_v56 = vpop.f32.mrf.mxu1 }
 0x1dc   : > { %3400 = vmin.xlane.f32.xlu2 %v6013_v53  ;;  %v6037_v53 = vsel %vm1240_vm2, %v6021_v39, -1e+30  ;;  %v3002_v58 = vpop.xlane.xlu0 %3001 }
 0x1dd   : > { %4859 = vmatmul.msk.f32.gmra.mxu2 %vm836_vm1, %v802_v63  ;;  %9510 = vst [vmem:[#allocation40_spill] sm:$0xff] %v6037_v53  ;;  %v803_v63 = vmax.f32 %v707_v42, 0.0  ;;  %v6044_v10 = vpop.f32.mrf.mxu3  ;;  %v6047_v27 = vadd.f32 %v2865_v28, %v6037_v53  ;;  %v1375_v60 = vsel %vm1305_vm3, %v6037_v53, -inf  ;;  %v1378_v42 = vsel %vm1305_vm3, %v6053_v26, -inf }
 0x1de   : > { %vm3172_vm14 = vcmp.eq.f32.partialorder %v5636_v31, %v3002_v58  ;;  %v1580_v58 = vmul.f32 1.442695, %v1507_v13 }
 0x1df   : > { %3037 = vmax.xlane.f32.xlu0 %v3036_v61  ;;  %1709 = vadd.xlane.f32.xlu1 %v1708_v35  ;;  %9512 = vst [vmem:[#allocation42_spill] sm:$0xff] %v6047_v27  ;;  %v6055_v61 = vpop.xlane.xlu2 %1337  ;;  %v3039_v45 = vsel %vm1305_vm3, %v6047_v27, -inf  ;;  %v6069_v35 = vsel %vm1305_vm3, %v3234_v37, 2147483647  ;;  %v6071_v28 = vpop.eup %5016  ;;  %v3235_v27 = vsel %vm3171_vm13, %v5420_v15, 10  ;;  %v3236_v31 = vsel %vm3172_vm14, %v5420_v15, 10 }
 0x1e0   : > { %9514 = vst [vmem:[#allocation44_spill] sm:$0xff] %v6069_v35  ;;  %v6077_v39 = vpop.eup %5018  ;;  %v1711_v37 = vsel %vm1305_vm3, %v6071_v28, 0.0  ;;  %5020 = vpow2.f32 %v1580_v58  ;;  %v1508_v58 = vsub.f32 %v5632_v30, %v6055_v61 }
 0x1e2   : > { %v6062_v59 = vpop.xlane.xlu1 %1340  ;;  %v1582_v61 = vmul.f32 1.442695, %v1508_v58 }
 0x1e3   : > { %v1509_v30 = vsub.f32 %v5650_v49, %v6062_v59 }
 0x1e4   : > { %1376 = vmax.xlane.f32.xlu2 %v1375_v60  ;;  %5022 = vpow2.f32 %v1582_v61 }
 0x1e5   : > { %4860 = vmatmul.msk.f32.gmra.mxu2 %vm836_vm1, %v803_v63  ;;  %v3412_v63 = vshra.s32 %v6069_v35, 16  ;;  %v6075_v60 = vpop.f32.mrf.mxu3  ;;  %v6095_v35 = vsel %vm1305_vm3, %v3235_v27, 2147483647  ;;  %v1124_v27 = vpop.f32.mrf.mxu1  ;;  %v1584_v59 = vmul.f32 1.442695, %v1509_v30 }
 0x1e6   : > { %9516 = vst [vmem:[#allocation46_spill] sm:$0xff] %v6095_v35  ;;  %v719_v30 = vadd.f32 %v5969_v50, %v6075_v60 }
 0x1e7   : > { %1379 = vmax.xlane.f32.xlu0 %v1378_v42  ;;  %3040 = vmax.xlane.f32.xlu1 %v3039_v45  ;;  %v2866_v42 = vld [vmem:[%s5430_s29 + $0xc0] sm:$0xff]  ;;  %v6088_v47 = vcvt.s32.f32 %v3412_v63  ;;  %v1714_v45 = vsel %vm1305_vm3, %v6077_v39, 0.0  ;;  %5024 = vpow2.f32 %v1584_v59 }
 0x1e8   : > { %v6102_v11 = vadd.f32 %v2866_v42, %v6053_v26  ;;  %v808_v60 = vmax.f32 %v719_v30, 0.0 }
 0x1e9   : > { %9515 = vst [vmem:[#allocation45_spill] sm:$0xff] %v6088_v47 }
 0x1ea   : > { %v6080_v53 = vpop.xlane.xlu2 %1343  ;;  %9518 = vst [vmem:[#allocation48_spill] sm:$0xff] %v6102_v11  ;;  %v3005_v1 = vpop.xlane.xlu1 %3004  ;;  %v3042_v42 = vsel %vm1305_vm3, %v6102_v11, -inf }
 0x1eb   : > { %vm3173_vm15 = vcmp.eq.f32.partialorder %v5659_v62, %v3005_v1 }
 0x1ec   : > { %1712 = vadd.xlane.f32.xlu2 %v1711_v37  ;;  %v6098_v37 = vadd.f32 %v1121_v56, %v5423_v18 }
 0x1ed   : > { %4861 = vmatmul.msk.f32.gmra.mxu2 %vm836_vm1, %v804_v38  ;;  %v3427_v38 = vshra.s32 %v6095_v35, 16  ;;  %v6106_v63 = vpop.f32.mrf.mxu3  ;;  %v714_v35 = vadd.f32 %v5969_v50, %v6010_v46 }
 0x1ee   : > { %9517 = vst [vmem:[#allocation47_spill] sm:$0xff] %v6098_v37  ;;  %v6111_v56 = vsel %vm1240_vm2, %v6098_v37, -1e+30  ;;  %v722_v30 = vadd.f32 %v5969_v50, %v6106_v63 }
 0x1ef   : > { %1715 = vadd.xlane.f32.xlu0 %v1714_v45  ;;  %3415 = vmin.xlane.f32.xlu1 %v6088_v47  ;;  %9519 = vst [vmem:[#allocation49_spill] sm:$0xff] %v6111_v56  ;;  %v6116_v45 = vsel %vm1305_vm3, %v3236_v31, 2147483647  ;;  %v6119_v36 = vcvt.s32.f32 %v3427_v38  ;;  %v1381_v37 = vsel %vm1305_vm3, %v6111_v56, -inf  ;;  %v2867_v31 = vld [vmem:[%s5430_s29 + $0xc8] sm:$0xff]  ;;  %v806_v47 = vmax.f32 %v714_v35, 0.0  ;;  %v1127_v35 = vpop.f32.mrf.mxu1 }
 0x1f0   : > { %9520 = vst [vmem:[#allocation50_spill] sm:$0xff] %v6116_v45  ;;  %v3442_v26 = vshra.s32 %v6116_v45, 16  ;;  %v6139_v11 = vadd.f32 %v2867_v31, %v6111_v56  ;;  %v6141_v45 = vpop.eup %5020 }
 0x1f1   : > { %9521 = vst [vmem:[#allocation51_spill] sm:$0xff] %v6119_v36  ;;  %v6197_v59 = vpop.eup %5022 }
 0x1f2   : > { %v3008_v13 = vpop.xlane.xlu2 %3007  ;;  %v6136_v46 = vcvt.s32.f32 %v3442_v26  ;;  %9523 = vst [vmem:[#allocation53_spill] sm:$0xff] %v6139_v11  ;;  %v717_v26 = vadd.f32 %v5969_v50, %v6044_v10  ;;  %v3045_v31 = vsel %vm1305_vm3, %v6139_v11, -inf  ;;  %v2868_v10 = vld [vmem:[%s5430_s29 + $0xd0] sm:$0xff]  ;;  %v1510_v11 = vsub.f32 %v5667_v4, %v6080_v53 }
 0x1f3   : > { %9524 = vst [vmem:[#allocation54_spill] sm:$0xff] %v6141_v45  ;;  %vm3174_vm0 = vcmp.eq.f32.partialorder %v5677_v19, %v3008_v13  ;;  %v2869_v19 = vld [vmem:[%s5430_s29 + $0xd8] sm:$0xff] }
 0x1f4   : > { %3043 = vmax.xlane.f32.xlu2 %v3042_v42  ;;  %v6134_v38 = vpop.xlane.xlu0 %3010  ;;  %9522 = vst [vmem:[#allocation52_spill] sm:$0xff] %v6136_v46 }
 0x1f5   : > { %4862 = vmatmul.msk.f32.gmra.mxu2 %vm836_vm1, %v805_v12  ;;  %v6128_v42 = vpop.f32.mrf.mxu3  ;;  %v6132_v12 = vpop.xlane.xlu1 %1346  ;;  %9531 = vst [vmem:[#allocation61_spill] sm:$0xff] %v6197_v59  ;;  %vm3175_vm4 = vcmp.eq.f32.partialorder %v5696_v41, %v6134_v38  ;;  %v1586_v38 = vmul.f32 1.442695, %v1510_v11 }
 0x1f6   : > { %v3239_v63 = vsel %vm3175_vm4, %v5420_v15, 10 }
 0x1f7   : > { %3430 = vmin.xlane.f32.xlu0 %v6119_v36  ;;  %1382 = vmax.xlane.f32.xlu1 %v1381_v37  ;;  %v6144_v37 = vadd.f32 %v1124_v27, %v5423_v18  ;;  %v1717_v36 = vsel %vm1305_vm3, %v6141_v45, 0.0  ;;  %v6248_v11 = vsel %vm1305_vm3, %v3239_v63, 2147483647  ;;  %v1511_v63 = vsub.f32 %v5687_v34, %v6132_v12 }
 0x1f8   : > { %9538 = vst [vmem:[#allocation68_spill] sm:$0xff] %v6248_v11 }
 0x1f9   : > { %9525 = vst [vmem:[#allocation55_spill] sm:$0xff] %v6144_v37  ;;  %v6159_v27 = vsel %vm1240_vm2, %v6144_v37, -1e+30  ;;  %v1588_v34 = vmul.f32 1.442695, %v1511_v63 }
 0x1fa   : > { %9526 = vst [vmem:[#allocation56_spill] sm:$0xff] %v6159_v27  ;;  %v6164_v49 = vpop.xlane.xlu2 %1349  ;;  %v6173_v37 = vadd.f32 %v2868_v10, %v6159_v27  ;;  %v1384_v62 = vsel %vm1305_vm3, %v6159_v27, -inf  ;;  %v6203_v27 = vpop.eup %5024 }
 0x1fb   : > { %9532 = vst [vmem:[#allocation62_spill] sm:$0xff] %v6203_v27 }
 0x1fc   : > { %3445 = vmin.xlane.f32.xlu2 %v6136_v46  ;;  %v6162_v46 = vadd.f32 %v1127_v35, %v5423_v18  ;;  %9528 = vst [vmem:[#allocation58_spill] sm:$0xff] %v6173_v37  ;;  %v3048_v61 = vsel %vm1305_vm3, %v6173_v37, -inf }
 0x1fd   : > { %4863 = vmatmul.msk.f32.gmra.mxu2 %vm836_vm1, %v806_v47  ;;  %v807_v47 = vmax.f32 %v717_v26, 0.0  ;;  %v6168_v58 = vpop.xlane.xlu1 %3013  ;;  %v6183_v1 = vpop.f32.mrf.mxu3 }
 0x1fe   : > { %9527 = vst [vmem:[#allocation57_spill] sm:$0xff] %v6162_v46  ;;  %v6178_v35 = vsel %vm1240_vm2, %v6162_v46, -1e+30  ;;  %vm3176_vm5 = vcmp.eq.f32.partialorder %v5716_v8, %v6168_v58 }
 0x1ff   : > { %3046 = vmax.xlane.f32.xlu0 %v3045_v31  ;;  %1718 = vadd.xlane.f32.xlu1 %v1717_v36  ;;  %9529 = vst [vmem:[#allocation59_spill] sm:$0xff] %v6178_v35  ;;  %v3237_v36 = vsel %vm3173_vm15, %v5420_v15, 10  ;;  %v1387_v26 = vsel %vm1305_vm3, %v6178_v35, -inf  ;;  %v6234_v53 = vadd.f32 %v2869_v19, %v6178_v35  ;;  %v3240_v58 = vsel %vm3176_vm5, %v5420_v15, 10 }
 0x200   : > { %v6193_v31 = vsel %vm1305_vm3, %v3237_v36, 2147483647  ;;  %v3238_v36 = vsel %vm3174_vm0, %v5420_v15, 10 }
 0x201   : > { %9530 = vst [vmem:[#allocation60_spill] sm:$0xff] %v6193_v31  ;;  %v3051_v19 = vsel %vm1305_vm3, %v6234_v53, -inf }
 0x202   : > { %v6170_v56 = vpop.xlane.xlu0 %1352  ;;  %9536 = vst [vmem:[#allocation66_spill] sm:$0xff] %v6234_v53  ;;  %v2870_v53 = vld [vmem:[%s5430_s29 + $0xe0] sm:$0xff] }
 0x204   : > { %1385 = vmax.xlane.f32.xlu2 %v1384_v62  ;;  %v6195_v10 = vpop.xlane.xlu2 %3016  ;;  %v3457_v62 = vshra.s32 %v6193_v31, 16  ;;  %v1723_v31 = vsel %vm1305_vm3, %v6203_v27, 0.0 }
 0x205   : > { %4864 = vmatmul.msk.f32.gmra.mxu2 %vm836_vm1, %v807_v47  ;;  %v1130_v47 = vpop.f32.mrf.mxu1  ;;  %vm3177_vm10 = vcmp.eq.f32.partialorder %v5740_v14, %v6195_v10 }
 0x206   : > { %v6218_v13 = vcvt.s32.f32 %v3457_v62  ;;  %v6228_v4 = vadd.f32 %v1130_v47, %v5423_v18 }
 0x207   : > { %1388 = vmax.xlane.f32.xlu0 %v1387_v26  ;;  %3049 = vmax.xlane.f32.xlu1 %v3048_v61  ;;  %v1720_v26 = vsel %vm1305_vm3, %v6197_v59, 0.0  ;;  %v6210_v61 = vpop.f32.mrf.mxu3  ;;  %v6225_v59 = vsel %vm1305_vm3, %v3238_v36, 2147483647 }
 0x208   : > { %9533 = vst [vmem:[#allocation63_spill] sm:$0xff] %v6218_v13  ;;  %v3472_v62 = vshra.s32 %v6225_v59, 16 }
 0x209   : > { %9534 = vst [vmem:[#allocation64_spill] sm:$0xff] %v6225_v59 }
 0x20a   : > { %v6201_v46 = vpop.xlane.xlu1 %1355  ;;  %v6206_v37 = vpop.xlane.xlu0 %3295  ;;  %9535 = vst [vmem:[#allocation65_spill] sm:$0xff] %v6228_v4  ;;  %v6253_v59 = vcvt.s32.f32 %v3472_v62 }
 0x20c   : > { %1721 = vadd.xlane.f32.xlu2 %v1720_v26  ;;  %9539 = vst [vmem:[#allocation69_spill] sm:$0xff] %v6253_v59 }
 0x20d   : > { %4865 = vmatmul.msk.f32.gmra.mxu2 %vm836_vm1, %v808_v60  ;;  %v809_v60 = vmax.f32 %v722_v30, 0.0  ;;  %v1133_v36 = vpop.f32.mrf.mxu1 }
 0x20f   : > { %1724 = vadd.xlane.f32.xlu0 %v1723_v31  ;;  %3460 = vmin.xlane.f32.xlu1 %v6218_v13  ;;  %v6231_v41 = vpop.xlane.xlu2 %3310  ;;  %v6241_v31 = vsel %vm1240_vm2, %v6228_v4, -1e+30  ;;  %v6250_v30 = vpop.f32.mrf.mxu3  ;;  %v724_v4 = vadd.f32 %v5969_v50, %v6128_v42  ;;  %v3487_v13 = vshra.s32 %v6248_v11, 16 }
 0x210   : > { %9537 = vst [vmem:[#allocation67_spill] sm:$0xff] %v6241_v31  ;;  %v1390_v35 = vsel %vm1305_vm3, %v6241_v31, -inf }
 0x211   : > { %v810_v62 = vmax.f32 %v724_v4, 0.0  ;;  %v6273_v11 = vcvt.s32.f32 %v3487_v13 }
 0x212   : > { %v1692_v26 = vpop.xlane.xlu1 %1691  ;;  %v6243_v47 = vpop.xlane.xlu0 %3019 }
 0x213   : > { %5026 = vrcp.f32 %v1692_v26  ;;  %9542 = vst [vmem:[#allocation72_spill] sm:$0xff] %v6273_v11  ;;  %vm1887_vm7 = vweird.f32 %v1692_v26  ;;  %vm3178_vm12 = vcmp.eq.f32.partialorder %v5780_v24, %v6243_v47 }
 0x214   : > { %5028 = vpow2.f32 %v1586_v38  ;;  %3052 = vmax.xlane.f32.xlu2 %v3051_v19  ;;  %v6267_v19 = vadd.f32 %v2870_v53, %v6241_v31  ;;  %v1893_v53 = vand.u32 2147483648, %v1692_v26 }
 0x215   : > { %4866 = vmatmul.msk.f32.gmra.mxu2 %vm836_vm1, %v809_v60  ;;  %v1136_v12 = vpop.f32.mrf.mxu1 }
 0x216   : > { %9540 = vst [vmem:[#allocation70_spill] sm:$0xff] %v6267_v19  ;;  %v3054_v13 = vsel %vm1305_vm3, %v6267_v19, -inf  ;;  %v6300_v31 = vadd.f32 %v1136_v12, %v5423_v18  ;;  %v2871_v19 = vld [vmem:[%s5430_s29 + $0xe8] sm:$0xff] }
 0x217   : > { %3475 = vmin.xlane.f32.xlu0 %v6253_v59  ;;  %1391 = vmax.xlane.f32.xlu1 %v1390_v35  ;;  %v6262_v38 = vpop.xlane.xlu2 %1358  ;;  %v6276_v59 = vadd.f32 %v1133_v36, %v5423_v18  ;;  %v1512_v35 = vsub.f32 %v5710_v5, %v6164_v49  ;;  %v727_v5 = vadd.f32 %v5969_v50, %v6183_v1  ;;  %v6292_v63 = vpop.f32.mrf.mxu3 }
 0x218   : > { %9545 = vst [vmem:[#allocation75_spill] sm:$0xff] %v6300_v31 }
 0x219   : > { %v5027_v60 = vpop.eup %5026  ;;  %9543 = vst [vmem:[#allocation73_spill] sm:$0xff] %v6276_v59 }
 0x21a   : > { %v6269_v42 = vpop.eup %5028  ;;  %v1883_v27 = vmul.f32 %v5027_v60, %v1692_v26  ;;  %v6271_v45 = vpop.xlane.xlu1 %3022  ;;  %vm1888_vm6 = vweird.f32 %v5027_v60 }
 0x21b   : > { %9541 = vst [vmem:[#allocation71_spill] sm:$0xff] %v6269_v42  ;;  %v6280_v2 = vpop.xlane.xlu0 %1361  ;;  %v1726_v36 = vsel %vm1305_vm3, %v6269_v42, 0.0  ;;  %vm1889_vm8 = vmor %vm1887_vm7, %vm1888_vm6  ;;  %v811_v42 = vmax.f32 %v727_v5, 0.0  ;;  %vm3297_vm6 = vcmp.eq.f32.partialorder %v5762_v57, %v6206_v37 }
 0x21c   : > { %v1884_v4 = vsub.f32 1.0, %v1883_v27  ;;  %3490 = vmin.xlane.f32.xlu2 %v6273_v11  ;;  %v1891_v27 = vand.u32 2147483647, %v1692_v26  ;;  %v1590_v11 = vmul.f32 1.442695, %v1512_v35 }
 0x21d   : > { %4867 = vmatmul.msk.f32.gmra.mxu2 %vm836_vm1, %v810_v62  ;;  %v6297_v62 = vsel %vm1240_vm2, %v6276_v59, -1e+30  ;;  %v6315_v26 = vsel %vm1240_vm2, %v6300_v31, -1e+30  ;;  %v3291_v31 = vand.u32 65535, %v5744_v16 }
 0x21e   : > { %v1885_v49 = vmul.f32 %v5027_v60, %v1884_v4  ;;  %9544 = vst [vmem:[#allocation74_spill] sm:$0xff] %v6297_v62  ;;  %v1894_v4 = vor.u32 1.1754944e-38, %v1893_v53  ;;  %vm1892_vm9 = vcmp.eq.f32.partialorder %v1891_v27, 8.507059e+37  ;;  %v6310_v12 = vadd.f32 %v2871_v19, %v6297_v62 }
 0x21f   : > { %3055 = vmax.xlane.f32.xlu0 %v3054_v13  ;;  %1727 = vadd.xlane.f32.xlu1 %v1726_v36  ;;  %v6302_v1 = vpop.xlane.xlu2 %1694  ;;  %9547 = vst [vmem:[#allocation77_spill] sm:$0xff] %v6315_v26  ;;  %v729_v19 = vadd.f32 %v5969_v50, %v6210_v61 }
 0x220   : > { %v1886_v8 = vadd.f32 %v5027_v60, %v1885_v49  ;;  %5030 = vrcp.f32 %v6302_v1  ;;  %9546 = vst [vmem:[#allocation76_spill] sm:$0xff] %v6310_v12  ;;  %v3057_v36 = vsel %vm1305_vm3, %v6310_v12, -inf  ;;  %vm1902_vm13 = vweird.f32 %v6302_v1 }
 0x221   : > { %5032 = vpow2.f32 %v1588_v34  ;;  %v1393_v34 = vsel %vm1305_vm3, %v6297_v62, -inf }
 0x222   : > { %v1890_v59 = vsel %vm1889_vm8, %v5027_v60, %v1886_v8  ;;  %v6307_v35 = vpop.xlane.xlu1 %3325  ;;  %5034 = vpow2.f32 %v1590_v11  ;;  %v6323_v60 = vsel %vm1305_vm3, %v3240_v58, 2147483647  ;;  %v6349_v8 = vpop.f32.mrf.mxu3 }
 0x223   : > { %v1895_v13 = vsel %vm1892_vm9, %v1894_v4, %v1890_v59  ;;  %v6317_v53 = vpop.xlane.xlu0 %1697  ;;  %9548 = vst [vmem:[#allocation78_spill] sm:$0xff] %v6323_v60  ;;  %v1396_v59 = vsel %vm1305_vm3, %v6315_v26, -inf  ;;  %v3502_v61 = vshra.s32 %v6323_v60, 16  ;;  %v812_v4 = vmax.f32 %v729_v19, 0.0 }
 0x224   : > { %5036 = vrcp.f32 %v6317_v53  ;;  %1394 = vmax.xlane.f32.xlu2 %v1393_v34  ;;  %v1896_v11 = vmul.f32 %v5782_v20, %v1895_v13  ;;  %v3241_v13 = vsel %vm3177_vm10, %v5420_v15, 10  ;;  %v1908_v60 = vand.u32 2147483648, %v6302_v1 }
 0x225   : > { %4868 = vmatmul.msk.f32.gmra.mxu2 %vm836_vm1, %v811_v42  ;;  %v2872_v42 = vld [vmem:[%s5430_s29 + $0xf0] sm:$0xff]  ;;  %vm1917_vm4 = vweird.f32 %v6317_v53  ;;  %vm3179_vm9 = vcmp.eq.f32.partialorder %v5807_v6, %v6271_v45 }
 0x226   : > { %v5031_v5 = vpop.eup %5030  ;;  %v4250_v14 = vsel %vm1240_vm2, %v1896_v11, %v5435_v22  ;;  %v6371_v11 = vcvt.s32.f32 %v3502_v61  ;;  %v6382_v61 = vsel %vm1305_vm3, %v3241_v13, 2147483647  ;;  %v3243_v6 = vsel %vm3179_vm9, %v5420_v15, 10 }
 0x227   : > { %1397 = vmax.xlane.f32.xlu0 %v1396_v59  ;;  %3058 = vmax.xlane.f32.xlu1 %v3057_v36  ;;  %v6342_v20 = vpop.xlane.xlu2 %3025  ;;  %v6346_v49 = vpop.eup %5032  ;;  %v1898_v27 = vmul.f32 %v5031_v5, %v6302_v1  ;;  %v6360_v36 = vadd.f32 %v2872_v42, %v6315_v26  ;;  %4314 = vst.msk [vmem:[%s6338_s8] sm:$0xff] %vm1305_vm3, %v4250_v14  ;;  %vm1903_vm11 = vweird.f32 %v5031_v5  ;;  %v1906_v42 = vand.u32 2147483647, %v6302_v1 }
 0x228   : > { %9549 = vst [vmem:[#allocation79_spill] sm:$0xff] %v6346_v49  ;;  %v6351_v58 = vpop.eup %5034  ;;  %v1729_v22 = vsel %vm1305_vm3, %v6346_v49, 0.0  ;;  %v732_v26 = vadd.f32 %v5969_v50, %v6250_v30  ;;  %vm1904_vm14 = vmor %vm1902_vm13, %vm1903_vm11  ;;  %v1909_v49 = vor.u32 1.1754944e-38, %v1908_v60  ;;  %v3242_v1 = vsel %vm3178_vm12, %v5420_v15, 10 }
 0x229   : > { %9550 = vst [vmem:[#allocation80_spill] sm:$0xff] %v6351_v58  ;;  %v1899_v34 = vsub.f32 1.0, %v1898_v27  ;;  %v1732_v16 = vsel %vm1305_vm3, %v6351_v58, 0.0  ;;  %v3060_v62 = vsel %vm1305_vm3, %v6360_v36, -inf  ;;  %v1139_v58 = vpop.f32.mrf.mxu1  ;;  %vm1907_vm0 = vcmp.eq.f32.partialorder %v1906_v42, 8.507059e+37 }
 0x22a   : > { %v5037_v10 = vpop.eup %5036  ;;  %v6357_v59 = vpop.xlane.xlu1 %1364  ;;  %9551 = vst [vmem:[#allocation81_spill] sm:$0xff] %v6360_v36  ;;  %vm3312_vm13 = vcmp.eq.f32.partialorder %v5777_v23, %v6231_v41  ;;  %v6501_v23 = vsel %vm1305_vm3, %v3243_v6, 2147483647 }
 0x22b   : > { %v1913_v19 = vmul.f32 %v5037_v10, %v6317_v53  ;;  %v6367_v12 = vpop.xlane.xlu0 %3340  ;;  %9552 = vst [vmem:[#allocation82_spill] sm:$0xff] %v6371_v11  ;;  %v1900_v27 = vmul.f32 %v5031_v5, %v1899_v34  ;;  %vm1918_vm15 = vweird.f32 %v5037_v10  ;;  %v6408_v47 = vpop.f32.mrf.mxu3 }
 0x22c   : > { %1730 = vadd.xlane.f32.xlu2 %v1729_v22  ;;  %v1923_v22 = vand.u32 2147483648, %v6317_v53  ;;  %vm1919_vm5 = vmor %vm1917_vm4, %vm1918_vm15  ;;  %9555 = vst [vmem:[#allocation85_spill] sm:$0xff] %v6501_v23  ;;  %vm3327_vm15 = vcmp.eq.f32.partialorder %v5849_v9, %v6307_v35 }
 0x22d   : > { %v1914_v14 = vsub.f32 1.0, %v1913_v19  ;;  %4869 = vmatmul.msk.f32.gmra.mxu2 %vm836_vm1, %v812_v4  ;;  %v1901_v34 = vadd.f32 %v5031_v5, %v1900_v27  ;;  %v1921_v4 = vand.u32 2147483647, %v6317_v53  ;;  %v3517_v27 = vshra.s32 %v6382_v61, 16 }
 0x22e   : > { %v1924_v48 = vor.u32 1.1754944e-38, %v1923_v22  ;;  %v6414_v53 = vsel %vm1305_vm3, %v3242_v1, 2147483647 }
 0x22f   : > { %v1915_v19 = vmul.f32 %v5037_v10, %v1914_v14  ;;  %1733 = vadd.xlane.f32.xlu0 %v1732_v16  ;;  %3505 = vmin.xlane.f32.xlu1 %v6371_v11  ;;  %v6390_v30 = vpop.xlane.xlu2 %3355  ;;  %v1905_v13 = vsel %vm1904_vm14, %v5031_v5, %v1901_v34  ;;  %v813_v14 = vmax.f32 %v732_v26, 0.0  ;;  %v6399_v16 = vadd.f32 %v1139_v58, %v5423_v18 }
 0x230   : > { %v1910_v36 = vsel %vm1907_vm0, %v1909_v49, %v1905_v13  ;;  %v1514_v11 = vsub.f32 %v5758_v40, %v6201_v46  ;;  %vm1922_vm7 = vcmp.eq.f32.partialorder %v1921_v4, 8.507059e+37  ;;  %v1513_v40 = vsub.f32 %v5731_v55, %v6170_v56  ;;  %v2873_v56 = vld [vmem:[%s5430_s29 + $0xf8] sm:$0xff] }
 0x231   : > { %v1916_v60 = vadd.f32 %v5037_v10, %v1915_v19  ;;  %9553 = vst [vmem:[#allocation83_spill] sm:$0xff] %v6399_v16  ;;  %v1911_v46 = vmul.f32 %v5831_v51, %v1910_v36  ;;  %v3293_v58 = vcvt.s32.f32 %v3291_v31  ;;  %v734_v34 = vadd.f32 %v5969_v50, %v6292_v63 }
 0x232   : > { %v6404_v24 = vpop.xlane.xlu1 %1700  ;;  %v1594_v22 = vmul.f32 1.442695, %v1514_v11  ;;  %v3532_v51 = vshra.s32 %v6414_v53, 16  ;;  %v1592_v31 = vmul.f32 1.442695, %v1513_v40  ;;  %vm3180_vm14 = vcmp.eq.f32.partialorder %v5862_v54, %v6342_v20 }
 0x233   : > { %v1920_v5 = vsel %vm1919_vm5, %v5037_v10, %v1916_v60  ;;  %5038 = vrcp.f32 %v6404_v24  ;;  %v6411_v26 = vpop.xlane.xlu0 %3028  ;;  %v6421_v10 = vcvt.s32.f32 %v3517_v27  ;;  %v3298_v55 = vsel %vm3297_vm6, %v3293_v58, inf  ;;  %v6459_v13 = vpop.f32.mrf.mxu3 }
 0x234   : > { %v1925_v49 = vsel %vm1922_vm7, %v1924_v48, %v1920_v5  ;;  %3061 = vmax.xlane.f32.xlu2 %v3060_v62  ;;  %v6432_v48 = vsel %vm1240_vm2, %v6399_v16, -1e+30  ;;  %v4251_v57 = vsel %vm1240_vm2, %v1911_v46, %v5454_v32  ;;  %v814_v36 = vmax.f32 %v734_v34, 0.0 }
 0x235   : > { %v1926_v42 = vmul.f32 %v5836_v33, %v1925_v49  ;;  %4870 = vmatmul.msk.f32.gmra.mxu2 %vm836_vm1, %v813_v14  ;;  %4315 = vst.msk [vmem:[%s6338_s8 + $0x8] sm:$0xff] %vm1305_vm3, %v4251_v57  ;;  %5040 = vpow2.f32 %v1594_v22  ;;  %v6449_v4 = vcvt.s32.f32 %v3532_v51  ;;  %v6452_v1 = vadd.f32 %v2873_v56, %v6432_v48 }
 0x236   : > { %5042 = vpow2.f32 %v1592_v31  ;;  %v1515_v27 = vsub.f32 %v5801_v7, %v6262_v38  ;;  %v1938_v60 = vand.u32 2147483648, %v6404_v24  ;;  %v1399_v14 = vsel %vm1305_vm3, %v6432_v48, -inf  ;;  %v1142_v31 = vpop.f32.mrf.mxu2 }
 0x237   : > { %3520 = vmin.xlane.f32.xlu0 %v6421_v10  ;;  %v6435_v33 = vpop.xlane.xlu2 %1367  ;;  %3299 = vmin.xlane.f32.xlu1 %v3298_v55  ;;  %v4252_v63 = vsel %vm1240_vm2, %v1926_v42, %v5474_v43  ;;  %9554 = vst [vmem:[#allocation84_spill] sm:$0xff] %v6449_v4  ;;  %v737_v5 = vadd.f32 %v5969_v50, %v6349_v8  ;;  %v1936_v46 = vand.u32 2147483647, %v6404_v24  ;;  %v3063_v49 = vsel %vm1305_vm3, %v6452_v1, -inf }
 0x238   : > { %4316 = vst.msk [vmem:[%s6338_s8 + $0x10] sm:$0xff] %vm1305_vm3, %v4252_v63  ;;  %vm1932_vm10 = vweird.f32 %v6404_v24  ;;  %v3306_v8 = vand.u32 65535, %v5769_v29  ;;  %v1596_v42 = vmul.f32 1.442695, %v1515_v27  ;;  %v1939_v34 = vor.u32 1.1754944e-38, %v1938_v60 }
 0x239   : > { %v5039_v62 = vpop.eup %5038  ;;  %v815_v22 = vmax.f32 %v737_v5, 0.0  ;;  %vm1937_vm12 = vcmp.eq.f32.partialorder %v1936_v46, 8.507059e+37  ;;  %v3244_v46 = vsel %vm3180_vm14, %v5420_v15, 10 }
 0x23a   : > { %v1928_v11 = vmul.f32 %v5039_v62, %v6404_v24  ;;  %v6447_v19 = vpop.xlane.xlu1 %3031  ;;  %vm1933_vm8 = vweird.f32 %v5039_v62  ;;  %v3308_v24 = vcvt.s32.f32 %v3306_v8 }
 0x23b   : > { %v6456_v32 = vpop.xlane.xlu0 %1370  ;;  %v6474_v7 = vpop.eup %5040  ;;  %vm1934_vm11 = vmor %vm1932_vm10, %vm1933_vm8 }
 0x23c   : > { %v1929_v43 = vsub.f32 1.0, %v1928_v11  ;;  %3535 = vmin.xlane.f32.xlu2 %v6449_v4  ;;  %v6481_v55 = vpop.eup %5042  ;;  %v1738_v29 = vsel %vm1305_vm3, %v6474_v7, 0.0  ;;  %v3313_v11 = vsel %vm3312_vm13, %v3308_v24, inf  ;;  %v6503_v27 = vpop.f32.mrf.mxu3  ;;  %v742_v24 = vadd.f32 %v5969_v50, %v6459_v13  ;;  %v2874_v13 = vld [vmem:[%s5430_s29 + $0x100] sm:$0xff] }
 0x23d   : > { %4871 = vmatmul.msk.f32.gmra.mxu2 %vm836_vm1, %v814_v36  ;;  %v3321_v36 = vand.u32 65535, %v5829_v44  ;;  %v6510_v44 = vadd.f32 %v1142_v31, %v5423_v18 }
 0x23e   : > { %v1930_v40 = vmul.f32 %v5039_v62, %v1929_v43  ;;  %v1735_v43 = vsel %vm1305_vm3, %v6481_v55, 0.0  ;;  %v1145_v6 = vpop.f32.mrf.mxu2 }
 0x23f   : > { %3064 = vmax.xlane.f32.xlu0 %v3063_v49  ;;  %v6472_v58 = vpop.xlane.xlu2 %1703  ;;  %1400 = vmax.xlane.f32.xlu1 %v1399_v14  ;;  %9556 = vst [vmem:[#allocation86_spill] sm:$0xff] %v6510_v44  ;;  %v3323_v5 = vcvt.s32.f32 %v3321_v36  ;;  %v6534_v31 = vsel %vm1240_vm2, %v6510_v44, -1e+30  ;;  %v9582_v44 = vld [vmem:[#allocation4_spill] sm:$0xff] }
 0x240   : > { %v1931_v38 = vadd.f32 %v5039_v62, %v1930_v40  ;;  %5044 = vrcp.f32 %v6472_v58  ;;  %v3547_v40 = vshra.s32 %v6501_v23, 16  ;;  %v1953_v9 = vand.u32 2147483648, %v6472_v58  ;;  %9557 = vst [vmem:[#allocation87_spill] sm:$0xff] %v6534_v31 }
 0x241   : > { %vm1947_vm4 = vweird.f32 %v6472_v58 }
 0x242   : > { %v1935_v51 = vsel %vm1934_vm11, %v5039_v62, %v1931_v38  ;;  %v6483_v56 = vpop.xlane.xlu1 %3370  ;;  %v739_v62 = vadd.f32 %v5969_v50, %v6408_v47  ;;  %vm3181_vm11 = vcmp.eq.f32.partialorder %v5894_v25, %v6411_v26 }
 0x243   : > { %v1940_v45 = vsel %vm1937_vm12, %v1939_v34, %v1935_v51  ;;  %v6486_v57 = vpop.xlane.xlu0 %1706 }
 0x244   : > { %5046 = vrcp.f32 %v6486_v57  ;;  %1739 = vadd.xlane.f32.xlu2 %v1738_v29  ;;  %v1941_v63 = vmul.f32 %v5896_v0, %v1940_v45  ;;  %v816_v14 = vmax.f32 %v739_v62, 0.0  ;;  %v6537_v29 = vcvt.s32.f32 %v3547_v40 }
 0x245   : > { %5048 = vpow2.f32 %v1596_v42  ;;  %4872 = vmatmul.msk.f32.gmra.mxu2 %vm836_vm1, %v815_v22  ;;  %v3328_v22 = vsel %vm3327_vm15, %v3323_v5, inf  ;;  %v1968_v36 = vand.u32 2147483648, %v6486_v57  ;;  %v6554_v40 = vadd.f32 %v1145_v6, %v5423_v18 }
 0x246   : > { %v5045_v60 = vpop.eup %5044  ;;  %v4253_v54 = vsel %vm1240_vm2, %v1941_v63, %v5490_v52  ;;  %v1951_v52 = vand.u32 2147483647, %v6472_v58  ;;  %9558 = vst [vmem:[#allocation88_spill] sm:$0xff] %v6537_v29  ;;  %v6542_v63 = vsel %vm1305_vm3, %v3244_v46, 2147483647  ;;  %v746_v46 = vpop.f32.mrf.mxu3  ;;  %vm1962_vm8 = vweird.f32 %v6486_v57 }
 0x247   : > { %3314 = vmin.xlane.f32.xlu0 %v3313_v11  ;;  %v6507_v0 = vpop.xlane.xlu2 %3034  ;;  %1736 = vadd.xlane.f32.xlu1 %v1735_v43  ;;  %v1943_v47 = vmul.f32 %v5045_v60, %v6472_v58  ;;  %4317 = vst.msk [vmem:[%s6338_s8 + $0x18] sm:$0xff] %vm1305_vm3, %v4253_v54  ;;  %vm1948_vm0 = vweird.f32 %v5045_v60  ;;  %v1954_v43 = vor.u32 1.1754944e-38, %v1953_v9  ;;  %v3562_v54 = vshra.s32 %v6542_v63, 16 }
 0x248   : > { %9559 = vst [vmem:[#allocation89_spill] sm:$0xff] %v6542_v63  ;;  %vm1949_vm5 = vmor %vm1947_vm4, %vm1948_vm0  ;;  %vm1952_vm7 = vcmp.eq.f32.partialorder %v1951_v52, 8.507059e+37  ;;  %v1402_v52 = vsel %vm1305_vm3, %v6534_v31, -inf }
 0x249   : > { %v1944_v49 = vsub.f32 1.0, %v1943_v47  ;;  %9560 = vst [vmem:[#allocation90_spill] sm:$0xff] %v6554_v40 }
 0x24a   : > { %v5047_v20 = vpop.eup %5046  ;;  %v6520_v38 = vpop.xlane.xlu1 %1373 }
 0x24b   : > { %v6524_v8 = vpop.eup %5048  ;;  %v1958_v42 = vmul.f32 %v5047_v20, %v6486_v57  ;;  %v6528_v34 = vpop.xlane.xlu0 %3385  ;;  %v1945_v51 = vmul.f32 %v5045_v60, %v1944_v49  ;;  %vm1963_vm6 = vweird.f32 %v5047_v20 }
 0x24c   : > { %3329 = vmin.xlane.f32.xlu2 %v3328_v22  ;;  %v1741_v11 = vsel %vm1305_vm3, %v6524_v8, 0.0  ;;  %vm1964_vm9 = vmor %vm1962_vm8, %vm1963_vm6  ;;  %v1969_v22 = vor.u32 1.1754944e-38, %v1968_v36 }
 0x24d   : > { %v1959_v45 = vsub.f32 1.0, %v1958_v42  ;;  %4873 = vmatmul.msk.f32.gmra.mxu2 %vm836_vm1, %v816_v14  ;;  %v1946_v62 = vadd.f32 %v5045_v60, %v1945_v51  ;;  %v1966_v14 = vand.u32 2147483647, %v6486_v57  ;;  %v817_v42 = vmax.f32 %v742_v24, 0.0  ;;  %v9562_v57 = vld [vmem:[#allocation17_spill] sm:$0xff] }
 0x24e   : > { %v1516_v24 = vsub.f32 %v9562_v57, %v6280_v2  ;;  %v744_v2 = vadd.f32 %v5969_v50, %v6503_v27  ;;  %v9568_v27 = vld [vmem:[#allocation3_spill] sm:$0xff] }
 0x24f   : > { %v1960_v47 = vmul.f32 %v5047_v20, %v1959_v45  ;;  %1742 = vadd.xlane.f32.xlu0 %v1741_v11  ;;  %v6549_v5 = vpop.xlane.xlu2 %3400  ;;  %3550 = vmin.xlane.f32.xlu1 %v6537_v29  ;;  %v1950_v58 = vsel %vm1949_vm5, %v5045_v60, %v1946_v62  ;;  %v6562_v45 = vadd.f32 %v2874_v13, %v6534_v31  ;;  %vm1967_vm10 = vcmp.eq.f32.partialorder %v1966_v14, 8.507059e+37 }
 0x250   : > { %v1955_v49 = vsel %vm1952_vm7, %v1954_v43, %v1950_v58  ;;  %v6574_v62 = vsel %vm1240_vm2, %v6554_v40, -1e+30  ;;  %v1598_v13 = vmul.f32 1.442695, %v1516_v24  ;;  %v3245_v58 = vsel %vm3181_vm11, %v5420_v15, 10  ;;  %v9570_v24 = vld [vmem:[#allocation22_spill] sm:$0xff] }
 0x251   : > { %v1961_v9 = vadd.f32 %v5047_v20, %v1960_v47  ;;  %9561 = vst [vmem:[#allocation91_spill] sm:$0xff] %v6562_v45  ;;  %v1956_v36 = vmul.f32 %v5947_v3, %v1955_v49  ;;  %v6582_v47 = vcvt.s32.f32 %v3562_v54  ;;  %v3066_v14 = vsel %vm1305_vm3, %v6562_v45, -inf  ;;  %v9567_v54 = vld [vmem:[#allocation2_spill] sm:$0xff] }
 0x252   : > { %v6559_v51 = vpop.xlane.xlu1 %1709  ;;  %9563 = vst [vmem:[#allocation17_spill] sm:$0xff] %v6574_v62  ;;  %vm3342_vm12 = vcmp.eq.f32.partialorder %v9570_v24, %v6367_v12 }
 0x253   : > { %v1965_v6 = vsel %vm1964_vm9, %v5047_v20, %v1961_v9  ;;  %5050 = vrcp.f32 %v6559_v51  ;;  %v6565_v60 = vpop.xlane.xlu0 %3037  ;;  %v2875_v20 = vld [vmem:[%s5430_s29 + $0x108] sm:$0xff]  ;;  %9564 = vst [vmem:[#allocation92_spill] sm:$0xff] %v6582_v47  ;;  %v4254_v50 = vsel %vm1240_vm2, %v1956_v36, %v9567_v54  ;;  %v1148_v36 = vpop.f32.mrf.mxu2  ;;  %vm1977_vm14 = vweird.f32 %v6559_v51 }
 0x254   : > { %v1970_v11 = vsel %vm1967_vm10, %v1969_v22, %v1965_v6  ;;  %1403 = vmax.xlane.f32.xlu2 %v1402_v52  ;;  %v6592_v25 = vadd.f32 %v2875_v20, %v6574_v62  ;;  %v818_v6 = vmax.f32 %v744_v2, 0.0  ;;  %4318 = vst.msk [vmem:[%s6338_s8 + $0x20] sm:$0xff] %vm1305_vm3, %v4254_v50  ;;  %v6618_v2 = vsel %vm1305_vm3, %v3245_v58, 2147483647 }
 0x255   : > { %v1971_v43 = vmul.f32 %v5953_v17, %v1970_v11  ;;  %4874 = vmatmul.msk.f32.gmra.mxu2 %vm836_vm1, %v817_v42  ;;  %v9566_v17 = vld [vmem:[#allocation18_spill] sm:$0xff]  ;;  %v9569_v42 = vld [vmem:[#allocation20_spill] sm:$0xff]  ;;  %v748_v11 = vpop.f32.mrf.mxu3  ;;  %5052 = vpow2.f32 %v1598_v13  ;;  %v1983_v50 = vand.u32 2147483648, %v6559_v51  ;;  %v1981_v13 = vand.u32 2147483647, %v6559_v51 }
 0x256   : > { %9565 = vst [vmem:[#allocation93_spill] sm:$0xff] %v6592_v25  ;;  %v3336_v26 = vand.u32 65535, %v9566_v17  ;;  %v1517_v22 = vsub.f32 %v9569_v42, %v6357_v59  ;;  %v1405_v17 = vsel %vm1305_vm3, %v6574_v62, -inf  ;;  %v3577_v42 = vshra.s32 %v6618_v2, 16 }
 0x257   : > { %3565 = vmin.xlane.f32.xlu0 %v6582_v47  ;;  %v6589_v3 = vpop.xlane.xlu2 %1376  ;;  %3067 = vmax.xlane.f32.xlu1 %v3066_v14  ;;  %v4255_v49 = vsel %vm1240_vm2, %v1971_v43, %v9568_v27  ;;  %v3069_v43 = vsel %vm1305_vm3, %v6592_v25, -inf  ;;  %9571 = vst [vmem:[#allocation18_spill] sm:$0xff] %v6618_v2  ;;  %v6636_v24 = vadd.f32 %v1148_v36, %v5423_v18  ;;  %vm1982_vm0 = vcmp.eq.f32.partialorder %v1981_v13, 8.507059e+37  ;;  %v2876_v13 = vld [vmem:[%s5430_s29 + $0x110] sm:$0xff]  ;;  %v9586_v47 = vld [vmem:[#allocation33_spill] sm:$0xff] }
 0x258   : > { %4319 = vst.msk [vmem:[%s6338_s8 + $0x28] sm:$0xff] %vm1305_vm3, %v4255_v49  ;;  %v3338_v59 = vcvt.s32.f32 %v3336_v26  ;;  %v1600_v54 = vmul.f32 1.442695, %v1517_v22  ;;  %v6627_v49 = vld [vmem:[%s9191_s3] ss:$0 sm:$0xff]  ;;  %vm3183_vm8 = vcmp.eq.f32.partialorder %v9586_v47, %v6507_v0 }
 0x259   : > { %v5051_v9 = vpop.eup %5050  ;;  %v747_v26 = vadd.f32 %v6627_v49, %v746_v46  ;;  %9573 = vst [vmem:[#allocation2_spill] sm:$0xff] %v6636_v24  ;;  %v1984_v46 = vor.u32 1.1754944e-38, %v1983_v50  ;;  %v6653_v50 = vsel %vm1240_vm2, %v6636_v24, -1e+30 }
 0x25a   : > { %v1973_v52 = vmul.f32 %v5051_v9, %v6559_v51  ;;  %v6607_v57 = vpop.xlane.xlu1 %3040  ;;  %v3343_v27 = vsel %vm3342_vm12, %v3338_v59, inf  ;;  %vm1978_vm13 = vweird.f32 %v5051_v9  ;;  %v9576_v51 = vld [vmem:[#allocation23_spill] sm:$0xff]  ;;  %9577 = vst [vmem:[#allocation22_spill] sm:$0xff] %v6653_v50  ;;  %v6671_v24 = vadd.f32 %v2876_v13, %v6653_v50 }
 0x25b   : > { %v6613_v20 = vpop.xlane.xlu0 %1379  ;;  %vm1979_vm15 = vmor %vm1977_vm14, %vm1978_vm13  ;;  %v819_v59 = vmax.f32 %v747_v26, 0.0  ;;  %vm3357_vm4 = vcmp.eq.f32.partialorder %v9576_v51, %v6390_v30  ;;  %v9579_v51 = vld [vmem:[#allocation29_spill] sm:$0xff]  ;;  %v1408_v13 = vsel %vm1305_vm3, %v6653_v50, -inf  ;;  %v9584_v50 = vld [vmem:[#allocation30_spill] sm:$0xff] }
 0x25c   : > { %v1974_v14 = vsub.f32 1.0, %v1973_v52  ;;  %3070 = vmax.xlane.f32.xlu2 %v3069_v43  ;;  %v9572_v52 = vld [vmem:[#allocation21_spill] sm:$0xff]  ;;  %vm3372_vm7 = vcmp.eq.f32.partialorder %v9584_v50, %v6483_v56 }
 0x25d   : > { %4875 = vmatmul.msk.f32.gmra.mxu2 %vm836_vm1, %v818_v6  ;;  %v3351_v6 = vand.u32 65535, %v9572_v52  ;;  %v6644_v52 = vcvt.s32.f32 %v3577_v42  ;;  %v751_v42 = vpop.f32.mrf.mxu3  ;;  %9581 = vst [vmem:[#allocation21_spill] sm:$0xff] %v6671_v24 }
 0x25e   : > { %v1975_v58 = vmul.f32 %v5051_v9, %v1974_v14  ;;  %v6640_v14 = vpop.eup %5052 }
 0x25f   : > { %1406 = vmax.xlane.f32.xlu0 %v1405_v17  ;;  %v6632_v22 = vpop.xlane.xlu2 %1712  ;;  %3344 = vmin.xlane.f32.xlu1 %v3343_v27  ;;  %9575 = vst [vmem:[#allocation20_spill] sm:$0xff] %v6644_v52 }
 0x260   : > { %v1976_v43 = vadd.f32 %v5051_v9, %v1975_v58  ;;  %5054 = vrcp.f32 %v6632_v22  ;;  %v3353_v58 = vcvt.s32.f32 %v3351_v6  ;;  %v1151_v6 = vpop.f32.mrf.mxu2  ;;  %vm1992_vm9 = vweird.f32 %v6632_v22 }
 0x261   : > { %5056 = vpow2.f32 %v1600_v54  ;;  %v9578_v54 = vld [vmem:[#allocation25_spill] sm:$0xff] }
 0x262   : > { %v1980_v17 = vsel %vm1979_vm15, %v5051_v9, %v1976_v43  ;;  %v6642_v27 = vpop.xlane.xlu1 %3415  ;;  %v1518_v9 = vsub.f32 %v9578_v54, %v6435_v33  ;;  %v749_v43 = vadd.f32 %v6627_v49, %v748_v11  ;;  %v3366_v33 = vand.u32 65535, %v9579_v51 }
 0x263   : > { %9574 = vst [vmem:[#allocation3_spill] sm:$0xff] %v6642_v27  ;;  %v1985_v36 = vsel %vm1982_vm0, %v1984_v46, %v1980_v17  ;;  %v6646_v40 = vpop.xlane.xlu0 %1715  ;;  %v3358_v46 = vsel %vm3357_vm4, %v3353_v58, inf  ;;  %v1744_v17 = vsel %vm1305_vm3, %v6640_v14, 0.0 }
 0x264   : > { %v1986_v26 = vmul.f32 %v6018_v21, %v1985_v36  ;;  %5058 = vrcp.f32 %v6646_v40  ;;  %3580 = vmin.xlane.f32.xlu2 %v6644_v52  ;;  %v9580_v21 = vld [vmem:[#allocation27_spill] sm:$0xff]  ;;  %v1602_v11 = vmul.f32 1.442695, %v1518_v9  ;;  %v820_v16 = vmax.f32 %v749_v43, 0.0 }
 0x265   : > { %4876 = vmatmul.msk.f32.gmra.mxu2 %vm836_vm1, %v819_v59  ;;  %vm3182_vm5 = vcmp.eq.f32.partialorder %v9580_v21, %v6447_v19  ;;  %v3368_v62 = vcvt.s32.f32 %v3366_v33  ;;  %v1998_v9 = vand.u32 2147483648, %v6632_v22  ;;  %v752_v33 = vadd.f32 %v6627_v49, %v751_v42 }
 0x266   : > { %v5055_v54 = vpop.eup %5054  ;;  %v4256_v51 = vsel %vm1240_vm2, %v1986_v26, %v9582_v44  ;;  %v3072_v26 = vsel %vm1305_vm3, %v6671_v24, -inf  ;;  %5060 = vpow2.f32 %v1602_v11  ;;  %v2011_v42 = vand.u32 2147483647, %v6646_v40 }
 0x267   : > { %3359 = vmin.xlane.f32.xlu0 %v3358_v46  ;;  %v6668_v36 = vpop.xlane.xlu2 %3043  ;;  %1745 = vadd.xlane.f32.xlu1 %v1744_v17  ;;  %v6673_v59 = vpop.eup %5056  ;;  %v1988_v58 = vmul.f32 %v5055_v54, %v6632_v22  ;;  %4320 = vst.msk [vmem:[%s6338_s8 + $0x30] sm:$0xff] %vm1305_vm3, %v4256_v51  ;;  %v3246_v46 = vsel %vm3182_vm5, %v5420_v15, 10  ;;  %vm1993_vm6 = vweird.f32 %v5055_v54  ;;  %vm2007_vm13 = vweird.f32 %v6646_v40 }
 0x268   : > { %v1747_v44 = vsel %vm1305_vm3, %v6673_v59, 0.0  ;;  %v6700_v25 = vsel %vm1305_vm3, %v3246_v46, 2147483647  ;;  %vm1994_vm10 = vmor %vm1992_vm9, %vm1993_vm6  ;;  %v6710_v46 = vadd.f32 %v1151_v6, %v5423_v18  ;;  %vm2012_vm15 = vcmp.eq.f32.partialorder %v2011_v42, 8.507059e+37  ;;  %v9594_v42 = vld [vmem:[#allocation6_spill] sm:$0xff] }
 0x269   : > { %v1989_v21 = vsub.f32 1.0, %v1988_v58  ;;  %v1996_v58 = vand.u32 2147483647, %v6632_v22  ;;  %9585 = vst [vmem:[#allocation25_spill] sm:$0xff] %v6700_v25  ;;  %v3592_v22 = vshra.s32 %v6700_v25, 16 }
 0x26a   : > { %v5059_v19 = vpop.eup %5058  ;;  %v6682_v17 = vpop.xlane.xlu1 %1382  ;;  %9587 = vst [vmem:[#allocation29_spill] sm:$0xff] %v6710_v46 }
 0x26b   : > { %v2003_v52 = vmul.f32 %v5059_v19, %v6646_v40  ;;  %v6688_v2 = vpop.xlane.xlu0 %3430  ;;  %v1990_v43 = vmul.f32 %v5055_v54, %v1989_v21  ;;  %v2013_v21 = vand.u32 2147483648, %v6646_v40  ;;  %vm2008_vm11 = vweird.f32 %v5059_v19 }
 0x26c   : > { %9583 = vst [vmem:[#allocation23_spill] sm:$0xff] %v6688_v2  ;;  %1748 = vadd.xlane.f32.xlu2 %v1747_v44  ;;  %v753_v44 = vpop.f32.mrf.mxu3  ;;  %vm1997_vm12 = vcmp.eq.f32.partialorder %v1996_v58, 8.507059e+37  ;;  %vm2009_vm14 = vmor %vm2007_vm13, %vm2008_vm11 }
 0x26d   : > { %v2004_v51 = vsub.f32 1.0, %v2003_v52  ;;  %4877 = vmatmul.msk.f32.gmra.mxu2 %vm836_vm1, %v820_v16  ;;  %v1991_v11 = vadd.f32 %v5055_v54, %v1990_v43  ;;  %v1154_v52 = vpop.f32.mrf.mxu2  ;;  %v1999_v16 = vor.u32 1.1754944e-38, %v1998_v9  ;;  %v821_v9 = vmax.f32 %v752_v33, 0.0 }
 0x26e   : > { %v2014_v6 = vor.u32 1.1754944e-38, %v2013_v21  ;;  %v6732_v33 = vcvt.s32.f32 %v3592_v22  ;;  %v754_v50 = vadd.f32 %v6627_v49, %v753_v44 }
 0x26f   : > { %v2005_v24 = vmul.f32 %v5059_v19, %v2004_v51  ;;  %3073 = vmax.xlane.f32.xlu0 %v3072_v26  ;;  %v6707_v63 = vpop.xlane.xlu2 %3445  ;;  %1409 = vmax.xlane.f32.xlu1 %v1408_v13  ;;  %v1995_v43 = vsel %vm1994_vm10, %v5055_v54, %v1991_v11  ;;  %v6714_v51 = vpop.eup %5060  ;;  %v3247_v26 = vsel %vm3183_vm8, %v5420_v15, 10  ;;  %v9592_v11 = vld [vmem:[#allocation5_spill] sm:$0xff] }
 0x270   : > { %v2000_v45 = vsel %vm1997_vm12, %v1999_v16, %v1995_v43  ;;  %9588 = vst [vmem:[#allocation27_spill] sm:$0xff] %v6732_v33 }
 0x271   : > { %v2006_v29 = vadd.f32 %v5059_v19, %v2005_v24  ;;  %v3373_v24 = vsel %vm3372_vm7, %v3368_v62, inf  ;;  %v2001_v40 = vmul.f32 %v6071_v28, %v2000_v45  ;;  %v6738_v28 = vsel %vm1240_vm2, %v6710_v46, -1e+30 }
 0x272   : > { %v6721_v54 = vpop.xlane.xlu1 %1718  ;;  %9589 = vst [vmem:[#allocation4_spill] sm:$0xff] %v6738_v28  ;;  %v1750_v45 = vsel %vm1305_vm3, %v6714_v51, 0.0  ;;  %v6744_v62 = vsel %vm1305_vm3, %v3247_v26, 2147483647 }
 0x273   : > { %v2010_v13 = vsel %vm2009_vm14, %v5059_v19, %v2006_v29  ;;  %5062 = vrcp.f32 %v6721_v54  ;;  %v6728_v58 = vpop.xlane.xlu0 %3046  ;;  %v2877_v29 = vld [vmem:[%s5430_s29 + $0x118] sm:$0xff]  ;;  %9590 = vst [vmem:[#allocation30_spill] sm:$0xff] %v6744_v62  ;;  %v4257_v21 = vsel %vm1240_vm2, %v2001_v40, %v9592_v11  ;;  %v3607_v26 = vshra.s32 %v6744_v62, 16 }
 0x274   : > { %v2015_v0 = vsel %vm2012_vm15, %v2014_v6, %v2010_v13  ;;  %3374 = vmin.xlane.f32.xlu2 %v3373_v24  ;;  %v6756_v44 = vadd.f32 %v2877_v29, %v6738_v28  ;;  %v756_v16 = vpop.f32.mrf.mxu3  ;;  %4321 = vst.msk [vmem:[%s6338_s8 + $0x38] sm:$0xff] %vm1305_vm3, %v4257_v21  ;;  %v9596_v13 = vld [vmem:[#allocation28_spill] sm:$0xff]  ;;  %v2878_v29 = vld [vmem:[%s5430_s29 + $0x120] sm:$0xff]  ;;  %vm2022_vm5 = vweird.f32 %v6721_v54 }
 0x275   : > { %v2016_v47 = vmul.f32 %v6077_v39, %v2015_v0  ;;  %4878 = vmatmul.msk.f32.gmra.mxu2 %vm836_vm1, %v821_v9  ;;  %v6747_v39 = vadd.f32 %v1154_v52, %v5423_v18  ;;  %v6763_v22 = vpop.f32.mrf.mxu2  ;;  %v822_v9 = vmax.f32 %v754_v50, 0.0  ;;  %v1519_v0 = vsub.f32 %v9596_v13, %v6456_v32  ;;  %v9597_v21 = vld [vmem:[#allocation38_spill] sm:$0xff] }
 0x276   : > { %9593 = vst [vmem:[#allocation5_spill] sm:$0xff] %v6756_v44  ;;  %v1411_v50 = vsel %vm1305_vm3, %v6738_v28, -inf  ;;  %v3075_v11 = vsel %vm1305_vm3, %v6756_v44, -inf  ;;  %vm3184_vm0 = vcmp.eq.f32.partialorder %v9597_v21, %v6565_v60  ;;  %v757_v32 = vadd.f32 %v6627_v49, %v756_v16 }
 0x277   : > { %9591 = vst [vmem:[#allocation33_spill] sm:$0xff] %v6747_v39  ;;  %1751 = vadd.xlane.f32.xlu0 %v1750_v45  ;;  %v6749_v19 = vpop.xlane.xlu2 %1385  ;;  %3595 = vmin.xlane.f32.xlu1 %v6732_v33  ;;  %v4258_v52 = vsel %vm1240_vm2, %v2016_v47, %v9594_v42  ;;  %v6774_v40 = vsel %vm1240_vm2, %v6747_v39, -1e+30  ;;  %v2028_v42 = vand.u32 2147483648, %v6721_v54  ;;  %v2026_v39 = vand.u32 2147483647, %v6721_v54 }
 0x278   : > { %4322 = vst.msk [vmem:[%s6338_s8 + $0x40] sm:$0xff] %vm1305_vm3, %v4258_v52  ;;  %v6789_v52 = vcvt.s32.f32 %v3607_v26  ;;  %v3248_v60 = vsel %vm3184_vm0, %v5420_v15, 10  ;;  %v9600_v26 = vld [vmem:[#allocation31_spill] sm:$0xff] }
 0x279   : > { %v5063_v43 = vpop.eup %5062  ;;  %9595 = vst [vmem:[#allocation6_spill] sm:$0xff] %v6774_v40  ;;  %v3381_v16 = vand.u32 65535, %v9600_v26  ;;  %v2029_v62 = vor.u32 1.1754944e-38, %v2028_v42  ;;  %vm2027_vm7 = vcmp.eq.f32.partialorder %v2026_v39, 8.507059e+37  ;;  %v6816_v42 = vsel %vm1305_vm3, %v3248_v60, 2147483647 }
 0x27a   : > { %v2018_v6 = vmul.f32 %v5063_v43, %v6721_v54  ;;  %v6769_v24 = vpop.xlane.xlu1 %3049  ;;  %9598 = vst [vmem:[#allocation28_spill] sm:$0xff] %v6789_v52  ;;  %vm2023_vm4 = vweird.f32 %v5063_v43  ;;  %v2879_v33 = vld [vmem:[%s5430_s29 + $0x128] sm:$0xff] }
 0x27b   : > { %v6778_v47 = vpop.xlane.xlu0 %1388  ;;  %vm2024_vm6 = vmor %vm2022_vm5, %vm2023_vm4  ;;  %9603 = vst [vmem:[#allocation31_spill] sm:$0xff] %v6816_v42 }
 0x27c   : > { %v2019_v45 = vsub.f32 1.0, %v2018_v6  ;;  %1412 = vmax.xlane.f32.xlu2 %v1411_v50  ;;  %v6794_v6 = vadd.f32 %v2878_v29, %v6774_v40  ;;  %v1604_v50 = vmul.f32 1.442695, %v1519_v0  ;;  %v823_v0 = vmax.f32 %v757_v32, 0.0 }
 0x27d   : > { %4879 = vmatmul.msk.f32.gmra.mxu2 %vm836_vm1, %v822_v9  ;;  %v6809_v54 = vpop.f32.mrf.mxu2  ;;  %v3383_v32 = vcvt.s32.f32 %v3381_v16 }
 0x27e   : > { %v2020_v13 = vmul.f32 %v5063_v43, %v2019_v45  ;;  %9599 = vst [vmem:[#allocation38_spill] sm:$0xff] %v6794_v6  ;;  %v9601_v45 = vld [vmem:[#allocation34_spill] sm:$0xff] }
 0x27f   : > { %3610 = vmin.xlane.f32.xlu0 %v6789_v52  ;;  %v6797_v46 = vpop.xlane.xlu2 %1721  ;;  %3076 = vmax.xlane.f32.xlu1 %v3075_v11  ;;  %v1520_v21 = vsub.f32 %v9601_v45, %v6520_v38  ;;  %v3078_v11 = vsel %vm1305_vm3, %v6794_v6, -inf  ;;  %v9602_v38 = vld [vmem:[#allocation36_spill] sm:$0xff] }
 0x280   : > { %v2021_v9 = vadd.f32 %v5063_v43, %v2020_v13  ;;  %5064 = vrcp.f32 %v6797_v46  ;;  %v758_v13 = vpop.f32.mrf.mxu3  ;;  %vm3387_vm8 = vcmp.eq.f32.partialorder %v9602_v38, %v6528_v34  ;;  %vm2037_vm12 = vweird.f32 %v6797_v46 }
 0x281   : > { %5066 = vpow2.f32 %v1604_v50  ;;  %v1414_v50 = vsel %vm1305_vm3, %v6774_v40, -inf  ;;  %v3388_v45 = vsel %vm3387_vm8, %v3383_v32, inf }
 0x282   : > { %v2025_v29 = vsel %vm2024_vm6, %v5063_v43, %v2021_v9  ;;  %v6805_v52 = vpop.xlane.xlu1 %3460  ;;  %v9604_v43 = vld [vmem:[#allocation54_spill] sm:$0xff]  ;;  %v1606_v9 = vmul.f32 1.442695, %v1520_v21 }
 0x283   : > { %v2030_v26 = vsel %vm2027_vm7, %v2029_v62, %v2025_v29  ;;  %v6811_v44 = vpop.xlane.xlu0 %1724  ;;  %v759_v62 = vadd.f32 %v6627_v49, %v758_v13  ;;  %v3622_v29 = vshra.s32 %v6816_v42, 16 }
 0x284   : > { %v2031_v39 = vmul.f32 %v9604_v43, %v2030_v26  ;;  %5068 = vrcp.f32 %v6811_v44  ;;  %3079 = vmax.xlane.f32.xlu2 %v3078_v11  ;;  %v9605_v26 = vld [vmem:[#allocation35_spill] sm:$0xff]  ;;  %vm2052_vm15 = vweird.f32 %v6811_v44 }
 0x285   : > { %4880 = vmatmul.msk.f32.gmra.mxu2 %vm836_vm1, %v823_v0  ;;  %v3396_v43 = vand.u32 65535, %v9605_v26  ;;  %v9606_v11 = vld [vmem:[#allocation7_spill] sm:$0xff]  ;;  %v6838_v0 = vadd.f32 %v6763_v22, %v5423_v18  ;;  %5070 = vpow2.f32 %v1606_v9  ;;  %v824_v13 = vmax.f32 %v759_v62, 0.0  ;;  %v9611_v22 = vld [vmem:[#allocation40_spill] sm:$0xff] }
 0x286   : > { %v5065_v60 = vpop.eup %5064  ;;  %v4259_v16 = vsel %vm1240_vm2, %v2031_v39, %v9606_v11  ;;  %v6842_v26 = vcvt.s32.f32 %v3622_v29  ;;  %v9610_v39 = vld [vmem:[#allocation37_spill] sm:$0xff]  ;;  %v2043_v11 = vand.u32 2147483648, %v6797_v46  ;;  %v1521_v9 = vsub.f32 %v9611_v22, %v6589_v3 }
 0x287   : > { %1415 = vmax.xlane.f32.xlu0 %v1414_v50  ;;  %v6825_v38 = vpop.xlane.xlu2 %3052  ;;  %3389 = vmin.xlane.f32.xlu1 %v3388_v45  ;;  %v2033_v21 = vmul.f32 %v5065_v60, %v6797_v46  ;;  %4323 = vst.msk [vmem:[%s6338_s8 + $0x48] sm:$0xff] %vm1305_vm3, %v4259_v16  ;;  %v6834_v49 = vpop.eup %5066  ;;  %vm3402_vm9 = vcmp.eq.f32.partialorder %v9610_v39, %v6549_v5  ;;  %v3398_v42 = vcvt.s32.f32 %v3396_v43  ;;  %vm2038_vm10 = vweird.f32 %v5065_v60 }
 0x288   : > { %9607 = vst [vmem:[#allocation34_spill] sm:$0xff] %v6834_v49  ;;  %v6857_v29 = vsel %vm1240_vm2, %v6838_v0, -1e+30  ;;  %v6859_v39 = vpop.f32.mrf.mxu2  ;;  %v1753_v3 = vsel %vm1305_vm3, %v6834_v49, 0.0  ;;  %vm2039_vm13 = vmor %vm2037_vm12, %vm2038_vm10  ;;  %v2044_v28 = vor.u32 1.1754944e-38, %v2043_v11 }
 0x289   : > { %9608 = vst [vmem:[#allocation36_spill] sm:$0xff] %v6838_v0  ;;  %v2034_v50 = vsub.f32 1.0, %v2033_v21  ;;  %v2041_v21 = vand.u32 2147483647, %v6797_v46  ;;  %v3403_v43 = vsel %vm3402_vm9, %v3398_v42, inf }
 0x28a   : > { %v5069_v32 = vpop.eup %5068  ;;  %v6840_v45 = vpop.xlane.xlu1 %1391  ;;  %9609 = vst [vmem:[#allocation54_spill] sm:$0xff] %v6842_v26  ;;  %v1608_v25 = vmul.f32 1.442695, %v1521_v9 }
 0x28b   : > { %v2048_v16 = vmul.f32 %v5069_v32, %v6811_v44  ;;  %v6848_v40 = vpop.xlane.xlu0 %3475  ;;  %v2035_v62 = vmul.f32 %v5065_v60, %v2034_v50  ;;  %9612 = vst [vmem:[#allocation35_spill] sm:$0xff] %v6857_v29  ;;  %v9613_v50 = vld [vmem:[#allocation42_spill] sm:$0xff]  ;;  %v6868_v0 = vpop.eup %5070  ;;  %vm2053_vm14 = vweird.f32 %v5069_v32 }
 0x28c   : > { %3625 = vmin.xlane.f32.xlu2 %v6842_v26  ;;  %vm3185_vm11 = vcmp.eq.f32.partialorder %v9613_v50, %v6607_v57  ;;  %v2058_v26 = vand.u32 2147483648, %v6811_v44  ;;  %9614 = vst [vmem:[#allocation7_spill] sm:$0xff] %v6868_v0  ;;  %vm2054_vm0 = vmor %vm2052_vm15, %vm2053_vm14 }
 0x28d   : > { %v2049_v6 = vsub.f32 1.0, %v2048_v16  ;;  %4881 = vmatmul.msk.f32.gmra.mxu2 %vm836_vm1, %v824_v13  ;;  %v2036_v22 = vadd.f32 %v5065_v60, %v2035_v62  ;;  %v2056_v13 = vand.u32 2147483647, %v6811_v44  ;;  %vm2042_vm1 = vcmp.eq.f32.partialorder %v2041_v21, 8.507059e+37  ;;  %v9618_v21 = vld [vmem:[#allocation44_spill] sm:$0xff] }
 0x28e   : > { %v2059_v11 = vor.u32 1.1754944e-38, %v2058_v26  ;;  %v3411_v50 = vand.u32 65535, %v9618_v21 }
 0x28f   : > { %v2050_v16 = vmul.f32 %v5069_v32, %v2049_v6  ;;  %3404 = vmin.xlane.f32.xlu0 %v3403_v43  ;;  %v6871_v42 = vpop.xlane.xlu2 %3490  ;;  %1754 = vadd.xlane.f32.xlu1 %v1753_v3  ;;  %v2040_v49 = vsel %vm2039_vm13, %v5065_v60, %v2036_v22  ;;  %v3249_v6 = vsel %vm3185_vm11, %v5420_v15, 10  ;;  %v1756_v43 = vsel %vm1305_vm3, %v6868_v0, 0.0  ;;  %v9616_v60 = vld [vmem:[#allocation61_spill] sm:$0xff] }
 0x290   : > { %v2045_v62 = vsel %vm2042_vm1, %v2044_v28, %v2040_v49  ;;  %v6882_v3 = vadd.f32 %v2879_v33, %v6857_v29  ;;  %vm2057_vm4 = vcmp.eq.f32.partialorder %v2056_v13, 8.507059e+37  ;;  %v9617_v49 = vld [vmem:[#allocation62_spill] sm:$0xff]  ;;  %v1417_v22 = vsel %vm1305_vm3, %v6857_v29, -inf }
 0x291   : > { %v2051_v46 = vadd.f32 %v5069_v32, %v2050_v16  ;;  %v2046_v9 = vmul.f32 %v9616_v60, %v2045_v62  ;;  %v9621_v62 = vld [vmem:[#allocation48_spill] sm:$0xff]  ;;  %v3413_v60 = vcvt.s32.f32 %v3411_v50 }
 0x292   : > { %v1728_v31 = vpop.xlane.xlu1 %1727  ;;  %9615 = vst [vmem:[#allocation37_spill] sm:$0xff] %v6882_v3  ;;  %v3081_v33 = vsel %vm1305_vm3, %v6882_v3, -inf  ;;  %vm3186_vm5 = vcmp.eq.f32.partialorder %v9621_v62, %v6668_v36  ;;  %v6919_v36 = vadd.f32 %v6809_v54, %v5423_v18  ;;  %v3302_v3 = vcvt.f32.s32 %v6206_v37  ;;  %v9639_v37 = vld [vmem:[#allocation10_spill] sm:$0xff] }
 0x293   : > { %v2055_v28 = vsel %vm2054_vm0, %v5069_v32, %v2051_v46  ;;  %5072 = vrcp.f32 %v1728_v31  ;;  %v6885_v44 = vpop.xlane.xlu0 %3055  ;;  %v6894_v32 = vsel %vm1305_vm3, %v3249_v6, 2147483647  ;;  %v9622_v46 = vld [vmem:[#allocation45_spill] sm:$0xff]  ;;  %v3250_v21 = vsel %vm3186_vm5, %v5420_v15, 10 }
 0x294   : > { %5074 = vpow2.f32 %v1608_v25  ;;  %v2060_v57 = vsel %vm2057_vm4, %v2059_v11, %v2055_v28  ;;  %1757 = vadd.xlane.f32.xlu2 %v1756_v43  ;;  %9619 = vst [vmem:[#allocation40_spill] sm:$0xff] %v6894_v32  ;;  %v9620_v25 = vld [vmem:[#allocation8_spill] sm:$0xff]  ;;  %vm3417_vm6 = vcmp.eq.f32.partialorder %v9622_v46, %v6642_v27  ;;  %v9623_v11 = vld [vmem:[#allocation9_spill] sm:$0xff]  ;;  %v3637_v28 = vshra.s32 %v6894_v32, 16 }
 0x295   : > { %v2061_v26 = vmul.f32 %v9617_v49, %v2060_v57  ;;  %v4260_v13 = vsel %vm1240_vm2, %v2046_v9, %v9620_v25  ;;  %9625 = vst [vmem:[#allocation61_spill] sm:$0xff] %v6919_v36  ;;  %v2073_v25 = vand.u32 2147483648, %v1728_v31  ;;  %v2071_v46 = vand.u32 2147483647, %v1728_v31 }
 0x296   : > { %4324 = vst.msk [vmem:[%s6338_s8 + $0x50] sm:$0xff] %vm1305_vm3, %v4260_v13  ;;  %v6930_v62 = vcvt.s32.f32 %v3637_v28  ;;  %vm2067_vm8 = vweird.f32 %v1728_v31  ;;  %vm4506_vm4 = vcmask 89168  }
 0x297   : > { %3082 = vmax.xlane.f32.xlu0 %v3081_v33  ;;  %v6896_v16 = vpop.xlane.xlu2 %1394  ;;  %1418 = vmax.xlane.f32.xlu1 %v1417_v22  ;;  %v4261_v6 = vsel %vm1240_vm2, %v2061_v26, %v9623_v11  ;;  %v3418_v26 = vsel %vm3417_vm6, %v3413_v60, inf  ;;  %v6926_v22 = vadd.f32 %v6859_v39, %v5423_v18  ;;  %v6933_v11 = vsel %vm1305_vm3, %v3250_v21, 2147483647  ;;  %v2880_v60 = vld [vmem:[%s5430_s29 + $0x130] sm:$0xff] }
 0x298   : > { %4325 = vst.msk [vmem:[%s6338_s8 + $0x58] sm:$0xff] %vm1305_vm3, %v4261_v6  ;;  %v6941_v39 = vsel %vm1240_vm2, %v6919_v36, -1e+30  ;;  %v3652_v21 = vshra.s32 %v6933_v11, 16  ;;  %vm2072_vm10 = vcmp.eq.f32.partialorder %v2071_v46, 8.507059e+37 }
 0x299   : > { %v5073_v43 = vpop.eup %5072  ;;  %9626 = vst [vmem:[#allocation62_spill] sm:$0xff] %v6926_v22  ;;  %v6954_v36 = vadd.f32 %v2880_v60, %v6941_v39  ;;  %v9635_v60 = vld [vmem:[#allocation46_spill] sm:$0xff] }
 0x29a   : > { %v6913_v57 = vpop.eup %5074  ;;  %v2063_v9 = vmul.f32 %v5073_v43, %v1728_v31  ;;  %v6915_v49 = vpop.xlane.xlu1 %3058  ;;  %9627 = vst [vmem:[#allocation44_spill] sm:$0xff] %v6930_v62  ;;  %vm2068_vm7 = vweird.f32 %v5073_v43  ;;  %v9632_v31 = vld [vmem:[#allocation43_spill] sm:$0xff] }
 0x29b   : > { %9624 = vst [vmem:[#allocation42_spill] sm:$0xff] %v6913_v57  ;;  %v6922_v33 = vpop.xlane.xlu0 %1397  ;;  %v1759_v13 = vsel %vm1305_vm3, %v6913_v57, 0.0  ;;  %vm2069_vm9 = vmor %vm2067_vm8, %vm2068_vm7 }
 0x29c   : > { %v2064_v50 = vsub.f32 1.0, %v2063_v9  ;;  %3419 = vmin.xlane.f32.xlu2 %v3418_v26  ;;  %9628 = vst [vmem:[#allocation8_spill] sm:$0xff] %v6933_v11  ;;  %v2074_v9 = vor.u32 1.1754944e-38, %v2073_v25  ;;  %v6949_v26 = vsel %vm1240_vm2, %v6926_v22, -1e+30  ;;  %v1522_v25 = vsub.f32 %v9632_v31, %v6613_v20  ;;  %v9633_v22 = vld [vmem:[#allocation53_spill] sm:$0xff] }
 0x29d   : > { %9629 = vst [vmem:[#allocation48_spill] sm:$0xff] %v6941_v39  ;;  %v1420_v11 = vsel %vm1305_vm3, %v6941_v39, -inf  ;;  %vm3187_vm11 = vcmp.eq.f32.partialorder %v9633_v22, %v6728_v58  ;;  %v6969_v20 = vcvt.s32.f32 %v3652_v21 }
 0x29e   : > { %v2065_v54 = vmul.f32 %v5073_v43, %v2064_v50  ;;  %9630 = vst [vmem:[#allocation45_spill] sm:$0xff] %v6949_v26  ;;  %v1610_v58 = vmul.f32 1.442695, %v1522_v25  ;;  %v3303_v25 = vshll.u32 %v3302_v3, 16 }
 0x29f   : > { %1760 = vadd.xlane.f32.xlu0 %v1759_v13  ;;  %v6935_v6 = vpop.xlane.xlu2 %1730  ;;  %3640 = vmin.xlane.f32.xlu1 %v6930_v62  ;;  %9631 = vst [vmem:[#allocation9_spill] sm:$0xff] %v6954_v36 }
 0x2a0   : > { %v2066_v28 = vadd.f32 %v5073_v43, %v2065_v54  ;;  %5076 = vrcp.f32 %v6935_v6  ;;  %v2881_v54 = vld [vmem:[%s5430_s29 + $0x138] sm:$0xff]  ;;  %9636 = vst [vmem:[#allocation43_spill] sm:$0xff] %v6969_v20  ;;  %v2088_v32 = vand.u32 2147483648, %v6935_v6  ;;  %vm2082_vm14 = vweird.f32 %v6935_v6 }
 0x2a2   : > { %v2070_v50 = vsel %vm2069_vm9, %v5073_v43, %v2066_v28  ;;  %v6951_v13 = vpop.xlane.xlu1 %3505  ;;  %v9634_v43 = vld [vmem:[#allocation71_spill] sm:$0xff]  ;;  %v3426_v28 = vand.u32 65535, %v9635_v60 }
 0x2a3   : > { %v2075_v29 = vsel %vm2072_vm10, %v2074_v9, %v2070_v50  ;;  %v6959_v62 = vpop.xlane.xlu0 %1733  ;;  %v6972_v9 = vadd.f32 %v2881_v54, %v6949_v26  ;;  %v3084_v50 = vsel %vm1305_vm3, %v6954_v36, -inf }
 0x2a4   : > { %v2076_v46 = vmul.f32 %v9634_v43, %v2075_v29  ;;  %5078 = vrcp.f32 %v6959_v62  ;;  %1421 = vmax.xlane.f32.xlu2 %v1420_v11  ;;  %v9638_v29 = vld [vmem:[#allocation49_spill] sm:$0xff]  ;;  %v3251_v11 = vsel %vm3187_vm11, %v5420_v15, 10  ;;  %v3428_v60 = vcvt.s32.f32 %v3426_v28 }
 0x2a5   : > { %9637 = vst [vmem:[#allocation53_spill] sm:$0xff] %v6972_v9  ;;  %v1523_v22 = vsub.f32 %v9638_v29, %v6682_v17  ;;  %v3087_v17 = vsel %vm1305_vm3, %v6972_v9, -inf  ;;  %v9640_v29 = vld [vmem:[#allocation51_spill] sm:$0xff]  ;;  %v6997_v28 = vsel %vm1305_vm3, %v3251_v11, 2147483647  ;;  %5080 = vpow2.f32 %v1610_v58  ;;  %v9642_v11 = vld [vmem:[#allocation56_spill] sm:$0xff] }
 0x2a6   : > { %v5077_v31 = vpop.eup %5076  ;;  %v4262_v21 = vsel %vm1240_vm2, %v2076_v46, %v9639_v37  ;;  %vm3432_vm12 = vcmp.eq.f32.partialorder %v9640_v29, %v6688_v2  ;;  %v1423_v46 = vsel %vm1305_vm3, %v6949_v26, -inf  ;;  %v1166_v26 = vpop.f32.mrf.mxu2  ;;  %v1524_v27 = vsub.f32 %v9642_v11, %v6749_v19 }
 0x2a7   : > { %3655 = vmin.xlane.f32.xlu0 %v6969_v20  ;;  %v6980_v43 = vpop.xlane.xlu2 %3061  ;;  %3085 = vmax.xlane.f32.xlu1 %v3084_v50  ;;  %v2078_v54 = vmul.f32 %v5077_v31, %v6935_v6  ;;  %4326 = vst.msk [vmem:[%s6338_s8 + $0x60] sm:$0xff] %vm1305_vm3, %v4262_v21  ;;  %v9641_v20 = vld [vmem:[#allocation50_spill] sm:$0xff]  ;;  %v1612_v3 = vmul.f32 1.442695, %v1523_v22  ;;  %vm2083_vm13 = vweird.f32 %v5077_v31  ;;  %v3667_v23 = vshra.s32 %v6997_v28, 16 }
 0x2a8   : > { %v3441_v36 = vand.u32 65535, %v9641_v20  ;;  %v2086_v20 = vand.u32 2147483647, %v6935_v6  ;;  %v2103_v4 = vand.u32 2147483648, %v6959_v62  ;;  %vm2084_vm1 = vmor %vm2082_vm14, %vm2083_vm13  ;;  %v2101_v29 = vand.u32 2147483647, %v6959_v62 }
 0x2a9   : > { %v2079_v50 = vsub.f32 1.0, %v2078_v54  ;;  %v3433_v54 = vsel %vm3432_vm12, %v3428_v60, inf  ;;  %v7015_v19 = vadd.f32 %v1166_v26, %v5423_v18  ;;  %vm2097_vm5 = vweird.f32 %v6959_v62 }
 0x2aa   : > { %v5079_v39 = vpop.eup %5078  ;;  %v3300_v57 = vpop.xlane.xlu1 %3299  ;;  %vm2087_vm0 = vcmp.eq.f32.partialorder %v2086_v20, 8.507059e+37  ;;  %5082 = vpow2.f32 %v1612_v3  ;;  %v7024_v26 = vcvt.s32.f32 %v3667_v23  ;;  %vm2102_vm7 = vcmp.eq.f32.partialorder %v2101_v29, 8.507059e+37  ;;  %v9646_v3 = vld [vmem:[#allocation58_spill] sm:$0xff]  ;;  %v9647_v23 = vld [vmem:[#allocation80_spill] sm:$0xff] }
 0x2ab   : > { %v2093_v37 = vmul.f32 %v5079_v39, %v6959_v62  ;;  %v3301_v21 = vcvt.f32.s32 %v3300_v57  ;;  %v7000_v9 = vpop.xlane.xlu0 %3520  ;;  %v2080_v0 = vmul.f32 %v5077_v31, %v2079_v50  ;;  %v2089_v50 = vor.u32 1.1754944e-38, %v2088_v32  ;;  %9643 = vst [vmem:[#allocation71_spill] sm:$0xff] %v7015_v19  ;;  %v9645_v62 = vld [vmem:[#allocation52_spill] sm:$0xff] }
 0x2ac   : > { %3088 = vmax.xlane.f32.xlu2 %v3087_v17  ;;  %vm2098_vm15 = vweird.f32 %v5079_v39  ;;  %vm3447_vm8 = vcmp.eq.f32.partialorder %v9645_v62, %v6707_v63  ;;  %vm3188_vm9 = vcmp.eq.f32.partialorder %v9646_v3, %v6769_v24  ;;  %v7046_v24 = vsel %vm1240_vm2, %v7015_v19, -1e+30 }
 0x2ad   : > { %v2094_v58 = vsub.f32 1.0, %v2093_v37  ;;  %v3304_v22 = vadd.s32 %v3303_v25, %v3301_v21  ;;  %v2081_v57 = vadd.f32 %v5077_v31, %v2080_v0  ;;  %v7017_v0 = vpop.eup %5080  ;;  %v9644_v21 = vld [vmem:[#allocation79_spill] sm:$0xff]  ;;  %vm2099_vm6 = vmor %vm2097_vm5, %vm2098_vm15  ;;  %9649 = vst [vmem:[#allocation46_spill] sm:$0xff] %v7046_v24 }
 0x2af   : > { %v2095_v17 = vmul.f32 %v5079_v39, %v2094_v58  ;;  %v4882_v60 = vadd.s32 4294967294, %v3304_v22  ;;  %1424 = vmax.xlane.f32.xlu0 %v1423_v46  ;;  %v7012_v2 = vpop.xlane.xlu2 %3535  ;;  %3434 = vmin.xlane.f32.xlu1 %v3433_v54  ;;  %v2085_v25 = vsel %vm2084_vm1, %v5077_v31, %v2081_v57  ;;  %v2104_v54 = vor.u32 1.1754944e-38, %v2103_v4 }
 0x2b0   : > { %v2090_v32 = vsel %vm2087_vm0, %v2089_v50, %v2085_v25  ;;  %v1614_v31 = vmul.f32 1.442695, %v1524_v27  ;;  %v3443_v22 = vcvt.s32.f32 %v3441_v36  ;;  %v9648_v27 = vld [vmem:[#allocation11_spill] sm:$0xff]  ;;  %v3252_v36 = vsel %vm3188_vm9, %v5420_v15, 10  ;;  %v9650_v25 = vld [vmem:[#allocation12_spill] sm:$0xff] }
 0x2b1   : > { %v2096_v6 = vadd.f32 %v5079_v39, %v2095_v17  ;;  %v4442_v37 = vcvt.s32.f32 %v4882_v60  ;;  %v2091_v46 = vmul.f32 %v9644_v21, %v2090_v32  ;;  %v1762_v17 = vsel %vm1305_vm3, %v7017_v0, 0.0  ;;  %v2882_v60 = vld [vmem:[%s5430_s29 + $0x140] sm:$0xff]  ;;  %v1169_v21 = vpop.f32.mrf.mxu2 }
 0x2b2   : > { %v7022_v11 = vpop.xlane.xlu1 %1400  ;;  %v3448_v50 = vsel %vm3447_vm8, %v3443_v22, inf  ;;  %5084 = vpow2.f32 %v1614_v31  ;;  %v7067_v31 = vadd.f32 %v2882_v60, %v7046_v24  ;;  %v3332_v22 = vcvt.f32.s32 %v6307_v35  ;;  %v9654_v60 = vld [vmem:[#allocation66_spill] sm:$0xff] }
 0x2b3   : > { %v2100_v20 = vsel %vm2099_vm6, %v5079_v39, %v2096_v6  ;;  %4507 = vst.msk [vmem:[%s6338_s8] sm:$0xff] %vm4506_vm4, %v4442_v37  ;;  %v7028_v58 = vpop.xlane.xlu0 %3064  ;;  %v4263_v39 = vsel %vm1240_vm2, %v2091_v46, %v9648_v27  ;;  %v7055_v6 = vpop.eup %5082  ;;  %v3317_v37 = vcvt.f32.s32 %v6231_v41  ;;  %v7062_v46 = vsel %vm1305_vm3, %v3252_v36, 2147483647 }
 0x2b4   : > { %v2105_v4 = vsel %vm2102_vm7, %v2104_v54, %v2100_v20  ;;  %3670 = vmin.xlane.f32.xlu2 %v7024_v26  ;;  %4327 = vst.msk [vmem:[%s6338_s8 + $0x68] sm:$0xff] %vm1305_vm3, %v4263_v39  ;;  %v9653_v20 = vld [vmem:[#allocation60_spill] sm:$0xff]  ;;  %v1765_v41 = vsel %vm1305_vm3, %v7055_v6, 0.0  ;;  %v3682_v27 = vshra.s32 %v7062_v46, 16  ;;  %v1426_v36 = vsel %vm1305_vm3, %v7046_v24, -inf }
 0x2b5   : > { %v2106_v57 = vmul.f32 %v9647_v23, %v2105_v4  ;;  %9651 = vst [vmem:[#allocation49_spill] sm:$0xff] %v7062_v46  ;;  %v3456_v62 = vand.u32 65535, %v9653_v20  ;;  %v3318_v4 = vshll.u32 %v3317_v37, 16  ;;  %vm3189_vm10 = vcmp.eq.f32.partialorder %v9654_v60, %v6825_v38 }
 0x2b6   : > { %9652 = vst [vmem:[#allocation10_spill] sm:$0xff] %v7067_v31  ;;  %v3333_v37 = vshll.u32 %v3332_v22, 16  ;;  %v7091_v60 = vcvt.s32.f32 %v3682_v27 }
 0x2b7   : > { %3449 = vmin.xlane.f32.xlu0 %v3448_v50  ;;  %v7049_v29 = vpop.xlane.xlu2 %1739  ;;  %1763 = vadd.xlane.f32.xlu1 %v1762_v17  ;;  %v4264_v32 = vsel %vm1240_vm2, %v2106_v57, %v9650_v25  ;;  %v3090_v17 = vsel %vm1305_vm3, %v7067_v31, -inf }
 0x2b8   : > { %5086 = vrcp.f32 %v7049_v29  ;;  %4328 = vst.msk [vmem:[%s6338_s8 + $0x70] sm:$0xff] %vm1305_vm3, %v4264_v32  ;;  %v7074_v57 = vpop.eup %5084  ;;  %v3458_v32 = vcvt.s32.f32 %v3456_v62  ;;  %v2131_v31 = vand.u32 2147483647, %v7049_v29  ;;  %vm2127_vm13 = vweird.f32 %v7049_v29 }
 0x2b9   : > { %v1768_v38 = vsel %vm1305_vm3, %v7074_v57, 0.0  ;;  %v1172_v24 = vpop.f32.mrf.mxu2 }
 0x2ba   : > { %v7064_v54 = vpop.xlane.xlu1 %1736  ;;  %vm2132_vm15 = vcmp.eq.f32.partialorder %v2131_v31, 8.507059e+37 }
 0x2bb   : > { %5088 = vrcp.f32 %v7064_v54  ;;  %v3315_v3 = vpop.xlane.xlu0 %3314  ;;  %vm2112_vm0 = vweird.f32 %v7064_v54 }
 0x2bc   : > { %v3316_v23 = vcvt.f32.s32 %v3315_v3  ;;  %1766 = vadd.xlane.f32.xlu2 %v1765_v41  ;;  %v9655_v41 = vld [vmem:[#allocation63_spill] sm:$0xff] }
 0x2bd   : > { %vm3462_vm11 = vcmp.eq.f32.partialorder %v9655_v41, %v6805_v52 }
 0x2be   : > { %v5087_v39 = vpop.eup %5086  ;;  %v3319_v50 = vadd.s32 %v3318_v4, %v3316_v23  ;;  %v7087_v23 = vadd.f32 %v1169_v21, %v5423_v18  ;;  %v2133_v21 = vand.u32 2147483648, %v7049_v29 }
 0x2bf   : > { %v2123_v25 = vmul.f32 %v5087_v39, %v7049_v29  ;;  %3091 = vmax.xlane.f32.xlu0 %v3090_v17  ;;  %v3330_v35 = vpop.xlane.xlu2 %3329  ;;  %1427 = vmax.xlane.f32.xlu1 %v1426_v36  ;;  %v3253_v17 = vsel %vm3189_vm10, %v5420_v15, 10  ;;  %vm2128_vm12 = vweird.f32 %v5087_v39 }
 0x2c0   : > { %v4883_v20 = vadd.s32 4294967294, %v3319_v50  ;;  %v3331_v3 = vcvt.f32.s32 %v3330_v35  ;;  %9656 = vst [vmem:[#allocation51_spill] sm:$0xff] %v7087_v23  ;;  %vm7110_vm14 = vmor %vm2127_vm13, %vm2128_vm12  ;;  %v7118_v29 = vsel %vm1240_vm2, %v7087_v23, -1e+30 }
 0x2c1   : > { %v5089_v4 = vpop.eup %5088  ;;  %v2124_v19 = vsub.f32 1.0, %v2123_v25  ;;  %v3463_v25 = vsel %vm3462_vm11, %v3458_v32, inf  ;;  %9660 = vst [vmem:[#allocation56_spill] sm:$0xff] %v7118_v29 }
 0x2c2   : > { %v2108_v62 = vmul.f32 %v5089_v4, %v7064_v54  ;;  %v4443_v22 = vcvt.s32.f32 %v4883_v20  ;;  %v3334_v50 = vadd.s32 %v3333_v37, %v3331_v3  ;;  %v7095_v36 = vpop.xlane.xlu1 %3550  ;;  %v7107_v20 = vsel %vm1305_vm3, %v3253_v17, 2147483647 }
 0x2c3   : > { %v2125_v35 = vmul.f32 %v5087_v39, %v2124_v19  ;;  %v7098_v41 = vpop.xlane.xlu0 %1742  ;;  %v2118_v19 = vand.u32 2147483648, %v7064_v54  ;;  %9657 = vst [vmem:[#allocation50_spill] sm:$0xff] %v7107_v20  ;;  %vm2113_vm1 = vweird.f32 %v5089_v4 }
 0x2c4   : > { %v2109_v27 = vsub.f32 1.0, %v2108_v62  ;;  %4508 = vst.msk [vmem:[%s6338_s8 + $0x8] sm:$0xff] %vm4506_vm4, %v4443_v22  ;;  %v4884_v46 = vadd.s32 4294967294, %v3334_v50  ;;  %5090 = vrcp.f32 %v7098_v41  ;;  %3464 = vmin.xlane.f32.xlu2 %v3463_v25  ;;  %v2116_v62 = vand.u32 2147483647, %v7064_v54  ;;  %vm2114_vm5 = vmor %vm2112_vm0, %vm2113_vm1 }
 0x2c5   : > { %v2126_v37 = vadd.f32 %v5087_v39, %v2125_v35  ;;  %v7121_v50 = vadd.f32 %v1172_v24, %v5423_v18  ;;  %v2134_v35 = vor.u32 1.1754944e-38, %v2133_v21  ;;  %v2119_v24 = vor.u32 1.1754944e-38, %v2118_v19 }
 0x2c6   : > { %v2110_v3 = vmul.f32 %v5089_v4, %v2109_v27  ;;  %v4444_v22 = vcvt.s32.f32 %v4884_v46  ;;  %v2883_v27 = vld [vmem:[%s5430_s29 + $0x148] sm:$0xff]  ;;  %vm2117_vm6 = vcmp.eq.f32.partialorder %v2116_v62, 8.507059e+37  ;;  %v1429_v19 = vsel %vm1305_vm3, %v7118_v29, -inf }
 0x2c7   : > { %9661 = vst [vmem:[#allocation79_spill] sm:$0xff] %v7121_v50  ;;  %v2130_v17 = vsel %vm7110_vm14, %v5087_v39, %v2126_v37  ;;  %1769 = vadd.xlane.f32.xlu0 %v1768_v38  ;;  %v7125_v25 = vpop.xlane.xlu2 %1403  ;;  %3685 = vmin.xlane.f32.xlu1 %v7091_v60  ;;  %v3697_v39 = vshra.s32 %v7107_v20, 16  ;;  %v7137_v32 = vadd.f32 %v2883_v27, %v7118_v29  ;;  %v7142_v54 = vsel %vm1240_vm2, %v7121_v50, -1e+30  ;;  %v9664_v27 = vld [vmem:[#allocation59_spill] sm:$0xff] }
 0x2c8   : > { %v2111_v46 = vadd.f32 %v5089_v4, %v2110_v3  ;;  %4509 = vst.msk [vmem:[%s6338_s8 + $0x10] sm:$0xff] %vm4506_vm4, %v4444_v22  ;;  %v2135_v23 = vsel %vm2132_vm15, %v2134_v35, %v2130_v17  ;;  %v3347_v62 = vcvt.f32.s32 %v6367_v12  ;;  %v2148_v20 = vand.u32 2147483648, %v7098_v41 }
 0x2c9   : > { %9662 = vst [vmem:[#allocation52_spill] sm:$0xff] %v7137_v32  ;;  %v2136_v17 = vmul.f32 %v6474_v7, %v2135_v23  ;;  %v7157_v50 = vcvt.s32.f32 %v3697_v39  ;;  %v3093_v12 = vsel %vm1305_vm3, %v7137_v32, -inf  ;;  %vm2142_vm9 = vweird.f32 %v7098_v41  ;;  %v9672_v32 = vld [vmem:[#allocation69_spill] sm:$0xff] }
 0x2ca   : > { %v5091_v21 = vpop.eup %5090  ;;  %v2115_v38 = vsel %vm2114_vm5, %v5089_v4, %v2111_v46  ;;  %v7134_v37 = vpop.xlane.xlu1 %3067  ;;  %9663 = vst [vmem:[#allocation58_spill] sm:$0xff] %v7142_v54  ;;  %v2884_v4 = vld [vmem:[%s5430_s29 + $0x150] sm:$0xff]  ;;  %v1525_v46 = vsub.f32 %v9664_v27, %v6778_v47  ;;  %vm3477_vm11 = vcmp.eq.f32.partialorder %v9672_v32, %v6848_v40  ;;  %v1432_v32 = vsel %vm1305_vm3, %v7142_v54, -inf }
 0x2cb   : > { %v2120_v31 = vsel %vm2117_vm6, %v2119_v24, %v2115_v38  ;;  %v2138_v3 = vmul.f32 %v5091_v21, %v7098_v41  ;;  %v7145_v22 = vpop.xlane.xlu0 %3565  ;;  %v9665_v24 = vld [vmem:[#allocation70_spill] sm:$0xff]  ;;  %9666 = vst [vmem:[#allocation80_spill] sm:$0xff] %v7157_v50  ;;  %v7163_v7 = vadd.f32 %v2884_v4, %v7142_v54  ;;  %vm2143_vm8 = vweird.f32 %v5091_v21 }
 0x2cc   : > { %v2121_v35 = vmul.f32 %v6481_v55, %v2120_v31  ;;  %1430 = vmax.xlane.f32.xlu2 %v1429_v19  ;;  %vm3190_vm7 = vcmp.eq.f32.partialorder %v9665_v24, %v6885_v44  ;;  %v9668_v55 = vld [vmem:[#allocation13_spill] sm:$0xff]  ;;  %v2146_v44 = vand.u32 2147483647, %v7098_v41  ;;  %v9669_v31 = vld [vmem:[#allocation64_spill] sm:$0xff]  ;;  %v9670_v4 = vld [vmem:[#allocation14_spill] sm:$0xff] }
 0x2cd   : > { %v2139_v38 = vsub.f32 1.0, %v2138_v3  ;;  %9667 = vst [vmem:[#allocation11_spill] sm:$0xff] %v7163_v7  ;;  %v3471_v3 = vand.u32 65535, %v9669_v31  ;;  %v3254_v19 = vsel %vm3190_vm7, %v5420_v15, 10  ;;  %v4266_v27 = vsel %vm1240_vm2, %v2136_v17, %v9670_v4  ;;  %vm2144_vm10 = vmor %vm2142_vm9, %vm2143_vm8 }
 0x2ce   : > { %v4265_v23 = vsel %vm1240_vm2, %v2121_v35, %v9668_v55  ;;  %v3348_v35 = vshll.u32 %v3347_v62, 16  ;;  %v1616_v24 = vmul.f32 1.442695, %v1525_v46  ;;  %4330 = vst.msk [vmem:[%s6338_s8 + $0x80] sm:$0xff] %vm1305_vm3, %v4266_v27  ;;  %v9671_v55 = vld [vmem:[#allocation67_spill] sm:$0xff]  ;;  %vm2147_vm12 = vcmp.eq.f32.partialorder %v2146_v44, 8.507059e+37 }
 0x2cf   : > { %v2140_v47 = vmul.f32 %v5091_v21, %v2139_v38  ;;  %3700 = vmin.xlane.f32.xlu0 %v7157_v50  ;;  %v7170_v39 = vpop.xlane.xlu2 %3070  ;;  %3094 = vmax.xlane.f32.xlu1 %v3093_v12  ;;  %4329 = vst.msk [vmem:[%s6338_s8 + $0x78] sm:$0xff] %vm1305_vm3, %v4265_v23  ;;  %v1526_v12 = vsub.f32 %v9671_v55, %v6840_v45  ;;  %v2149_v23 = vor.u32 1.1754944e-38, %v2148_v20  ;;  %v3096_v50 = vsel %vm1305_vm3, %v7163_v7, -inf }
 0x2d0   : > { %v7190_v62 = vsel %vm1305_vm3, %v3254_v19, 2147483647  ;;  %v3473_v45 = vcvt.s32.f32 %v3471_v3  ;;  %5092 = vpow2.f32 %v1616_v24  ;;  %v3362_v24 = vcvt.f32.s32 %v6390_v30  ;;  %v9678_v30 = vld [vmem:[#allocation72_spill] sm:$0xff] }
 0x2d1   : > { %v2141_v38 = vadd.f32 %v5091_v21, %v2140_v47  ;;  %9673 = vst [vmem:[#allocation12_spill] sm:$0xff] %v7190_v62  ;;  %v1618_v27 = vmul.f32 1.442695, %v1526_v12  ;;  %v3712_v19 = vshra.s32 %v7190_v62, 16  ;;  %vm3492_vm13 = vcmp.eq.f32.partialorder %v9678_v30, %v6871_v42 }
 0x2d2   : > { %v3345_v31 = vpop.xlane.xlu1 %3344  ;;  %v3478_v55 = vsel %vm3477_vm11, %v3473_v45, inf  ;;  %v3363_v45 = vshll.u32 %v3362_v24, 16 }
 0x2d3   : > { %v2145_v17 = vsel %vm2144_vm10, %v5091_v21, %v2141_v38  ;;  %v3346_v41 = vcvt.f32.s32 %v3345_v31  ;;  %v7192_v46 = vpop.xlane.xlu0 %1406  ;;  %v1175_v21 = vpop.f32.mrf.mxu2  ;;  %5094 = vpow2.f32 %v1618_v27 }
 0x2d4   : > { %v2150_v47 = vsel %vm2147_vm12, %v2149_v23, %v2145_v17  ;;  %3097 = vmax.xlane.f32.xlu2 %v3096_v50  ;;  %v9674_v50 = vld [vmem:[#allocation15_spill] sm:$0xff]  ;;  %v7208_v23 = vadd.f32 %v1175_v21, %v5423_v18  ;;  %v7212_v17 = vcvt.s32.f32 %v3712_v19  ;;  %vm3193_vm12 = vcmp.eq.f32.partialorder %v6452_v1, %v7028_v58 }
 0x2d5   : > { %v2151_v20 = vmul.f32 %v6524_v8, %v2150_v47  ;;  %v3349_v4 = vadd.s32 %v3348_v35, %v3346_v41  ;;  %v9675_v8 = vld [vmem:[#allocation68_spill] sm:$0xff] }
 0x2d6   : > { %v3486_v35 = vand.u32 65535, %v9675_v8  ;;  %9676 = vst [vmem:[#allocation60_spill] sm:$0xff] %v7208_v23  ;;  %v7214_v41 = vpop.eup %5092 }
 0x2d7   : > { %v4885_v44 = vadd.s32 4294967294, %v3349_v4  ;;  %1433 = vmax.xlane.f32.xlu0 %v1432_v32  ;;  %v7198_v38 = vpop.xlane.xlu2 %3580  ;;  %3479 = vmin.xlane.f32.xlu1 %v3478_v55  ;;  %v4267_v3 = vsel %vm1240_vm2, %v2151_v20, %v9674_v50  ;;  %9677 = vst [vmem:[#allocation66_spill] sm:$0xff] %v7212_v17  ;;  %v9679_v20 = vld [vmem:[#allocation74_spill] sm:$0xff]  ;;  %v7227_v55 = vsel %vm1240_vm2, %v7208_v23, -1e+30  ;;  %v2885_v50 = vld [vmem:[%s5430_s29 + $0x158] sm:$0xff] }
 0x2d8   : > { %4331 = vst.msk [vmem:[%s6338_s8 + $0x88] sm:$0xff] %vm1305_vm3, %v4267_v3  ;;  %v1527_v4 = vsub.f32 %v9679_v20, %v6896_v16  ;;  %v3488_v32 = vcvt.s32.f32 %v3486_v35  ;;  %v9681_v3 = vld [vmem:[#allocation76_spill] sm:$0xff]  ;;  %v7240_v30 = vadd.f32 %v2885_v50, %v7227_v55  ;;  %v1435_v50 = vsel %vm1305_vm3, %v7227_v55, -inf  ;;  %v9685_v23 = vld [vmem:[#allocation82_spill] sm:$0xff] }
 0x2d9   : > { %v4445_v12 = vcvt.s32.f32 %v4885_v44  ;;  %9680 = vst [vmem:[#allocation63_spill] sm:$0xff] %v7227_v55  ;;  %v1771_v44 = vsel %vm1305_vm3, %v7214_v41, 0.0  ;;  %vm3191_vm14 = vcmp.eq.f32.partialorder %v9681_v3, %v6915_v49  ;;  %v7236_v8 = vpop.eup %5094  ;;  %vm3507_vm1 = vcmp.eq.f32.partialorder %v9685_v23, %v6951_v13 }
 0x2da   : > { %v7210_v31 = vpop.xlane.xlu1 %1745  ;;  %v3493_v21 = vsel %vm3492_vm13, %v3488_v32, inf  ;;  %v1620_v35 = vmul.f32 1.442695, %v1527_v4  ;;  %9682 = vst [vmem:[#allocation59_spill] sm:$0xff] %v7240_v30  ;;  %v9683_v32 = vld [vmem:[#allocation78_spill] sm:$0xff]  ;;  %v3377_v4 = vcvt.f32.s32 %v6483_v56  ;;  %v3099_v56 = vsel %vm1305_vm3, %v7240_v30, -inf }
 0x2db   : > { %4510 = vst.msk [vmem:[%s6338_s8 + $0x18] sm:$0xff] %vm4506_vm4, %v4445_v12  ;;  %5096 = vrcp.f32 %v7210_v31  ;;  %v3360_v47 = vpop.xlane.xlu0 %3359  ;;  %vm2157_vm5 = vweird.f32 %v7210_v31 }
 0x2dc   : > { %v3361_v27 = vcvt.f32.s32 %v3360_v47  ;;  %3715 = vmin.xlane.f32.xlu2 %v7212_v17  ;;  %v1178_v47 = vpop.f32.mrf.mxu2 }
 0x2de   : > { %v3364_v19 = vadd.s32 %v3363_v45, %v3361_v27  ;;  %v3255_v45 = vsel %vm3191_vm14, %v5420_v15, 10 }
 0x2df   : > { %3494 = vmin.xlane.f32.xlu0 %v3493_v21  ;;  %v7234_v16 = vpop.xlane.xlu2 %1748  ;;  %1772 = vadd.xlane.f32.xlu1 %v1771_v44  ;;  %v3501_v21 = vand.u32 65535, %v9683_v32  ;;  %v2163_v32 = vand.u32 2147483648, %v7210_v31 }
 0x2e0   : > { %v4886_v24 = vadd.s32 4294967294, %v3364_v19  ;;  %5098 = vrcp.f32 %v7234_v16  ;;  %v1774_v19 = vsel %vm1305_vm3, %v7236_v8, 0.0  ;;  %vm2172_vm9 = vweird.f32 %v7234_v16 }
 0x2e1   : > { %v5097_v12 = vpop.eup %5096  ;;  %5100 = vpow2.f32 %v1620_v35  ;;  %v9686_v35 = vld [vmem:[#allocation81_spill] sm:$0xff]  ;;  %v3503_v30 = vcvt.s32.f32 %v3501_v21  ;;  %v2178_v21 = vand.u32 2147483648, %v7234_v16 }
 0x2e2   : > { %v2153_v49 = vmul.f32 %v5097_v12, %v7210_v31  ;;  %v4446_v20 = vcvt.s32.f32 %v4886_v24  ;;  %v7244_v27 = vpop.xlane.xlu1 %1409  ;;  %v7257_v24 = vsel %vm1305_vm3, %v3255_v45, 2147483647  ;;  %vm3192_vm15 = vcmp.eq.f32.partialorder %v9686_v35, %v6980_v43 }
 0x2e3   : > { %v7248_v44 = vpop.xlane.xlu0 %3073  ;;  %9684 = vst [vmem:[#allocation70_spill] sm:$0xff] %v7257_v24  ;;  %vm2158_vm0 = vweird.f32 %v5097_v12  ;;  %v7268_v45 = vadd.f32 %v1178_v47, %v5423_v18  ;;  %v3727_v43 = vshra.s32 %v7257_v24, 16  ;;  %v2164_v35 = vor.u32 1.1754944e-38, %v2163_v32 }
 0x2e4   : > { %v2154_v3 = vsub.f32 1.0, %v2153_v49  ;;  %4511 = vst.msk [vmem:[%s6338_s8 + $0x20] sm:$0xff] %vm4506_vm4, %v4446_v20  ;;  %1775 = vadd.xlane.f32.xlu2 %v1774_v19  ;;  %v2161_v20 = vand.u32 2147483647, %v7210_v31  ;;  %v3378_v19 = vshll.u32 %v3377_v4, 16  ;;  %vm2159_vm6 = vmor %vm2157_vm5, %vm2158_vm0  ;;  %v3508_v47 = vsel %vm3507_vm1, %v3503_v30, inf }
 0x2e5   : > { %9687 = vst [vmem:[#allocation13_spill] sm:$0xff] %v7268_v45  ;;  %v2176_v32 = vand.u32 2147483647, %v7234_v16 }
 0x2e6   : > { %v5099_v54 = vpop.eup %5098  ;;  %v2155_v49 = vmul.f32 %v5097_v12, %v2154_v3  ;;  %v3256_v3 = vsel %vm3192_vm15, %v5420_v15, 10  ;;  %vm2162_vm7 = vcmp.eq.f32.partialorder %v2161_v20, 8.507059e+37  ;;  %vm3522_vm15 = vcmp.eq.f32.partialorder %v6421_v10, %v7000_v9 }
 0x2e7   : > { %v2168_v55 = vmul.f32 %v5099_v54, %v7234_v16  ;;  %3100 = vmax.xlane.f32.xlu0 %v3099_v56  ;;  %v3375_v17 = vpop.xlane.xlu2 %3374  ;;  %1436 = vmax.xlane.f32.xlu1 %v1435_v50  ;;  %v7277_v29 = vpop.eup %5100  ;;  %vm2173_vm8 = vweird.f32 %v5099_v54  ;;  %v7293_v20 = vsel %vm1305_vm3, %v3256_v3, 2147483647  ;;  %v7301_v16 = vsel %vm1240_vm2, %v7268_v45, -1e+30 }
 0x2e8   : > { %v2156_v7 = vadd.f32 %v5097_v12, %v2155_v49  ;;  %v3376_v62 = vcvt.f32.s32 %v3375_v17  ;;  %v1181_v17 = vpop.f32.mrf.mxu2  ;;  %9690 = vst [vmem:[#allocation67_spill] sm:$0xff] %v7293_v20  ;;  %vm2174_vm10 = vmor %vm2172_vm9, %vm2173_vm8  ;;  %vm2177_vm11 = vcmp.eq.f32.partialorder %v2176_v32, 8.507059e+37 }
 0x2e9   : > { %v2169_v4 = vsub.f32 1.0, %v2168_v55  ;;  %9692 = vst [vmem:[#allocation69_spill] sm:$0xff] %v7301_v16 }
 0x2ea   : > { %v2160_v56 = vsel %vm2159_vm6, %v5097_v12, %v2156_v7  ;;  %v3379_v50 = vadd.s32 %v3378_v19, %v3376_v62  ;;  %v7280_v31 = vpop.xlane.xlu1 %3595  ;;  %v1777_v62 = vsel %vm1305_vm3, %v7277_v29, 0.0  ;;  %v7290_v12 = vcvt.s32.f32 %v3727_v43 }
 0x2eb   : > { %9688 = vst [vmem:[#allocation64_spill] sm:$0xff] %v7280_v31  ;;  %v2165_v49 = vsel %vm2162_vm7, %v2164_v35, %v2160_v56  ;;  %v2170_v24 = vmul.f32 %v5099_v54, %v2169_v4  ;;  %v7283_v55 = vpop.xlane.xlu0 %1751  ;;  %v9691_v35 = vld [vmem:[#allocation16_spill] sm:$0xff]  ;;  %v7304_v4 = vadd.f32 %v1181_v17, %v5423_v18 }
 0x2ec   : > { %v2166_v23 = vmul.f32 %v6640_v14, %v2165_v49  ;;  %v4887_v30 = vadd.s32 4294967294, %v3379_v50  ;;  %5102 = vrcp.f32 %v7283_v55  ;;  %3509 = vmin.xlane.f32.xlu2 %v3508_v47  ;;  %9689 = vst [vmem:[#allocation14_spill] sm:$0xff] %v7290_v12  ;;  %v2179_v14 = vor.u32 1.1754944e-38, %v2178_v21  ;;  %v2886_v47 = vld [vmem:[%s5430_s29 + $0x160] sm:$0xff] }
 0x2ed   : > { %v2171_v7 = vadd.f32 %v5099_v54, %v2170_v24  ;;  %9693 = vst [vmem:[#allocation15_spill] sm:$0xff] %v7304_v4  ;;  %v3742_v50 = vshra.s32 %v7293_v20, 16  ;;  %v7324_v32 = vsel %vm1240_vm2, %v7304_v4, -1e+30  ;;  %v2193_v4 = vand.u32 2147483648, %v7283_v55 }
 0x2ee   : > { %v4447_v19 = vcvt.s32.f32 %v4887_v30  ;;  %v4268_v24 = vsel %vm1240_vm2, %v2166_v23, %v9691_v35  ;;  %9695 = vst [vmem:[#allocation72_spill] sm:$0xff] %v7324_v32  ;;  %v2191_v1 = vand.u32 2147483647, %v7283_v55  ;;  %vm2187_vm14 = vweird.f32 %v7283_v55 }
 0x2ef   : > { %v2175_v43 = vsel %vm2174_vm10, %v5099_v54, %v2171_v7  ;;  %1778 = vadd.xlane.f32.xlu0 %v1777_v62  ;;  %v7306_v3 = vpop.xlane.xlu2 %1412  ;;  %3730 = vmin.xlane.f32.xlu1 %v7290_v12  ;;  %4332 = vst.msk [vmem:[%s6338_s8 + $0x90] sm:$0xff] %vm1305_vm3, %v4268_v24  ;;  %v7319_v54 = vadd.f32 %v2886_v47, %v7301_v16  ;;  %v2887_v7 = vld [vmem:[%s5430_s29 + $0x168] sm:$0xff]  ;;  %v3392_v62 = vcvt.f32.s32 %v6528_v34  ;;  %v1441_v10 = vsel %vm1305_vm3, %v7324_v32, -inf }
 0x2f0   : > { %v2180_v56 = vsel %vm2177_vm11, %v2179_v14, %v2175_v43  ;;  %4512 = vst.msk [vmem:[%s6338_s8 + $0x28] sm:$0xff] %vm4506_vm4, %v4447_v19  ;;  %v9696_v14 = vld [vmem:[#allocation77_spill] sm:$0xff]  ;;  %v1184_v35 = vpop.f32.mrf.mxu2  ;;  %v7337_v43 = vcvt.s32.f32 %v3742_v50  ;;  %v9698_v47 = vld [vmem:[#allocation19_spill] sm:$0xff]  ;;  %v7346_v45 = vadd.f32 %v2887_v7, %v7324_v32  ;;  %v3257_v50 = vsel %vm3193_vm12, %v5420_v15, 10 }
 0x2f1   : > { %v2181_v21 = vmul.f32 %v6673_v59, %v2180_v56  ;;  %9694 = vst [vmem:[#allocation68_spill] sm:$0xff] %v7319_v54  ;;  %v1438_v59 = vsel %vm1305_vm3, %v7301_v16, -inf  ;;  %v1528_v19 = vsub.f32 %v9696_v14, %v6922_v33  ;;  %v3102_v34 = vsel %vm1305_vm3, %v7319_v54, -inf }
 0x2f2   : > { %v5103_v17 = vpop.eup %5102  ;;  %v7316_v49 = vpop.xlane.xlu1 %3076  ;;  %9697 = vst [vmem:[#allocation74_spill] sm:$0xff] %v7337_v43  ;;  %v1529_v7 = vsub.f32 %v6432_v48, %v7022_v11  ;;  %vm2192_vm0 = vcmp.eq.f32.partialorder %v2191_v1, 8.507059e+37 }
 0x2f3   : > { %v2183_v23 = vmul.f32 %v5103_v17, %v7283_v55  ;;  %v7327_v30 = vpop.xlane.xlu0 %3610  ;;  %v4269_v56 = vsel %vm1240_vm2, %v2181_v21, %v9698_v47  ;;  %9699 = vst [vmem:[#allocation76_spill] sm:$0xff] %v7346_v45  ;;  %vm2188_vm13 = vweird.f32 %v5103_v17  ;;  %v3516_v21 = vand.u32 65535, %v6382_v61 }
 0x2f4   : > { %1439 = vmax.xlane.f32.xlu2 %v1438_v59  ;;  %4333 = vst.msk [vmem:[%s6338_s8 + $0x98] sm:$0xff] %vm1305_vm3, %v4269_v56  ;;  %v1622_v59 = vmul.f32 1.442695, %v1528_v19  ;;  %vm2189_vm1 = vmor %vm2187_vm14, %vm2188_vm13  ;;  %v3105_v56 = vsel %vm1305_vm3, %v7346_v45, -inf  ;;  %v7364_v61 = vsel %vm1305_vm3, %v3257_v50, 2147483647 }
 0x2f5   : > { %v2184_v24 = vsub.f32 1.0, %v2183_v23  ;;  %v3393_v23 = vshll.u32 %v3392_v62, 16  ;;  %9700 = vst [vmem:[#allocation78_spill] sm:$0xff] %v7364_v61  ;;  %v3518_v48 = vcvt.s32.f32 %v3516_v21  ;;  %v3757_v50 = vshra.s32 %v7364_v61, 16  ;;  %v9701_v21 = vld [vmem:[#allocation24_spill] sm:$0xff] }
 0x2f6   : > { %5104 = vpow2.f32 %v1622_v59 }
 0x2f7   : > { %v2185_v33 = vmul.f32 %v5103_v17, %v2184_v24  ;;  %3745 = vmin.xlane.f32.xlu0 %v7337_v43  ;;  %v7352_v58 = vpop.xlane.xlu2 %3079  ;;  %3103 = vmax.xlane.f32.xlu1 %v3102_v34  ;;  %v2194_v24 = vor.u32 1.1754944e-38, %v2193_v4  ;;  %v3523_v43 = vsel %vm3522_vm15, %v3518_v48, inf }
 0x2f9   : > { %v2186_v14 = vadd.f32 %v5103_v17, %v2185_v33  ;;  %v1624_v33 = vmul.f32 1.442695, %v1529_v7 }
 0x2fa   : > { %v3390_v47 = vpop.xlane.xlu1 %3389 }
 0x2fb   : > { %v2190_v62 = vsel %vm2189_vm1, %v5103_v17, %v2186_v14  ;;  %v3391_v19 = vcvt.f32.s32 %v3390_v47  ;;  %v7366_v34 = vpop.xlane.xlu0 %1415  ;;  %v1187_v17 = vpop.f32.mrf.mxu2  ;;  %5106 = vpow2.f32 %v1624_v33  ;;  %v2888_v33 = vld [vmem:[%s5430_s29 + $0x170] sm:$0xff] }
 0x2fc   : > { %v2195_v55 = vsel %vm2192_vm0, %v2194_v24, %v2190_v62  ;;  %3106 = vmax.xlane.f32.xlu2 %v3105_v56  ;;  %v7382_v24 = vadd.f32 %v1184_v35, %v5423_v18  ;;  %v7386_v56 = vcvt.s32.f32 %v3757_v50 }
 0x2fd   : > { %v2196_v11 = vmul.f32 %v6714_v51, %v2195_v55  ;;  %v3394_v4 = vadd.s32 %v3393_v23, %v3391_v19  ;;  %v3531_v51 = vand.u32 65535, %v6414_v53  ;;  %v3407_v23 = vcvt.f32.s32 %v6549_v5  ;;  %v9704_v5 = vld [vmem:[#allocation84_spill] sm:$0xff] }
 0x2fe   : > { %9702 = vst [vmem:[#allocation82_spill] sm:$0xff] %v7382_v24  ;;  %vm3537_vm5 = vcmp.eq.f32.partialorder %v9704_v5, %v7012_v2  ;;  %v7399_v55 = vsel %vm1240_vm2, %v7382_v24, -1e+30 }
 0x2ff   : > { %v4888_v1 = vadd.s32 4294967294, %v3394_v4  ;;  %1442 = vmax.xlane.f32.xlu0 %v1441_v10  ;;  %v7372_v14 = vpop.xlane.xlu2 %3625  ;;  %3524 = vmin.xlane.f32.xlu1 %v3523_v43  ;;  %v4270_v59 = vsel %vm1240_vm2, %v2196_v11, %v9701_v21  ;;  %9703 = vst [vmem:[#allocation81_spill] sm:$0xff] %v7386_v56  ;;  %v7388_v43 = vpop.eup %5104  ;;  %v3408_v62 = vshll.u32 %v3407_v23, 16  ;;  %v3533_v35 = vcvt.s32.f32 %v3531_v51 }
 0x300   : > { %4334 = vst.msk [vmem:[%s6338_s8 + $0xa0] sm:$0xff] %vm1305_vm3, %v4270_v59  ;;  %v1780_v4 = vsel %vm1305_vm3, %v7388_v43, 0.0  ;;  %v7413_v23 = vadd.f32 %v2888_v33, %v7399_v55 }
 0x301   : > { %v4448_v7 = vcvt.s32.f32 %v4888_v1  ;;  %9705 = vst [vmem:[#allocation16_spill] sm:$0xff] %v7399_v55  ;;  %v3538_v11 = vsel %vm3537_vm5, %v3533_v35, inf  ;;  %v7406_v50 = vpop.eup %5106  ;;  %v7409_v1 = vadd.f32 %v1187_v17, %v5423_v18  ;;  %v9709_v35 = vld [vmem:[#allocation3_spill] sm:$0xff] }
 0x302   : > { %v7384_v47 = vpop.xlane.xlu1 %1754  ;;  %9707 = vst [vmem:[#allocation19_spill] sm:$0xff] %v7413_v23  ;;  %v3422_v17 = vcvt.f32.s32 %v9709_v35  ;;  %v9712_v35 = vld [vmem:[#allocation87_spill] sm:$0xff]  ;;  %v3108_v32 = vsel %vm1305_vm3, %v7413_v23, -inf }
 0x303   : > { %4513 = vst.msk [vmem:[%s6338_s8 + $0x30] sm:$0xff] %vm4506_vm4, %v4448_v7  ;;  %5108 = vrcp.f32 %v7384_v47  ;;  %v3405_v53 = vpop.xlane.xlu0 %3404  ;;  %v1190_v51 = vpop.f32.mrf.mxu2  ;;  %v1530_v24 = vsub.f32 %v9712_v35, %v7125_v25  ;;  %vm2202_vm8 = vweird.f32 %v7384_v47 }
 0x304   : > { %v3406_v19 = vcvt.f32.s32 %v3405_v53  ;;  %3760 = vmin.xlane.f32.xlu2 %v7386_v56  ;;  %9706 = vst [vmem:[#allocation77_spill] sm:$0xff] %v7409_v1  ;;  %v7430_v33 = vadd.f32 %v1190_v51, %v5423_v18  ;;  %v2208_v56 = vand.u32 2147483648, %v7384_v47  ;;  %v2206_v51 = vand.u32 2147483647, %v7384_v47 }
 0x305   : > { %v1626_v20 = vmul.f32 1.442695, %v1530_v24 }
 0x306   : > { %v3409_v48 = vadd.s32 %v3408_v62, %v3406_v19  ;;  %v9708_v62 = vld [vmem:[#allocation85_spill] sm:$0xff]  ;;  %9711 = vst [vmem:[#allocation84_spill] sm:$0xff] %v7430_v33  ;;  %vm2207_vm10 = vcmp.eq.f32.partialorder %v2206_v51, 8.507059e+37 }
 0x307   : > { %3539 = vmin.xlane.f32.xlu0 %v3538_v11  ;;  %v7404_v10 = vpop.xlane.xlu2 %1757  ;;  %1781 = vadd.xlane.f32.xlu1 %v1780_v4  ;;  %v3546_v19 = vand.u32 65535, %v9708_v62  ;;  %v7427_v4 = vsel %vm1240_vm2, %v7409_v1, -1e+30  ;;  %v2889_v62 = vld [vmem:[%s5430_s29 + $0x178] sm:$0xff]  ;;  %v1444_v1 = vsel %vm1305_vm3, %v7399_v55, -inf }
 0x308   : > { %v4889_v21 = vadd.s32 4294967294, %v3409_v48  ;;  %5110 = vrcp.f32 %v7404_v10  ;;  %v1783_v48 = vsel %vm1305_vm3, %v7406_v50, 0.0  ;;  %9710 = vst [vmem:[#allocation24_spill] sm:$0xff] %v7427_v4  ;;  %v7447_v23 = vadd.f32 %v2889_v62, %v7427_v4 }
 0x309   : > { %v5109_v59 = vpop.eup %5108  ;;  %v3548_v35 = vcvt.s32.f32 %v3546_v19  ;;  %v2223_v62 = vand.u32 2147483648, %v7404_v10  ;;  %v2221_v24 = vand.u32 2147483647, %v7404_v10  ;;  %vm2217_vm12 = vweird.f32 %v7404_v10 }
 0x30a   : > { %v2198_v7 = vmul.f32 %v5109_v59, %v7384_v47  ;;  %v4449_v53 = vcvt.s32.f32 %v4889_v21  ;;  %v7416_v5 = vpop.xlane.xlu1 %1418  ;;  %vm2203_vm6 = vweird.f32 %v5109_v59  ;;  %9714 = vst [vmem:[#allocation85_spill] sm:$0xff] %v7447_v23 }
 0x30b   : > { %v7420_v11 = vpop.xlane.xlu0 %3082  ;;  %vm2204_vm9 = vmor %vm2202_vm8, %vm2203_vm6  ;;  %vm2222_vm1 = vcmp.eq.f32.partialorder %v2221_v24, 8.507059e+37 }
 0x30c   : > { %v2199_v21 = vsub.f32 1.0, %v2198_v7  ;;  %4514 = vst.msk [vmem:[%s6338_s8 + $0x38] sm:$0xff] %vm4506_vm4, %v4449_v53  ;;  %1784 = vadd.xlane.f32.xlu2 %v1783_v48  ;;  %v9713_v7 = vld [vmem:[#allocation88_spill] sm:$0xff]  ;;  %v3423_v53 = vshll.u32 %v3422_v17, 16  ;;  %v2209_v17 = vor.u32 1.1754944e-38, %v2208_v56  ;;  %v9716_v56 = vld [vmem:[#allocation34_spill] sm:$0xff] }
 0x30d   : > { %vm3552_vm7 = vcmp.eq.f32.partialorder %v9713_v7, %v7095_v36 }
 0x30e   : > { %v5111_v45 = vpop.eup %5110  ;;  %v2200_v61 = vmul.f32 %v5109_v59, %v2199_v21  ;;  %v7452_v21 = vsel %vm1240_vm2, %v7430_v33, -1e+30 }
 0x30f   : > { %v2213_v48 = vmul.f32 %v5111_v45, %v7404_v10  ;;  %3109 = vmax.xlane.f32.xlu0 %v3108_v32  ;;  %v3420_v25 = vpop.xlane.xlu2 %3419  ;;  %1445 = vmax.xlane.f32.xlu1 %v1444_v1  ;;  %9715 = vst [vmem:[#allocation3_spill] sm:$0xff] %v7452_v21  ;;  %v3553_v1 = vsel %vm3552_vm7, %v3548_v35, inf  ;;  %vm2218_vm11 = vweird.f32 %v5111_v45  ;;  %v1450_v7 = vsel %vm1305_vm3, %v7452_v21, -inf  ;;  %v9718_v35 = vld [vmem:[#allocation91_spill] sm:$0xff]  ;;  %v9719_v10 = vld [vmem:[#allocation89_spill] sm:$0xff] }
 0x310   : > { %v2201_v55 = vadd.f32 %v5109_v59, %v2200_v61  ;;  %v3421_v54 = vcvt.f32.s32 %v3420_v25  ;;  %vm2219_vm13 = vmor %vm2217_vm12, %vm2218_vm11  ;;  %vm3194_vm14 = vcmp.eq.f32.partialorder %v9718_v35, %v7134_v37 }
 0x311   : > { %v2214_v32 = vsub.f32 1.0, %v2213_v48  ;;  %v3258_v37 = vsel %vm3194_vm14, %v5420_v15, 10 }
 0x312   : > { %v2205_v19 = vsel %vm2204_vm9, %v5109_v59, %v2201_v55  ;;  %v3424_v16 = vadd.s32 %v3423_v53, %v3421_v54  ;;  %v7460_v33 = vpop.xlane.xlu1 %3640  ;;  %v3111_v54 = vsel %vm1305_vm3, %v7447_v23, -inf  ;;  %v2224_v59 = vor.u32 1.1754944e-38, %v2223_v62  ;;  %v9717_v53 = vld [vmem:[#allocation26_spill] sm:$0xff] }
 0x313   : > { %v2210_v61 = vsel %vm2207_vm10, %v2209_v17, %v2205_v19  ;;  %v2215_v12 = vmul.f32 %v5111_v45, %v2214_v32  ;;  %v7463_v47 = vpop.xlane.xlu0 %1760  ;;  %v3561_v17 = vand.u32 65535, %v9719_v10  ;;  %v7505_v35 = vsel %vm1305_vm3, %v3258_v37, 2147483647 }
 0x314   : > { %v2211_v48 = vmul.f32 %v9716_v56, %v2210_v61  ;;  %v4890_v25 = vadd.s32 4294967294, %v3424_v16  ;;  %5112 = vrcp.f32 %v7463_v47  ;;  %3554 = vmin.xlane.f32.xlu2 %v3553_v1  ;;  %v9720_v1 = vld [vmem:[#allocation7_spill] sm:$0xff]  ;;  %v2238_v10 = vand.u32 2147483648, %v7463_v47 }
 0x315   : > { %5114 = vpow2.f32 %v1626_v20  ;;  %v2216_v55 = vadd.f32 %v5111_v45, %v2215_v12  ;;  %vm2232_vm6 = vweird.f32 %v7463_v47 }
 0x316   : > { %v4450_v51 = vcvt.s32.f32 %v4890_v25  ;;  %v4271_v16 = vsel %vm1240_vm2, %v2211_v48, %v9717_v53  ;;  %v1447_v48 = vsel %vm1305_vm3, %v7427_v4, -inf  ;;  %v9722_v25 = vld [vmem:[#allocation92_spill] sm:$0xff] }
 0x317   : > { %v2220_v12 = vsel %vm2219_vm13, %v5111_v45, %v2216_v55  ;;  %1451 = vmax.xlane.f32.xlu0 %v1450_v7  ;;  %v7477_v20 = vpop.xlane.xlu2 %1421  ;;  %3112 = vmax.xlane.f32.xlu1 %v3111_v54  ;;  %4335 = vst.msk [vmem:[%s6338_s8 + $0xa8] sm:$0xff] %vm1305_vm3, %v4271_v16  ;;  %vm3567_vm15 = vcmp.eq.f32.partialorder %v9722_v25, %v7145_v22  ;;  %v2890_v55 = vld [vmem:[%s5430_s29 + $0x180] sm:$0xff]  ;;  %v9723_v54 = vld [vmem:[#allocation32_spill] sm:$0xff]  ;;  %v9724_v7 = vld [vmem:[#allocation23_spill] sm:$0xff]  ;;  %v1193_v16 = vpop.f32.mrf.mxu2 }
 0x318   : > { %v2225_v32 = vsel %vm2222_vm1, %v2224_v59, %v2220_v12  ;;  %4515 = vst.msk [vmem:[%s6338_s8 + $0x40] sm:$0xff] %vm4506_vm4, %v4450_v51  ;;  %v3563_v51 = vcvt.s32.f32 %v3561_v17  ;;  %v3437_v53 = vcvt.f32.s32 %v9724_v7  ;;  %v7511_v25 = vadd.f32 %v2890_v55, %v7452_v21  ;;  %v9726_v17 = vld [vmem:[#allocation93_spill] sm:$0xff] }
 0x319   : > { %v2226_v19 = vmul.f32 %v9720_v1, %v2225_v32  ;;  %vm3195_vm0 = vcmp.eq.f32.partialorder %v9726_v17, %v7170_v39  ;;  %v2239_v39 = vor.u32 1.1754944e-38, %v2238_v10  ;;  %v9731_v10 = vld [vmem:[#allocation17_spill] sm:$0xff] }
 0x31a   : > { %v5113_v62 = vpop.eup %5112  ;;  %v7486_v45 = vpop.xlane.xlu1 %3085  ;;  %v3568_v1 = vsel %vm3567_vm15, %v3563_v51, inf  ;;  %9725 = vst [vmem:[#allocation88_spill] sm:$0xff] %v7511_v25  ;;  %v3438_v55 = vshll.u32 %v3437_v53, 16  ;;  %v3259_v51 = vsel %vm3195_vm0, %v5420_v15, 10  ;;  %v3114_v17 = vsel %vm1305_vm3, %v7511_v25, -inf  ;;  %v9732_v25 = vld [vmem:[#allocation21_spill] sm:$0xff] }
 0x31b   : > { %v7488_v61 = vpop.eup %5114  ;;  %v2228_v24 = vmul.f32 %v5113_v62, %v7463_v47  ;;  %v7491_v56 = vpop.xlane.xlu0 %3655  ;;  %v4272_v59 = vsel %vm1240_vm2, %v2226_v19, %v9723_v54  ;;  %vm2233_vm5 = vweird.f32 %v5113_v62  ;;  %vm3196_vm10 = vcmp.eq.f32.partialorder %v9732_v25, %v7248_v44 }
 0x31c   : > { %9721 = vst [vmem:[#allocation87_spill] sm:$0xff] %v7488_v61  ;;  %1448 = vmax.xlane.f32.xlu2 %v1447_v48  ;;  %v1786_v32 = vsel %vm1305_vm3, %v7488_v61, 0.0  ;;  %v2236_v48 = vand.u32 2147483647, %v7463_v47  ;;  %vm2234_vm7 = vmor %vm2232_vm6, %vm2233_vm5  ;;  %v1531_v61 = vsub.f32 %v9731_v10, %v7192_v46  ;;  %v9736_v46 = vld [vmem:[#allocation39_spill] sm:$0xff]  ;;  %v3260_v25 = vsel %vm3196_vm10, %v5420_v15, 10 }
 0x31d   : > { %4336 = vst.msk [vmem:[%s6338_s8 + $0xb0] sm:$0xff] %vm1305_vm3, %v4272_v59  ;;  %v2229_v12 = vsub.f32 1.0, %v2228_v24  ;;  %v9727_v24 = vld [vmem:[#allocation18_spill] sm:$0xff]  ;;  %v3772_v59 = vshra.s32 %v7505_v35, 16 }
 0x31e   : > { %v3576_v54 = vand.u32 65535, %v9727_v24  ;;  %vm2237_vm8 = vcmp.eq.f32.partialorder %v2236_v48, 8.507059e+37  ;;  %v9728_v24 = vld [vmem:[#allocation20_spill] sm:$0xff] }
 0x31f   : > { %v2230_v19 = vmul.f32 %v5113_v62, %v2229_v12  ;;  %1787 = vadd.xlane.f32.xlu0 %v1786_v32  ;;  %v7516_v37 = vpop.xlane.xlu2 %3088  ;;  %3569 = vmin.xlane.f32.xlu1 %v3568_v1  ;;  %vm3582_vm9 = vcmp.eq.f32.partialorder %v9728_v24, %v7198_v38  ;;  %v7529_v4 = vcvt.s32.f32 %v3772_v59 }
 0x320   : > { %v3578_v53 = vcvt.s32.f32 %v3576_v54  ;;  %v1196_v54 = vpop.f32.mrf.mxu2 }
 0x321   : > { %v2231_v7 = vadd.f32 %v5113_v62, %v2230_v19  ;;  %v9729_v19 = vld [vmem:[#allocation25_spill] sm:$0xff]  ;;  %9730 = vst [vmem:[#allocation34_spill] sm:$0xff] %v7529_v4 }
 0x322   : > { %v3435_v12 = vpop.xlane.xlu1 %3434  ;;  %v3591_v23 = vand.u32 65535, %v9729_v19  ;;  %v3583_v24 = vsel %vm3582_vm9, %v3578_v53, inf }
 0x323   : > { %v2235_v32 = vsel %vm2234_vm7, %v5113_v62, %v2231_v7  ;;  %v3436_v21 = vcvt.f32.s32 %v3435_v12  ;;  %v7524_v1 = vpop.xlane.xlu0 %1424  ;;  %v9733_v62 = vld [vmem:[#allocation42_spill] sm:$0xff]  ;;  %v7537_v12 = vsel %vm1305_vm3, %v3259_v51, 2147483647 }
 0x324   : > { %v2240_v47 = vsel %vm2237_vm8, %v2239_v39, %v2235_v32  ;;  %3115 = vmax.xlane.f32.xlu2 %v3114_v17  ;;  %9734 = vst [vmem:[#allocation26_spill] sm:$0xff] %v7537_v12  ;;  %v7540_v39 = vadd.f32 %v1193_v16, %v5423_v18  ;;  %v1628_v16 = vmul.f32 1.442695, %v1531_v61  ;;  %v3593_v32 = vcvt.s32.f32 %v3591_v23 }
 0x325   : > { %v2241_v48 = vmul.f32 %v9733_v62, %v2240_v47  ;;  %v3439_v7 = vadd.s32 %v3438_v55, %v3436_v21  ;;  %v3452_v21 = vcvt.f32.s32 %v6707_v63  ;;  %v9737_v55 = vld [vmem:[#allocation27_spill] sm:$0xff]  ;;  %v3787_v19 = vshra.s32 %v7537_v12, 16 }
 0x326   : > { %9735 = vst [vmem:[#allocation91_spill] sm:$0xff] %v7540_v39  ;;  %vm3597_vm11 = vcmp.eq.f32.partialorder %v9737_v55, %v7280_v31  ;;  %v7560_v53 = vsel %vm1240_vm2, %v7540_v39, -1e+30  ;;  %v7563_v63 = vsel %vm1305_vm3, %v3260_v25, 2147483647  ;;  %v7578_v25 = vadd.f32 %v1196_v54, %v5423_v18  ;;  %v9748_v39 = vld [vmem:[#allocation4_spill] sm:$0xff] }
 0x327   : > { %v4891_v59 = vadd.s32 4294967294, %v3439_v7  ;;  %3584 = vmin.xlane.f32.xlu0 %v3583_v24  ;;  %v7542_v17 = vpop.xlane.xlu2 %3670  ;;  %3775 = vmin.xlane.f32.xlu1 %v7529_v4  ;;  %v4273_v44 = vsel %vm1240_vm2, %v2241_v48, %v9736_v46  ;;  %9738 = vst [vmem:[#allocation89_spill] sm:$0xff] %v7560_v53  ;;  %v3598_v10 = vsel %vm3597_vm11, %v3593_v32, inf  ;;  %v3453_v23 = vshll.u32 %v3452_v21, 16  ;;  %v2891_v46 = vld [vmem:[%s5430_s29 + $0x188] sm:$0xff] }
 0x328   : > { %4337 = vst.msk [vmem:[%s6338_s8 + $0xb8] sm:$0xff] %vm1305_vm3, %v4273_v44  ;;  %v7568_v48 = vcvt.s32.f32 %v3787_v19  ;;  %v1453_v24 = vsel %vm1305_vm3, %v7560_v53, -inf  ;;  %v7584_v19 = vadd.f32 %v2891_v46, %v7560_v53 }
 0x329   : > { %v4451_v51 = vcvt.s32.f32 %v4891_v59  ;;  %9739 = vst [vmem:[#allocation7_spill] sm:$0xff] %v7563_v63  ;;  %v3802_v59 = vshra.s32 %v7563_v63, 16 }
 0x32a   : > { %v7555_v47 = vpop.xlane.xlu1 %1763  ;;  %9740 = vst [vmem:[#allocation92_spill] sm:$0xff] %v7568_v48 }
 0x32b   : > { %4516 = vst.msk [vmem:[%s6338_s8 + $0x48] sm:$0xff] %vm4506_vm4, %v4451_v51  ;;  %5116 = vrcp.f32 %v7555_v47  ;;  %v3450_v61 = vpop.xlane.xlu0 %3449  ;;  %v9742_v51 = vld [vmem:[#allocation22_spill] sm:$0xff]  ;;  %v7589_v54 = vcvt.s32.f32 %v3802_v59  ;;  %v2892_v59 = vld [vmem:[%s5430_s29 + $0x190] sm:$0xff]  ;;  %v2253_v53 = vand.u32 2147483648, %v7555_v47  ;;  %vm2247_vm13 = vweird.f32 %v7555_v47 }
 0x32c   : > { %v3451_v62 = vcvt.f32.s32 %v3450_v61  ;;  %3599 = vmin.xlane.f32.xlu2 %v3598_v10  ;;  %5118 = vpow2.f32 %v1628_v16  ;;  %9741 = vst [vmem:[#allocation32_spill] sm:$0xff] %v7578_v25  ;;  %v1199_v16 = vpop.f32.mrf.mxu2  ;;  %v1532_v32 = vsub.f32 %v9742_v51, %v7244_v27  ;;  %v7599_v27 = vsel %vm1240_vm2, %v7578_v25, -1e+30 }
 0x32d   : > { %9743 = vst [vmem:[#allocation23_spill] sm:$0xff] %v7584_v19  ;;  %v7602_v46 = vadd.f32 %v1199_v16, %v5423_v18  ;;  %v2251_v16 = vand.u32 2147483647, %v7555_v47 }
 0x32e   : > { %v3454_v7 = vadd.s32 %v3453_v23, %v3451_v62  ;;  %9744 = vst [vmem:[#allocation93_spill] sm:$0xff] %v7589_v54 }
 0x32f   : > { %3790 = vmin.xlane.f32.xlu0 %v7568_v48  ;;  %v7575_v44 = vpop.xlane.xlu2 %1766  ;;  %1454 = vmax.xlane.f32.xlu1 %v1453_v24  ;;  %9746 = vst [vmem:[#allocation20_spill] sm:$0xff] %v7599_v27  ;;  %v3117_v48 = vsel %vm1305_vm3, %v7584_v19, -inf  ;;  %vm2252_vm1 = vcmp.eq.f32.partialorder %v2251_v16, 8.507059e+37  ;;  %v9753_v16 = vld [vmem:[#allocation30_spill] sm:$0xff] }
 0x330   : > { %v4892_v21 = vadd.s32 4294967294, %v3454_v7  ;;  %5120 = vrcp.f32 %v7575_v44  ;;  %v3467_v7 = vcvt.f32.s32 %v6805_v52  ;;  %9747 = vst [vmem:[#allocation25_spill] sm:$0xff] %v7602_v46  ;;  %v1533_v52 = vsub.f32 %v9748_v39, %v7306_v3 }
 0x331   : > { %v5117_v55 = vpop.eup %5116  ;;  %v1456_v3 = vsel %vm1305_vm3, %v7599_v27, -inf  ;;  %v7620_v39 = vadd.f32 %v2892_v59, %v7599_v27  ;;  %v2268_v59 = vand.u32 2147483648, %v7575_v44  ;;  %vm2262_vm0 = vweird.f32 %v7575_v44 }
 0x332   : > { %v2243_v61 = vmul.f32 %v5117_v55, %v7555_v47  ;;  %v4452_v10 = vcvt.s32.f32 %v4892_v21  ;;  %v7587_v23 = vpop.xlane.xlu1 %1427  ;;  %v7591_v62 = vpop.eup %5118  ;;  %v1630_v21 = vmul.f32 1.442695, %v1532_v32  ;;  %vm2248_vm12 = vweird.f32 %v5117_v55 }
 0x333   : > { %9745 = vst [vmem:[#allocation18_spill] sm:$0xff] %v7591_v62  ;;  %v7594_v24 = vpop.xlane.xlu0 %3091  ;;  %vm2249_vm14 = vmor %vm2247_vm13, %vm2248_vm12 }
 0x334   : > { %v2244_v51 = vsub.f32 1.0, %v2243_v61  ;;  %4517 = vst.msk [vmem:[%s6338_s8 + $0x50] sm:$0xff] %vm4506_vm4, %v4452_v10  ;;  %3805 = vmin.xlane.f32.xlu2 %v7589_v54  ;;  %v1789_v61 = vsel %vm1305_vm3, %v7591_v62, 0.0  ;;  %v3468_v10 = vshll.u32 %v3467_v7, 16  ;;  %5122 = vpow2.f32 %v1630_v21 }
 0x335   : > { %9749 = vst [vmem:[#allocation17_spill] sm:$0xff] %v7620_v39  ;;  %v1632_v62 = vmul.f32 1.442695, %v1533_v52 }
 0x336   : > { %v5121_v25 = vpop.eup %5120  ;;  %v2245_v63 = vmul.f32 %v5117_v55, %v2244_v51  ;;  %v7625_v51 = vsel %vm1240_vm2, %v7602_v46, -1e+30 }
 0x337   : > { %v2258_v54 = vmul.f32 %v5121_v25, %v7575_v44  ;;  %3118 = vmax.xlane.f32.xlu0 %v3117_v48  ;;  %v3465_v32 = vpop.xlane.xlu2 %3464  ;;  %1790 = vadd.xlane.f32.xlu1 %v1789_v61  ;;  %9750 = vst [vmem:[#allocation21_spill] sm:$0xff] %v7625_v51  ;;  %v2254_v48 = vor.u32 1.1754944e-38, %v2253_v53  ;;  %vm2263_vm15 = vweird.f32 %v5121_v25 }
 0x338   : > { %v2246_v19 = vadd.f32 %v5117_v55, %v2245_v63  ;;  %v3466_v7 = vcvt.f32.s32 %v3465_v32  ;;  %v2266_v63 = vand.u32 2147483647, %v7575_v44  ;;  %vm2264_vm5 = vmor %vm2262_vm0, %vm2263_vm15 }
 0x339   : > { %v2259_v61 = vsub.f32 1.0, %v2258_v54  ;;  %v1459_v54 = vsel %vm1305_vm3, %v7625_v51, -inf }
 0x33a   : > { %v2250_v4 = vsel %vm2249_vm14, %v5117_v55, %v2246_v19  ;;  %v3469_v27 = vadd.s32 %v3468_v10, %v3466_v7  ;;  %v7630_v12 = vpop.xlane.xlu1 %3685  ;;  %v2269_v55 = vor.u32 1.1754944e-38, %v2268_v59  ;;  %vm2267_vm7 = vcmp.eq.f32.partialorder %v2266_v63, 8.507059e+37 }
 0x33b   : > { %v2255_v31 = vsel %vm2252_vm1, %v2254_v48, %v2250_v4  ;;  %v2260_v46 = vmul.f32 %v5121_v25, %v2259_v61  ;;  %v7633_v47 = vpop.xlane.xlu0 %1769  ;;  %v3120_v4 = vsel %vm1305_vm3, %v7620_v39, -inf  ;;  %v3606_v10 = vand.u32 65535, %v9753_v16 }
 0x33c   : > { %v2256_v21 = vmul.f32 %v7017_v0, %v2255_v31  ;;  %v4893_v52 = vadd.s32 4294967294, %v3469_v27  ;;  %5124 = vrcp.f32 %v7633_v47  ;;  %1457 = vmax.xlane.f32.xlu2 %v1456_v3  ;;  %v9751_v0 = vld [vmem:[#allocation41_spill] sm:$0xff]  ;;  %v7645_v27 = vpop.eup %5122  ;;  %vm2277_vm11 = vweird.f32 %v7633_v47 }
 0x33d   : > { %5126 = vpow2.f32 %v1632_v62  ;;  %v2261_v53 = vadd.f32 %v5121_v25, %v2260_v46  ;;  %v9752_v62 = vld [vmem:[#allocation5_spill] sm:$0xff]  ;;  %v1792_v63 = vsel %vm1305_vm3, %v7645_v27, 0.0 }
 0x33e   : > { %v4453_v19 = vcvt.s32.f32 %v4893_v52  ;;  %v4274_v31 = vsel %vm1240_vm2, %v2256_v21, %v9751_v0  ;;  %vm3197_vm6 = vcmp.eq.f32.partialorder %v9752_v62, %v7316_v49  ;;  %v9754_v21 = vld [vmem:[#allocation28_spill] sm:$0xff]  ;;  %v2893_v52 = vld [vmem:[%s5430_s29 + $0x198] sm:$0xff] }
 0x33f   : > { %v2265_v44 = vsel %vm2264_vm5, %v5121_v25, %v2261_v53  ;;  %1460 = vmax.xlane.f32.xlu0 %v1459_v54  ;;  %v7649_v46 = vpop.xlane.xlu2 %1430  ;;  %3121 = vmax.xlane.f32.xlu1 %v3120_v4  ;;  %4338 = vst.msk [vmem:[%s6338_s8 + $0xc0] sm:$0xff] %vm1305_vm3, %v4274_v31  ;;  %v3261_v49 = vsel %vm3197_vm6, %v5420_v15, 10  ;;  %vm3612_vm8 = vcmp.eq.f32.partialorder %v9754_v21, %v7327_v30  ;;  %v9755_v53 = vld [vmem:[#allocation47_spill] sm:$0xff]  ;;  %v3608_v4 = vcvt.s32.f32 %v3606_v10  ;;  %v9758_v10 = vld [vmem:[#allocation38_spill] sm:$0xff] }
 0x340   : > { %v2270_v32 = vsel %vm2267_vm7, %v2269_v55, %v2265_v44  ;;  %4518 = vst.msk [vmem:[%s6338_s8 + $0x58] sm:$0xff] %vm4506_vm4, %v4453_v19  ;;  %v3482_v55 = vcvt.f32.s32 %v6848_v40  ;;  %v1202_v19 = vpop.f32.mrf.mxu2  ;;  %v7677_v54 = vsel %vm1305_vm3, %v3261_v49, 2147483647  ;;  %v2283_v31 = vand.u32 2147483648, %v7633_v47  ;;  %v9759_v49 = vld [vmem:[#allocation31_spill] sm:$0xff] }
 0x341   : > { %v2271_v3 = vmul.f32 %v7055_v6, %v2270_v32  ;;  %9756 = vst [vmem:[#allocation42_spill] sm:$0xff] %v7677_v54  ;;  %v3613_v44 = vsel %vm3612_vm8, %v3608_v4, inf  ;;  %v7683_v16 = vadd.f32 %v2893_v52, %v7625_v51  ;;  %vm3198_vm9 = vcmp.eq.f32.partialorder %v9758_v10, %v7352_v58  ;;  %v9760_v10 = vld [vmem:[#allocation54_spill] sm:$0xff] }
 0x342   : > { %v5125_v7 = vpop.eup %5124  ;;  %v7658_v25 = vpop.xlane.xlu1 %3094  ;;  %v2281_v40 = vand.u32 2147483647, %v7633_v47  ;;  %v3483_v52 = vshll.u32 %v3482_v55, 16  ;;  %v2284_v58 = vor.u32 1.1754944e-38, %v2283_v31  ;;  %vm3627_vm14 = vcmp.eq.f32.partialorder %v9760_v10, %v7372_v14  ;;  %v9763_v31 = vld [vmem:[#allocation6_spill] sm:$0xff] }
 0x343   : > { %v7660_v48 = vpop.eup %5126  ;;  %v2273_v61 = vmul.f32 %v5125_v7, %v7633_v47  ;;  %v7663_v59 = vpop.xlane.xlu0 %3700  ;;  %v4275_v6 = vsel %vm1240_vm2, %v2271_v3, %v9755_v53  ;;  %9757 = vst [vmem:[#allocation39_spill] sm:$0xff] %v7683_v16  ;;  %vm2278_vm10 = vweird.f32 %v5125_v7  ;;  %v3262_v53 = vsel %vm3198_vm9, %v5420_v15, 10 }
 0x344   : > { %1793 = vadd.xlane.f32.xlu2 %v1792_v63  ;;  %4339 = vst.msk [vmem:[%s6338_s8 + $0xc8] sm:$0xff] %vm1305_vm3, %v4275_v6  ;;  %v1795_v62 = vsel %vm1305_vm3, %v7660_v48, 0.0  ;;  %v3817_v63 = vshra.s32 %v7677_v54, 16  ;;  %vm2279_vm12 = vmor %vm2277_vm11, %vm2278_vm10  ;;  %v3123_v4 = vsel %vm1305_vm3, %v7683_v16, -inf  ;;  %vm2282_vm13 = vcmp.eq.f32.partialorder %v2281_v40, 8.507059e+37  ;;  %v9764_v16 = vld [vmem:[#allocation37_spill] sm:$0xff] }
 0x345   : > { %v2274_v0 = vsub.f32 1.0, %v2273_v61  ;;  %v3621_v61 = vand.u32 65535, %v9759_v49  ;;  %v1534_v51 = vsub.f32 %v9763_v31, %v7366_v34  ;;  %vm3199_vm1 = vcmp.eq.f32.partialorder %v9764_v16, %v7420_v11  ;;  %v9767_v34 = vld [vmem:[#allocation55_spill] sm:$0xff] }
 0x346   : > { %v7701_v54 = vcvt.s32.f32 %v3817_v63  ;;  %v3497_v11 = vcvt.f32.s32 %v6871_v42  ;;  %v3263_v16 = vsel %vm3199_vm1, %v5420_v15, 10 }
 0x347   : > { %v2275_v32 = vmul.f32 %v5125_v7, %v2274_v0  ;;  %1796 = vadd.xlane.f32.xlu0 %v1795_v62  ;;  %v7688_v3 = vpop.xlane.xlu2 %3097  ;;  %3614 = vmin.xlane.f32.xlu1 %v3613_v44  ;;  %v3623_v55 = vcvt.s32.f32 %v3621_v61  ;;  %v7735_v42 = vsel %vm1305_vm3, %v3263_v16, 2147483647 }
 0x348   : > { %9762 = vst [vmem:[#allocation27_spill] sm:$0xff] %v7701_v54  ;;  %v1205_v61 = vpop.f32.mrf.mxu2 }
 0x349   : > { %v2276_v21 = vadd.f32 %v5125_v7, %v2275_v32  ;;  %v9761_v32 = vld [vmem:[#allocation40_spill] sm:$0xff]  ;;  %9770 = vst [vmem:[#allocation5_spill] sm:$0xff] %v7735_v42 }
 0x34a   : > { %v3480_v6 = vpop.xlane.xlu1 %3479  ;;  %v3636_v49 = vand.u32 65535, %v9761_v32 }
 0x34b   : > { %v2280_v0 = vsel %vm2279_vm12, %v5125_v7, %v2276_v21  ;;  %v3481_v62 = vcvt.f32.s32 %v3480_v6  ;;  %v7696_v44 = vpop.xlane.xlu0 %1433  ;;  %v7709_v21 = vsel %vm1305_vm3, %v3262_v53, 2147483647  ;;  %v3628_v6 = vsel %vm3627_vm14, %v3623_v55, inf }
 0x34c   : > { %v2285_v47 = vsel %vm2282_vm13, %v2284_v58, %v2280_v0  ;;  %3124 = vmax.xlane.f32.xlu2 %v3123_v4  ;;  %9765 = vst [vmem:[#allocation22_spill] sm:$0xff] %v7709_v21  ;;  %v7712_v58 = vadd.f32 %v1202_v19, %v5423_v18  ;;  %v1634_v19 = vmul.f32 1.442695, %v1534_v51  ;;  %v3638_v0 = vcvt.s32.f32 %v3636_v49 }
 0x34d   : > { %v2286_v7 = vmul.f32 %v7074_v57, %v2285_v47  ;;  %v3484_v40 = vadd.s32 %v3483_v52, %v3481_v62  ;;  %v9768_v52 = vld [vmem:[#allocation44_spill] sm:$0xff]  ;;  %v3832_v62 = vshra.s32 %v7709_v21, 16  ;;  %v3498_v49 = vshll.u32 %v3497_v11, 16 }
 0x34e   : > { %9766 = vst [vmem:[#allocation4_spill] sm:$0xff] %v7712_v58  ;;  %vm3642_vm15 = vcmp.eq.f32.partialorder %v9768_v52, %v7460_v33  ;;  %v7732_v32 = vsel %vm1240_vm2, %v7712_v58, -1e+30 }
 0x34f   : > { %v4894_v63 = vadd.s32 4294967294, %v3484_v40  ;;  %3629 = vmin.xlane.f32.xlu0 %v3628_v6  ;;  %v7714_v4 = vpop.xlane.xlu2 %3715  ;;  %3820 = vmin.xlane.f32.xlu1 %v7701_v54  ;;  %v4276_v57 = vsel %vm1240_vm2, %v2286_v7, %v9767_v34  ;;  %9769 = vst [vmem:[#allocation41_spill] sm:$0xff] %v7732_v32  ;;  %v3643_v47 = vsel %vm3642_vm15, %v3638_v0, inf  ;;  %v7740_v31 = vcvt.s32.f32 %v3832_v62 }
 0x350   : > { %4340 = vst.msk [vmem:[%s6338_s8 + $0xd0] sm:$0xff] %vm1305_vm3, %v4276_v57  ;;  %v1462_v40 = vsel %vm1305_vm3, %v7732_v32, -inf  ;;  %v3847_v6 = vshra.s32 %v7735_v42, 16  ;;  %v7750_v57 = vadd.f32 %v1205_v61, %v5423_v18  ;;  %v1208_v52 = vpop.f32.mrf.mxu2 }
 0x351   : > { %v4454_v53 = vcvt.s32.f32 %v4894_v63  ;;  %9771 = vst [vmem:[#allocation30_spill] sm:$0xff] %v7740_v31  ;;  %v2894_v63 = vld [vmem:[%s5430_s29 + $0x1a0] sm:$0xff] }
 0x352   : > { %v7727_v10 = vpop.xlane.xlu1 %1772  ;;  %9772 = vst [vmem:[#allocation28_spill] sm:$0xff] %v7750_v57  ;;  %v7756_v0 = vadd.f32 %v2894_v63, %v7732_v32  ;;  %v7761_v61 = vcvt.s32.f32 %v3847_v6  ;;  %v2895_v6 = vld [vmem:[%s5430_s29 + $0x1a8] sm:$0xff] }
 0x353   : > { %4519 = vst.msk [vmem:[%s6338_s8 + $0x60] sm:$0xff] %vm4506_vm4, %v4454_v53  ;;  %5128 = vrcp.f32 %v7727_v10  ;;  %v3495_v51 = vpop.xlane.xlu0 %3494  ;;  %v2298_v58 = vand.u32 2147483648, %v7727_v10  ;;  %vm2292_vm5 = vweird.f32 %v7727_v10 }
 0x354   : > { %v3496_v55 = vcvt.f32.s32 %v3495_v51  ;;  %3644 = vmin.xlane.f32.xlu2 %v3643_v47  ;;  %5130 = vpow2.f32 %v1634_v19  ;;  %v9773_v19 = vld [vmem:[#allocation35_spill] sm:$0xff]  ;;  %9774 = vst [vmem:[#allocation47_spill] sm:$0xff] %v7756_v0  ;;  %v3126_v42 = vsel %vm1305_vm3, %v7756_v0, -inf }
 0x355   : > { %v1535_v53 = vsub.f32 %v9773_v19, %v7416_v5  ;;  %9775 = vst [vmem:[#allocation38_spill] sm:$0xff] %v7761_v61  ;;  %v7771_v5 = vsel %vm1240_vm2, %v7750_v57, -1e+30  ;;  %v9778_v19 = vld [vmem:[#allocation48_spill] sm:$0xff] }
 0x356   : > { %v3499_v7 = vadd.s32 %v3498_v49, %v3496_v55  ;;  %v3512_v55 = vcvt.f32.s32 %v6951_v13  ;;  %9776 = vst [vmem:[#allocation31_spill] sm:$0xff] %v7771_v5  ;;  %v1536_v13 = vsub.f32 %v9778_v19, %v7477_v20  ;;  %v1465_v20 = vsel %vm1305_vm3, %v7771_v5, -inf }
 0x357   : > { %3835 = vmin.xlane.f32.xlu0 %v7740_v31  ;;  %v7747_v34 = vpop.xlane.xlu2 %1775  ;;  %1463 = vmax.xlane.f32.xlu1 %v1462_v40  ;;  %v7774_v40 = vadd.f32 %v1208_v52, %v5423_v18  ;;  %v2296_v52 = vand.u32 2147483647, %v7727_v10  ;;  %v7792_v19 = vadd.f32 %v2895_v6, %v7771_v5 }
 0x358   : > { %v4895_v11 = vadd.s32 4294967294, %v3499_v7  ;;  %5132 = vrcp.f32 %v7747_v34  ;;  %v1638_v0 = vmul.f32 1.442695, %v1536_v13  ;;  %v2313_v6 = vand.u32 2147483648, %v7747_v34 }
 0x359   : > { %v5129_v16 = vpop.eup %5128  ;;  %9777 = vst [vmem:[#allocation54_spill] sm:$0xff] %v7774_v40  ;;  %vm2297_vm7 = vcmp.eq.f32.partialorder %v2296_v52, 8.507059e+37  ;;  %vm2307_vm9 = vweird.f32 %v7747_v34  ;;  %v9782_v52 = vld [vmem:[#allocation8_spill] sm:$0xff] }
 0x35a   : > { %v2288_v62 = vmul.f32 %v5129_v16, %v7727_v10  ;;  %v4455_v51 = vcvt.s32.f32 %v4895_v11  ;;  %v7759_v47 = vpop.xlane.xlu1 %1436  ;;  %v7763_v49 = vpop.eup %5130  ;;  %v1636_v11 = vmul.f32 1.442695, %v1535_v53  ;;  %vm2293_vm0 = vweird.f32 %v5129_v16 }
 0x35b   : > { %v7766_v7 = vpop.xlane.xlu0 %3100  ;;  %vm2294_vm6 = vmor %vm2292_vm5, %vm2293_vm0 }
 0x35c   : > { %v2289_v63 = vsub.f32 1.0, %v2288_v62  ;;  %4520 = vst.msk [vmem:[%s6338_s8 + $0x68] sm:$0xff] %vm4506_vm4, %v4455_v51  ;;  %3850 = vmin.xlane.f32.xlu2 %v7761_v61  ;;  %v1798_v62 = vsel %vm1305_vm3, %v7763_v49, 0.0  ;;  %v3513_v51 = vshll.u32 %v3512_v55, 16  ;;  %5134 = vpow2.f32 %v1636_v11 }
 0x35e   : > { %v5133_v57 = vpop.eup %5132  ;;  %v2290_v32 = vmul.f32 %v5129_v16, %v2289_v63  ;;  %v7797_v63 = vsel %vm1240_vm2, %v7774_v40, -1e+30 }
 0x35f   : > { %v2303_v61 = vmul.f32 %v5133_v57, %v7747_v34  ;;  %3127 = vmax.xlane.f32.xlu0 %v3126_v42  ;;  %v3510_v53 = vpop.xlane.xlu2 %3509  ;;  %1799 = vadd.xlane.f32.xlu1 %v1798_v62  ;;  %9779 = vst [vmem:[#allocation40_spill] sm:$0xff] %v7797_v63  ;;  %v2299_v42 = vor.u32 1.1754944e-38, %v2298_v58  ;;  %vm2308_vm8 = vweird.f32 %v5133_v57  ;;  %v3129_v58 = vsel %vm1305_vm3, %v7792_v19, -inf }
 0x360   : > { %v2291_v54 = vadd.f32 %v5129_v16, %v2290_v32  ;;  %v3511_v55 = vcvt.f32.s32 %v3510_v53  ;;  %v2311_v32 = vand.u32 2147483647, %v7747_v34  ;;  %vm2309_vm10 = vmor %vm2307_vm9, %vm2308_vm8  ;;  %vm3687_vm8 = vcmp.eq.f32.partialorder %v7091_v60, %v7630_v12 }
 0x361   : > { %v2304_v62 = vsub.f32 1.0, %v2303_v61  ;;  %v1468_v61 = vsel %vm1305_vm3, %v7797_v63, -inf }
 0x362   : > { %v2295_v31 = vsel %vm2294_vm6, %v5129_v16, %v2291_v54  ;;  %v3514_v5 = vadd.s32 %v3513_v51, %v3511_v55  ;;  %v7802_v21 = vpop.xlane.xlu1 %3730  ;;  %vm2312_vm12 = vcmp.eq.f32.partialorder %v2311_v32, 8.507059e+37  ;;  %v3651_v51 = vand.u32 65535, %v9782_v52 }
 0x363   : > { %v2300_v39 = vsel %vm2297_vm7, %v2299_v42, %v2295_v31  ;;  %v2305_v40 = vmul.f32 %v5133_v57, %v2304_v62  ;;  %v7805_v10 = vpop.xlane.xlu0 %1778  ;;  %v2314_v31 = vor.u32 1.1754944e-38, %v2313_v6  ;;  %vm3672_vm6 = vcmp.eq.f32.partialorder %v7024_v26, %v7542_v17 }
 0x364   : > { %v2301_v11 = vmul.f32 %v7214_v41, %v2300_v39  ;;  %v4896_v13 = vadd.s32 4294967294, %v3514_v5  ;;  %5136 = vrcp.f32 %v7805_v10  ;;  %1466 = vmax.xlane.f32.xlu2 %v1465_v20  ;;  %v9780_v41 = vld [vmem:[#allocation57_spill] sm:$0xff]  ;;  %v7817_v5 = vpop.eup %5134  ;;  %vm2322_vm15 = vweird.f32 %v7805_v10 }
 0x365   : > { %5138 = vpow2.f32 %v1638_v0  ;;  %v2306_v54 = vadd.f32 %v5133_v57, %v2305_v40  ;;  %v9781_v0 = vld [vmem:[#allocation9_spill] sm:$0xff]  ;;  %v1801_v32 = vsel %vm1305_vm3, %v7817_v5, 0.0 }
 0x366   : > { %v4456_v16 = vcvt.s32.f32 %v4896_v13  ;;  %v4277_v39 = vsel %vm1240_vm2, %v2301_v11, %v9780_v41  ;;  %vm3200_vm11 = vcmp.eq.f32.partialorder %v9781_v0, %v7486_v45  ;;  %v9784_v11 = vld [vmem:[#allocation43_spill] sm:$0xff]  ;;  %v2896_v13 = vld [vmem:[%s5430_s29 + $0x1b0] sm:$0xff] }
 0x367   : > { %v2310_v34 = vsel %vm2309_vm10, %v5133_v57, %v2306_v54  ;;  %1469 = vmax.xlane.f32.xlu0 %v1468_v61  ;;  %v7821_v40 = vpop.xlane.xlu2 %1439  ;;  %3130 = vmax.xlane.f32.xlu1 %v3129_v58  ;;  %4341 = vst.msk [vmem:[%s6338_s8 + $0xd8] sm:$0xff] %vm1305_vm3, %v4277_v39  ;;  %v3264_v45 = vsel %vm3200_vm11, %v5420_v15, 10  ;;  %vm3657_vm13 = vcmp.eq.f32.partialorder %v9784_v11, %v7491_v56  ;;  %v9785_v54 = vld [vmem:[#allocation65_spill] sm:$0xff]  ;;  %v3653_v58 = vcvt.s32.f32 %v3651_v51 }
 0x368   : > { %v2315_v53 = vsel %vm2312_vm12, %v2314_v31, %v2310_v34  ;;  %4521 = vst.msk [vmem:[%s6338_s8 + $0x70] sm:$0xff] %vm4506_vm4, %v4456_v16  ;;  %v3527_v31 = vcvt.f32.s32 %v7000_v9  ;;  %v1211_v16 = vpop.f32.mrf.mxu2  ;;  %v7849_v61 = vsel %vm1305_vm3, %v3264_v45, 2147483647  ;;  %v2328_v39 = vand.u32 2147483648, %v7805_v10  ;;  %v9786_v51 = vld [vmem:[#allocation53_spill] sm:$0xff] }
 0x369   : > { %v2316_v20 = vmul.f32 %v7236_v8, %v2315_v53  ;;  %v3658_v34 = vsel %vm3657_vm13, %v3653_v58, inf  ;;  %v7855_v52 = vadd.f32 %v2896_v13, %v7797_v63  ;;  %vm3201_vm14 = vcmp.eq.f32.partialorder %v9786_v51, %v7516_v37  ;;  %v9790_v63 = vld [vmem:[#allocation10_spill] sm:$0xff] }
 0x36a   : > { %v5137_v55 = vpop.eup %5136  ;;  %v7830_v57 = vpop.xlane.xlu1 %3103  ;;  %v2326_v9 = vand.u32 2147483647, %v7805_v10  ;;  %v3666_v45 = vand.u32 65535, %v6997_v28  ;;  %v3528_v11 = vshll.u32 %v3527_v31, 16  ;;  %v3265_v13 = vsel %vm3201_vm14, %v5420_v15, 10 }
 0x36b   : > { %v7832_v42 = vpop.eup %5138  ;;  %v2318_v62 = vmul.f32 %v5137_v55, %v7805_v10  ;;  %v7835_v6 = vpop.xlane.xlu0 %3745  ;;  %v4278_v8 = vsel %vm1240_vm2, %v2316_v20, %v9785_v54  ;;  %vm2323_vm1 = vweird.f32 %v5137_v55  ;;  %v2329_v37 = vor.u32 1.1754944e-38, %v2328_v39  ;;  %v9789_v39 = vld [vmem:[#allocation45_spill] sm:$0xff] }
 0x36c   : > { %9783 = vst [vmem:[#allocation6_spill] sm:$0xff] %v7835_v6  ;;  %1802 = vadd.xlane.f32.xlu2 %v1801_v32  ;;  %v1804_v0 = vsel %vm1305_vm3, %v7832_v42, 0.0  ;;  %vm2324_vm0 = vmor %vm2322_vm15, %vm2323_vm1  ;;  %vm2327_vm5 = vcmp.eq.f32.partialorder %v2326_v9, 8.507059e+37  ;;  %v3668_v10 = vcvt.s32.f32 %v3666_v45  ;;  %vm3202_vm7 = vcmp.eq.f32.partialorder %v9790_v63, %v7594_v24 }
 0x36d   : > { %4342 = vst.msk [vmem:[%s6338_s8 + $0xe0] sm:$0xff] %vm1305_vm3, %v4278_v8  ;;  %v2319_v41 = vsub.f32 1.0, %v2318_v62  ;;  %v3862_v62 = vshra.s32 %v7849_v61, 16  ;;  %v3132_v8 = vsel %vm1305_vm3, %v7855_v52, -inf  ;;  %v7884_v45 = vadd.f32 %v1211_v16, %v5423_v18 }
 0x36e   : > { %v3673_v26 = vsel %vm3672_vm6, %v3668_v10, inf  ;;  %v3542_v24 = vcvt.f32.s32 %v7012_v2  ;;  %v3266_v63 = vsel %vm3202_vm7, %v5420_v15, 10 }
 0x36f   : > { %v2320_v53 = vmul.f32 %v5137_v55, %v2319_v41  ;;  %1805 = vadd.xlane.f32.xlu0 %v1804_v0  ;;  %v7860_v20 = vpop.xlane.xlu2 %3106  ;;  %3659 = vmin.xlane.f32.xlu1 %v3658_v34  ;;  %v7872_v31 = vcvt.s32.f32 %v3862_v62  ;;  %v9788_v34 = vld [vmem:[#allocation49_spill] sm:$0xff]  ;;  %9791 = vst [vmem:[#allocation55_spill] sm:$0xff] %v7884_v45  ;;  %v7907_v2 = vsel %vm1305_vm3, %v3266_v63, 2147483647  ;;  %v9797_v63 = vld [vmem:[#allocation46_spill] sm:$0xff] }
 0x370   : > { %v3681_v51 = vand.u32 65535, %v9788_v34  ;;  %v1214_v62 = vpop.f32.mrf.mxu2  ;;  %9794 = vst [vmem:[#allocation35_spill] sm:$0xff] %v7907_v2  ;;  %v3543_v10 = vshll.u32 %v3542_v24, 16 }
 0x371   : > { %v2321_v32 = vadd.f32 %v5137_v55, %v2320_v53  ;;  %9787 = vst [vmem:[#allocation37_spill] sm:$0xff] %v7872_v31  ;;  %v1537_v53 = vsub.f32 %v9789_v39, %v7524_v1  ;;  %v9792_v1 = vld [vmem:[#allocation73_spill] sm:$0xff] }
 0x372   : > { %v3525_v54 = vpop.xlane.xlu1 %3524 }
 0x373   : > { %v2325_v58 = vsel %vm2324_vm0, %v5137_v55, %v2321_v32  ;;  %v3526_v41 = vcvt.f32.s32 %v3525_v54  ;;  %v7868_v0 = vpop.xlane.xlu0 %1442  ;;  %v7881_v32 = vsel %vm1305_vm3, %v3265_v13, 2147483647  ;;  %v1640_v16 = vmul.f32 1.442695, %v1537_v53 }
 0x374   : > { %v2330_v28 = vsel %vm2327_vm5, %v2329_v37, %v2325_v58  ;;  %3133 = vmax.xlane.f32.xlu2 %v3132_v8  ;;  %v3683_v13 = vcvt.s32.f32 %v3681_v51  ;;  %v3877_v8 = vshra.s32 %v7881_v32, 16 }
 0x375   : > { %v2331_v55 = vmul.f32 %v7277_v29, %v2330_v28  ;;  %v3529_v9 = vadd.s32 %v3528_v11, %v3526_v41  ;;  %v7904_v41 = vsel %vm1240_vm2, %v7884_v45, -1e+30 }
 0x376   : > { %9793 = vst [vmem:[#allocation44_spill] sm:$0xff] %v7904_v41  ;;  %v3688_v28 = vsel %vm3687_vm8, %v3683_v13, inf  ;;  %v7912_v51 = vcvt.s32.f32 %v3877_v8  ;;  %v1471_v53 = vsel %vm1305_vm3, %v7904_v41, -inf }
 0x377   : > { %v4897_v37 = vadd.s32 4294967294, %v3529_v9  ;;  %3674 = vmin.xlane.f32.xlu0 %v3673_v26  ;;  %v7886_v54 = vpop.xlane.xlu2 %3760  ;;  %3865 = vmin.xlane.f32.xlu1 %v7872_v31  ;;  %v4279_v29 = vsel %vm1240_vm2, %v2331_v55, %v9792_v1  ;;  %v3892_v55 = vshra.s32 %v7907_v2, 16  ;;  %v2897_v9 = vld [vmem:[%s5430_s29 + $0x1b8] sm:$0xff] }
 0x378   : > { %4343 = vst.msk [vmem:[%s6338_s8 + $0xe8] sm:$0xff] %vm1305_vm3, %v4279_v29  ;;  %v1217_v24 = vpop.f32.mrf.mxu2 }
 0x379   : > { %v4457_v11 = vcvt.s32.f32 %v4897_v37  ;;  %9795 = vst [vmem:[#allocation48_spill] sm:$0xff] %v7912_v51  ;;  %v7922_v37 = vadd.f32 %v1214_v62, %v5423_v18  ;;  %v7933_v62 = vcvt.s32.f32 %v3892_v55  ;;  %v2898_v55 = vld [vmem:[%s5430_s29 + $0x1c0] sm:$0xff] }
 0x37a   : > { %v7899_v58 = vpop.xlane.xlu1 %1781 }
 0x37b   : > { %4522 = vst.msk [vmem:[%s6338_s8 + $0x78] sm:$0xff] %vm4506_vm4, %v4457_v11  ;;  %5140 = vrcp.f32 %v7899_v58  ;;  %v3540_v60 = vpop.xlane.xlu0 %3539  ;;  %v7928_v11 = vadd.f32 %v2897_v9, %v7904_v41  ;;  %vm2337_vm10 = vweird.f32 %v7899_v58 }
 0x37c   : > { %v3541_v34 = vcvt.f32.s32 %v3540_v60  ;;  %3689 = vmin.xlane.f32.xlu2 %v3688_v28  ;;  %5142 = vpow2.f32 %v1640_v16  ;;  %9796 = vst [vmem:[#allocation57_spill] sm:$0xff] %v7922_v37  ;;  %v1538_v16 = vsub.f32 %v9797_v63, %v7587_v23  ;;  %v7943_v23 = vsel %vm1240_vm2, %v7922_v37, -1e+30 }
 0x37d   : > { %9798 = vst [vmem:[#allocation9_spill] sm:$0xff] %v7928_v11  ;;  %v2343_v63 = vand.u32 2147483648, %v7899_v58  ;;  %v3135_v45 = vsel %vm1305_vm3, %v7928_v11, -inf }
 0x37e   : > { %v3544_v39 = vadd.s32 %v3543_v10, %v3541_v34  ;;  %9799 = vst [vmem:[#allocation8_spill] sm:$0xff] %v7933_v62  ;;  %v3557_v10 = vcvt.f32.s32 %v7095_v36  ;;  %v1642_v9 = vmul.f32 1.442695, %v1538_v16 }
 0x37f   : > { %3880 = vmin.xlane.f32.xlu0 %v7912_v51  ;;  %v7919_v26 = vpop.xlane.xlu2 %1784  ;;  %1472 = vmax.xlane.f32.xlu1 %v1471_v53  ;;  %9801 = vst [vmem:[#allocation65_spill] sm:$0xff] %v7943_v23 }
 0x380   : > { %v4898_v1 = vadd.s32 4294967294, %v3544_v39  ;;  %5144 = vrcp.f32 %v7919_v26  ;;  %v7946_v39 = vadd.f32 %v1217_v24, %v5423_v18  ;;  %v2341_v24 = vand.u32 2147483647, %v7899_v58 }
 0x381   : > { %v5141_v29 = vpop.eup %5140  ;;  %5146 = vpow2.f32 %v1642_v9  ;;  %vm2352_vm14 = vweird.f32 %v7919_v26 }
 0x382   : > { %v2333_v13 = vmul.f32 %v5141_v29, %v7899_v58  ;;  %v4458_v8 = vcvt.s32.f32 %v4898_v1  ;;  %v7931_v60 = vpop.xlane.xlu1 %1445  ;;  %v7935_v28 = vpop.eup %5142  ;;  %9802 = vst [vmem:[#allocation53_spill] sm:$0xff] %v7946_v39  ;;  %v9803_v1 = vld [vmem:[#allocation56_spill] sm:$0xff]  ;;  %vm2338_vm9 = vweird.f32 %v5141_v29  ;;  %vm2342_vm12 = vcmp.eq.f32.partialorder %v2341_v24, 8.507059e+37 }
 0x383   : > { %9800 = vst [vmem:[#allocation43_spill] sm:$0xff] %v7935_v28  ;;  %v7938_v34 = vpop.xlane.xlu0 %3109  ;;  %v1539_v36 = vsub.f32 %v9803_v1, %v7649_v46  ;;  %v1474_v46 = vsel %vm1305_vm3, %v7943_v23, -inf  ;;  %v7964_v1 = vadd.f32 %v2898_v55, %v7943_v23  ;;  %vm2339_vm11 = vmor %vm2337_vm10, %vm2338_vm9  ;;  %v2358_v55 = vand.u32 2147483648, %v7919_v26 }
 0x384   : > { %v2334_v53 = vsub.f32 1.0, %v2333_v13  ;;  %4523 = vst.msk [vmem:[%s6338_s8 + $0x80] sm:$0xff] %vm4506_vm4, %v4458_v8  ;;  %3895 = vmin.xlane.f32.xlu2 %v7933_v62  ;;  %v1807_v13 = vsel %vm1305_vm3, %v7935_v28, 0.0  ;;  %v3558_v8 = vshll.u32 %v3557_v10, 16 }
 0x385   : > { %9804 = vst [vmem:[#allocation49_spill] sm:$0xff] %v7964_v1  ;;  %v1644_v31 = vmul.f32 1.442695, %v1539_v36  ;;  %v3138_v24 = vsel %vm1305_vm3, %v7964_v1, -inf }
 0x386   : > { %v5145_v37 = vpop.eup %5144  ;;  %v2335_v2 = vmul.f32 %v5141_v29, %v2334_v53  ;;  %v7969_v53 = vsel %vm1240_vm2, %v7946_v39, -1e+30 }
 0x387   : > { %v2348_v62 = vmul.f32 %v5145_v37, %v7919_v26  ;;  %3136 = vmax.xlane.f32.xlu0 %v3135_v45  ;;  %v3555_v16 = vpop.xlane.xlu2 %3554  ;;  %1808 = vadd.xlane.f32.xlu1 %v1807_v13  ;;  %9805 = vst [vmem:[#allocation45_spill] sm:$0xff] %v7969_v53  ;;  %v2344_v45 = vor.u32 1.1754944e-38, %v2343_v63  ;;  %vm2353_vm13 = vweird.f32 %v5145_v37  ;;  %5148 = vpow2.f32 %v1644_v31  ;;  %v9806_v31 = vld [vmem:[#allocation75_spill] sm:$0xff] }
 0x388   : > { %v2336_v41 = vadd.f32 %v5141_v29, %v2335_v2  ;;  %v3556_v10 = vcvt.f32.s32 %v3555_v16  ;;  %v2356_v2 = vand.u32 2147483647, %v7919_v26  ;;  %vm2354_vm1 = vmor %vm2352_vm14, %vm2353_vm13  ;;  %v1477_v63 = vsel %vm1305_vm3, %v7969_v53, -inf }
 0x389   : > { %v2349_v13 = vsub.f32 1.0, %v2348_v62  ;;  %v3572_v62 = vcvt.f32.s32 %v7145_v22 }
 0x38a   : > { %v2340_v11 = vsel %vm2339_vm11, %v5141_v29, %v2336_v41  ;;  %v3559_v23 = vadd.s32 %v3558_v8, %v3556_v10  ;;  %v7974_v51 = vpop.xlane.xlu1 %3112  ;;  %v2359_v29 = vor.u32 1.1754944e-38, %v2358_v55  ;;  %vm2357_vm15 = vcmp.eq.f32.partialorder %v2356_v2, 8.507059e+37  ;;  %v9808_v8 = vld [vmem:[#allocation52_spill] sm:$0xff]  ;;  %v9809_v2 = vld [vmem:[#allocation83_spill] sm:$0xff] }
 0x38b   : > { %v2345_v28 = vsel %vm2342_vm12, %v2344_v45, %v2340_v11  ;;  %v2350_v39 = vmul.f32 %v5145_v37, %v2349_v13  ;;  %v7977_v58 = vpop.xlane.xlu0 %1451  ;;  %vm3203_vm0 = vcmp.eq.f32.partialorder %v9808_v8, %v7658_v25 }
 0x38c   : > { %v2346_v9 = vmul.f32 %v7388_v43, %v2345_v28  ;;  %v4899_v36 = vadd.s32 4294967294, %v3559_v23  ;;  %1475 = vmax.xlane.f32.xlu2 %v1474_v46  ;;  %v7986_v43 = vpop.eup %5146  ;;  %v9807_v23 = vld [vmem:[#allocation50_spill] sm:$0xff]  ;;  %v3573_v46 = vshll.u32 %v3572_v62, 16  ;;  %v3267_v55 = vsel %vm3203_vm0, %v5420_v15, 10 }
 0x38d   : > { %v2351_v41 = vadd.f32 %v5145_v37, %v2350_v39  ;;  %v3696_v39 = vand.u32 65535, %v9807_v23  ;;  %v1810_v45 = vsel %vm1305_vm3, %v7986_v43, 0.0  ;;  %v8003_v13 = vpop.eup %5148  ;;  %v8022_v23 = vsel %vm1305_vm3, %v3267_v55, 2147483647 }
 0x38e   : > { %v4459_v11 = vcvt.s32.f32 %v4899_v36  ;;  %v4280_v26 = vsel %vm1240_vm2, %v2346_v9, %v9806_v31  ;;  %v3771_v31 = vand.u32 65535, %v7505_v35  ;;  %9813 = vst [vmem:[#allocation10_spill] sm:$0xff] %v8022_v23  ;;  %v1813_v8 = vsel %vm1305_vm3, %v8003_v13, 0.0  ;;  %v9815_v35 = vld [vmem:[#allocation11_spill] sm:$0xff] }
 0x38f   : > { %v2355_v28 = vsel %vm2354_vm1, %v5145_v37, %v2351_v41  ;;  %1478 = vmax.xlane.f32.xlu0 %v1477_v63  ;;  %v7988_v22 = vpop.xlane.xlu2 %1448  ;;  %3139 = vmax.xlane.f32.xlu1 %v3138_v24  ;;  %4344 = vst.msk [vmem:[%s6338_s8 + $0xf0] sm:$0xff] %vm1305_vm3, %v4280_v26  ;;  %v3698_v62 = vcvt.s32.f32 %v3696_v39  ;;  %v2899_v41 = vld [vmem:[%s5430_s29 + $0x1c8] sm:$0xff]  ;;  %v9812_v24 = vld [vmem:[#allocation70_spill] sm:$0xff]  ;;  %v3587_v26 = vcvt.f32.s32 %v7198_v38  ;;  %vm3204_vm6 = vcmp.eq.f32.partialorder %v9815_v35, %v7688_v3  ;;  %v9816_v38 = vld [vmem:[#allocation64_spill] sm:$0xff] }
 0x390   : > { %v2360_v16 = vsel %vm2357_vm15, %v2359_v29, %v2355_v28  ;;  %4524 = vst.msk [vmem:[%s6338_s8 + $0x88] sm:$0xff] %vm4506_vm4, %v4459_v11  ;;  %v9811_v29 = vld [vmem:[#allocation12_spill] sm:$0xff]  ;;  %v3726_v28 = vand.u32 65535, %v9812_v24  ;;  %v9819_v3 = vld [vmem:[#allocation34_spill] sm:$0xff] }
 0x391   : > { %v2361_v37 = vmul.f32 %v7406_v50, %v2360_v16  ;;  %v9810_v50 = vld [vmem:[#allocation80_spill] sm:$0xff]  ;;  %v3711_v11 = vand.u32 65535, %v9811_v29  ;;  %v3773_v29 = vcvt.s32.f32 %v3771_v31 }
 0x392   : > { %v3570_v10 = vpop.xlane.xlu1 %3569  ;;  %vm3702_vm5 = vcmp.eq.f32.partialorder %v9810_v50, %v7663_v59 }
 0x393   : > { %v4281_v25 = vsel %vm1240_vm2, %v2361_v37, %v9809_v2  ;;  %v3571_v9 = vcvt.f32.s32 %v3570_v10  ;;  %v8009_v36 = vpop.xlane.xlu0 %1787  ;;  %v3703_v16 = vsel %vm3702_vm5, %v3698_v62, inf  ;;  %v1220_v10 = vpop.f32.mrf.mxu2  ;;  %v3713_v2 = vcvt.s32.f32 %v3711_v11 }
 0x394   : > { %4345 = vst.msk [vmem:[%s6338_s8 + $0xf8] sm:$0xff] %vm1305_vm3, %v4281_v25  ;;  %1811 = vadd.xlane.f32.xlu2 %v1810_v45  ;;  %5150 = vrcp.f32 %v8009_v36  ;;  %v3602_v45 = vcvt.f32.s32 %v9816_v38  ;;  %v3907_v25 = vshra.s32 %v8022_v23, 16  ;;  %v3728_v62 = vcvt.s32.f32 %v3726_v28  ;;  %v9821_v28 = vld [vmem:[#allocation59_spill] sm:$0xff] }
 0x395   : > { %v3574_v63 = vadd.s32 %v3573_v46, %v3571_v9  ;;  %v8029_v46 = vadd.f32 %v2899_v41, %v7969_v53  ;;  %v3588_v9 = vshll.u32 %v3587_v26, 16  ;;  %v3268_v41 = vsel %vm3204_vm6, %v5420_v15, 10  ;;  %v9820_v26 = vld [vmem:[#allocation66_spill] sm:$0xff] }
 0x396   : > { %vm3717_vm8 = vcmp.eq.f32.partialorder %v9820_v26, %v7714_v4  ;;  %vm3205_vm9 = vcmp.eq.f32.partialorder %v9821_v28, %v7766_v7  ;;  %v8053_v38 = vadd.f32 %v1220_v10, %v5423_v18  ;;  %v8060_v26 = vsel %vm1305_vm3, %v3268_v41, 2147483647 }
 0x397   : > { %v4900_v39 = vadd.s32 4294967294, %v3574_v63  ;;  %1814 = vadd.xlane.f32.xlu0 %v1813_v8  ;;  %v8026_v37 = vpop.xlane.xlu2 %3115  ;;  %3704 = vmin.xlane.f32.xlu1 %v3703_v16  ;;  %9814 = vst [vmem:[#allocation73_spill] sm:$0xff] %v8029_v46  ;;  %v9818_v63 = vld [vmem:[#allocation26_spill] sm:$0xff]  ;;  %v3141_v11 = vsel %vm1305_vm3, %v8029_v46, -inf  ;;  %v3718_v28 = vsel %vm3717_vm8, %v3713_v2, inf  ;;  %v3922_v2 = vshra.s32 %v8060_v26, 16 }
 0x398   : > { %v3786_v24 = vand.u32 65535, %v9818_v63  ;;  %9822 = vst [vmem:[#allocation56_spill] sm:$0xff] %v8053_v38  ;;  %v9823_v63 = vld [vmem:[#allocation58_spill] sm:$0xff]  ;;  %vm2367_vm12 = vweird.f32 %v8009_v36 }
 0x399   : > { %v4460_v55 = vcvt.s32.f32 %v4900_v39  ;;  %9825 = vst [vmem:[#allocation50_spill] sm:$0xff] %v8060_v26 }
 0x39a   : > { %v8035_v50 = vpop.xlane.xlu1 %3775  ;;  %v5151_v8 = vpop.eup %5150 }
 0x39b   : > { %9817 = vst [vmem:[#allocation46_spill] sm:$0xff] %v8035_v50  ;;  %vm3777_vm7 = vcmp.eq.f32.partialorder %v9819_v3, %v8035_v50  ;;  %v3585_v16 = vpop.xlane.xlu0 %3584  ;;  %v2363_v31 = vmul.f32 %v5151_v8, %v8009_v36  ;;  %v1540_v3 = vsub.f32 %v9823_v63, %v7696_v44  ;;  %v8057_v50 = vcvt.s32.f32 %v3907_v25  ;;  %v9826_v44 = vld [vmem:[#allocation14_spill] sm:$0xff]  ;;  %v1223_v53 = vpop.f32.mrf.mxu2 }
 0x39c   : > { %4525 = vst.msk [vmem:[%s6338_s8 + $0x90] sm:$0xff] %vm4506_vm4, %v4460_v55  ;;  %v3586_v39 = vcvt.f32.s32 %v3585_v16  ;;  %3142 = vmax.xlane.f32.xlu2 %v3141_v11  ;;  %v8050_v35 = vsel %vm3777_vm7, %v3773_v29, inf  ;;  %v3603_v55 = vshll.u32 %v3602_v45, 16  ;;  %v3269_v16 = vsel %vm3205_vm9, %v5420_v15, 10 }
 0x39d   : > { %9824 = vst [vmem:[#allocation75_spill] sm:$0xff] %v8057_v50  ;;  %v2364_v23 = vsub.f32 1.0, %v2363_v31  ;;  %v2371_v29 = vand.u32 2147483647, %v8009_v36  ;;  %v2373_v11 = vand.u32 2147483648, %v8009_v36  ;;  %vm3732_vm10 = vcmp.eq.f32.partialorder %v9826_v44, %v7802_v21  ;;  %v9833_v44 = vld [vmem:[#allocation87_spill] sm:$0xff] }
 0x39e   : > { %v3589_v7 = vadd.s32 %v3588_v9, %v3586_v39  ;;  %vm2368_vm11 = vweird.f32 %v5151_v8  ;;  %v1646_v31 = vmul.f32 1.442695, %v1540_v3  ;;  %v3788_v9 = vcvt.s32.f32 %v3786_v24  ;;  %v9827_v39 = vld [vmem:[#allocation7_spill] sm:$0xff] }
 0x39f   : > { %3719 = vmin.xlane.f32.xlu0 %v3718_v28  ;;  %v3600_v10 = vpop.xlane.xlu2 %3599  ;;  %3910 = vmin.xlane.f32.xlu1 %v8057_v50  ;;  %v2365_v45 = vmul.f32 %v5151_v8, %v2364_v23  ;;  %v3801_v63 = vand.u32 65535, %v9827_v39  ;;  %v8076_v23 = vsel %vm1240_vm2, %v8053_v38, -1e+30  ;;  %v8079_v3 = vsel %vm1305_vm3, %v3269_v16, 2147483647  ;;  %vm2369_vm13 = vmor %vm2367_vm12, %vm2368_vm11  ;;  %v9835_v39 = vld [vmem:[#allocation86_spill] sm:$0xff] }
 0x3a0   : > { %v4901_v25 = vadd.s32 4294967294, %v3589_v7  ;;  %v3601_v41 = vcvt.f32.s32 %v3600_v10  ;;  %9828 = vst [vmem:[#allocation52_spill] sm:$0xff] %v8076_v23  ;;  %v2374_v24 = vor.u32 1.1754944e-38, %v2373_v11  ;;  %v3733_v36 = vsel %vm3732_vm10, %v3728_v62, inf  ;;  %v9848_v38 = vld [vmem:[#allocation68_spill] sm:$0xff] }
 0x3a1   : > { %v2366_v46 = vadd.f32 %v5151_v8, %v2365_v45  ;;  %9829 = vst [vmem:[#allocation83_spill] sm:$0xff] %v8079_v3  ;;  %vm2372_vm14 = vcmp.eq.f32.partialorder %v2371_v29, 8.507059e+37  ;;  %v9831_v45 = vld [vmem:[#allocation92_spill] sm:$0xff]  ;;  %5152 = vpow2.f32 %v1646_v31  ;;  %v8091_v11 = vcvt.s32.f32 %v3922_v2 }
 0x3a2   : > { %v4461_v28 = vcvt.s32.f32 %v4901_v25  ;;  %v3604_v50 = vadd.s32 %v3603_v55, %v3601_v41  ;;  %v8071_v1 = vpop.xlane.xlu1 %1454  ;;  %v2900_v41 = vld [vmem:[%s5430_s29 + $0x1d0] sm:$0xff]  ;;  %v3803_v31 = vcvt.s32.f32 %v3801_v63  ;;  %vm3206_vm0 = vcmp.eq.f32.partialorder %v9848_v38, %v7830_v57 }
 0x3a3   : > { %v8082_v7 = vpop.xlane.xlu0 %3790  ;;  %v2370_v55 = vsel %vm2369_vm13, %v5151_v8, %v2366_v46  ;;  %9832 = vst [vmem:[#allocation12_spill] sm:$0xff] %v8091_v11  ;;  %v1480_v8 = vsel %vm1305_vm3, %v8076_v23, -inf }
 0x3a4   : > { %9830 = vst [vmem:[#allocation80_spill] sm:$0xff] %v8082_v7  ;;  %v4902_v10 = vadd.s32 4294967294, %v3604_v50  ;;  %vm3792_vm1 = vcmp.eq.f32.partialorder %v9831_v45, %v8082_v7  ;;  %3734 = vmin.xlane.f32.xlu2 %v3733_v36  ;;  %v2375_v16 = vsel %vm2372_vm14, %v2374_v24, %v2370_v55  ;;  %v3937_v50 = vshra.s32 %v8079_v3, 16 }
 0x3a5   : > { %4526 = vst.msk [vmem:[%s6338_s8 + $0x98] sm:$0xff] %vm4506_vm4, %v4461_v28  ;;  %v8093_v25 = vsel %vm3792_vm1, %v3788_v9, inf  ;;  %v2376_v62 = vmul.f32 %v9833_v44, %v2375_v16  ;;  %v9836_v9 = vld [vmem:[#allocation93_spill] sm:$0xff]  ;;  %v9837_v28 = vld [vmem:[#allocation63_spill] sm:$0xff]  ;;  %v8117_v55 = vadd.f32 %v1223_v53, %v5423_v18  ;;  %v8122_v45 = vadd.f32 %v2900_v41, %v8076_v23 }
 0x3a6   : > { %v4462_v46 = vcvt.s32.f32 %v4902_v10  ;;  %v1541_v24 = vsub.f32 %v9837_v28, %v7759_v47  ;;  %v8119_v10 = vcvt.s32.f32 %v3937_v50  ;;  %v1226_v47 = vpop.f32.mrf.mxu2 }
 0x3a7   : > { %3925 = vmin.xlane.f32.xlu0 %v8091_v11  ;;  %v8100_v29 = vpop.xlane.xlu2 %3805  ;;  %1481 = vmax.xlane.f32.xlu1 %v1480_v8  ;;  %v4282_v2 = vsel %vm1240_vm2, %v2376_v62, %v9835_v39  ;;  %9838 = vst [vmem:[#allocation11_spill] sm:$0xff] %v8117_v55  ;;  %v8124_v16 = vpop.eup %5152  ;;  %v8134_v53 = vsel %vm1240_vm2, %v8117_v55, -1e+30  ;;  %v3144_v50 = vsel %vm1305_vm3, %v8122_v45, -inf  ;;  %v8142_v39 = vadd.f32 %v1226_v47, %v5423_v18 }
 0x3a8   : > { %9834 = vst [vmem:[#allocation70_spill] sm:$0xff] %v8100_v29  ;;  %vm3807_vm15 = vcmp.eq.f32.partialorder %v9836_v9, %v8100_v29  ;;  %v1648_v62 = vmul.f32 1.442695, %v1541_v24  ;;  %v1816_v41 = vsel %vm1305_vm3, %v8124_v16, 0.0 }
 0x3a9   : > { %4527 = vst.msk [vmem:[%s6338_s8 + $0xa0] sm:$0xff] %vm4506_vm4, %v4462_v46  ;;  %v8114_v36 = vsel %vm3807_vm15, %v3803_v31, inf  ;;  %v9842_v46 = vld [vmem:[#allocation69_spill] sm:$0xff]  ;;  %v8154_v55 = vsel %vm1240_vm2, %v8142_v39, -1e+30 }
 0x3aa   : > { %4346 = vst.msk [vmem:[%s6338_s8 + $0x100] sm:$0xff] %vm1305_vm3, %v4282_v2  ;;  %v1791_v63 = vpop.xlane.xlu1 %1790  ;;  %v1542_v8 = vsub.f32 %v9842_v46, %v7821_v40  ;;  %v2901_v31 = vld [vmem:[%s5430_s29 + $0x1d8] sm:$0xff] }
 0x3ab   : > { %9839 = vst [vmem:[#allocation64_spill] sm:$0xff] %v8119_v10  ;;  %5154 = vrcp.f32 %v1791_v63  ;;  %v8126_v44 = vpop.xlane.xlu0 %3118  ;;  %v8147_v28 = vadd.f32 %v2901_v31, %v8134_v53  ;;  %v2388_v29 = vand.u32 2147483648, %v1791_v63  ;;  %vm2382_vm6 = vweird.f32 %v1791_v63 }
 0x3ac   : > { %9840 = vst [vmem:[#allocation26_spill] sm:$0xff] %v8122_v45  ;;  %3940 = vmin.xlane.f32.xlu2 %v8119_v10  ;;  %5156 = vpow2.f32 %v1648_v62  ;;  %v1650_v9 = vmul.f32 1.442695, %v1542_v8  ;;  %v9847_v8 = vld [vmem:[#allocation67_spill] sm:$0xff]  ;;  %v2386_v10 = vand.u32 2147483647, %v1791_v63 }
 0x3ad   : > { %9841 = vst [vmem:[#allocation34_spill] sm:$0xff] %v8124_v16  ;;  %v3741_v31 = vand.u32 65535, %v9847_v8  ;;  %v2902_v8 = vld [vmem:[%s5430_s29 + $0x1e0] sm:$0xff]  ;;  %v9851_v16 = vld [vmem:[#allocation76_spill] sm:$0xff]  ;;  %v9855_v45 = vld [vmem:[#allocation19_spill] sm:$0xff] }
 0x3ae   : > { %9843 = vst [vmem:[#allocation66_spill] sm:$0xff] %v8134_v53  ;;  %5158 = vpow2.f32 %v1650_v9  ;;  %v3270_v9 = vsel %vm3206_vm0, %v5420_v15, 10  ;;  %vm3207_vm8 = vcmp.eq.f32.partialorder %v9851_v16, %v7860_v20  ;;  %vm2387_vm9 = vcmp.eq.f32.partialorder %v2386_v10, 8.507059e+37  ;;  %v9856_v10 = vld [vmem:[#allocation18_spill] sm:$0xff] }
 0x3af   : > { %9844 = vst [vmem:[#allocation59_spill] sm:$0xff] %v8142_v39  ;;  %3145 = vmax.xlane.f32.xlu0 %v3144_v50  ;;  %v8144_v2 = vpop.xlane.xlu2 %1457  ;;  %1817 = vadd.xlane.f32.xlu1 %v1816_v41  ;;  %v1483_v50 = vsel %vm1305_vm3, %v8134_v53, -inf  ;;  %v3617_v41 = vcvt.f32.s32 %v7327_v30  ;;  %v3147_v39 = vsel %vm1305_vm3, %v8147_v28, -inf  ;;  %v1486_v53 = vsel %vm1305_vm3, %v8154_v55, -inf }
 0x3b0   : > { %9845 = vst [vmem:[#allocation58_spill] sm:$0xff] %v8147_v28  ;;  %v3743_v38 = vcvt.s32.f32 %v3741_v31  ;;  %v9850_v28 = vld [vmem:[#allocation78_spill] sm:$0xff]  ;;  %vm3208_vm11 = vcmp.eq.f32.partialorder %v9855_v45, %v7938_v34 }
 0x3b1   : > { %v5155_v40 = vpop.eup %5154  ;;  %9846 = vst [vmem:[#allocation14_spill] sm:$0xff] %v8154_v55  ;;  %v3756_v3 = vand.u32 65535, %v9850_v28  ;;  %v9854_v28 = vld [vmem:[#allocation74_spill] sm:$0xff]  ;;  %v3272_v20 = vsel %vm3208_vm11, %v5420_v15, 10 }
 0x3b2   : > { %v2378_v24 = vmul.f32 %v5155_v40, %v1791_v63  ;;  %v8149_v46 = vpop.xlane.xlu1 %3121  ;;  %vm2383_vm5 = vweird.f32 %v5155_v40  ;;  %v8168_v30 = vpop.eup %5156  ;;  %v8183_v63 = vsel %vm1305_vm3, %v3270_v9, 2147483647  ;;  %vm3747_vm10 = vcmp.eq.f32.partialorder %v9854_v28, %v7835_v6 }
 0x3b3   : > { %v8156_v47 = vpop.xlane.xlu0 %1460  ;;  %9849 = vst [vmem:[#allocation7_spill] sm:$0xff] %v8168_v30  ;;  %vm2384_vm7 = vmor %vm2382_vm6, %vm2383_vm5  ;;  %v3632_v9 = vcvt.f32.s32 %v7372_v14  ;;  %v1229_v28 = vpop.f32.mrf.mxu2 }
 0x3b4   : > { %v2379_v62 = vsub.f32 1.0, %v2378_v24  ;;  %1484 = vmax.xlane.f32.xlu2 %v1483_v50  ;;  %v3618_v50 = vshll.u32 %v3617_v41, 16  ;;  %9853 = vst [vmem:[#allocation87_spill] sm:$0xff] %v8183_v63  ;;  %v8225_v34 = vadd.f32 %v1229_v28, %v5423_v18 }
 0x3b6   : > { %v2380_v7 = vmul.f32 %v5155_v40, %v2379_v62  ;;  %v2389_v62 = vor.u32 1.1754944e-38, %v2388_v29  ;;  %9861 = vst [vmem:[#allocation63_spill] sm:$0xff] %v8225_v34 }
 0x3b7   : > { %1487 = vmax.xlane.f32.xlu0 %v1486_v53  ;;  %v8170_v24 = vpop.xlane.xlu2 %1793  ;;  %3148 = vmax.xlane.f32.xlu1 %v3147_v39  ;;  %v1819_v39 = vsel %vm1305_vm3, %v8168_v30, 0.0  ;;  %v9858_v30 = vld [vmem:[#allocation90_spill] sm:$0xff] }
 0x3b8   : > { %v2381_v57 = vadd.f32 %v5155_v40, %v2380_v7  ;;  %5160 = vrcp.f32 %v8170_v24  ;;  %v8180_v7 = vpop.eup %5158  ;;  %vm2397_vm14 = vweird.f32 %v8170_v24 }
 0x3b9   : > { %9852 = vst [vmem:[#allocation92_spill] sm:$0xff] %v8180_v7 }
 0x3ba   : > { %v2385_v53 = vsel %vm2384_vm7, %v5155_v40, %v2381_v57  ;;  %v3615_v23 = vpop.xlane.xlu1 %3614  ;;  %v8194_v57 = vadd.f32 %v2902_v8, %v8154_v55  ;;  %v3748_v8 = vsel %vm3747_vm10, %v3743_v38, inf }
 0x3bb   : > { %v2390_v29 = vsel %vm2387_vm9, %v2389_v62, %v2385_v53  ;;  %v3616_v41 = vcvt.f32.s32 %v3615_v23  ;;  %v8185_v31 = vpop.xlane.xlu0 %1796  ;;  %v3647_v23 = vcvt.f32.s32 %v7460_v33  ;;  %v3271_v62 = vsel %vm3207_vm8, %v5420_v15, 10  ;;  %v9859_v33 = vld [vmem:[#allocation72_spill] sm:$0xff] }
 0x3bc   : > { %v2391_v40 = vmul.f32 %v9856_v10, %v2390_v29  ;;  %5162 = vrcp.f32 %v8185_v31  ;;  %1820 = vadd.xlane.f32.xlu2 %v1819_v39  ;;  %9857 = vst [vmem:[#allocation86_spill] sm:$0xff] %v8194_v57  ;;  %v1822_v39 = vsel %vm1305_vm3, %v8180_v7, 0.0  ;;  %v3952_v10 = vshra.s32 %v8183_v63, 16 }
 0x3bd   : > { %v3619_v53 = vadd.s32 %v3618_v50, %v3616_v41  ;;  %v1543_v55 = vsub.f32 %v9859_v33, %v7868_v0  ;;  %v8219_v38 = vsel %vm1305_vm3, %v3271_v62, 2147483647  ;;  %v3150_v0 = vsel %vm1305_vm3, %v8194_v57, -inf  ;;  %v9862_v33 = vld [vmem:[#allocation81_spill] sm:$0xff]  ;;  %v9863_v57 = vld [vmem:[#allocation16_spill] sm:$0xff] }
 0x3be   : > { %v4283_v29 = vsel %vm1240_vm2, %v2391_v40, %v9858_v30  ;;  %v5161_v14 = vpop.eup %5160  ;;  %9860 = vst [vmem:[#allocation93_spill] sm:$0xff] %v8219_v38  ;;  %v3758_v41 = vcvt.s32.f32 %v3756_v3  ;;  %v3633_v40 = vshll.u32 %v3632_v9, 16  ;;  %v3648_v45 = vshll.u32 %v3647_v23, 16 }
 0x3bf   : > { %4347 = vst.msk [vmem:[%s6338_s8 + $0x108] sm:$0xff] %vm1305_vm3, %v4283_v29  ;;  %v4903_v16 = vadd.s32 4294967294, %v3619_v53  ;;  %1823 = vadd.xlane.f32.xlu0 %v1822_v39  ;;  %v8216_v30 = vpop.xlane.xlu2 %3124  ;;  %3749 = vmin.xlane.f32.xlu1 %v3748_v8  ;;  %v2393_v50 = vmul.f32 %v5161_v14, %v8170_v24  ;;  %v8228_v39 = vsel %vm1305_vm3, %v3272_v20, 2147483647  ;;  %vm3762_vm12 = vcmp.eq.f32.partialorder %v9862_v33, %v7886_v54 }
 0x3c0   : > { %v8234_v63 = vcvt.s32.f32 %v3952_v10  ;;  %v1652_v7 = vmul.f32 1.442695, %v1543_v55  ;;  %v2403_v3 = vand.u32 2147483648, %v8170_v24  ;;  %v3967_v28 = vshra.s32 %v8219_v38, 16 }
 0x3c1   : > { %v4463_v53 = vcvt.s32.f32 %v4903_v16  ;;  %v2394_v8 = vsub.f32 1.0, %v2393_v50  ;;  %vm2398_vm13 = vweird.f32 %v5161_v14  ;;  %v2401_v16 = vand.u32 2147483647, %v8170_v24 }
 0x3c2   : > { %v5163_v29 = vpop.eup %5162  ;;  %v8230_v62 = vpop.xlane.xlu1 %3820  ;;  %v1544_v10 = vsub.f32 %v9863_v57, %v7931_v60  ;;  %v3982_v55 = vshra.s32 %v8228_v39, 16  ;;  %vm2399_vm1 = vmor %vm2397_vm14, %vm2398_vm13  ;;  %v2404_v26 = vor.u32 1.1754944e-38, %v2403_v3  ;;  %vm2412_vm5 = vweird.f32 %v8185_v31 }
 0x3c3   : > { %4528 = vst.msk [vmem:[%s6338_s8 + $0xa8] sm:$0xff] %vm4506_vm4, %v4463_v53  ;;  %v2408_v9 = vmul.f32 %v5163_v29, %v8185_v31  ;;  %v3630_v23 = vpop.xlane.xlu0 %3629  ;;  %v2395_v20 = vmul.f32 %v5161_v14, %v2394_v8  ;;  %v3763_v53 = vsel %vm3762_vm12, %v3758_v41, inf  ;;  %v2418_v8 = vand.u32 2147483648, %v8185_v31 }
 0x3c4   : > { %v3631_v50 = vcvt.f32.s32 %v3630_v23  ;;  %3151 = vmax.xlane.f32.xlu2 %v3150_v0  ;;  %vm2413_vm15 = vweird.f32 %v5163_v29  ;;  %v2416_v0 = vand.u32 2147483647, %v8185_v31  ;;  %vm2402_vm0 = vcmp.eq.f32.partialorder %v2401_v16, 8.507059e+37 }
 0x3c5   : > { %v2409_v6 = vsub.f32 1.0, %v2408_v9  ;;  %v2396_v11 = vadd.f32 %v5161_v14, %v2395_v20  ;;  %v1232_v9 = vpop.f32.mrf.mxu2  ;;  %vm2414_vm6 = vmor %vm2412_vm5, %vm2413_vm15  ;;  %v2419_v3 = vor.u32 1.1754944e-38, %v2418_v8  ;;  %5164 = vpow2.f32 %v1652_v7  ;;  %v2903_v7 = vld [vmem:[%s5430_s29 + $0x1e8] sm:$0xff] }
 0x3c6   : > { %v3634_v38 = vadd.s32 %v3633_v40, %v3631_v50  ;;  %v8253_v40 = vcvt.s32.f32 %v3982_v55  ;;  %vm2417_vm7 = vcmp.eq.f32.partialorder %v2416_v0, 8.507059e+37  ;;  %v8278_v8 = vcvt.s32.f32 %v3967_v28 }
 0x3c7   : > { %v2410_v23 = vmul.f32 %v5163_v29, %v2409_v6  ;;  %3764 = vmin.xlane.f32.xlu0 %v3763_v53  ;;  %v3645_v60 = vpop.xlane.xlu2 %3644  ;;  %3955 = vmin.xlane.f32.xlu1 %v8234_v63  ;;  %v2400_v57 = vsel %vm2399_vm1, %v5161_v14, %v2396_v11 }
 0x3c8   : > { %v4904_v33 = vadd.s32 4294967294, %v3634_v38  ;;  %v3646_v41 = vcvt.f32.s32 %v3645_v60  ;;  %v2405_v20 = vsel %vm2402_vm0, %v2404_v26, %v2400_v57  ;;  %v8262_v26 = vsel %vm1240_vm2, %v8225_v34, -1e+30  ;;  %v9866_v57 = vld [vmem:[#allocation29_spill] sm:$0xff] }
 0x3c9   : > { %v2411_v24 = vadd.f32 %v5163_v29, %v2410_v23  ;;  %v2406_v6 = vmul.f32 %v7645_v27, %v2405_v20  ;;  %v8267_v38 = vadd.f32 %v1232_v9, %v5423_v18  ;;  %v9865_v27 = vld [vmem:[#allocation2_spill] sm:$0xff]  ;;  %v1654_v23 = vmul.f32 1.442695, %v1544_v10 }
 0x3ca   : > { %v4464_v50 = vcvt.s32.f32 %v4904_v33  ;;  %v3649_v53 = vadd.s32 %v3648_v45, %v3646_v41  ;;  %v8257_v11 = vpop.xlane.xlu1 %1463  ;;  %v1489_v60 = vsel %vm1305_vm3, %v8262_v26, -inf  ;;  %v8299_v10 = vadd.f32 %v2903_v7, %v8262_v26 }
 0x3cb   : > { %v2415_v14 = vsel %vm2414_vm6, %v5163_v29, %v2411_v24  ;;  %v8264_v31 = vpop.xlane.xlu0 %3835  ;;  %9864 = vst [vmem:[#allocation69_spill] sm:$0xff] %v8267_v38  ;;  %v4284_v16 = vsel %vm1240_vm2, %v2406_v6, %v9865_v27  ;;  %5166 = vpow2.f32 %v1654_v23  ;;  %v8301_v9 = vpop.eup %5164 }
 0x3cc   : > { %v2420_v45 = vsel %vm2417_vm7, %v2419_v3, %v2415_v14  ;;  %4529 = vst.msk [vmem:[%s6338_s8 + $0xb0] sm:$0xff] %vm4506_vm4, %v4464_v50  ;;  %v4905_v55 = vadd.s32 4294967294, %v3649_v53  ;;  %3985 = vmin.xlane.f32.xlu2 %v8253_v40  ;;  %v9868_v3 = vld [vmem:[#allocation24_spill] sm:$0xff]  ;;  %v3153_v27 = vsel %vm1305_vm3, %v8299_v10, -inf }
 0x3cd   : > { %4348 = vst.msk [vmem:[%s6338_s8 + $0x110] sm:$0xff] %vm1305_vm3, %v4284_v16  ;;  %v2421_v29 = vmul.f32 %v7660_v48, %v2420_v45  ;;  %v8292_v48 = vsel %vm1240_vm2, %v8267_v38, -1e+30  ;;  %v1235_v20 = vpop.f32.mrf.mxu2  ;;  %v1545_v50 = vsub.f32 %v9868_v3, %v7988_v22  ;;  %v2904_v53 = vld [vmem:[%s5430_s29 + $0x1f0] sm:$0xff]  ;;  %v1825_v16 = vsel %vm1305_vm3, %v8301_v9, 0.0  ;;  %v9870_v45 = vld [vmem:[#allocation85_spill] sm:$0xff] }
 0x3ce   : > { %v4465_v0 = vcvt.s32.f32 %v4905_v55  ;;  %9867 = vst [vmem:[#allocation67_spill] sm:$0xff] %v8301_v9  ;;  %v1492_v6 = vsel %vm1305_vm3, %v8292_v48, -inf  ;;  %v8311_v14 = vadd.f32 %v1235_v20, %v5423_v18  ;;  %vm3209_vm8 = vcmp.eq.f32.partialorder %v9870_v45, %v7974_v51 }
 0x3cf   : > { %v4285_v33 = vsel %vm1240_vm2, %v2421_v29, %v9866_v57  ;;  %3970 = vmin.xlane.f32.xlu0 %v8278_v8  ;;  %v8286_v41 = vpop.xlane.xlu2 %3850  ;;  %1490 = vmax.xlane.f32.xlu1 %v1489_v60  ;;  %v8324_v22 = vadd.f32 %v2904_v53, %v8292_v48  ;;  %v1656_v23 = vmul.f32 1.442695, %v1545_v50  ;;  %v3273_v60 = vsel %vm3209_vm8, %v5420_v15, 10 }
 0x3d0   : > { %4349 = vst.msk [vmem:[%s6338_s8 + $0x118] sm:$0xff] %vm1305_vm3, %v4285_v33  ;;  %v8341_v3 = vsel %vm1305_vm3, %v3273_v60, 2147483647 }
 0x3d1   : > { %4530 = vst.msk [vmem:[%s6338_s8 + $0xb8] sm:$0xff] %vm4506_vm4, %v4465_v0  ;;  %v8321_v29 = vpop.eup %5166  ;;  %v8329_v0 = vsel %vm1240_vm2, %v8311_v14, -1e+30 }
 0x3d2   : > { %v1800_v28 = vpop.xlane.xlu1 %1799  ;;  %9869 = vst [vmem:[#allocation68_spill] sm:$0xff] %v8311_v14  ;;  %v1828_v7 = vsel %vm1305_vm3, %v8321_v29, 0.0  ;;  %v1495_v53 = vsel %vm1305_vm3, %v8329_v0, -inf }
 0x3d3   : > { %5168 = vrcp.f32 %v1800_v28  ;;  %v8303_v24 = vpop.xlane.xlu0 %3127  ;;  %9871 = vst [vmem:[#allocation78_spill] sm:$0xff] %v8321_v29  ;;  %v2433_v50 = vand.u32 2147483648, %v1800_v28  ;;  %v2431_v45 = vand.u32 2147483647, %v1800_v28  ;;  %vm2427_vm11 = vweird.f32 %v1800_v28 }
 0x3d4   : > { %1493 = vmax.xlane.f32.xlu2 %v1492_v6  ;;  %9872 = vst [vmem:[#allocation76_spill] sm:$0xff] %v8329_v0  ;;  %v3156_v6 = vsel %vm1305_vm3, %v8324_v22, -inf  ;;  %5170 = vpow2.f32 %v1656_v23  ;;  %v3997_v23 = vshra.s32 %v8341_v3, 16 }
 0x3d5   : > { %v2434_v38 = vor.u32 1.1754944e-38, %v2433_v50  ;;  %vm2432_vm13 = vcmp.eq.f32.partialorder %v2431_v45, 8.507059e+37  ;;  %v9876_v50 = vld [vmem:[#allocation23_spill] sm:$0xff]  ;;  %v9877_v45 = vld [vmem:[#allocation89_spill] sm:$0xff] }
 0x3d6   : > { %vm3211_vm14 = vcmp.eq.f32.partialorder %v9876_v50, %v8126_v44  ;;  %v3692_v44 = vcvt.f32.s32 %v7630_v12 }
 0x3d7   : > { %3154 = vmax.xlane.f32.xlu0 %v3153_v27  ;;  %v8319_v55 = vpop.xlane.xlu2 %1466  ;;  %1826 = vadd.xlane.f32.xlu1 %v1825_v16  ;;  %v9873_v27 = vld [vmem:[#allocation88_spill] sm:$0xff] }
 0x3d8   : > { %vm3210_vm9 = vcmp.eq.f32.partialorder %v9873_v27, %v8026_v37  ;;  %v2905_v27 = vld [vmem:[%s5430_s29 + $0x1f8] sm:$0xff] }
 0x3d9   : > { %v5169_v18 = vpop.eup %5168  ;;  %v3274_v14 = vsel %vm3210_vm9, %v5420_v15, 10 }
 0x3da   : > { %v2423_v57 = vmul.f32 %v5169_v18, %v1800_v28  ;;  %v8332_v51 = vpop.xlane.xlu1 %3130  ;;  %vm2428_vm10 = vweird.f32 %v5169_v18  ;;  %v8354_v34 = vpop.eup %5170  ;;  %v8361_v9 = vsel %vm1305_vm3, %v3274_v14, 2147483647  ;;  %v3677_v14 = vcvt.f32.s32 %v7542_v17 }
 0x3db   : > { %v8334_v33 = vpop.xlane.xlu0 %1469  ;;  %vm2429_vm12 = vmor %vm2427_vm11, %vm2428_vm10  ;;  %9874 = vst [vmem:[#allocation74_spill] sm:$0xff] %v8354_v34 }
 0x3dc   : > { %v2424_v20 = vsub.f32 1.0, %v2423_v57  ;;  %1829 = vadd.xlane.f32.xlu2 %v1828_v7  ;;  %v3662_v57 = vcvt.f32.s32 %v7491_v56  ;;  %v3678_v50 = vshll.u32 %v3677_v14, 16 }
 0x3de   : > { %v2425_v16 = vmul.f32 %v5169_v18, %v2424_v20  ;;  %v3663_v56 = vshll.u32 %v3662_v57, 16  ;;  %v8370_v57 = vcvt.s32.f32 %v3997_v23  ;;  %v3275_v23 = vsel %vm3211_vm14, %v5420_v15, 10 }
 0x3df   : > { %1496 = vmax.xlane.f32.xlu0 %v1495_v53  ;;  %v8348_v7 = vpop.xlane.xlu2 %1802  ;;  %3157 = vmax.xlane.f32.xlu1 %v3156_v6  ;;  %v9875_v53 = vld [vmem:[#allocation3_spill] sm:$0xff] }
 0x3e0   : > { %v2426_v60 = vadd.f32 %v5169_v18, %v2425_v16  ;;  %5172 = vrcp.f32 %v8348_v7  ;;  %v1546_v6 = vsub.f32 %v9875_v53, %v7977_v58  ;;  %v1547_v58 = vsub.f32 %v9877_v45, %v8071_v1  ;;  %9878 = vst [vmem:[#allocation19_spill] sm:$0xff] %v8370_v57 }
 0x3e1   : > { %v4012_v1 = vshra.s32 %v8361_v9, 16  ;;  %v8393_v45 = vsel %vm1305_vm3, %v3275_v23, 2147483647  ;;  %v2446_v14 = vand.u32 2147483647, %v8348_v7  ;;  %vm2442_vm0 = vweird.f32 %v8348_v7 }
 0x3e2   : > { %v2430_v37 = vsel %vm2429_vm12, %v5169_v18, %v2426_v60  ;;  %v3660_v20 = vpop.xlane.xlu1 %3659  ;;  %v8373_v60 = vadd.f32 %v2905_v27, %v8329_v0  ;;  %v1658_v53 = vmul.f32 1.442695, %v1546_v6  ;;  %9881 = vst [vmem:[#allocation90_spill] sm:$0xff] %v8393_v45  ;;  %v4027_v23 = vshra.s32 %v8393_v45, 16 }
 0x3e3   : > { %v2435_v16 = vsel %vm2432_vm13, %v2434_v38, %v2430_v37  ;;  %v3661_v28 = vcvt.f32.s32 %v3660_v20  ;;  %v8358_v29 = vpop.xlane.xlu0 %1805  ;;  %v9880_v37 = vld [vmem:[#allocation33_spill] sm:$0xff]  ;;  %vm2447_vm7 = vcmp.eq.f32.partialorder %v2446_v14, 8.507059e+37 }
 0x3e4   : > { %v2436_v18 = vmul.f32 %v7763_v49, %v2435_v16  ;;  %5174 = vrcp.f32 %v8358_v29  ;;  %3779 = vmin.xlane.f32.xlu2 %v8050_v35  ;;  %9879 = vst [vmem:[#allocation18_spill] sm:$0xff] %v8373_v60  ;;  %v1831_v35 = vsel %vm1305_vm3, %v8354_v34, 0.0  ;;  %v3159_v6 = vsel %vm1305_vm3, %v8373_v60, -inf }
 0x3e5   : > { %v3664_v38 = vadd.s32 %v3663_v56, %v3661_v28  ;;  %v1660_v56 = vmul.f32 1.442695, %v1547_v58  ;;  %5176 = vpow2.f32 %v1658_v53  ;;  %v9882_v53 = vld [vmem:[#allocation17_spill] sm:$0xff]  ;;  %vm2457_vm8 = vweird.f32 %v8358_v29 }
 0x3e6   : > { %v4286_v49 = vsel %vm1240_vm2, %v2436_v18, %v9880_v37  ;;  %v5173_v20 = vpop.eup %5172  ;;  %v3693_v18 = vshll.u32 %v3692_v44, 16  ;;  %vm3212_vm15 = vcmp.eq.f32.partialorder %v9882_v53, %v8149_v46  ;;  %v9887_v53 = vld [vmem:[#allocation61_spill] sm:$0xff] }
 0x3e7   : > { %4350 = vst.msk [vmem:[%s6338_s8 + $0x120] sm:$0xff] %vm1305_vm3, %v4286_v49  ;;  %v4906_v27 = vadd.s32 4294967294, %v3664_v38  ;;  %1832 = vadd.xlane.f32.xlu0 %v1831_v35  ;;  %v8386_v17 = vpop.xlane.xlu2 %3133  ;;  %4000 = vmin.xlane.f32.xlu1 %v8370_v57  ;;  %v2438_v12 = vmul.f32 %v5173_v20, %v8348_v7  ;;  %v2448_v49 = vand.u32 2147483648, %v8348_v7  ;;  %vm2443_vm1 = vweird.f32 %v5173_v20 }
 0x3e8   : > { %5178 = vpow2.f32 %v1660_v56  ;;  %vm2444_vm5 = vmor %vm2442_vm0, %vm2443_vm1  ;;  %vm3215_vm1 = vcmp.eq.f32.partialorder %v7792_v19, %v8332_v51  ;;  %v3876_v19 = vand.u32 65535, %v7881_v32  ;;  %v9898_v51 = vld [vmem:[#allocation31_spill] sm:$0xff] }
 0x3e9   : > { %v4466_v16 = vcvt.s32.f32 %v4906_v27  ;;  %v2439_v38 = vsub.f32 1.0, %v2438_v12  ;;  %v8401_v27 = vcvt.s32.f32 %v4012_v1 }
 0x3ea   : > { %v5175_v28 = vpop.eup %5174  ;;  %v8395_v37 = vpop.xlane.xlu1 %3865 }
 0x3eb   : > { %4531 = vst.msk [vmem:[%s6338_s8 + $0xc0] sm:$0xff] %vm4506_vm4, %v4466_v16  ;;  %v2453_v58 = vmul.f32 %v5175_v28, %v8358_v29  ;;  %v3675_v35 = vpop.xlane.xlu0 %3674  ;;  %v2440_v34 = vmul.f32 %v5173_v20, %v2439_v38  ;;  %v2463_v16 = vand.u32 2147483648, %v8358_v29  ;;  %v2449_v38 = vor.u32 1.1754944e-38, %v2448_v49  ;;  %v8412_v45 = vpop.eup %5176 }
 0x3ec   : > { %v3676_v44 = vcvt.f32.s32 %v3675_v35  ;;  %3160 = vmax.xlane.f32.xlu2 %v3159_v6  ;;  %vm2458_vm6 = vweird.f32 %v5175_v28  ;;  %v2461_v35 = vand.u32 2147483647, %v8358_v29  ;;  %v3276_v29 = vsel %vm3212_vm15, %v5420_v15, 10 }
 0x3ed   : > { %v2454_v12 = vsub.f32 1.0, %v2453_v58  ;;  %v2441_v0 = vadd.f32 %v5173_v20, %v2440_v34  ;;  %vm2459_vm9 = vmor %vm2457_vm8, %vm2458_vm6  ;;  %vm3216_vm6 = vcmp.eq.f32.partialorder %v7855_v52, %v8386_v17 }
 0x3ee   : > { %v3679_v1 = vadd.s32 %v3678_v50, %v3676_v44  ;;  %v8415_v50 = vcvt.s32.f32 %v4027_v23  ;;  %v2464_v44 = vor.u32 1.1754944e-38, %v2463_v16  ;;  %v8421_v14 = vpop.eup %5178  ;;  %vm2462_vm10 = vcmp.eq.f32.partialorder %v2461_v35, 8.507059e+37 }
 0x3ef   : > { %v2455_v60 = vmul.f32 %v5175_v28, %v2454_v12  ;;  %4015 = vmin.xlane.f32.xlu0 %v8401_v27  ;;  %v3690_v56 = vpop.xlane.xlu2 %3689  ;;  %3794 = vmin.xlane.f32.xlu1 %v8093_v25  ;;  %v2445_v6 = vsel %vm2444_vm5, %v5173_v20, %v2441_v0  ;;  %9883 = vst [vmem:[#allocation72_spill] sm:$0xff] %v8421_v14 }
 0x3f0   : > { %v4907_v58 = vadd.s32 4294967294, %v3679_v1  ;;  %v3691_v34 = vcvt.f32.s32 %v3690_v56  ;;  %v2450_v7 = vsel %vm2447_vm7, %v2449_v38, %v2445_v6  ;;  %v9886_v1 = vld [vmem:[#allocation36_spill] sm:$0xff] }
 0x3f1   : > { %v2456_v57 = vadd.f32 %v5175_v28, %v2455_v60  ;;  %v2451_v49 = vmul.f32 %v7817_v5, %v2450_v7  ;;  %v9885_v5 = vld [vmem:[#allocation20_spill] sm:$0xff] }
 0x3f2   : > { %v4467_v25 = vcvt.s32.f32 %v4907_v58  ;;  %v3694_v0 = vadd.s32 %v3693_v18, %v3691_v34  ;;  %v8419_v20 = vpop.xlane.xlu1 %1472  ;;  %v1548_v12 = vsub.f32 %v9885_v5, %v8144_v2  ;;  %v9888_v58 = vld [vmem:[#allocation39_spill] sm:$0xff] }
 0x3f3   : > { %v2460_v60 = vsel %vm2459_vm9, %v5175_v28, %v2456_v57  ;;  %v8427_v23 = vpop.xlane.xlu0 %3880  ;;  %v4287_v18 = vsel %vm1240_vm2, %v2451_v49, %v9886_v1  ;;  %v8441_v57 = vsel %vm1305_vm3, %v3276_v29, 2147483647  ;;  %v1834_v28 = vsel %vm1305_vm3, %v8412_v45, 0.0  ;;  %v9893_v1 = vld [vmem:[#allocation42_spill] sm:$0xff] }
 0x3f4   : > { %9884 = vst [vmem:[#allocation81_spill] sm:$0xff] %v8427_v23  ;;  %v2465_v16 = vsel %vm2462_vm10, %v2464_v44, %v2460_v60  ;;  %v4908_v38 = vadd.s32 4294967294, %v3694_v0  ;;  %4030 = vmin.xlane.f32.xlu2 %v8415_v50  ;;  %v1662_v6 = vmul.f32 1.442695, %v1548_v12  ;;  %vm3213_vm11 = vcmp.eq.f32.partialorder %v9888_v58, %v8216_v30  ;;  %v9891_v0 = vld [vmem:[#allocation21_spill] sm:$0xff]  ;;  %v9892_v60 = vld [vmem:[#allocation47_spill] sm:$0xff] }
 0x3f5   : > { %4532 = vst.msk [vmem:[%s6338_s8 + $0xc8] sm:$0xff] %vm4506_vm4, %v4467_v25  ;;  %v2466_v46 = vmul.f32 %v7832_v42, %v2465_v16  ;;  %v9889_v42 = vld [vmem:[#allocation22_spill] sm:$0xff]  ;;  %v4042_v7 = vshra.s32 %v8441_v57, 16  ;;  %v3277_v44 = vsel %vm3213_vm11, %v5420_v15, 10  ;;  %v1837_v30 = vsel %vm1305_vm3, %v8421_v14, 0.0 }
 0x3f6   : > { %4351 = vst.msk [vmem:[%s6338_s8 + $0x128] sm:$0xff] %vm1305_vm3, %v4287_v18  ;;  %v4468_v2 = vcvt.s32.f32 %v4908_v38  ;;  %v3831_v34 = vand.u32 65535, %v9889_v42  ;;  %v1549_v29 = vsub.f32 %v9891_v0, %v8156_v47  ;;  %vm3214_vm13 = vcmp.eq.f32.partialorder %v9892_v60, %v8303_v24  ;;  %v9894_v24 = vld [vmem:[#allocation27_spill] sm:$0xff]  ;;  %v9897_v0 = vld [vmem:[#allocation5_spill] sm:$0xff] }
 0x3f7   : > { %v4288_v35 = vsel %vm1240_vm2, %v2466_v46, %v9887_v53  ;;  %3809 = vmin.xlane.f32.xlu0 %v8114_v36  ;;  %v8449_v56 = vpop.xlane.xlu2 %3895  ;;  %1835 = vadd.xlane.f32.xlu1 %v1834_v28  ;;  %v9890_v36 = vld [vmem:[#allocation30_spill] sm:$0xff]  ;;  %v8473_v12 = vcvt.s32.f32 %v4042_v7  ;;  %v3816_v18 = vand.u32 65535, %v9893_v1  ;;  %v8477_v16 = vsel %vm1305_vm3, %v3277_v44, 2147483647  ;;  %v9895_v28 = vld [vmem:[#allocation41_spill] sm:$0xff] }
 0x3f8   : > { %4352 = vst.msk [vmem:[%s6338_s8 + $0x130] sm:$0xff] %vm1305_vm3, %v4288_v35  ;;  %vm3837_vm12 = vcmp.eq.f32.partialorder %v9890_v36, %v8264_v31  ;;  %v3833_v5 = vcvt.s32.f32 %v3831_v34  ;;  %v3278_v46 = vsel %vm3214_vm13, %v5420_v15, 10  ;;  %v1664_v47 = vmul.f32 1.442695, %v1549_v29 }
 0x3f9   : > { %4533 = vst.msk [vmem:[%s6338_s8 + $0xd0] sm:$0xff] %vm4506_vm4, %v4468_v2  ;;  %vm3822_vm14 = vcmp.eq.f32.partialorder %v9894_v24, %v8230_v62  ;;  %v1550_v53 = vsub.f32 %v9895_v28, %v8257_v11  ;;  %v3818_v58 = vcvt.s32.f32 %v3816_v18  ;;  %v8491_v34 = vsel %vm1305_vm3, %v3278_v46, 2147483647 }
 0x3fa   : > { %v8459_v49 = vpop.xlane.xlu1 %1808  ;;  %v3838_v38 = vsel %vm3837_vm12, %v3833_v5, inf  ;;  %v3846_v29 = vand.u32 65535, %v9897_v0  ;;  %v4072_v5 = vshra.s32 %v8491_v34, 16 }
 0x3fb   : > { %5180 = vrcp.f32 %v8459_v49  ;;  %v8465_v25 = vpop.xlane.xlu0 %3136  ;;  %v1666_v11 = vmul.f32 1.442695, %v1550_v53  ;;  %v2478_v1 = vand.u32 2147483648, %v8459_v49  ;;  %v2476_v24 = vand.u32 2147483647, %v8459_v49 }
 0x3fc   : > { %5182 = vpow2.f32 %v1662_v6  ;;  %1838 = vadd.xlane.f32.xlu2 %v1837_v30  ;;  %v4057_v6 = vshra.s32 %v8477_v16, 16  ;;  %v3823_v30 = vsel %vm3822_vm14, %v3818_v58, inf  ;;  %v3848_v53 = vcvt.s32.f32 %v3846_v29 }
 0x3fd   : > { %5184 = vpow2.f32 %v1664_v47  ;;  %v3707_v47 = vcvt.f32.s32 %v7663_v59  ;;  %v3861_v58 = vand.u32 65535, %v7849_v61  ;;  %vm2472_vm0 = vweird.f32 %v8459_v49 }
 0x3fe   : > { %5186 = vpow2.f32 %v1666_v11  ;;  %v2479_v59 = vor.u32 1.1754944e-38, %v2478_v1  ;;  %vm2477_vm7 = vcmp.eq.f32.partialorder %v2476_v24, 8.507059e+37  ;;  %v9900_v11 = vld [vmem:[#allocation38_spill] sm:$0xff]  ;;  %v3722_v1 = vcvt.f32.s32 %v7714_v4 }
 0x3ff   : > { %4045 = vmin.xlane.f32.xlu0 %v8473_v12  ;;  %v8481_v2 = vpop.xlane.xlu2 %1475  ;;  %3839 = vmin.xlane.f32.xlu1 %v3838_v38  ;;  %v8503_v38 = vcvt.s32.f32 %v4057_v6  ;;  %v3708_v32 = vshll.u32 %v3707_v47, 16  ;;  %vm3852_vm8 = vcmp.eq.f32.partialorder %v9900_v11, %v8286_v41  ;;  %v3280_v47 = vsel %vm3216_vm6, %v5420_v15, 10 }
 0x400   : > { %v3878_v11 = vcvt.s32.f32 %v3876_v19 }
 0x401   : > { %v5181_v35 = vpop.eup %5180 }
 0x402   : > { %v8488_v42 = vpop.eup %5182  ;;  %v2468_v7 = vmul.f32 %v5181_v35, %v8459_v49  ;;  %v8494_v44 = vpop.xlane.xlu1 %3139  ;;  %vm2473_vm15 = vweird.f32 %v5181_v35  ;;  %v8523_v49 = vcvt.s32.f32 %v4072_v5  ;;  %v3737_v5 = vcvt.f32.s32 %v7802_v21 }
 0x403   : > { %9896 = vst [vmem:[#allocation16_spill] sm:$0xff] %v8488_v42  ;;  %v8496_v36 = vpop.xlane.xlu0 %1478  ;;  %v1840_v18 = vsel %vm1305_vm3, %v8488_v42, 0.0  ;;  %vm2474_vm5 = vmor %vm2472_vm0, %vm2473_vm15  ;;  %v8519_v0 = vpop.eup %5184  ;;  %v3853_v21 = vsel %vm3852_vm8, %v3848_v53, inf }
 0x404   : > { %v2469_v60 = vsub.f32 1.0, %v2468_v7  ;;  %3824 = vmin.xlane.f32.xlu2 %v3823_v30  ;;  %v1551_v7 = vsub.f32 %v9898_v51, %v8319_v55  ;;  %v3279_v30 = vsel %vm3215_vm1, %v5420_v15, 10  ;;  %9899 = vst [vmem:[#allocation2_spill] sm:$0xff] %v8519_v0  ;;  %v9902_v51 = vld [vmem:[#allocation43_spill] sm:$0xff]  ;;  %v8541_v4 = vpop.eup %5186 }
 0x405   : > { %9903 = vst [vmem:[#allocation24_spill] sm:$0xff] %v8541_v4 }
 0x406   : > { %v2470_v46 = vmul.f32 %v5181_v35, %v2469_v60  ;;  %v1668_v24 = vmul.f32 1.442695, %v1551_v7  ;;  %v1843_v7 = vsel %vm1305_vm3, %v8519_v0, 0.0 }
 0x407   : > { %1841 = vadd.xlane.f32.xlu0 %v1840_v18  ;;  %v8509_v28 = vpop.xlane.xlu2 %1811  ;;  %4060 = vmin.xlane.f32.xlu1 %v8503_v38 }
 0x408   : > { %v2471_v6 = vadd.f32 %v5181_v35, %v2470_v46  ;;  %5188 = vrcp.f32 %v8509_v28  ;;  %v8531_v46 = vsel %vm1305_vm3, %v3279_v30, 2147483647  ;;  %v9904_v30 = vld [vmem:[#allocation40_spill] sm:$0xff]  ;;  %v2493_v19 = vand.u32 2147483648, %v8509_v28 }
 0x409   : > { %9901 = vst [vmem:[#allocation29_spill] sm:$0xff] %v8531_v46  ;;  %v4087_v52 = vshra.s32 %v8531_v46, 16  ;;  %vm2487_vm13 = vweird.f32 %v8509_v28 }
 0x40a   : > { %v2475_v61 = vsel %vm2474_vm5, %v5181_v35, %v2471_v6  ;;  %v3705_v29 = vpop.xlane.xlu1 %3704 }
 0x40b   : > { %v2480_v55 = vsel %vm2477_vm7, %v2479_v59, %v2475_v61  ;;  %v3706_v60 = vcvt.f32.s32 %v3705_v29  ;;  %v8527_v18 = vpop.xlane.xlu0 %1814  ;;  %v1552_v59 = vsub.f32 %v9904_v30, %v8334_v33  ;;  %v9905_v61 = vld [vmem:[#allocation62_spill] sm:$0xff]  ;;  %v3863_v33 = vcvt.s32.f32 %v3861_v58  ;;  %v9908_v58 = vld [vmem:[#allocation9_spill] sm:$0xff] }
 0x40c   : > { %v2481_v35 = vmul.f32 %v9902_v51, %v2480_v55  ;;  %5190 = vrcp.f32 %v8527_v18  ;;  %4075 = vmin.xlane.f32.xlu2 %v8523_v49  ;;  %v8559_v51 = vsel %vm1305_vm3, %v3280_v47, 2147483647  ;;  %vm3217_vm10 = vcmp.eq.f32.partialorder %v9908_v58, %v8465_v25  ;;  %v9910_v25 = vld [vmem:[#allocation37_spill] sm:$0xff] }
 0x40d   : > { %v3709_v6 = vadd.s32 %v3708_v32, %v3706_v60  ;;  %v3723_v60 = vshll.u32 %v3722_v1, 16  ;;  %9906 = vst [vmem:[#allocation85_spill] sm:$0xff] %v8559_v51  ;;  %5192 = vpow2.f32 %v1668_v24  ;;  %vm3867_vm12 = vcmp.eq.f32.partialorder %v9910_v25, %v8395_v37 }
 0x40e   : > { %v4289_v29 = vsel %vm1240_vm2, %v2481_v35, %v9905_v61  ;;  %v5189_v55 = vpop.eup %5188  ;;  %v3738_v35 = vshll.u32 %v3737_v5, 16  ;;  %v1846_v61 = vsel %vm1305_vm3, %v8541_v4, 0.0  ;;  %v2491_v4 = vand.u32 2147483647, %v8509_v28 }
 0x40f   : > { %4353 = vst.msk [vmem:[%s6338_s8 + $0x138] sm:$0xff] %vm1305_vm3, %v4289_v29  ;;  %v4909_v17 = vadd.s32 4294967294, %v3709_v6  ;;  %3854 = vmin.xlane.f32.xlu0 %v3853_v21  ;;  %v8556_v32 = vpop.xlane.xlu2 %3142  ;;  %1844 = vadd.xlane.f32.xlu1 %v1843_v7  ;;  %v2483_v53 = vmul.f32 %v5189_v55, %v8509_v28  ;;  %v1670_v29 = vmul.f32 1.442695, %v1552_v59  ;;  %v9907_v21 = vld [vmem:[#allocation48_spill] sm:$0xff]  ;;  %v4102_v7 = vshra.s32 %v8559_v51, 16 }
 0x410   : > { %vm3882_vm9 = vcmp.eq.f32.partialorder %v9907_v21, %v8427_v23  ;;  %vm2488_vm11 = vweird.f32 %v5189_v55  ;;  %v2506_v46 = vand.u32 2147483647, %v8527_v18  ;;  %vm2492_vm15 = vcmp.eq.f32.partialorder %v2491_v4, 8.507059e+37  ;;  %v9911_v28 = vld [vmem:[#allocation44_spill] sm:$0xff] }
 0x411   : > { %v4469_v30 = vcvt.s32.f32 %v4909_v17  ;;  %v2484_v1 = vsub.f32 1.0, %v2483_v53  ;;  %v8575_v17 = vcvt.s32.f32 %v4087_v52  ;;  %v3281_v53 = vsel %vm3217_vm10, %v5420_v15, 10  ;;  %vm2489_vm14 = vmor %vm2487_vm13, %vm2488_vm11 }
 0x412   : > { %v5191_v6 = vpop.eup %5190  ;;  %v8568_v47 = vpop.xlane.xlu1 %3910  ;;  %v2508_v52 = vand.u32 2147483648, %v8527_v18  ;;  %v1553_v23 = vsub.f32 %v9911_v28, %v8419_v20  ;;  %vm2502_vm0 = vweird.f32 %v8527_v18  ;;  %v8597_v4 = vsel %vm1305_vm3, %v3281_v53, 2147483647 }
 0x413   : > { %4534 = vst.msk [vmem:[%s6338_s8 + $0xd8] sm:$0xff] %vm4506_vm4, %v4469_v30  ;;  %v2498_v5 = vmul.f32 %v5191_v6, %v8527_v18  ;;  %v3720_v24 = vpop.xlane.xlu0 %3719  ;;  %v2485_v59 = vmul.f32 %v5189_v55, %v2484_v1  ;;  %v3883_v30 = vsel %vm3882_vm9, %v3878_v11, inf  ;;  %v8586_v42 = vpop.eup %5192  ;;  %vm2503_vm1 = vweird.f32 %v5191_v6 }
 0x414   : > { %9909 = vst [vmem:[#allocation88_spill] sm:$0xff] %v8575_v17  ;;  %v3721_v0 = vcvt.f32.s32 %v3720_v24  ;;  %1847 = vadd.xlane.f32.xlu2 %v1846_v61  ;;  %v2494_v61 = vor.u32 1.1754944e-38, %v2493_v19  ;;  %vm2504_vm5 = vmor %vm2502_vm0, %vm2503_vm1  ;;  %vm2507_vm6 = vcmp.eq.f32.partialorder %v2506_v46, 8.507059e+37  ;;  %v3868_v18 = vsel %vm3867_vm12, %v3863_v33, inf }
 0x415   : > { %v2499_v58 = vsub.f32 1.0, %v2498_v5  ;;  %v2486_v51 = vadd.f32 %v5189_v55, %v2485_v59  ;;  %5194 = vpow2.f32 %v1670_v29  ;;  %v1672_v25 = vmul.f32 1.442695, %v1553_v23  ;;  %v9916_v23 = vld [vmem:[#allocation35_spill] sm:$0xff] }
 0x416   : > { %v3724_v1 = vadd.s32 %v3723_v60, %v3721_v0  ;;  %v4117_v33 = vshra.s32 %v8597_v4, 16  ;;  %v3891_v29 = vand.u32 65535, %v9916_v23 }
 0x417   : > { %v2500_v24 = vmul.f32 %v5191_v6, %v2499_v58  ;;  %4090 = vmin.xlane.f32.xlu0 %v8575_v17  ;;  %v3735_v5 = vpop.xlane.xlu2 %3734  ;;  %3884 = vmin.xlane.f32.xlu1 %v3883_v30  ;;  %v2490_v21 = vsel %vm2489_vm14, %v5189_v55, %v2486_v51  ;;  %v2509_v58 = vor.u32 1.1754944e-38, %v2508_v52  ;;  %v9912_v51 = vld [vmem:[#allocation71_spill] sm:$0xff]  ;;  %5196 = vpow2.f32 %v1672_v25 }
 0x418   : > { %v4910_v11 = vadd.s32 4294967294, %v3724_v1  ;;  %v3736_v59 = vcvt.f32.s32 %v3735_v5  ;;  %v2495_v0 = vsel %vm2492_vm15, %v2494_v61, %v2490_v21  ;;  %v1849_v1 = vsel %vm1305_vm3, %v8586_v42, 0.0  ;;  %v9913_v61 = vld [vmem:[#allocation51_spill] sm:$0xff]  ;;  %v9918_v21 = vld [vmem:[#allocation8_spill] sm:$0xff] }
 0x419   : > { %v2501_v60 = vadd.f32 %v5191_v6, %v2500_v24  ;;  %v2496_v19 = vmul.f32 %v7986_v43, %v2495_v0  ;;  %v8630_v24 = vcvt.s32.f32 %v4117_v33  ;;  %vm3897_vm8 = vcmp.eq.f32.partialorder %v9918_v21, %v8449_v56 }
 0x41a   : > { %v4470_v17 = vcvt.s32.f32 %v4910_v11  ;;  %v3739_v14 = vadd.s32 %v3738_v35, %v3736_v59  ;;  %v8594_v30 = vpop.xlane.xlu1 %1481  ;;  %v3893_v0 = vcvt.s32.f32 %v3891_v29  ;;  %v9925_v29 = vld [vmem:[#allocation10_spill] sm:$0xff] }
 0x41b   : > { %v2505_v55 = vsel %vm2504_vm5, %v5191_v6, %v2501_v60  ;;  %v8599_v20 = vpop.xlane.xlu0 %3925  ;;  %v4290_v43 = vsel %vm1240_vm2, %v2496_v19, %v9912_v51  ;;  %v8612_v6 = vcvt.s32.f32 %v4102_v7  ;;  %v8632_v5 = vpop.eup %5194  ;;  %v9921_v51 = vld [vmem:[#allocation50_spill] sm:$0xff]  ;;  %v3906_v21 = vand.u32 65535, %v9925_v29 }
 0x41c   : > { %v2510_v52 = vsel %vm2507_vm6, %v2509_v58, %v2505_v55  ;;  %4535 = vst.msk [vmem:[%s6338_s8 + $0xe0] sm:$0xff] %vm4506_vm4, %v4470_v17  ;;  %v4911_v35 = vadd.s32 4294967294, %v3739_v14  ;;  %3869 = vmin.xlane.f32.xlu2 %v3868_v18  ;;  %v3898_v19 = vsel %vm3897_vm8, %v3893_v0, inf  ;;  %v1852_v58 = vsel %vm1305_vm3, %v8632_v5, 0.0  ;;  %v9920_v55 = vld [vmem:[#allocation73_spill] sm:$0xff] }
 0x41d   : > { %4354 = vst.msk [vmem:[%s6338_s8 + $0x140] sm:$0xff] %vm1305_vm3, %v4290_v43  ;;  %v2511_v46 = vmul.f32 %v8003_v13, %v2510_v52  ;;  %v9915_v13 = vld [vmem:[#allocation49_spill] sm:$0xff]  ;;  %vm3219_vm9 = vcmp.eq.f32.partialorder %v9920_v55, %v8556_v32  ;;  %v3921_v43 = vand.u32 65535, %v9921_v51  ;;  %v9924_v32 = vld [vmem:[#allocation12_spill] sm:$0xff] }
 0x41e   : > { %v4471_v53 = vcvt.s32.f32 %v4911_v35  ;;  %vm3218_vm7 = vcmp.eq.f32.partialorder %v9915_v13, %v8494_v44  ;;  %9917 = vst [vmem:[#allocation23_spill] sm:$0xff] %v8632_v5  ;;  %v9919_v44 = vld [vmem:[#allocation65_spill] sm:$0xff]  ;;  %vm3927_vm10 = vcmp.eq.f32.partialorder %v9924_v32, %v8599_v20 }
 0x41f   : > { %v4291_v14 = vsel %vm1240_vm2, %v2511_v46, %v9913_v61  ;;  %1850 = vadd.xlane.f32.xlu0 %v1849_v1  ;;  %v8620_v17 = vpop.xlane.xlu2 %3940  ;;  %4105 = vmin.xlane.f32.xlu1 %v8612_v6  ;;  %v3282_v11 = vsel %vm3218_vm7, %v5420_v15, 10  ;;  %v1554_v28 = vsub.f32 %v9919_v44, %v8481_v2  ;;  %v8650_v2 = vpop.eup %5196  ;;  %v9923_v35 = vld [vmem:[#allocation45_spill] sm:$0xff]  ;;  %v3923_v23 = vcvt.s32.f32 %v3921_v43 }
 0x420   : > { %9914 = vst [vmem:[#allocation3_spill] sm:$0xff] %v8620_v17  ;;  %v8641_v60 = vsel %vm1305_vm3, %v3282_v11, 2147483647  ;;  %v1555_v46 = vsub.f32 %v9923_v35, %v8496_v36  ;;  %v1855_v13 = vsel %vm1305_vm3, %v8650_v2, 0.0  ;;  %v9926_v36 = vld [vmem:[#allocation6_spill] sm:$0xff] }
 0x421   : > { %4355 = vst.msk [vmem:[%s6338_s8 + $0x148] sm:$0xff] %vm1305_vm3, %v4291_v14  ;;  %v1674_v52 = vmul.f32 1.442695, %v1554_v28  ;;  %v4132_v33 = vshra.s32 %v8641_v60, 16  ;;  %v3752_v11 = vcvt.f32.s32 %v9926_v36  ;;  %v3928_v43 = vsel %vm3927_vm10, %v3923_v23, inf }
 0x422   : > { %4536 = vst.msk [vmem:[%s6338_s8 + $0xe8] sm:$0xff] %vm4506_vm4, %v4471_v53  ;;  %v1818_v7 = vpop.xlane.xlu1 %1817  ;;  %v3283_v53 = vsel %vm3219_vm9, %v5420_v15, 10  ;;  %v1676_v44 = vmul.f32 1.442695, %v1555_v46  ;;  %v3908_v46 = vcvt.s32.f32 %v3906_v21 }
 0x423   : > { %5198 = vrcp.f32 %v1818_v7  ;;  %v3146_v59 = vpop.xlane.xlu0 %3145  ;;  %9922 = vst [vmem:[#allocation89_spill] sm:$0xff] %v8650_v2  ;;  %v8667_v0 = vsel %vm1305_vm3, %v3283_v53, 2147483647  ;;  %v8670_v55 = vcvt.s32.f32 %v4132_v33  ;;  %v2521_v35 = vand.u32 2147483647, %v1818_v7  ;;  %v9928_v53 = vld [vmem:[#allocation75_spill] sm:$0xff] }
 0x424   : > { %4120 = vmin.xlane.f32.xlu2 %v8630_v24  ;;  %5200 = vpow2.f32 %v1674_v52  ;;  %vm3912_vm13 = vcmp.eq.f32.partialorder %v9928_v53, %v8568_v47  ;;  %vm2517_vm14 = vweird.f32 %v1818_v7  ;;  %v4147_v33 = vshra.s32 %v8667_v0, 16 }
 0x425   : > { %v3753_v36 = vshll.u32 %v3752_v11, 16  ;;  %vm2522_vm15 = vcmp.eq.f32.partialorder %v2521_v35, 8.507059e+37 }
 0x427   : > { %3899 = vmin.xlane.f32.xlu0 %v3898_v19  ;;  %v8647_v18 = vpop.xlane.xlu2 %1484  ;;  %1853 = vadd.xlane.f32.xlu1 %v1852_v58  ;;  %v2523_v19 = vand.u32 2147483648, %v1818_v7  ;;  %v9927_v58 = vld [vmem:[#allocation26_spill] sm:$0xff] }
 0x428   : > { %vm3220_vm11 = vcmp.eq.f32.partialorder %v9927_v58, %v3146_v59 }
 0x429   : > { %v5199_v25 = vpop.eup %5198  ;;  %v3284_v59 = vsel %vm3220_vm11, %v5420_v15, 10  ;;  %v2524_v32 = vor.u32 1.1754944e-38, %v2523_v19  ;;  %v9932_v19 = vld [vmem:[#allocation34_spill] sm:$0xff] }
 0x42a   : > { %v2513_v1 = vmul.f32 %v5199_v25, %v1818_v7  ;;  %v8656_v61 = vpop.xlane.xlu1 %3148  ;;  %vm2518_vm12 = vweird.f32 %v5199_v25  ;;  %v8685_v23 = vpop.eup %5200  ;;  %v8688_v7 = vsel %vm1305_vm3, %v3284_v59, 2147483647  ;;  %v9935_v59 = vld [vmem:[#allocation79_spill] sm:$0xff] }
 0x42b   : > { %v8660_v14 = vpop.xlane.xlu0 %1487  ;;  %vm2519_vm1 = vmor %vm2517_vm14, %vm2518_vm12  ;;  %9930 = vst [vmem:[#allocation33_spill] sm:$0xff] %v8685_v23 }
 0x42c   : > { %v2514_v28 = vsub.f32 1.0, %v2513_v1  ;;  %1856 = vadd.xlane.f32.xlu2 %v1855_v13  ;;  %v9929_v13 = vld [vmem:[#allocation52_spill] sm:$0xff]  ;;  %9931 = vst [vmem:[#allocation17_spill] sm:$0xff] %v8688_v7 }
 0x42d   : > { %v1556_v29 = vsub.f32 %v9929_v13, %v8594_v30  ;;  %v3913_v30 = vsel %vm3912_vm13, %v3908_v46, inf  ;;  %v1858_v46 = vsel %vm1305_vm3, %v8685_v23, 0.0 }
 0x42e   : > { %v2515_v51 = vmul.f32 %v5199_v25, %v2514_v28 }
 0x42f   : > { %4135 = vmin.xlane.f32.xlu0 %v8670_v55  ;;  %v8676_v52 = vpop.xlane.xlu2 %1820  ;;  %3929 = vmin.xlane.f32.xlu1 %v3928_v43 }
 0x430   : > { %v2516_v1 = vadd.f32 %v5199_v25, %v2515_v51  ;;  %5202 = vrcp.f32 %v8676_v52  ;;  %vm2532_vm7 = vweird.f32 %v8676_v52 }
 0x431   : > { %5204 = vpow2.f32 %v1676_v44  ;;  %v1678_v44 = vmul.f32 1.442695, %v1556_v29 }
 0x432   : > { %v2520_v21 = vsel %vm2519_vm1, %v5199_v25, %v2516_v1  ;;  %v3750_v28 = vpop.xlane.xlu1 %3749  ;;  %v9933_v25 = vld [vmem:[#allocation83_spill] sm:$0xff]  ;;  %v8698_v1 = vcvt.s32.f32 %v4147_v33 }
 0x433   : > { %v2525_v58 = vsel %vm2522_vm15, %v2524_v32, %v2520_v21  ;;  %v3751_v51 = vcvt.f32.s32 %v3750_v28  ;;  %v8690_v43 = vpop.xlane.xlu0 %1823  ;;  %v3936_v11 = vand.u32 65535, %v9933_v25  ;;  %v4162_v21 = vshra.s32 %v8688_v7, 16  ;;  %v9939_v25 = vld [vmem:[#allocation93_spill] sm:$0xff] }
 0x434   : > { %v2526_v13 = vmul.f32 %v9932_v19, %v2525_v58  ;;  %5206 = vrcp.f32 %v8690_v43  ;;  %3914 = vmin.xlane.f32.xlu2 %v3913_v30  ;;  %9934 = vst [vmem:[#allocation20_spill] sm:$0xff] %v8698_v1  ;;  %v3767_v28 = vcvt.f32.s32 %v7886_v54  ;;  %v9936_v58 = vld [vmem:[#allocation58_spill] sm:$0xff]  ;;  %vm2547_vm12 = vweird.f32 %v8690_v43 }
 0x435   : > { %v3754_v35 = vadd.s32 %v3753_v36, %v3751_v51  ;;  %vm3221_vm0 = vcmp.eq.f32.partialorder %v9936_v58, %v8656_v61  ;;  %v3938_v30 = vcvt.s32.f32 %v3936_v11  ;;  %5208 = vpow2.f32 %v1678_v44  ;;  %v9938_v19 = vld [vmem:[#allocation66_spill] sm:$0xff]  ;;  %v9940_v61 = vld [vmem:[#allocation64_spill] sm:$0xff] }
 0x436   : > { %v4292_v32 = vsel %vm1240_vm2, %v2526_v13, %v9935_v59  ;;  %v5203_v53 = vpop.eup %5202  ;;  %v1557_v54 = vsub.f32 %v9938_v19, %v8647_v18  ;;  %v3966_v59 = vand.u32 65535, %v9939_v25  ;;  %vm3942_vm5 = vcmp.eq.f32.partialorder %v9940_v61, %v8620_v17 }
 0x437   : > { %4356 = vst.msk [vmem:[%s6338_s8 + $0x150] sm:$0xff] %vm1305_vm3, %v4292_v32  ;;  %v4912_v29 = vadd.s32 4294967294, %v3754_v35  ;;  %1859 = vadd.xlane.f32.xlu0 %v1858_v46  ;;  %v3152_v33 = vpop.xlane.xlu2 %3151  ;;  %4150 = vmin.xlane.f32.xlu1 %v8698_v1  ;;  %v8712_v36 = vpop.eup %5204  ;;  %v2528_v51 = vmul.f32 %v5203_v53, %v8676_v52  ;;  %v3285_v35 = vsel %vm3221_vm0, %v5420_v15, 10  ;;  %v8723_v23 = vcvt.s32.f32 %v4162_v21 }
 0x438   : > { %9937 = vst [vmem:[#allocation36_spill] sm:$0xff] %v8712_v36  ;;  %v3768_v2 = vshll.u32 %v3767_v28, 16  ;;  %v2538_v11 = vand.u32 2147483648, %v8676_v52  ;;  %vm2533_vm6 = vweird.f32 %v5203_v53  ;;  %v2536_v25 = vand.u32 2147483647, %v8676_v52 }
 0x439   : > { %v4472_v13 = vcvt.s32.f32 %v4912_v29  ;;  %v2529_v46 = vsub.f32 1.0, %v2528_v51  ;;  %9941 = vst [vmem:[#allocation61_spill] sm:$0xff] %v8723_v23  ;;  %v1861_v29 = vsel %vm1305_vm3, %v8712_v36, 0.0  ;;  %v1680_v21 = vmul.f32 1.442695, %v1557_v54  ;;  %vm2534_vm8 = vmor %vm2532_vm7, %vm2533_vm6 }
 0x43a   : > { %v5207_v32 = vpop.eup %5206  ;;  %v8721_v58 = vpop.xlane.xlu1 %3955  ;;  %v8734_v28 = vsel %vm1305_vm3, %v3285_v35, 2147483647  ;;  %v2551_v54 = vand.u32 2147483647, %v8690_v43  ;;  %vm2537_vm10 = vcmp.eq.f32.partialorder %v2536_v25, 8.507059e+37 }
 0x43b   : > { %4537 = vst.msk [vmem:[%s6338_s8 + $0xf0] sm:$0xff] %vm4506_vm4, %v4472_v13  ;;  %v2543_v18 = vmul.f32 %v5207_v32, %v8690_v43  ;;  %v3765_v44 = vpop.xlane.xlu0 %3764  ;;  %v2530_v19 = vmul.f32 %v5203_v53, %v2529_v46  ;;  %v3943_v13 = vsel %vm3942_vm5, %v3938_v30, inf  ;;  %v2553_v46 = vand.u32 2147483648, %v8690_v43  ;;  %v8741_v7 = vpop.eup %5208  ;;  %v9942_v30 = vld [vmem:[#allocation86_spill] sm:$0xff]  ;;  %v9945_v43 = vld [vmem:[#allocation60_spill] sm:$0xff] }
 0x43c   : > { %v3766_v51 = vcvt.f32.s32 %v3765_v44  ;;  %4165 = vmin.xlane.f32.xlu2 %v8723_v23  ;;  %v2539_v44 = vor.u32 1.1754944e-38, %v2538_v11  ;;  %vm2548_vm9 = vweird.f32 %v5207_v32  ;;  %vm3222_vm11 = vcmp.eq.f32.partialorder %v9942_v30, %v3152_v33 }
 0x43d   : > { %v2544_v5 = vsub.f32 1.0, %v2543_v18  ;;  %v2531_v1 = vadd.f32 %v5203_v53, %v2530_v19  ;;  %v4177_v18 = vshra.s32 %v8734_v28, 16  ;;  %vm2549_vm13 = vmor %vm2547_vm12, %vm2548_vm9  ;;  %vm2552_vm14 = vcmp.eq.f32.partialorder %v2551_v54, 8.507059e+37 }
 0x43e   : > { %v3769_v36 = vadd.s32 %v3768_v2, %v3766_v51  ;;  %v2554_v51 = vor.u32 1.1754944e-38, %v2553_v46  ;;  %5210 = vpow2.f32 %v1680_v21  ;;  %vm3957_vm15 = vcmp.eq.f32.partialorder %v8234_v63, %v8721_v58 }
 0x43f   : > { %v2545_v23 = vmul.f32 %v5207_v32, %v2544_v5  ;;  %3944 = vmin.xlane.f32.xlu0 %v3943_v13  ;;  %v8744_v35 = vpop.xlane.xlu2 %3985  ;;  %1862 = vadd.xlane.f32.xlu1 %v1861_v29  ;;  %v2535_v61 = vsel %vm2534_vm8, %v5203_v53, %v2531_v1  ;;  %v9943_v5 = vld [vmem:[#allocation7_spill] sm:$0xff]  ;;  %v1864_v1 = vsel %vm1305_vm3, %v8741_v7, 0.0  ;;  %v9944_v53 = vld [vmem:[#allocation14_spill] sm:$0xff]  ;;  %v3286_v29 = vsel %vm3222_vm11, %v5420_v15, 10 }
 0x440   : > { %v4913_v52 = vadd.s32 4294967294, %v3769_v36  ;;  %v2540_v2 = vsel %vm2537_vm10, %v2539_v44, %v2535_v61  ;;  %v1558_v33 = vsub.f32 %v9944_v53, %v8660_v14  ;;  %v3968_v44 = vcvt.s32.f32 %v3966_v59  ;;  %v9946_v14 = vld [vmem:[#allocation92_spill] sm:$0xff]  ;;  %v9947_v61 = vld [vmem:[#allocation87_spill] sm:$0xff] }
 0x441   : > { %v2546_v19 = vadd.f32 %v5207_v32, %v2545_v23  ;;  %v2541_v11 = vmul.f32 %v9943_v5, %v2540_v2  ;;  %v8767_v54 = vcvt.s32.f32 %v4177_v18  ;;  %v3951_v30 = vand.u32 65535, %v9947_v61  ;;  %v9949_v61 = vld [vmem:[#allocation46_spill] sm:$0xff] }
 0x442   : > { %v4473_v13 = vcvt.s32.f32 %v4913_v52  ;;  %v1491_v17 = vpop.xlane.xlu1 %1490  ;;  %v8771_v52 = vsel %vm1305_vm3, %v3286_v29, 2147483647  ;;  %v1682_v59 = vmul.f32 1.442695, %v1558_v33  ;;  %vm3987_vm5 = vcmp.eq.f32.partialorder %v8253_v40, %v8744_v35 }
 0x443   : > { %v2550_v36 = vsel %vm2549_vm13, %v5207_v32, %v2546_v19  ;;  %v8755_v23 = vpop.xlane.xlu0 %3970  ;;  %v4293_v25 = vsel %vm1240_vm2, %v2541_v11, %v9945_v43  ;;  %v9948_v19 = vld [vmem:[#allocation13_spill] sm:$0xff]  ;;  %v4192_v21 = vshra.s32 %v8771_v52, 16  ;;  %v1559_v18 = vsub.f32 %v8262_v26, %v1491_v17 }
 0x444   : > { %v2555_v46 = vsel %vm2552_vm14, %v2554_v51, %v2550_v36  ;;  %4538 = vst.msk [vmem:[%s6338_s8 + $0xf8] sm:$0xff] %vm4506_vm4, %v4473_v13  ;;  %vm3972_vm1 = vcmp.eq.f32.partialorder %v8278_v8, %v8755_v23  ;;  %1865 = vadd.xlane.f32.xlu2 %v1864_v1  ;;  %v3953_v11 = vcvt.s32.f32 %v3951_v30  ;;  %v8783_v13 = vpop.eup %5210  ;;  %v3782_v30 = vcvt.f32.s32 %v9949_v61 }
 0x445   : > { %4357 = vst.msk [vmem:[%s6338_s8 + $0x158] sm:$0xff] %vm1305_vm3, %v4293_v25  ;;  %v2556_v32 = vmul.f32 %v9946_v14, %v2555_v46  ;;  %v3973_v2 = vsel %vm3972_vm1, %v3968_v44, inf  ;;  %v1684_v33 = vmul.f32 1.442695, %v1559_v18  ;;  %v8787_v29 = vcvt.s32.f32 %v4192_v21 }
 0x446   : > { %v3958_v53 = vsel %vm3957_vm15, %v3953_v11, inf  ;;  %v1867_v26 = vsel %vm1305_vm3, %v8783_v13, 0.0 }
 0x447   : > { %v4294_v5 = vsel %vm1240_vm2, %v2556_v32, %v9948_v19  ;;  %4180 = vmin.xlane.f32.xlu0 %v8767_v54  ;;  %v1494_v8 = vpop.xlane.xlu2 %1493  ;;  %3974 = vmin.xlane.f32.xlu1 %v3973_v2 }
 0x448   : > { %4358 = vst.msk [vmem:[%s6338_s8 + $0x160] sm:$0xff] %vm1305_vm3, %v4294_v5 }
 0x44a   : > { %v1827_v51 = vpop.xlane.xlu1 %1826 }
 0x44b   : > { %5212 = vrcp.f32 %v1827_v51  ;;  %v3155_v1 = vpop.xlane.xlu0 %3154  ;;  %v2566_v21 = vand.u32 2147483647, %v1827_v51  ;;  %v2568_v18 = vand.u32 2147483648, %v1827_v51  ;;  %vm2562_vm8 = vweird.f32 %v1827_v51 }
 0x44c   : > { %5214 = vpow2.f32 %v1682_v59  ;;  %vm3223_vm0 = vcmp.eq.f32.partialorder %v8299_v10, %v3155_v1  ;;  %3959 = vmin.xlane.f32.xlu2 %v3958_v53  ;;  %v3981_v10 = vand.u32 65535, %v8228_v39  ;;  %v1560_v39 = vsub.f32 %v8292_v48, %v1494_v8 }
 0x44d   : > { %v3287_v36 = vsel %vm3223_vm0, %v5420_v15, 10  ;;  %v3783_v48 = vshll.u32 %v3782_v30, 16  ;;  %vm2567_vm10 = vcmp.eq.f32.partialorder %v2566_v21, 8.507059e+37 }
 0x44e   : > { %v8790_v63 = vsel %vm1305_vm3, %v3287_v36, 2147483647  ;;  %v3983_v59 = vcvt.s32.f32 %v3981_v10 }
 0x44f   : > { %v4207_v17 = vshra.s32 %v8790_v63, 16  ;;  %1868 = vadd.xlane.f32.xlu0 %v1867_v26  ;;  %v8795_v43 = vpop.xlane.xlu2 %1829  ;;  %4195 = vmin.xlane.f32.xlu1 %v8787_v29  ;;  %v1686_v26 = vmul.f32 1.442695, %v1560_v39 }
 0x450   : > { %5216 = vrcp.f32 %v8795_v43  ;;  %vm2577_vm12 = vweird.f32 %v8795_v43 }
 0x451   : > { %v5213_v25 = vpop.eup %5212  ;;  %5218 = vpow2.f32 %v1684_v33  ;;  %v8802_v32 = vcvt.s32.f32 %v4207_v17 }
 0x452   : > { %v8800_v46 = vpop.eup %5214  ;;  %v2558_v44 = vmul.f32 %v5213_v25, %v1827_v51  ;;  %v3158_v14 = vpop.xlane.xlu1 %3157  ;;  %vm2563_vm7 = vweird.f32 %v5213_v25  ;;  %v2581_v51 = vand.u32 2147483647, %v8795_v43 }
 0x453   : > { %vm3224_vm6 = vcmp.eq.f32.partialorder %v8324_v22, %v3158_v14  ;;  %v8808_v2 = vpop.xlane.xlu0 %1496  ;;  %v1870_v11 = vsel %vm1305_vm3, %v8800_v46, 0.0  ;;  %v3988_v22 = vsel %vm3987_vm5, %v3983_v59, inf  ;;  %vm2564_vm9 = vmor %vm2562_vm8, %vm2563_vm7 }
 0x454   : > { %v2559_v19 = vsub.f32 1.0, %v2558_v44  ;;  %v3288_v5 = vsel %vm3224_vm6, %v5420_v15, 10  ;;  %4210 = vmin.xlane.f32.xlu2 %v8802_v32  ;;  %v2569_v44 = vor.u32 1.1754944e-38, %v2568_v18  ;;  %v3996_v18 = vand.u32 65535, %v8341_v3 }
 0x455   : > { %v8816_v40 = vsel %vm1305_vm3, %v3288_v5, 2147483647  ;;  %v2583_v5 = vand.u32 2147483648, %v8795_v43  ;;  %vm2582_vm14 = vcmp.eq.f32.partialorder %v2581_v51, 8.507059e+37 }
 0x456   : > { %v5217_v1 = vpop.eup %5216  ;;  %v2560_v53 = vmul.f32 %v5213_v25, %v2559_v19  ;;  %v4222_v61 = vshra.s32 %v8816_v40, 16 }
 0x457   : > { %v8818_v33 = vpop.eup %5218  ;;  %v2573_v8 = vmul.f32 %v5217_v1, %v8795_v43  ;;  %v3780_v36 = vpop.xlane.xlu2 %3779  ;;  %3989 = vmin.xlane.f32.xlu0 %v3988_v22  ;;  %1871 = vadd.xlane.f32.xlu1 %v1870_v11  ;;  %vm2578_vm11 = vweird.f32 %v5217_v1 }
 0x458   : > { %v2561_v17 = vadd.f32 %v5213_v25, %v2560_v53  ;;  %v3781_v10 = vcvt.f32.s32 %v3780_v36  ;;  %v1873_v22 = vsel %vm1305_vm3, %v8818_v33, 0.0  ;;  %v9950_v53 = vld [vmem:[#allocation67_spill] sm:$0xff]  ;;  %v8834_v36 = vcvt.s32.f32 %v4222_v61  ;;  %vm2579_vm13 = vmor %vm2577_vm12, %vm2578_vm11 }
 0x459   : > { %v2574_v14 = vsub.f32 1.0, %v2573_v8 }
 0x45a   : > { %v2565_v19 = vsel %vm2564_vm9, %v5213_v25, %v2561_v17  ;;  %v3784_v59 = vadd.s32 %v3783_v48, %v3781_v10  ;;  %v8823_v30 = vpop.xlane.xlu1 %4000  ;;  %v9951_v17 = vld [vmem:[#allocation15_spill] sm:$0xff] }
 0x45b   : > { %v2570_v11 = vsel %vm2567_vm10, %v2569_v44, %v2565_v19  ;;  %v2575_v39 = vmul.f32 %v5217_v1, %v2574_v14  ;;  %v8828_v21 = vpop.xlane.xlu0 %1832  ;;  %v2584_v44 = vor.u32 1.1754944e-38, %v2583_v5  ;;  %v4011_v14 = vand.u32 65535, %v8361_v9  ;;  %v9954_v5 = vld [vmem:[#allocation18_spill] sm:$0xff] }
 0x45c   : > { %v2571_v25 = vmul.f32 %v9950_v53, %v2570_v11  ;;  %v4914_v8 = vadd.s32 4294967294, %v3784_v59  ;;  %5220 = vrcp.f32 %v8828_v21  ;;  %1874 = vadd.xlane.f32.xlu2 %v1873_v22  ;;  %v9952_v59 = vld [vmem:[#allocation80_spill] sm:$0xff]  ;;  %v9953_v22 = vld [vmem:[#allocation19_spill] sm:$0xff]  ;;  %v9955_v11 = vld [vmem:[#allocation78_spill] sm:$0xff]  ;;  %vm2592_vm7 = vweird.f32 %v8828_v21 }
 0x45d   : > { %5222 = vpow2.f32 %v1686_v26  ;;  %v2576_v48 = vadd.f32 %v5217_v1, %v2575_v39  ;;  %v3797_v43 = vcvt.f32.s32 %v9952_v59  ;;  %vm4002_vm1 = vcmp.eq.f32.partialorder %v9953_v22, %v8823_v30 }
 0x45e   : > { %v4295_v10 = vsel %vm1240_vm2, %v2571_v25, %v9951_v17  ;;  %v4474_v3 = vcvt.s32.f32 %v4914_v8  ;;  %v3998_v39 = vcvt.s32.f32 %v3996_v18  ;;  %v9957_v17 = vld [vmem:[#allocation82_spill] sm:$0xff] }
 0x45f   : > { %4359 = vst.msk [vmem:[%s6338_s8 + $0x168] sm:$0xff] %vm1305_vm3, %v4295_v10  ;;  %v2580_v19 = vsel %vm2579_vm13, %v5217_v1, %v2576_v48  ;;  %v3161_v26 = vpop.xlane.xlu2 %3160  ;;  %4225 = vmin.xlane.f32.xlu0 %v8834_v36  ;;  %v9956_v1 = vld [vmem:[#allocation76_spill] sm:$0xff]  ;;  %v3798_v18 = vshll.u32 %v3797_v43, 16 }
 0x460   : > { %v2585_v61 = vsel %vm2582_vm14, %v2584_v44, %v2580_v19  ;;  %4539 = vst.msk [vmem:[%s6338_s8 + $0x100] sm:$0xff] %vm4506_vm4, %v4474_v3  ;;  %vm3225_vm15 = vcmp.eq.f32.partialorder %v9954_v5, %v3161_v26  ;;  %v1561_v51 = vsub.f32 %v9956_v1, %v8808_v2  ;;  %v4003_v19 = vsel %vm4002_vm1, %v3998_v39, inf  ;;  %v9958_v2 = vld [vmem:[#allocation90_spill] sm:$0xff] }
 0x461   : > { %v2586_v9 = vmul.f32 %v9955_v11, %v2585_v61  ;;  %v3289_v25 = vsel %vm3225_vm15, %v5420_v15, 10  ;;  %v4013_v26 = vcvt.s32.f32 %v4011_v14  ;;  %v4026_v61 = vand.u32 65535, %v9958_v2 }
 0x462   : > { %v5221_v53 = vpop.eup %5220  ;;  %v3795_v8 = vpop.xlane.xlu1 %3794  ;;  %v8867_v5 = vsel %vm1305_vm3, %v3289_v25, 2147483647  ;;  %v2598_v1 = vand.u32 2147483648, %v8828_v21 }
 0x463   : > { %v8853_v48 = vpop.eup %5222  ;;  %v4296_v10 = vsel %vm1240_vm2, %v2586_v9, %v9957_v17  ;;  %v2588_v44 = vmul.f32 %v5221_v53, %v8828_v21  ;;  %v8859_v3 = vpop.xlane.xlu0 %4015  ;;  %v3796_v59 = vcvt.f32.s32 %v3795_v8  ;;  %v1688_v9 = vmul.f32 1.442695, %v1561_v51  ;;  %v9959_v17 = vld [vmem:[#allocation70_spill] sm:$0xff] }
 0x464   : > { %4360 = vst.msk [vmem:[%s6338_s8 + $0x170] sm:$0xff] %vm1305_vm3, %v4296_v10  ;;  %vm4017_vm0 = vcmp.eq.f32.partialorder %v8401_v27, %v8859_v3  ;;  %4004 = vmin.xlane.f32.xlu2 %v4003_v19  ;;  %v1876_v14 = vsel %vm1305_vm3, %v8853_v48, 0.0  ;;  %vm2593_vm5 = vweird.f32 %v5221_v53  ;;  %v2596_v27 = vand.u32 2147483647, %v8828_v21  ;;  %v9960_v21 = vld [vmem:[#allocation74_spill] sm:$0xff] }
 0x465   : > { %v2589_v22 = vsub.f32 1.0, %v2588_v44  ;;  %v4018_v11 = vsel %vm4017_vm0, %v4013_v26, inf  ;;  %v3799_v39 = vadd.s32 %v3798_v18, %v3796_v59  ;;  %v3812_v10 = vcvt.f32.s32 %v9959_v17  ;;  %vm2594_vm8 = vmor %vm2592_vm7, %vm2593_vm5 }
 0x466   : > { %4019 = vmin.xlane.f32.xlu1 %v4018_v11  ;;  %v4237_v25 = vshra.s32 %v8867_v5, 16  ;;  %v4028_v19 = vcvt.s32.f32 %v4026_v61  ;;  %5224 = vpow2.f32 %v1688_v9  ;;  %v2599_v26 = vor.u32 1.1754944e-38, %v2598_v1 }
 0x467   : > { %v2590_v43 = vmul.f32 %v5221_v53, %v2589_v22  ;;  %1877 = vadd.xlane.f32.xlu0 %v1876_v14  ;;  %v8873_v8 = vpop.xlane.xlu2 %4030  ;;  %v4915_v44 = vadd.s32 4294967294, %v3799_v39  ;;  %vm2597_vm9 = vcmp.eq.f32.partialorder %v2596_v27, 8.507059e+37  ;;  %v3813_v39 = vshll.u32 %v3812_v10, 16  ;;  %v9961_v27 = vld [vmem:[#allocation77_spill] sm:$0xff] }
 0x468   : > { %vm4032_vm6 = vcmp.eq.f32.partialorder %v8415_v50, %v8873_v8  ;;  %v3842_v1 = vcvt.f32.s32 %v8264_v31  ;;  %v3827_v31 = vcvt.f32.s32 %v8230_v62 }
 0x469   : > { %v2591_v51 = vadd.f32 %v5221_v53, %v2590_v43  ;;  %v4475_v18 = vcvt.s32.f32 %v4915_v44  ;;  %v4033_v11 = vsel %vm4032_vm6, %v4028_v19, inf  ;;  %v8882_v43 = vcvt.s32.f32 %v4237_v25 }
 0x46a   : > { %v1836_v59 = vpop.xlane.xlu1 %1835 }
 0x46b   : > { %v2595_v2 = vsel %vm2594_vm8, %v5221_v53, %v2591_v51  ;;  %5226 = vrcp.f32 %v1836_v59  ;;  %v3810_v22 = vpop.xlane.xlu0 %3809  ;;  %4540 = vst.msk [vmem:[%s6338_s8 + $0x108] sm:$0xff] %vm4506_vm4, %v4475_v18  ;;  %v4041_v53 = vand.u32 65535, %v8441_v57  ;;  %v3843_v18 = vshll.u32 %v3842_v1, 16 }
 0x46c   : > { %v2600_v14 = vsel %vm2597_vm9, %v2599_v26, %v2595_v2  ;;  %v3811_v50 = vcvt.f32.s32 %v3810_v22  ;;  %4034 = vmin.xlane.f32.xlu2 %v4033_v11  ;;  %v8893_v44 = vpop.eup %5224  ;;  %v3828_v1 = vshll.u32 %v3827_v31, 16  ;;  %vm2607_vm12 = vweird.f32 %v1836_v59 }
 0x46d   : > { %v2601_v61 = vmul.f32 %v9960_v21, %v2600_v14  ;;  %9962 = vst [vmem:[#allocation39_spill] sm:$0xff] %v8893_v44  ;;  %v4043_v11 = vcvt.s32.f32 %v4041_v53  ;;  %v1879_v14 = vsel %vm1305_vm3, %v8893_v44, 0.0  ;;  %v2613_v21 = vand.u32 2147483648, %v1836_v59 }
 0x46e   : > { %v3814_v9 = vadd.s32 %v3813_v39, %v3811_v50  ;;  %4240 = vmin.xlane.f32.xlu1 %v8882_v43  ;;  %v2611_v50 = vand.u32 2147483647, %v1836_v59  ;;  %v4056_v53 = vand.u32 65535, %v8477_v16 }
 0x46f   : > { %v4297_v17 = vsel %vm1240_vm2, %v2601_v61, %v9961_v27  ;;  %v8891_v10 = vpop.xlane.xlu2 %1838 }
 0x470   : > { %4361 = vst.msk [vmem:[%s6338_s8 + $0x178] sm:$0xff] %vm1305_vm3, %v4297_v17  ;;  %v4916_v25 = vadd.s32 4294967294, %v3814_v9  ;;  %5228 = vrcp.f32 %v8891_v10  ;;  %vm2612_vm14 = vcmp.eq.f32.partialorder %v2611_v50, 8.507059e+37  ;;  %v2628_v16 = vand.u32 2147483648, %v8891_v10 }
 0x471   : > { %v5227_v51 = vpop.eup %5226  ;;  %v4058_v50 = vcvt.s32.f32 %v4056_v53  ;;  %vm2622_vm0 = vweird.f32 %v8891_v10 }
 0x472   : > { %v2603_v19 = vmul.f32 %v5227_v51, %v1836_v59  ;;  %v4476_v26 = vcvt.s32.f32 %v4916_v25  ;;  %v3840_v57 = vpop.xlane.xlu1 %3839  ;;  %vm2608_vm11 = vweird.f32 %v5227_v51 }
 0x473   : > { %v3841_v2 = vcvt.f32.s32 %v3840_v57  ;;  %v8899_v22 = vpop.xlane.xlu0 %4045  ;;  %vm2609_vm13 = vmor %vm2607_vm12, %vm2608_vm11 }
 0x474   : > { %v2604_v39 = vsub.f32 1.0, %v2603_v19  ;;  %4541 = vst.msk [vmem:[%s6338_s8 + $0x110] sm:$0xff] %vm4506_vm4, %v4476_v26  ;;  %vm4047_vm10 = vcmp.eq.f32.partialorder %v8473_v12, %v8899_v22  ;;  %v4071_v12 = vand.u32 65535, %v8491_v34 }
 0x475   : > { %v3844_v61 = vadd.s32 %v3843_v18, %v3841_v2  ;;  %v4048_v9 = vsel %vm4047_vm10, %v4043_v11, inf  ;;  %v2614_v18 = vor.u32 1.1754944e-38, %v2613_v21 }
 0x476   : > { %v5229_v27 = vpop.eup %5228  ;;  %v2605_v62 = vmul.f32 %v5227_v51, %v2604_v39  ;;  %1880 = vadd.xlane.f32.xlu1 %v1879_v14  ;;  %4049 = vmin.xlane.f32.xlu0 %v4048_v9  ;;  %v2626_v14 = vand.u32 2147483647, %v8891_v10  ;;  %v4073_v53 = vcvt.s32.f32 %v4071_v12 }
 0x477   : > { %v2618_v17 = vmul.f32 %v5229_v27, %v8891_v10  ;;  %v4918_v25 = vadd.s32 4294967294, %v3844_v61  ;;  %v3825_v19 = vpop.xlane.xlu2 %3824  ;;  %vm2623_vm1 = vweird.f32 %v5229_v27 }
 0x478   : > { %v2606_v26 = vadd.f32 %v5227_v51, %v2605_v62  ;;  %v3826_v57 = vcvt.f32.s32 %v3825_v19  ;;  %v9963_v62 = vld [vmem:[#allocation84_spill] sm:$0xff]  ;;  %vm2624_vm5 = vmor %vm2622_vm0, %vm2623_vm1  ;;  %vm2627_vm6 = vcmp.eq.f32.partialorder %v2626_v14, 8.507059e+37 }
 0x479   : > { %v2619_v2 = vsub.f32 1.0, %v2618_v17  ;;  %v4478_v11 = vcvt.s32.f32 %v4918_v25  ;;  %v2629_v17 = vor.u32 1.1754944e-38, %v2628_v16 }
 0x47a   : > { %v2610_v39 = vsel %vm2609_vm13, %v5227_v51, %v2606_v26  ;;  %v3829_v31 = vadd.s32 %v3828_v1, %v3826_v57  ;;  %v8912_v9 = vpop.xlane.xlu1 %4060  ;;  %v9964_v26 = vld [vmem:[#allocation72_spill] sm:$0xff] }
 0x47b   : > { %v2615_v61 = vsel %vm2612_vm14, %v2614_v18, %v2610_v39  ;;  %v2620_v44 = vmul.f32 %v5229_v27, %v2619_v2  ;;  %4543 = vst.msk [vmem:[%s6338_s8 + $0x120] sm:$0xff] %vm4506_vm4, %v4478_v11  ;;  %vm4062_vm15 = vcmp.eq.f32.partialorder %v8503_v38, %v8912_v9  ;;  %v1842_v34 = vpop.xlane.xlu0 %1841 }
 0x47c   : > { %v2616_v59 = vmul.f32 %v8412_v45, %v2615_v61  ;;  %v4917_v51 = vadd.s32 4294967294, %v3829_v31  ;;  %5230 = vrcp.f32 %v1842_v34  ;;  %v4063_v19 = vsel %vm4062_vm15, %v4058_v50, inf  ;;  %v9966_v31 = vld [vmem:[#allocation29_spill] sm:$0xff] }
 0x47d   : > { %v2621_v21 = vadd.f32 %v5229_v27, %v2620_v44  ;;  %v3857_v44 = vcvt.f32.s32 %v8286_v41  ;;  %v4086_v61 = vand.u32 65535, %v9966_v31  ;;  %v9967_v50 = vld [vmem:[#allocation81_spill] sm:$0xff]  ;;  %vm2637_vm9 = vweird.f32 %v1842_v34 }
 0x47e   : > { %v4298_v1 = vsel %vm1240_vm2, %v2616_v59, %v9963_v62  ;;  %v4477_v25 = vcvt.s32.f32 %v4917_v51  ;;  %4064 = vmin.xlane.f32.xlu1 %v4063_v19  ;;  %v2643_v59 = vand.u32 2147483648, %v1842_v34 }
 0x47f   : > { %4362 = vst.msk [vmem:[%s6338_s8 + $0x180] sm:$0xff] %vm1305_vm3, %v4298_v1  ;;  %v2625_v38 = vsel %vm2624_vm5, %v5229_v27, %v2621_v21  ;;  %v8925_v45 = vpop.xlane.xlu2 %4075  ;;  %v9965_v27 = vld [vmem:[#allocation91_spill] sm:$0xff]  ;;  %v3858_v41 = vshll.u32 %v3857_v44, 16  ;;  %v3887_v21 = vcvt.f32.s32 %v9967_v50  ;;  %v2641_v1 = vand.u32 2147483647, %v1842_v34 }
 0x480   : > { %v2630_v10 = vsel %vm2627_vm6, %v2629_v17, %v2625_v38  ;;  %4542 = vst.msk [vmem:[%s6338_s8 + $0x118] sm:$0xff] %vm4506_vm4, %v4477_v25  ;;  %vm4077_vm7 = vcmp.eq.f32.partialorder %v8523_v49, %v8925_v45  ;;  %v3872_v44 = vcvt.f32.s32 %v8395_v37  ;;  %v9969_v37 = vld [vmem:[#allocation16_spill] sm:$0xff] }
 0x481   : > { %v2631_v57 = vmul.f32 %v9964_v26, %v2630_v10  ;;  %v4078_v18 = vsel %vm4077_vm7, %v4073_v53, inf  ;;  %v4088_v53 = vcvt.s32.f32 %v4086_v61  ;;  %v2644_v10 = vor.u32 1.1754944e-38, %v2643_v59 }
 0x482   : > { %v5231_v2 = vpop.eup %5230  ;;  %v1845_v11 = vpop.xlane.xlu1 %1844  ;;  %4079 = vmin.xlane.f32.xlu2 %v4078_v18  ;;  %vm2642_vm11 = vcmp.eq.f32.partialorder %v2641_v1, 8.507059e+37  ;;  %v3873_v1 = vshll.u32 %v3872_v44, 16 }
 0x483   : > { %v4299_v39 = vsel %vm1240_vm2, %v2631_v57, %v9965_v27  ;;  %v2633_v14 = vmul.f32 %v5231_v2, %v1842_v34  ;;  %5232 = vrcp.f32 %v1845_v11  ;;  %v3855_v12 = vpop.xlane.xlu0 %3854  ;;  %vm2638_vm8 = vweird.f32 %v5231_v2  ;;  %v9968_v34 = vld [vmem:[#allocation88_spill] sm:$0xff] }
 0x484   : > { %4363 = vst.msk [vmem:[%s6338_s8 + $0x188] sm:$0xff] %vm1305_vm3, %v4299_v39  ;;  %v3856_v16 = vcvt.f32.s32 %v3855_v12  ;;  %vm2639_vm10 = vmor %vm2637_vm9, %vm2638_vm8  ;;  %v3888_v27 = vshll.u32 %v3887_v21, 16  ;;  %v2656_v31 = vand.u32 2147483647, %v1845_v11  ;;  %vm2652_vm14 = vweird.f32 %v1845_v11 }
 0x485   : > { %v2634_v49 = vsub.f32 1.0, %v2633_v14 }
 0x486   : > { %v3859_v51 = vadd.s32 %v3858_v41, %v3856_v16  ;;  %vm2657_vm15 = vcmp.eq.f32.partialorder %v2656_v31, 8.507059e+37  ;;  %v9972_v31 = vld [vmem:[#allocation2_spill] sm:$0xff] }
 0x487   : > { %v2635_v62 = vmul.f32 %v5231_v2, %v2634_v49  ;;  %v8940_v17 = vpop.xlane.xlu2 %1847  ;;  %v2658_v49 = vand.u32 2147483648, %v1845_v11 }
 0x488   : > { %v4919_v25 = vadd.s32 4294967294, %v3859_v51  ;;  %5234 = vrcp.f32 %v8940_v17  ;;  %vm2667_vm6 = vweird.f32 %v8940_v17 }
 0x489   : > { %v5233_v19 = vpop.eup %5232  ;;  %v2636_v38 = vadd.f32 %v5231_v2, %v2635_v62 }
 0x48a   : > { %v2648_v26 = vmul.f32 %v5233_v19, %v1845_v11  ;;  %v4479_v57 = vcvt.s32.f32 %v4919_v25  ;;  %v3885_v18 = vpop.xlane.xlu1 %3884  ;;  %vm2653_vm13 = vweird.f32 %v5233_v19  ;;  %v9971_v25 = vld [vmem:[#allocation32_spill] sm:$0xff] }
 0x48b   : > { %v2640_v39 = vsel %vm2639_vm10, %v5231_v2, %v2636_v38  ;;  %v3886_v14 = vcvt.f32.s32 %v3885_v18  ;;  %v8944_v12 = vpop.xlane.xlu0 %4090  ;;  %v9970_v2 = vld [vmem:[#allocation85_spill] sm:$0xff]  ;;  %v4116_v18 = vand.u32 65535, %v8597_v4  ;;  %vm2654_vm1 = vmor %vm2652_vm14, %vm2653_vm13 }
 0x48c   : > { %v2645_v41 = vsel %vm2642_vm11, %v2644_v10, %v2640_v39  ;;  %v2649_v16 = vsub.f32 1.0, %v2648_v26  ;;  %4544 = vst.msk [vmem:[%s6338_s8 + $0x128] sm:$0xff] %vm4506_vm4, %v4479_v57  ;;  %vm4092_vm12 = vcmp.eq.f32.partialorder %v9968_v34, %v8944_v12  ;;  %v4101_v21 = vand.u32 65535, %v9970_v2 }
 0x48d   : > { %v2646_v61 = vmul.f32 %v9969_v37, %v2645_v41  ;;  %v3889_v59 = vadd.s32 %v3888_v27, %v3886_v14  ;;  %v4093_v51 = vsel %vm4092_vm12, %v4088_v53, inf  ;;  %v2659_v39 = vor.u32 1.1754944e-38, %v2658_v49 }
 0x48e   : > { %v5235_v50 = vpop.eup %5234  ;;  %v2650_v62 = vmul.f32 %v5233_v19, %v2649_v16  ;;  %4094 = vmin.xlane.f32.xlu0 %v4093_v51  ;;  %v2671_v16 = vand.u32 2147483647, %v8940_v17  ;;  %v2673_v34 = vand.u32 2147483648, %v8940_v17  ;;  %v4103_v51 = vcvt.s32.f32 %v4101_v21 }
 0x48f   : > { %v4300_v38 = vsel %vm1240_vm2, %v2646_v61, %v9971_v25  ;;  %v2663_v10 = vmul.f32 %v5235_v50, %v8940_v17  ;;  %v4921_v26 = vadd.s32 4294967294, %v3889_v59  ;;  %v3870_v57 = vpop.xlane.xlu2 %3869  ;;  %vm2668_vm0 = vweird.f32 %v5235_v50 }
 0x490   : > { %4364 = vst.msk [vmem:[%s6338_s8 + $0x190] sm:$0xff] %vm1305_vm3, %v4300_v38  ;;  %v2651_v53 = vadd.f32 %v5233_v19, %v2650_v62  ;;  %v3871_v27 = vcvt.f32.s32 %v3870_v57  ;;  %v9973_v62 = vld [vmem:[#allocation25_spill] sm:$0xff]  ;;  %vm2669_vm7 = vmor %vm2667_vm6, %vm2668_vm0  ;;  %v2674_v25 = vor.u32 1.1754944e-38, %v2673_v34  ;;  %vm2672_vm8 = vcmp.eq.f32.partialorder %v2671_v16, 8.507059e+37 }
 0x491   : > { %v2664_v44 = vsub.f32 1.0, %v2663_v10  ;;  %v4481_v14 = vcvt.s32.f32 %v4921_v26  ;;  %v4118_v21 = vcvt.s32.f32 %v4116_v18  ;;  %v3902_v57 = vcvt.f32.s32 %v8449_v56 }
 0x492   : > { %v2655_v41 = vsel %vm2654_vm1, %v5233_v19, %v2651_v53  ;;  %v3874_v37 = vadd.s32 %v3873_v1, %v3871_v27  ;;  %v8961_v61 = vpop.xlane.xlu1 %4105  ;;  %v9974_v53 = vld [vmem:[#allocation24_spill] sm:$0xff] }
 0x493   : > { %v2660_v4 = vsel %vm2657_vm15, %v2659_v39, %v2655_v41  ;;  %v2665_v59 = vmul.f32 %v5235_v50, %v2664_v44  ;;  %4546 = vst.msk [vmem:[%s6338_s8 + $0x138] sm:$0xff] %vm4506_vm4, %v4481_v14  ;;  %vm4107_vm5 = vcmp.eq.f32.partialorder %v8612_v6, %v8961_v61  ;;  %v1851_v11 = vpop.xlane.xlu0 %1850  ;;  %v3903_v56 = vshll.u32 %v3902_v57, 16 }
 0x494   : > { %v2661_v49 = vmul.f32 %v9972_v31, %v2660_v4  ;;  %v4920_v19 = vadd.s32 4294967294, %v3874_v37  ;;  %5236 = vrcp.f32 %v1851_v11  ;;  %v4108_v10 = vsel %vm4107_vm5, %v4103_v51, inf }
 0x495   : > { %v2666_v2 = vadd.f32 %v5235_v50, %v2665_v59  ;;  %4109 = vmin.xlane.f32.xlu1 %v4108_v10  ;;  %v4131_v37 = vand.u32 65535, %v8641_v60  ;;  %v2688_v4 = vand.u32 2147483648, %v1851_v11  ;;  %v3932_v31 = vcvt.f32.s32 %v8599_v20 }
 0x496   : > { %v4301_v1 = vsel %vm1240_vm2, %v2661_v49, %v9973_v62  ;;  %v4480_v38 = vcvt.s32.f32 %v4920_v19  ;;  %v2686_v19 = vand.u32 2147483647, %v1851_v11  ;;  %vm2682_vm11 = vweird.f32 %v1851_v11 }
 0x497   : > { %4365 = vst.msk [vmem:[%s6338_s8 + $0x198] sm:$0xff] %vm1305_vm3, %v4301_v1  ;;  %v2670_v6 = vsel %vm2669_vm7, %v5235_v50, %v2666_v2  ;;  %v8974_v26 = vpop.xlane.xlu2 %4120  ;;  %v9975_v50 = vld [vmem:[#allocation4_spill] sm:$0xff]  ;;  %v3917_v60 = vcvt.f32.s32 %v8568_v47 }
 0x498   : > { %v2675_v17 = vsel %vm2672_vm8, %v2674_v25, %v2670_v6  ;;  %4545 = vst.msk [vmem:[%s6338_s8 + $0x130] sm:$0xff] %vm4506_vm4, %v4480_v38  ;;  %vm4122_vm9 = vcmp.eq.f32.partialorder %v8630_v24, %v8974_v26  ;;  %v4133_v25 = vcvt.s32.f32 %v4131_v37  ;;  %v2689_v38 = vor.u32 1.1754944e-38, %v2688_v4  ;;  %v9976_v37 = vld [vmem:[#allocation28_spill] sm:$0xff] }
 0x499   : > { %v2676_v27 = vmul.f32 %v9974_v53, %v2675_v17  ;;  %v4123_v39 = vsel %vm4122_vm9, %v4118_v21, inf  ;;  %v3933_v21 = vshll.u32 %v3932_v31, 16  ;;  %vm2687_vm13 = vcmp.eq.f32.partialorder %v2686_v19, 8.507059e+37  ;;  %v9977_v31 = vld [vmem:[#allocation17_spill] sm:$0xff] }
 0x49a   : > { %v5237_v44 = vpop.eup %5236  ;;  %v1854_v14 = vpop.xlane.xlu1 %1853  ;;  %4124 = vmin.xlane.f32.xlu2 %v4123_v39 }
 0x49b   : > { %v4302_v41 = vsel %vm1240_vm2, %v2676_v27, %v9975_v50  ;;  %v2678_v16 = vmul.f32 %v5237_v44, %v1851_v11  ;;  %5238 = vrcp.f32 %v1854_v14  ;;  %v3900_v18 = vpop.xlane.xlu0 %3899  ;;  %vm2683_vm10 = vweird.f32 %v5237_v44 }
 0x49c   : > { %4366 = vst.msk [vmem:[%s6338_s8 + $0x1a0] sm:$0xff] %vm1305_vm3, %v4302_v41  ;;  %v3901_v34 = vcvt.f32.s32 %v3900_v18  ;;  %vm2684_vm12 = vmor %vm2682_vm11, %vm2683_vm10  ;;  %v2701_v50 = vand.u32 2147483647, %v1854_v14  ;;  %v2703_v11 = vand.u32 2147483648, %v1854_v14  ;;  %vm2697_vm15 = vweird.f32 %v1854_v14 }
 0x49d   : > { %v2679_v24 = vsub.f32 1.0, %v2678_v16 }
 0x49e   : > { %v3904_v59 = vadd.s32 %v3903_v56, %v3901_v34  ;;  %v3918_v34 = vshll.u32 %v3917_v60, 16  ;;  %vm2702_vm5 = vcmp.eq.f32.partialorder %v2701_v50, 8.507059e+37  ;;  %v2704_v19 = vor.u32 1.1754944e-38, %v2703_v11 }
 0x49f   : > { %v2680_v49 = vmul.f32 %v5237_v44, %v2679_v24  ;;  %v8989_v51 = vpop.xlane.xlu2 %1856 }
 0x4a0   : > { %v4922_v2 = vadd.s32 4294967294, %v3904_v59  ;;  %5240 = vrcp.f32 %v8989_v51  ;;  %v2716_v60 = vand.u32 2147483647, %v8989_v51  ;;  %vm2712_vm8 = vweird.f32 %v8989_v51 }
 0x4a1   : > { %v5239_v62 = vpop.eup %5238  ;;  %v2681_v1 = vadd.f32 %v5237_v44, %v2680_v49 }
 0x4a2   : > { %v2693_v10 = vmul.f32 %v5239_v62, %v1854_v14  ;;  %v4482_v6 = vcvt.s32.f32 %v4922_v2  ;;  %v3930_v20 = vpop.xlane.xlu1 %3929  ;;  %vm2698_vm1 = vweird.f32 %v5239_v62  ;;  %v9978_v14 = vld [vmem:[#allocation20_spill] sm:$0xff]  ;;  %vm2717_vm10 = vcmp.eq.f32.partialorder %v2716_v60, 8.507059e+37 }
 0x4a3   : > { %v2685_v57 = vsel %vm2684_vm12, %v5237_v44, %v2681_v1  ;;  %v3931_v17 = vcvt.f32.s32 %v3930_v20  ;;  %v8993_v53 = vpop.xlane.xlu0 %4135  ;;  %v4146_v44 = vand.u32 65535, %v8667_v0  ;;  %vm2699_vm0 = vmor %vm2697_vm15, %vm2698_vm1 }
 0x4a4   : > { %v2690_v27 = vsel %vm2687_vm13, %v2689_v38, %v2685_v57  ;;  %v2694_v39 = vsub.f32 1.0, %v2693_v10  ;;  %4547 = vst.msk [vmem:[%s6338_s8 + $0x140] sm:$0xff] %vm4506_vm4, %v4482_v6  ;;  %vm4137_vm14 = vcmp.eq.f32.partialorder %v8670_v55, %v8993_v53  ;;  %v2718_v38 = vand.u32 2147483648, %v8989_v51 }
 0x4a5   : > { %v2691_v47 = vmul.f32 %v8586_v42, %v2690_v27  ;;  %v3934_v41 = vadd.s32 %v3933_v21, %v3931_v17  ;;  %v4138_v16 = vsel %vm4137_vm14, %v4133_v25, inf  ;;  %v4161_v42 = vand.u32 65535, %v9977_v31  ;;  %v9979_v17 = vld [vmem:[#allocation23_spill] sm:$0xff] }
 0x4a6   : > { %v5241_v18 = vpop.eup %5240  ;;  %v2695_v56 = vmul.f32 %v5239_v62, %v2694_v39  ;;  %4139 = vmin.xlane.f32.xlu0 %v4138_v16  ;;  %v4148_v39 = vcvt.s32.f32 %v4146_v44 }
 0x4a7   : > { %v4303_v24 = vsel %vm1240_vm2, %v2691_v47, %v9976_v37  ;;  %v2708_v4 = vmul.f32 %v5241_v18, %v8989_v51  ;;  %v4924_v55 = vadd.s32 4294967294, %v3934_v41  ;;  %v3915_v59 = vpop.xlane.xlu2 %3914  ;;  %vm2713_vm6 = vweird.f32 %v5241_v18  ;;  %v9980_v47 = vld [vmem:[#allocation54_spill] sm:$0xff] }
 0x4a8   : > { %4367 = vst.msk [vmem:[%s6338_s8 + $0x1a8] sm:$0xff] %vm1305_vm3, %v4303_v24  ;;  %v2696_v49 = vadd.f32 %v5239_v62, %v2695_v56  ;;  %v3916_v0 = vcvt.f32.s32 %v3915_v59  ;;  %vm2714_vm9 = vmor %vm2712_vm8, %vm2713_vm6  ;;  %v2719_v41 = vor.u32 1.1754944e-38, %v2718_v38  ;;  %v4163_v44 = vcvt.s32.f32 %v4161_v42  ;;  %v9981_v24 = vld [vmem:[#allocation3_spill] sm:$0xff]  ;;  %v9983_v59 = vld [vmem:[#allocation89_spill] sm:$0xff] }
 0x4a9   : > { %v2709_v2 = vsub.f32 1.0, %v2708_v4  ;;  %v4484_v1 = vcvt.s32.f32 %v4924_v55  ;;  %v3947_v4 = vcvt.f32.s32 %v9981_v24  ;;  %v9982_v55 = vld [vmem:[#allocation61_spill] sm:$0xff]  ;;  %v4176_v38 = vand.u32 65535, %v8734_v28 }
 0x4aa   : > { %v2700_v25 = vsel %vm2699_vm0, %v5239_v62, %v2696_v49  ;;  %v3919_v10 = vadd.s32 %v3918_v34, %v3916_v0  ;;  %v9010_v6 = vpop.xlane.xlu1 %4150  ;;  %v3962_v28 = vcvt.f32.s32 %v8721_v58  ;;  %v9985_v58 = vld [vmem:[#allocation33_spill] sm:$0xff] }
 0x4ab   : > { %v2705_v20 = vsel %vm2702_vm5, %v2704_v19, %v2700_v25  ;;  %v2710_v21 = vmul.f32 %v5241_v18, %v2709_v2  ;;  %4549 = vst.msk [vmem:[%s6338_s8 + $0x150] sm:$0xff] %vm4506_vm4, %v4484_v1  ;;  %vm4152_vm7 = vcmp.eq.f32.partialorder %v9978_v14, %v9010_v6  ;;  %v1860_v57 = vpop.xlane.xlu0 %1859  ;;  %v3948_v25 = vshll.u32 %v3947_v4, 16 }
 0x4ac   : > { %v2706_v27 = vmul.f32 %v9979_v17, %v2705_v20  ;;  %v4923_v62 = vadd.s32 4294967294, %v3919_v10  ;;  %5242 = vrcp.f32 %v1860_v57  ;;  %v4153_v56 = vsel %vm4152_vm7, %v4148_v39, inf }
 0x4ad   : > { %v2711_v50 = vadd.f32 %v5241_v18, %v2710_v21  ;;  %4154 = vmin.xlane.f32.xlu1 %v4153_v56  ;;  %v2733_v20 = vand.u32 2147483648, %v1860_v57  ;;  %v3977_v14 = vcvt.f32.s32 %v8755_v23  ;;  %vm2727_vm13 = vweird.f32 %v1860_v57 }
 0x4ae   : > { %v4304_v11 = vsel %vm1240_vm2, %v2706_v27, %v9980_v47  ;;  %v4483_v16 = vcvt.s32.f32 %v4923_v62  ;;  %v2731_v27 = vand.u32 2147483647, %v1860_v57 }
 0x4af   : > { %4368 = vst.msk [vmem:[%s6338_s8 + $0x1b0] sm:$0xff] %vm1305_vm3, %v4304_v11  ;;  %v2715_v34 = vsel %vm2714_vm9, %v5241_v18, %v2711_v50  ;;  %v9023_v37 = vpop.xlane.xlu2 %4165  ;;  %v9984_v18 = vld [vmem:[#allocation55_spill] sm:$0xff]  ;;  %v4178_v11 = vcvt.s32.f32 %v4176_v38 }
 0x4b0   : > { %v2720_v51 = vsel %vm2717_vm10, %v2719_v41, %v2715_v34  ;;  %4548 = vst.msk [vmem:[%s6338_s8 + $0x148] sm:$0xff] %vm4506_vm4, %v4483_v16  ;;  %vm4167_vm11 = vcmp.eq.f32.partialorder %v9982_v55, %v9023_v37  ;;  %v2734_v41 = vor.u32 1.1754944e-38, %v2733_v20  ;;  %v3978_v34 = vshll.u32 %v3977_v14, 16 }
 0x4b1   : > { %v2721_v31 = vmul.f32 %v9983_v59, %v2720_v51  ;;  %v4168_v49 = vsel %vm4167_vm11, %v4163_v44, inf  ;;  %vm2732_vm1 = vcmp.eq.f32.partialorder %v2731_v27, 8.507059e+37  ;;  %v4206_v20 = vand.u32 65535, %v8790_v63 }
 0x4b2   : > { %v5243_v0 = vpop.eup %5242  ;;  %v1863_v19 = vpop.xlane.xlu1 %1862  ;;  %4169 = vmin.xlane.f32.xlu2 %v4168_v49 }
 0x4b3   : > { %v4305_v2 = vsel %vm1240_vm2, %v2721_v31, %v9984_v18  ;;  %v2723_v1 = vmul.f32 %v5243_v0, %v1860_v57  ;;  %5244 = vrcp.f32 %v1863_v19  ;;  %v3945_v42 = vpop.xlane.xlu0 %3944  ;;  %vm2728_vm12 = vweird.f32 %v5243_v0 }
 0x4b4   : > { %4369 = vst.msk [vmem:[%s6338_s8 + $0x1b8] sm:$0xff] %vm1305_vm3, %v4305_v2  ;;  %v3946_v60 = vcvt.f32.s32 %v3945_v42  ;;  %vm2729_vm14 = vmor %vm2727_vm13, %vm2728_vm12  ;;  %v2746_v59 = vand.u32 2147483647, %v1863_v19  ;;  %v2748_v31 = vand.u32 2147483648, %v1863_v19  ;;  %v3963_v42 = vshll.u32 %v3962_v28, 16 }
 0x4b5   : > { %v2724_v10 = vsub.f32 1.0, %v2723_v1  ;;  %vm2742_vm5 = vweird.f32 %v1863_v19 }
 0x4b6   : > { %v3949_v21 = vadd.s32 %v3948_v25, %v3946_v60  ;;  %v9986_v25 = vld [vmem:[#allocation57_spill] sm:$0xff]  ;;  %vm2747_vm7 = vcmp.eq.f32.partialorder %v2746_v59, 8.507059e+37  ;;  %v2749_v14 = vor.u32 1.1754944e-38, %v2748_v31  ;;  %v4208_v31 = vcvt.s32.f32 %v4206_v20 }
 0x4b7   : > { %v2725_v17 = vmul.f32 %v5243_v0, %v2724_v10  ;;  %v9038_v62 = vpop.xlane.xlu2 %1865 }
 0x4b8   : > { %v4925_v39 = vadd.s32 4294967294, %v3949_v21  ;;  %5246 = vrcp.f32 %v9038_v62  ;;  %vm2757_vm10 = vweird.f32 %v9038_v62 }
 0x4b9   : > { %v5245_v50 = vpop.eup %5244  ;;  %v2726_v47 = vadd.f32 %v5243_v0, %v2725_v17 }
 0x4ba   : > { %v2738_v16 = vmul.f32 %v5245_v50, %v1863_v19  ;;  %v4485_v56 = vcvt.s32.f32 %v4925_v39  ;;  %v3975_v23 = vpop.xlane.xlu1 %3974  ;;  %vm2743_vm0 = vweird.f32 %v5245_v50 }
 0x4bb   : > { %v2730_v44 = vsel %vm2729_vm14, %v5243_v0, %v2726_v47  ;;  %v3976_v24 = vcvt.f32.s32 %v3975_v23  ;;  %v9042_v4 = vpop.xlane.xlu0 %4180  ;;  %v4191_v0 = vand.u32 65535, %v8771_v52  ;;  %vm2744_vm6 = vmor %vm2742_vm5, %vm2743_vm0  ;;  %v2761_v47 = vand.u32 2147483647, %v9038_v62 }
 0x4bc   : > { %v2735_v51 = vsel %vm2732_vm1, %v2734_v41, %v2730_v44  ;;  %v2739_v55 = vsub.f32 1.0, %v2738_v16  ;;  %4550 = vst.msk [vmem:[%s6338_s8 + $0x158] sm:$0xff] %vm4506_vm4, %v4485_v56  ;;  %vm4182_vm15 = vcmp.eq.f32.partialorder %v8767_v54, %v9042_v4  ;;  %v9987_v56 = vld [vmem:[#allocation36_spill] sm:$0xff] }
 0x4bd   : > { %v2736_v57 = vmul.f32 %v9985_v58, %v2735_v51  ;;  %v3979_v49 = vadd.s32 %v3978_v34, %v3976_v24  ;;  %v4183_v18 = vsel %vm4182_vm15, %v4178_v11, inf  ;;  %v2763_v11 = vand.u32 2147483648, %v9038_v62  ;;  %v9988_v24 = vld [vmem:[#allocation53_spill] sm:$0xff] }
 0x4be   : > { %v5247_v2 = vpop.eup %5246  ;;  %v2740_v1 = vmul.f32 %v5245_v50, %v2739_v55  ;;  %4184 = vmin.xlane.f32.xlu0 %v4183_v18  ;;  %v4193_v34 = vcvt.s32.f32 %v4191_v0  ;;  %vm2762_vm12 = vcmp.eq.f32.partialorder %v2761_v47, 8.507059e+37 }
 0x4bf   : > { %v4306_v60 = vsel %vm1240_vm2, %v2736_v57, %v9986_v25  ;;  %v2753_v38 = vmul.f32 %v5247_v2, %v9038_v62  ;;  %v4927_v54 = vadd.s32 4294967294, %v3979_v49  ;;  %v3960_v10 = vpop.xlane.xlu2 %3959  ;;  %vm2758_vm8 = vweird.f32 %v5247_v2 }
 0x4c0   : > { %4370 = vst.msk [vmem:[%s6338_s8 + $0x1c0] sm:$0xff] %vm1305_vm3, %v4306_v60  ;;  %v2741_v21 = vadd.f32 %v5245_v50, %v2740_v1  ;;  %v3961_v52 = vcvt.f32.s32 %v3960_v10  ;;  %vm2759_vm11 = vmor %vm2757_vm10, %vm2758_vm8  ;;  %v2764_v55 = vor.u32 1.1754944e-38, %v2763_v11  ;;  %v3992_v49 = vcvt.f32.s32 %v8744_v35 }
 0x4c1   : > { %v2754_v17 = vsub.f32 1.0, %v2753_v38  ;;  %v4487_v27 = vcvt.s32.f32 %v4927_v54 }
 0x4c2   : > { %v2745_v39 = vsel %vm2744_vm6, %v5245_v50, %v2741_v21  ;;  %v3964_v28 = vadd.s32 %v3963_v42, %v3961_v52  ;;  %v9059_v41 = vpop.xlane.xlu1 %4195  ;;  %v3993_v35 = vshll.u32 %v3992_v49, 16 }
 0x4c3   : > { %v2750_v63 = vsel %vm2747_vm7, %v2749_v14, %v2745_v39  ;;  %v2755_v16 = vmul.f32 %v5247_v2, %v2754_v17  ;;  %4552 = vst.msk [vmem:[%s6338_s8 + $0x168] sm:$0xff] %vm4506_vm4, %v4487_v27  ;;  %vm4197_vm9 = vcmp.eq.f32.partialorder %v8787_v29, %v9059_v41  ;;  %v1869_v19 = vpop.xlane.xlu0 %1868 }
 0x4c4   : > { %v2751_v23 = vmul.f32 %v9987_v56, %v2750_v63  ;;  %v4926_v50 = vadd.s32 4294967294, %v3964_v28  ;;  %5248 = vrcp.f32 %v1869_v19  ;;  %v4198_v58 = vsel %vm4197_vm9, %v4193_v34, inf }
 0x4c5   : > { %v2756_v44 = vadd.f32 %v5247_v2, %v2755_v16  ;;  %4199 = vmin.xlane.f32.xlu1 %v4198_v58  ;;  %v2778_v20 = vand.u32 2147483648, %v1869_v19  ;;  %v2776_v52 = vand.u32 2147483647, %v1869_v19  ;;  %vm2772_vm1 = vweird.f32 %v1869_v19  ;;  %v9990_v58 = vld [vmem:[#allocation11_spill] sm:$0xff] }
 0x4c6   : > { %v4307_v51 = vsel %vm1240_vm2, %v2751_v23, %v9988_v24  ;;  %v4486_v59 = vcvt.s32.f32 %v4926_v50  ;;  %v4007_v63 = vcvt.f32.s32 %v8823_v30  ;;  %v4022_v23 = vcvt.f32.s32 %v8859_v3 }
 0x4c7   : > { %4371 = vst.msk [vmem:[%s6338_s8 + $0x1c8] sm:$0xff] %vm1305_vm3, %v4307_v51  ;;  %v2760_v29 = vsel %vm2759_vm11, %v5247_v2, %v2756_v44  ;;  %v9072_v57 = vpop.xlane.xlu2 %4210  ;;  %v9989_v2 = vld [vmem:[#allocation56_spill] sm:$0xff]  ;;  %v2779_v47 = vor.u32 1.1754944e-38, %v2778_v20  ;;  %vm2777_vm0 = vcmp.eq.f32.partialorder %v2776_v52, 8.507059e+37  ;;  %v9991_v52 = vld [vmem:[#allocation59_spill] sm:$0xff] }
 0x4c8   : > { %v2765_v62 = vsel %vm2762_vm12, %v2764_v55, %v2760_v29  ;;  %4551 = vst.msk [vmem:[%s6338_s8 + $0x160] sm:$0xff] %vm4506_vm4, %v4486_v59  ;;  %vm4212_vm13 = vcmp.eq.f32.partialorder %v8802_v32, %v9072_v57  ;;  %v4008_v59 = vshll.u32 %v4007_v63, 16  ;;  %v4023_v49 = vshll.u32 %v4022_v23, 16 }
 0x4c9   : > { %v2766_v18 = vmul.f32 %v8741_v7, %v2765_v62  ;;  %v4213_v0 = vsel %vm4212_vm13, %v4208_v31, inf  ;;  %v4221_v7 = vand.u32 65535, %v8816_v40  ;;  %v4037_v62 = vcvt.f32.s32 %v8873_v8 }
 0x4ca   : > { %v5249_v1 = vpop.eup %5248  ;;  %v1872_v42 = vpop.xlane.xlu1 %1871  ;;  %4214 = vmin.xlane.f32.xlu2 %v4213_v0 }
 0x4cb   : > { %v4308_v25 = vsel %vm1240_vm2, %v2766_v18, %v9989_v2  ;;  %v2768_v60 = vmul.f32 %v5249_v1, %v1869_v19  ;;  %5250 = vrcp.f32 %v1872_v42  ;;  %v3990_v38 = vpop.xlane.xlu0 %3989  ;;  %vm2773_vm14 = vweird.f32 %v5249_v1 }
 0x4cc   : > { %4372 = vst.msk [vmem:[%s6338_s8 + $0x1d0] sm:$0xff] %vm1305_vm3, %v4308_v25  ;;  %v3991_v54 = vcvt.f32.s32 %v3990_v38  ;;  %vm2774_vm15 = vmor %vm2772_vm1, %vm2773_vm14  ;;  %v4223_v56 = vcvt.s32.f32 %v4221_v7  ;;  %v2791_v44 = vand.u32 2147483647, %v1872_v42  ;;  %v2793_v24 = vand.u32 2147483648, %v1872_v42 }
 0x4cd   : > { %v2769_v10 = vsub.f32 1.0, %v2768_v60  ;;  %vm2787_vm7 = vweird.f32 %v1872_v42  ;;  %v4236_v7 = vand.u32 65535, %v8867_v5 }
 0x4ce   : > { %v3994_v32 = vadd.s32 %v3993_v35, %v3991_v54  ;;  %vm2792_vm9 = vcmp.eq.f32.partialorder %v2791_v44, 8.507059e+37  ;;  %v2794_v18 = vor.u32 1.1754944e-38, %v2793_v24 }
 0x4cf   : > { %v2770_v21 = vmul.f32 %v5249_v1, %v2769_v10  ;;  %v9086_v14 = vpop.xlane.xlu2 %1874  ;;  %v4238_v23 = vcvt.s32.f32 %v4236_v7 }
 0x4d0   : > { %v4928_v17 = vadd.s32 4294967294, %v3994_v32  ;;  %5252 = vrcp.f32 %v9086_v14  ;;  %v2808_v25 = vand.u32 2147483648, %v9086_v14  ;;  %v2806_v10 = vand.u32 2147483647, %v9086_v14 }
 0x4d1   : > { %v5251_v27 = vpop.eup %5250  ;;  %v2771_v39 = vadd.f32 %v5249_v1, %v2770_v21  ;;  %vm2802_vm11 = vweird.f32 %v9086_v14 }
 0x4d2   : > { %v2783_v11 = vmul.f32 %v5251_v27, %v1872_v42  ;;  %v4488_v28 = vcvt.s32.f32 %v4928_v17  ;;  %vm2788_vm6 = vweird.f32 %v5251_v27  ;;  %vm2807_vm13 = vcmp.eq.f32.partialorder %v2806_v10, 8.507059e+37 }
 0x4d3   : > { %v2775_v16 = vsel %vm2774_vm15, %v5249_v1, %v2771_v39  ;;  %v9090_v40 = vpop.xlane.xlu0 %4225  ;;  %vm2789_vm8 = vmor %vm2787_vm7, %vm2788_vm6 }
 0x4d4   : > { %v2780_v50 = vsel %vm2777_vm0, %v2779_v47, %v2775_v16  ;;  %v2784_v34 = vsub.f32 1.0, %v2783_v11  ;;  %4553 = vst.msk [vmem:[%s6338_s8 + $0x170] sm:$0xff] %vm4506_vm4, %v4488_v28  ;;  %vm4227_vm5 = vcmp.eq.f32.partialorder %v8834_v36, %v9090_v40  ;;  %v4038_v28 = vshll.u32 %v4037_v62, 16 }
 0x4d5   : > { %v2781_v19 = vmul.f32 %v8783_v13, %v2780_v50  ;;  %v4228_v30 = vsel %vm4227_vm5, %v4223_v56, inf }
 0x4d6   : > { %v5253_v51 = vpop.eup %5252  ;;  %v2785_v55 = vmul.f32 %v5251_v27, %v2784_v34  ;;  %4229 = vmin.xlane.f32.xlu0 %v4228_v30 }
 0x4d7   : > { %v4309_v3 = vsel %vm1240_vm2, %v2781_v19, %v9990_v58  ;;  %v2798_v29 = vmul.f32 %v5253_v51, %v9086_v14  ;;  %v4005_v31 = vpop.xlane.xlu2 %4004  ;;  %vm2803_vm10 = vweird.f32 %v5253_v51  ;;  %v9992_v19 = vld [vmem:[#allocation63_spill] sm:$0xff]  ;;  %v4052_v58 = vcvt.f32.s32 %v8899_v22 }
 0x4d8   : > { %4373 = vst.msk [vmem:[%s6338_s8 + $0x1d8] sm:$0xff] %vm1305_vm3, %v4309_v3  ;;  %v2786_v36 = vadd.f32 %v5251_v27, %v2785_v55  ;;  %v4006_v13 = vcvt.f32.s32 %v4005_v31  ;;  %vm2804_vm12 = vmor %vm2802_vm11, %vm2803_vm10 }
 0x4d9   : > { %v2799_v0 = vsub.f32 1.0, %v2798_v29  ;;  %v4020_v1 = vpop.xlane.xlu1 %4019 }
 0x4da   : > { %v2790_v2 = vsel %vm2789_vm8, %v5251_v27, %v2786_v36  ;;  %v4009_v60 = vadd.s32 %v4008_v59, %v4006_v13  ;;  %v4021_v38 = vcvt.f32.s32 %v4020_v1  ;;  %v2809_v27 = vor.u32 1.1754944e-38, %v2808_v25  ;;  %v9993_v25 = vld [vmem:[#allocation69_spill] sm:$0xff] }
 0x4db   : > { %v2795_v35 = vsel %vm2792_vm9, %v2794_v18, %v2790_v2  ;;  %v2800_v54 = vmul.f32 %v5253_v51, %v2799_v0  ;;  %v1878_v42 = vpop.xlane.xlu0 %1877  ;;  %v4053_v13 = vshll.u32 %v4052_v58, 16  ;;  %v4067_v2 = vcvt.f32.s32 %v8912_v9 }
 0x4dc   : > { %v2796_v20 = vmul.f32 %v8800_v46, %v2795_v35  ;;  %v4929_v8 = vadd.s32 4294967294, %v4009_v60  ;;  %v4024_v32 = vadd.s32 %v4023_v49, %v4021_v38  ;;  %5254 = vrcp.f32 %v1878_v42 }
 0x4dd   : > { %v2801_v21 = vadd.f32 %v5253_v51, %v2800_v54  ;;  %v2823_v55 = vand.u32 2147483648, %v1878_v42  ;;  %v2821_v29 = vand.u32 2147483647, %v1878_v42  ;;  %vm2817_vm15 = vweird.f32 %v1878_v42 }
 0x4de   : > { %v4310_v17 = vsel %vm1240_vm2, %v2796_v20, %v9991_v52  ;;  %v4489_v39 = vcvt.s32.f32 %v4929_v8  ;;  %v4930_v47 = vadd.s32 4294967294, %v4024_v32  ;;  %v4068_v8 = vshll.u32 %v4067_v2, 16 }
 0x4df   : > { %4374 = vst.msk [vmem:[%s6338_s8 + $0x1e0] sm:$0xff] %vm1305_vm3, %v4310_v17  ;;  %v2805_v46 = vsel %vm2804_vm12, %v5253_v51, %v2801_v21  ;;  %v4035_v11 = vpop.xlane.xlu2 %4034  ;;  %v2824_v36 = vor.u32 1.1754944e-38, %v2823_v55  ;;  %vm2822_vm5 = vcmp.eq.f32.partialorder %v2821_v29, 8.507059e+37 }
 0x4e0   : > { %v2810_v5 = vsel %vm2807_vm13, %v2809_v27, %v2805_v46  ;;  %4554 = vst.msk [vmem:[%s6338_s8 + $0x178] sm:$0xff] %vm4506_vm4, %v4489_v39  ;;  %v4490_v14 = vcvt.s32.f32 %v4930_v47  ;;  %v4036_v63 = vcvt.f32.s32 %v4035_v11 }
 0x4e1   : > { %v2811_v16 = vmul.f32 %v8818_v33, %v2810_v5  ;;  %v9118_v56 = vpop.xlane.xlu1 %4240 }
 0x4e2   : > { %v5255_v50 = vpop.eup %5254  ;;  %4555 = vst.msk [vmem:[%s6338_s8 + $0x180] sm:$0xff] %vm4506_vm4, %v4490_v14  ;;  %v4039_v34 = vadd.s32 %v4038_v28, %v4036_v63  ;;  %vm4242_vm14 = vcmp.eq.f32.partialorder %v8882_v43, %v9118_v56 }
 0x4e3   : > { %v4311_v44 = vsel %vm1240_vm2, %v2811_v16, %v9992_v19  ;;  %v2813_v24 = vmul.f32 %v5255_v50, %v1878_v42  ;;  %v4243_v30 = vsel %vm4242_vm14, %v4238_v23, inf  ;;  %vm2818_vm1 = vweird.f32 %v5255_v50  ;;  %v9994_v16 = vld [vmem:[#allocation39_spill] sm:$0xff] }
 0x4e4   : > { %4375 = vst.msk [vmem:[%s6338_s8 + $0x1e8] sm:$0xff] %vm1305_vm3, %v4311_v44  ;;  %v4931_v33 = vadd.s32 4294967294, %v4039_v34  ;;  %4244 = vmin.xlane.f32.xlu1 %v4243_v30  ;;  %vm2819_vm0 = vmor %vm2817_vm15, %vm2818_vm1  ;;  %v4082_v42 = vcvt.f32.s32 %v8925_v45  ;;  %v9995_v34 = vld [vmem:[#allocation68_spill] sm:$0xff]  ;;  %v4097_v44 = vcvt.f32.s32 %v8944_v12 }
 0x4e5   : > { %v2814_v51 = vsub.f32 1.0, %v2813_v24 }
 0x4e6   : > { %v4491_v59 = vcvt.s32.f32 %v4931_v33  ;;  %v4083_v27 = vshll.u32 %v4082_v42, 16  ;;  %v4098_v30 = vshll.u32 %v4097_v44, 16 }
 0x4e7   : > { %v2815_v3 = vmul.f32 %v5255_v50, %v2814_v51 }
 0x4e8   : > { %4556 = vst.msk [vmem:[%s6338_s8 + $0x188] sm:$0xff] %vm4506_vm4, %v4491_v59  ;;  %v4112_v59 = vcvt.f32.s32 %v8961_v61 }
 0x4e9   : > { %v2816_v43 = vadd.f32 %v5255_v50, %v2815_v3  ;;  %v1881_v31 = vpop.xlane.xlu1 %1880  ;;  %v4050_v49 = vpop.xlane.xlu0 %4049  ;;  %v4127_v3 = vcvt.f32.s32 %v8974_v26  ;;  %v4142_v26 = vcvt.f32.s32 %v8993_v53 }
 0x4ea   : > { %5256 = vrcp.f32 %v1881_v31  ;;  %v4051_v18 = vcvt.f32.s32 %v4050_v49  ;;  %v2838_v7 = vand.u32 2147483648, %v1881_v31  ;;  %v2836_v21 = vand.u32 2147483647, %v1881_v31 }
 0x4eb   : > { %v2820_v62 = vsel %vm2819_vm0, %v5255_v50, %v2816_v43  ;;  %vm2832_vm7 = vweird.f32 %v1881_v31  ;;  %v4113_v12 = vshll.u32 %v4112_v59, 16  ;;  %v4128_v49 = vshll.u32 %v4127_v3, 16 }
 0x4ec   : > { %v2825_v0 = vsel %vm2822_vm5, %v2824_v36, %v2820_v62  ;;  %v4054_v1 = vadd.s32 %v4053_v13, %v4051_v18  ;;  %v2839_v46 = vor.u32 1.1754944e-38, %v2838_v7  ;;  %vm2837_vm9 = vcmp.eq.f32.partialorder %v2836_v21, 8.507059e+37 }
 0x4ed   : > { %v2826_v22 = vmul.f32 %v8853_v48, %v2825_v0  ;;  %v4247_v3 = vcvt.f32.s32 %v9118_v56 }
 0x4ee   : > { %v4932_v38 = vadd.s32 4294967294, %v4054_v1  ;;  %v4143_v1 = vshll.u32 %v4142_v26, 16 }
 0x4ef   : > { %v4312_v60 = vsel %vm1240_vm2, %v2826_v22, %v9993_v25 }
 0x4f0   : > { %v5257_v35 = vpop.eup %5256  ;;  %4376 = vst.msk [vmem:[%s6338_s8 + $0x1f0] sm:$0xff] %vm1305_vm3, %v4312_v60  ;;  %v4492_v10 = vcvt.s32.f32 %v4932_v38  ;;  %v4157_v38 = vcvt.f32.s32 %v9010_v6 }
 0x4f1   : > { %v2828_v54 = vmul.f32 %v5257_v35, %v1881_v31  ;;  %v4065_v20 = vpop.xlane.xlu1 %4064  ;;  %vm2833_vm6 = vweird.f32 %v5257_v35 }
 0x4f2   : > { %4557 = vst.msk [vmem:[%s6338_s8 + $0x190] sm:$0xff] %vm4506_vm4, %v4492_v10  ;;  %v4066_v48 = vcvt.f32.s32 %v4065_v20  ;;  %vm2834_vm8 = vmor %vm2832_vm7, %vm2833_vm6  ;;  %v4158_v42 = vshll.u32 %v4157_v38, 16 }
 0x4f3   : > { %v2829_v32 = vsub.f32 1.0, %v2828_v54  ;;  %v4172_v54 = vcvt.f32.s32 %v9023_v37  ;;  %v4187_v37 = vcvt.f32.s32 %v9042_v4 }
 0x4f4   : > { %v4069_v52 = vadd.s32 %v4068_v8, %v4066_v48 }
 0x4f5   : > { %v2830_v9 = vmul.f32 %v5257_v35, %v2829_v32  ;;  %v4080_v17 = vpop.xlane.xlu2 %4079  ;;  %v4173_v32 = vshll.u32 %v4172_v54, 16 }
 0x4f6   : > { %v4081_v39 = vcvt.f32.s32 %v4080_v17  ;;  %v4933_v45 = vadd.s32 4294967294, %v4069_v52 }
 0x4f7   : > { %v2831_v47 = vadd.f32 %v5257_v35, %v2830_v9 }
 0x4f8   : > { %v4084_v11 = vadd.s32 %v4083_v27, %v4081_v39  ;;  %v4493_v5 = vcvt.s32.f32 %v4933_v45  ;;  %v4188_v27 = vshll.u32 %v4187_v37, 16 }
 0x4f9   : > { %v2835_v28 = vsel %vm2834_vm8, %v5257_v35, %v2831_v47 }
 0x4fa   : > { %v2840_v14 = vsel %vm2837_vm9, %v2839_v46, %v2835_v28  ;;  %v4934_v63 = vadd.s32 4294967294, %v4084_v11  ;;  %4558 = vst.msk [vmem:[%s6338_s8 + $0x198] sm:$0xff] %vm4506_vm4, %v4493_v5  ;;  %v4202_v46 = vcvt.f32.s32 %v9059_v41  ;;  %v4217_v28 = vcvt.f32.s32 %v9072_v57 }
 0x4fb   : > { %v2841_v23 = vmul.f32 %v9994_v16, %v2840_v14  ;;  %v4232_v57 = vcvt.f32.s32 %v9090_v40 }
 0x4fc   : > { %v4494_v50 = vcvt.s32.f32 %v4934_v63  ;;  %v4203_v14 = vshll.u32 %v4202_v46, 16 }
 0x4fd   : > { %v4313_v19 = vsel %vm1240_vm2, %v2841_v23, %v9995_v34  ;;  %v4218_v23 = vshll.u32 %v4217_v28, 16 }
 0x4fe   : > { %4377 = vst.msk [vmem:[%s6338_s8 + $0x1f8] sm:$0xff] %vm1305_vm3, %v4313_v19 }
 0x4ff   : > { %4559 = vst.msk [vmem:[%s6338_s8 + $0x1a0] sm:$0xff] %vm4506_vm4, %v4494_v50 }
 0x501   : > { %v4095_v24 = vpop.xlane.xlu0 %4094 }
 0x502   : > { %v4096_v33 = vcvt.f32.s32 %v4095_v24 }
 0x504   : > { %v4099_v51 = vadd.s32 %v4098_v30, %v4096_v33  ;;  %v4233_v33 = vshll.u32 %v4232_v57, 16 }
 0x506   : > { %v4935_v55 = vadd.s32 4294967294, %v4099_v51 }
 0x508   : > { %v4495_v58 = vcvt.s32.f32 %v4935_v55  ;;  %v4110_v15 = vpop.xlane.xlu1 %4109 }
 0x509   : > { %v4111_v29 = vcvt.f32.s32 %v4110_v15 }
 0x50a   : > { %4560 = vst.msk [vmem:[%s6338_s8 + $0x1a8] sm:$0xff] %vm4506_vm4, %v4495_v58 }
 0x50b   : > { %v4114_v43 = vadd.s32 %v4113_v12, %v4111_v29  ;;  %v4248_v12 = vshll.u32 %v4247_v3, 16 }
 0x50d   : > { %v4125_v31 = vpop.xlane.xlu2 %4124  ;;  %v4936_v13 = vadd.s32 4294967294, %v4114_v43 }
 0x50e   : > { %v4126_v36 = vcvt.f32.s32 %v4125_v31 }
 0x50f   : > { %v4496_v18 = vcvt.s32.f32 %v4936_v13 }
 0x510   : > { %v4129_v62 = vadd.s32 %v4128_v49, %v4126_v36 }
 0x511   : > { %4561 = vst.msk [vmem:[%s6338_s8 + $0x1b0] sm:$0xff] %vm4506_vm4, %v4496_v18 }
 0x512   : > { %v4937_v0 = vadd.s32 4294967294, %v4129_v62 }
 0x514   : > { %v4497_v61 = vcvt.s32.f32 %v4937_v0 }
 0x516   : > { %4562 = vst.msk [vmem:[%s6338_s8 + $0x1b8] sm:$0xff] %vm4506_vm4, %v4497_v61 }
 0x519   : > { %v4140_v22 = vpop.xlane.xlu0 %4139 }
 0x51a   : > { %v4141_v2 = vcvt.f32.s32 %v4140_v22 }
 0x51c   : > { %v4144_v25 = vadd.s32 %v4143_v1, %v4141_v2 }
 0x51e   : > { %v4938_v60 = vadd.s32 4294967294, %v4144_v25 }
 0x520   : > { %v4498_v35 = vcvt.s32.f32 %v4938_v60  ;;  %v4155_v10 = vpop.xlane.xlu1 %4154 }
 0x521   : > { %v4156_v20 = vcvt.f32.s32 %v4155_v10 }
 0x522   : > { %4563 = vst.msk [vmem:[%s6338_s8 + $0x1c0] sm:$0xff] %vm4506_vm4, %v4498_v35 }
 0x523   : > { %v4159_v53 = vadd.s32 %v4158_v42, %v4156_v20 }
 0x525   : > { %v4170_v8 = vpop.xlane.xlu2 %4169  ;;  %v4939_v7 = vadd.s32 4294967294, %v4159_v53 }
 0x526   : > { %v4171_v48 = vcvt.f32.s32 %v4170_v8 }
 0x527   : > { %v4499_v21 = vcvt.s32.f32 %v4939_v7 }
 0x528   : > { %v4174_v9 = vadd.s32 %v4173_v32, %v4171_v48 }
 0x529   : > { %4564 = vst.msk [vmem:[%s6338_s8 + $0x1c8] sm:$0xff] %vm4506_vm4, %v4499_v21 }
 0x52a   : > { %v4940_v52 = vadd.s32 4294967294, %v4174_v9 }
 0x52c   : > { %v4500_v6 = vcvt.s32.f32 %v4940_v52 }
 0x52e   : > { %4565 = vst.msk [vmem:[%s6338_s8 + $0x1d0] sm:$0xff] %vm4506_vm4, %v4500_v6 }
 0x531   : > { %v4185_v17 = vpop.xlane.xlu0 %4184 }
 0x532   : > { %v4186_v39 = vcvt.f32.s32 %v4185_v17 }
 0x534   : > { %v4189_v47 = vadd.s32 %v4188_v27, %v4186_v39 }
 0x536   : > { %v4941_v45 = vadd.s32 4294967294, %v4189_v47 }
 0x538   : > { %v4501_v11 = vcvt.s32.f32 %v4941_v45  ;;  %v4200_v5 = vpop.xlane.xlu1 %4199 }
 0x539   : > { %v4201_v63 = vcvt.f32.s32 %v4200_v5 }
 0x53a   : > { %4566 = vst.msk [vmem:[%s6338_s8 + $0x1d8] sm:$0xff] %vm4506_vm4, %v4501_v11 }
 0x53b   : > { %v4204_v4 = vadd.s32 %v4203_v14, %v4201_v63 }
 0x53d   : > { %v4215_v16 = vpop.xlane.xlu2 %4214  ;;  %v4942_v34 = vadd.s32 4294967294, %v4204_v4 }
 0x53e   : > { %v4216_v50 = vcvt.f32.s32 %v4215_v16 }
 0x53f   : > { %v4502_v44 = vcvt.s32.f32 %v4942_v34 }
 0x540   : > { %v4219_v19 = vadd.s32 %v4218_v23, %v4216_v50 }
 0x541   : > { %4567 = vst.msk [vmem:[%s6338_s8 + $0x1e0] sm:$0xff] %vm4506_vm4, %v4502_v44 }
 0x542   : > { %v4943_v24 = vadd.s32 4294967294, %v4219_v19 }
 0x544   : > { %v4503_v41 = vcvt.s32.f32 %v4943_v24 }
 0x546   : > { %4568 = vst.msk [vmem:[%s6338_s8 + $0x1e8] sm:$0xff] %vm4506_vm4, %v4503_v41 }
 0x549   : > { %v4230_v30 = vpop.xlane.xlu0 %4229 }
 0x54a   : > { %v4231_v51 = vcvt.f32.s32 %v4230_v30 }
 0x54c   : > { %v4234_v55 = vadd.s32 %v4233_v33, %v4231_v51 }
 0x54e   : > { %v4944_v59 = vadd.s32 4294967294, %v4234_v55 }
 0x550   : > { %v4504_v58 = vcvt.s32.f32 %v4944_v59 }
 0x552   : > { %4569 = vst.msk [vmem:[%s6338_s8 + $0x1f0] sm:$0xff] %vm4506_vm4, %v4504_v58 }
 0x557   : > { %v4245_v15 = vpop.xlane.xlu1 %4244 }
 0x558   : > { %v4246_v29 = vcvt.f32.s32 %v4245_v15 }
 0x55a   : > { %v4249_v43 = vadd.s32 %v4248_v12, %v4246_v29 }
 0x55c   : > { %v4945_v31 = vadd.s32 4294967294, %v4249_v43 }
 0x55e   : > { %v4505_v49 = vcvt.s32.f32 %v4945_v31 }
 0x560   : > { %4570 = vst.msk [vmem:[%s6338_s8 + $0x1f8] sm:$0xff] %vm4506_vm4, %v4505_v49 }
 0x561 PF: > { %s15_s18 = sadd.s32 1, %s5266_s18  }
 0x562   : > { %p12_p4 = scmp.ge.s32.totalorder %s15_s18, 4  }
 0x564   :  { %14 = sbr.rel (!%p12_p4) target bundleno = 1 (0x1), region = 73 }

</bundles_post_ra>
